<compile_context>
chip_gen: v5e
topology: v5e:2x2
jax: 0.10.0
libtpu: 0.0.40
codegen_flags: <defaults>
</compile_context>

<pallas_src>
import functools
import math

import jax
import jax.numpy as jnp
import numpy as np
from jax import lax
from jax.experimental import pallas as pl
from jax.experimental.pallas import tpu as pltpu


# ----------------------------- in-kernel helpers -----------------------------

def _layernorm(x, w, b, eps=1e-5):
    mu = jnp.mean(x, axis=-1, keepdims=True)
    var = jnp.mean((x - mu) ** 2, axis=-1, keepdims=True)
    return (x - mu) * lax.rsqrt(var + eps) * w + b


def _gelu(x):
    # exact (erf) GELU, matching torch.nn.GELU() default
    return 0.5 * x * (1.0 + lax.erf(x * (1.0 / math.sqrt(2.0))))


def _full_spec(a):
    nd = a.ndim
    return pl.BlockSpec(a.shape, lambda *args, _nd=nd: (0,) * _nd)


# -------------------------- kernel 1: LN1 + QKV proj --------------------------

def ln_qkv_kernel(x_ref, ln1_w_ref, ln1_b_ref, w_qkv_ref, b_qkv_ref, qkv_ref):
    x = x_ref[0]                                            # (TS, C) f32
    ln1 = _layernorm(x, ln1_w_ref[0], ln1_b_ref[0])
    qkv = jnp.dot(ln1.astype(jnp.bfloat16), w_qkv_ref[...],  # (C,3C) bf16, no .T
                  preferred_element_type=jnp.float32) + b_qkv_ref[0]
    qkv_ref[0] = qkv.astype(jnp.bfloat16)


def ln_qkv(x, p, *, seq_tile):
    B, T, C = x.shape
    grid = (B, T // seq_tile)
    return pl.pallas_call(
        ln_qkv_kernel,
        out_shape=jax.ShapeDtypeStruct((B, T, 3 * C), jnp.bfloat16),
        grid_spec=pltpu.PrefetchScalarGridSpec(
            num_scalar_prefetch=0,
            grid=grid,
            in_specs=[pl.BlockSpec((1, seq_tile, C), lambda b, t: (b, t, 0)),
                      _full_spec(p["ln1_w"]), _full_spec(p["ln1_b"]),
                      _full_spec(p["w_qkv"]), _full_spec(p["b_qkv"])],
            out_specs=pl.BlockSpec((1, seq_tile, 3 * C), lambda b, t: (b, t, 0))),
        compiler_params=pltpu.CompilerParams(
            dimension_semantics=("parallel", "parallel"),
            vmem_limit_bytes=32 * 1024 * 1024),
    )(x, p["ln1_w"], p["ln1_b"], p["w_qkv"], p["b_qkv"])


# ------------- kernel 2: attention (q-tiled) + out-proj + LN2 + MLP -----------

def attn_mlp_kernel(x_ref, q_ref, k_ref, v_ref,
                    w_ap_ref, b_ap_ref, ln2_w_ref, ln2_b_ref,
                    w_fc_ref, b_fc_ref, w_mp_ref, b_mp_ref,
                    x_out_ref, attn_out_ref, mlp_out_ref,
                    *, n_head, q_tile):
    x = x_ref[0]                        # (TQ, C) f32  (residual stream)
    q = q_ref[0]                        # (TQ, C) bf16
    k = k_ref[0]                        # (T,  C) bf16
    v = v_ref[0]                        # (T,  C) bf16
    TQ, C = x.shape
    T = k.shape[0]
    hs = C // n_head
    scale = 1.0 / math.sqrt(hs)

    # batched-head contraction (single MXU einsum instead of per-head loop)
    qh = jnp.swapaxes(q.reshape(TQ, n_head, hs), 0, 1)      # (H, TQ, hs)
    kh = jnp.swapaxes(k.reshape(T, n_head, hs), 0, 1)       # (H, T,  hs)
    vh = jnp.swapaxes(v.reshape(T, n_head, hs), 0, 1)       # (H, T,  hs)

    att = jnp.einsum("hqd,hkd->hqk", qh, kh,
                     preferred_element_type=jnp.float32) * scale   # (H, TQ, T)

    q0 = pl.program_id(1) * q_tile
    row = q0 + lax.broadcasted_iota(jnp.int32, (TQ, T), 0)
    col = lax.broadcasted_iota(jnp.int32, (TQ, T), 1)
    att = jnp.where((col <= row)[None, :, :], att, -1e30)

    att = att - jnp.max(att, axis=-1, keepdims=True)
    p = jnp.exp(att)
    p = p * pl.reciprocal(jnp.sum(p, axis=-1, keepdims=True), approx=True)

    y = jnp.einsum("hqk,hkd->hqd", p.astype(jnp.bfloat16), vh,
                   preferred_element_type=jnp.float32)             # (H, TQ, hs)
    y = jnp.swapaxes(y, 0, 1).reshape(TQ, C)

    # attention c_proj (Linear; block-level attn_proj is Identity)
    attn_out = jnp.dot(y.astype(jnp.bfloat16), w_ap_ref[...],
                       preferred_element_type=jnp.float32) + b_ap_ref[0]
    x2 = x + attn_out                                              # residual

    # MLP: LN2 -> c_fc -> GELU -> c_proj
    ln2 = _layernorm(x2, ln2_w_ref[0], ln2_b_ref[0])
    hid = _gelu(jnp.dot(ln2.astype(jnp.bfloat16), w_fc_ref[...],
                        preferred_element_type=jnp.float32) + b_fc_ref[0])
    mlp_out = jnp.dot(hid.astype(jnp.bfloat16), w_mp_ref[...],
                      preferred_element_type=jnp.float32) + b_mp_ref[0]

    x_out_ref[0] = x2 + mlp_out
    attn_out_ref[0] = attn_out
    mlp_out_ref[0] = mlp_out


def attn_mlp(x, qkv, p, *, n_head, q_tile):
    B, T, C = x.shape
    grid = (B, T // q_tile)

    in_specs = [
        pl.BlockSpec((1, q_tile, C), lambda b, q: (b, q, 0)),   # x (residual) tile
        pl.BlockSpec((1, q_tile, C), lambda b, q: (b, q, 0)),   # q tile from qkv
        pl.BlockSpec((1, T, C), lambda b, q: (b, 0, 1)),        # k (full seq)
        pl.BlockSpec((1, T, C), lambda b, q: (b, 0, 2)),        # v (full seq)
        _full_spec(p["w_attn_cproj"]), _full_spec(p["b_attn_cproj"]),
        _full_spec(p["ln2_w"]), _full_spec(p["ln2_b"]),
        _full_spec(p["w_fc"]), _full_spec(p["b_fc"]),
        _full_spec(p["w_mlp_cproj"]), _full_spec(p["b_mlp_cproj"]),
    ]
    out_specs = [pl.BlockSpec((1, q_tile, C), lambda b, q: (b, q, 0))
                 for _ in range(3)]
    out_shape = tuple(jax.ShapeDtypeStruct((B, T, C), jnp.float32)
                      for _ in range(3))

    return pl.pallas_call(
        functools.partial(attn_mlp_kernel, n_head=n_head, q_tile=q_tile),
        out_shape=out_shape,
        grid_spec=pltpu.PrefetchScalarGridSpec(
            num_scalar_prefetch=0, grid=grid,
            in_specs=in_specs, out_specs=out_specs),
        input_output_aliases={0: 0},   # x_out reuses x's HBM buffer
        compiler_params=pltpu.CompilerParams(
            dimension_semantics=("parallel", "parallel"),
            vmem_limit_bytes=32 * 1024 * 1024),
    )(x, qkv, qkv, qkv,
      p["w_attn_cproj"], p["b_attn_cproj"], p["ln2_w"], p["ln2_b"],
      p["w_fc"], p["b_fc"], p["w_mlp_cproj"], p["b_mlp_cproj"])


# -------------------- kernel 3: ln_f + tied lm_head (V-tiled) -----------------

def lnf_lmhead_kernel(x_ref, lnf_w_ref, lnf_b_ref, wte_ref, logits_ref):
    xn = _layernorm(x_ref[...], lnf_w_ref[0], lnf_b_ref[0])         # (B, C) f32
    # contract over C on both operands -> no in-kernel transpose of wte
    logits_ref[...] = lax.dot_general(
        xn.astype(jnp.bfloat16), wte_ref[...],
        dimension_numbers=(((1,), (1,)), ((), ())),
        preferred_element_type=jnp.float32)


def lnf_lmhead(x_last, lnf_w, lnf_b, wte, *, vocab_tile):
    B, C = x_last.shape
    V = wte.shape[0]
    grid = (V // vocab_tile,)
    return pl.pallas_call(
        lnf_lmhead_kernel,
        out_shape=jax.ShapeDtypeStruct((B, V), jnp.float32),
        grid_spec=pltpu.PrefetchScalarGridSpec(
            num_scalar_prefetch=0, grid=grid,
            in_specs=[pl.BlockSpec((B, C), lambda v: (0, 0)),
                      _full_spec(lnf_w), _full_spec(lnf_b),
                      pl.BlockSpec((vocab_tile, C), lambda v: (v, 0))],
            out_specs=pl.BlockSpec((B, vocab_tile), lambda v: (0, v))),
        compiler_params=pltpu.CompilerParams(
            dimension_semantics=("parallel",),
            vmem_limit_bytes=32 * 1024 * 1024),
    )(x_last, lnf_w, lnf_b, wte)


# --------------------------------- parameters ---------------------------------

def init_params(key, cfg):
    C, V, BS, L = cfg["n_embed"], cfg["vocab_size"], cfg["block_size"], cfg["n_layer"]
    std = 0.02
    cproj_std = 0.02 / math.sqrt(2 * L)          # GPT-2 residual-proj scaled init
    keys = jax.random.split(key, 2 + 4 * L)
    # wte is the master tied embedding (bf16: also used directly by lm_head kernel)
    wte = (std * jax.random.normal(keys[0], (V, C), jnp.float32)).astype(jnp.bfloat16)
    wpe = std * jax.random.normal(keys[1], (BS, C), jnp.float32)
    layers = []
    ki = 2
    for _ in range(L):
        # weights stored (in_features, out_features) in bf16 -> no .T in kernels
        w_qkv = (std * jax.random.normal(keys[ki], (C, 3 * C), jnp.float32)).astype(jnp.bfloat16); ki += 1
        w_ap = (cproj_std * jax.random.normal(keys[ki], (C, C), jnp.float32)).astype(jnp.bfloat16); ki += 1
        w_fc = (std * jax.random.normal(keys[ki], (C, 4 * C), jnp.float32)).astype(jnp.bfloat16); ki += 1
        w_mp = (cproj_std * jax.random.normal(keys[ki], (4 * C, C), jnp.float32)).astype(jnp.bfloat16); ki += 1
        layers.append(dict(
            ln1_w=jnp.ones((1, C), jnp.float32), ln1_b=jnp.zeros((1, C), jnp.float32),
            w_qkv=w_qkv, b_qkv=jnp.zeros((1, 3 * C), jnp.float32),
            w_attn_cproj=w_ap, b_attn_cproj=jnp.zeros((1, C), jnp.float32),
            ln2_w=jnp.ones((1, C), jnp.float32), ln2_b=jnp.zeros((1, C), jnp.float32),
            w_fc=w_fc, b_fc=jnp.zeros((1, 4 * C), jnp.float32),
            w_mlp_cproj=w_mp, b_mlp_cproj=jnp.zeros((1, C), jnp.float32),
        ))
    return dict(wte=wte, wpe=wpe, layers=layers,
                lnf_w=jnp.ones((1, C), jnp.float32),
                lnf_b=jnp.zeros((1, C), jnp.float32))


# --------------------------------- GPT forward --------------------------------

def gpt_forward(params, idx, cfg, *, seq_tile=64, vocab_tile=128):
    """Inference path (targets=None): returns (logits[B,1,V], spatial_outputs)."""
    B, T = idx.shape
    V = params["wte"].shape[0]
    assert T <= cfg["block_size"]
    assert T % seq_tile == 0 and V % vocab_tile == 0

    x = params["wte"][idx].astype(jnp.float32) + params["wpe"][:T][None, :, :]
    spatial_outputs = {}
    # TODO(synk): NetworkPositions.load_from_dir positions & spatial losses need
    # on-disk data; only the spatial activations are produced here.
    for i, lp in enumerate(params["layers"]):
        qkv = ln_qkv(x, lp, seq_tile=seq_tile)
        x, attn_out, mlp_out = attn_mlp(x, qkv, lp,
                                        n_head=cfg["n_head"], q_tile=seq_tile)
        spatial_outputs[f"layer.{i}.attn"] = attn_out.reshape(B * T, -1)
        spatial_outputs[f"layer.{i}.mlp"] = mlp_out.reshape(B * T, -1)

    logits_last = lnf_lmhead(x[:, -1, :], params["lnf_w"], params["lnf_b"],
                             params["wte"], vocab_tile=vocab_tile)
    return logits_last[:, None, :], spatial_outputs


# ------------------------------ pure-JAX reference -----------------------------

def _f32(w):
    return w.astype(jnp.float32)


def _ref_block(x, p, n_head):
    B, T, C = x.shape
    hs = C // n_head
    ln1 = _layernorm(x, p["ln1_w"][0], p["ln1_b"][0])
    qkv = ln1 @ _f32(p["w_qkv"]) + p["b_qkv"][0]
    q, k, v = jnp.split(qkv, 3, axis=-1)
    q = q.reshape(B, T, n_head, hs).transpose(0, 2, 1, 3)
    k = k.reshape(B, T, n_head, hs).transpose(0, 2, 1, 3)
    v = v.reshape(B, T, n_head, hs).transpose(0, 2, 1, 3)
    att = jnp.einsum("bhtd,bhsd->bhts", q, k) / math.sqrt(hs)
    causal = jnp.tril(jnp.ones((T, T), bool))
    att = jnp.where(causal[None, None], att, -jnp.inf)
    att = jax.nn.softmax(att, axis=-1)
    y = jnp.einsum("bhts,bhsd->bhtd", att, v).transpose(0, 2, 1, 3).reshape(B, T, C)
    attn_out = y @ _f32(p["w_attn_cproj"]) + p["b_attn_cproj"][0]
    x2 = x + attn_out
    ln2 = _layernorm(x2, p["ln2_w"][0], p["ln2_b"][0])
    mlp_out = (_gelu(ln2 @ _f32(p["w_fc"]) + p["b_fc"][0]) @ _f32(p["w_mlp_cproj"])
               + p["b_mlp_cproj"][0])
    return x2 + mlp_out


def ref_forward(params, idx, cfg):
    B, T = idx.shape
    x = _f32(params["wte"])[idx] + params["wpe"][:T][None, :, :]
    for lp in params["layers"]:
        x = _ref_block(x, lp, cfg["n_head"])
    x = _layernorm(x, params["lnf_w"][0], params["lnf_b"][0])
    return (x[:, -1, :] @ _f32(params["wte"]).T)[:, None, :]


# ------------------------------------ main -------------------------------------

if __name__ == "__main__":
    cfg = dict(vocab_size=512, block_size=128, n_embed=128, n_head=2, n_layer=2)
    key = jax.random.PRNGKey(0)
    pkey, ikey = jax.random.split(key)
    params = init_params(pkey, cfg)

    B, T = 2, 128
    idx = jax.random.randint(ikey, (B, T), 0, cfg["vocab_size"], dtype=jnp.int32)

    fwd = jax.jit(functools.partial(gpt_forward, cfg=cfg,
                                    seq_tile=64, vocab_tile=128))
    logits, spatial_outputs = fwd(params, idx)
    logits = jax.block_until_ready(logits)

    # f32 reference (kernel uses bf16 matmul operands + approx reciprocal,
    # hence the loose-but-bug-catching tolerance).
    ref_logits = ref_forward(params, idx, cfg)
    np.testing.assert_allclose(np.asarray(logits), np.asarray(ref_logits),
                               rtol=2e-2, atol=2e-2)
    assert logits.shape == (B, 1, cfg["vocab_size"])
    assert spatial_outputs["layer.0.attn"].shape == (B * T, cfg["n_embed"])
    assert spatial_outputs["layer.1.mlp"].shape == (B * T, cfg["n_embed"])

    print("KERNEL_OK")
</pallas_src>

<mosaic_0001>
module attributes {stable_mosaic.version = 11 : i64} {
  func.func @ln_qkv_kernel(%arg0: i32, %arg1: i32, %arg2: memref<1x64x128xf32, #tpu.memory_space<vmem>>, %arg3: memref<1x128xf32, #tpu.memory_space<vmem>>, %arg4: memref<1x128xf32, #tpu.memory_space<vmem>>, %arg5: memref<128x384xbf16, #tpu.memory_space<vmem>>, %arg6: memref<1x384xf32, #tpu.memory_space<vmem>>, %arg7: memref<1x64x384xbf16, #tpu.memory_space<vmem>>) attributes {dimension_semantics = [#tpu.dimension_semantics<parallel>, #tpu.dimension_semantics<parallel>], iteration_bounds = array<i64: 2, 2>, scalar_prefetch = 0 : i64, scratch_operands = 0 : i64, tpu.core_type = #tpu.core_type<tc>, window_params = [{transform_indices = @transform_0, window_bounds = array<i64: 1, 64, 128>}, {pipeline_mode = #tpu.pipeline_mode<synchronous>, transform_indices = @transform_1, window_bounds = array<i64: 1, 128>}, {pipeline_mode = #tpu.pipeline_mode<synchronous>, transform_indices = @transform_2, window_bounds = array<i64: 1, 128>}, {pipeline_mode = #tpu.pipeline_mode<synchronous>, transform_indices = @transform_3, window_bounds = array<i64: 128, 384>}, {pipeline_mode = #tpu.pipeline_mode<synchronous>, transform_indices = @transform_4, window_bounds = array<i64: 1, 384>}, {transform_indices = @transform_5, window_bounds = array<i64: 1, 64, 384>}]} {
    %c0 = arith.constant 0 : index
    %c0_0 = arith.constant 0 : index
    %c0_1 = arith.constant 0 : index
    %0 = vector.load %arg2[%c0, %c0_0, %c0_1] : memref<1x64x128xf32, #tpu.memory_space<vmem>>, vector<1x64x128xf32>
    %1 = vector.shape_cast %0 : vector<1x64x128xf32> to vector<64x128xf32>
    %c0_2 = arith.constant 0 : index
    %c0_3 = arith.constant 0 : index
    %2 = vector.load %arg3[%c0_2, %c0_3] : memref<1x128xf32, #tpu.memory_space<vmem>>, vector<1x128xf32>
    %3 = vector.shape_cast %2 : vector<1x128xf32> to vector<128xf32>
    %c0_4 = arith.constant 0 : index
    %c0_5 = arith.constant 0 : index
    %4 = vector.load %arg4[%c0_4, %c0_5] : memref<1x128xf32, #tpu.memory_space<vmem>>, vector<1x128xf32>
    %5 = vector.shape_cast %4 : vector<1x128xf32> to vector<128xf32>
    %cst = arith.constant dense<0.000000e+00> : vector<64xf32>
    %6 = vector.multi_reduction <add>, %1, %cst [1] : vector<64x128xf32> to vector<64xf32>
    %7 = vector.shape_cast %6 : vector<64xf32> to vector<64x1xf32>
    %cst_6 = arith.constant 1.280000e+02 : f32
    %8 = vector.broadcast %cst_6 : f32 to vector<64x1xf32>
    %9 = arith.divf %7, %8 : vector<64x1xf32>
    %10 = vector.broadcast %9 : vector<64x1xf32> to vector<64x128xf32>
    %11 = arith.subf %1, %10 : vector<64x128xf32>
    %12 = arith.mulf %11, %11 : vector<64x128xf32>
    %cst_7 = arith.constant dense<0.000000e+00> : vector<64xf32>
    %13 = vector.multi_reduction <add>, %12, %cst_7 [1] : vector<64x128xf32> to vector<64xf32>
    %14 = vector.shape_cast %13 : vector<64xf32> to vector<64x1xf32>
    %cst_8 = arith.constant 1.280000e+02 : f32
    %15 = vector.broadcast %cst_8 : f32 to vector<64x1xf32>
    %16 = arith.divf %14, %15 : vector<64x1xf32>
    %17 = vector.broadcast %9 : vector<64x1xf32> to vector<64x128xf32>
    %18 = arith.subf %1, %17 : vector<64x128xf32>
    %cst_9 = arith.constant 9.99999974E-6 : f32
    %19 = vector.broadcast %cst_9 : f32 to vector<64x1xf32>
    %20 = arith.addf %16, %19 : vector<64x1xf32>
    %21 = math.rsqrt %20 : vector<64x1xf32>
    %22 = vector.broadcast %21 : vector<64x1xf32> to vector<64x128xf32>
    %23 = arith.mulf %18, %22 : vector<64x128xf32>
    %24 = vector.shape_cast %3 : vector<128xf32> to vector<1x128xf32>
    %25 = vector.broadcast %24 : vector<1x128xf32> to vector<64x128xf32>
    %26 = arith.mulf %23, %25 : vector<64x128xf32>
    %27 = vector.shape_cast %5 : vector<128xf32> to vector<1x128xf32>
    %28 = vector.broadcast %27 : vector<1x128xf32> to vector<64x128xf32>
    %29 = arith.addf %26, %28 : vector<64x128xf32>
    %30 = arith.truncf %29 : vector<64x128xf32> to vector<64x128xbf16>
    %c0_10 = arith.constant 0 : index
    %c0_11 = arith.constant 0 : index
    %31 = vector.load %arg5[%c0_10, %c0_11] : memref<128x384xbf16, #tpu.memory_space<vmem>>, vector<128x384xbf16>
    %cst_12 = arith.constant dense<0.000000e+00> : vector<64x384xf32>
    %32 = tpu.matmul %30, %31, %cst_12 {dimension_numbers = #tpu.dot_dimension_numbers<[1], [0], [0], [1], [0, 0, 1, 1], [], []>} : vector<64x128xbf16>, vector<128x384xbf16>, vector<64x384xf32> -> vector<64x384xf32>
    %c0_13 = arith.constant 0 : index
    %c0_14 = arith.constant 0 : index
    %33 = vector.load %arg6[%c0_13, %c0_14] : memref<1x384xf32, #tpu.memory_space<vmem>>, vector<1x384xf32>
    %34 = vector.shape_cast %33 : vector<1x384xf32> to vector<384xf32>
    %35 = vector.shape_cast %34 : vector<384xf32> to vector<1x384xf32>
    %36 = vector.broadcast %35 : vector<1x384xf32> to vector<64x384xf32>
    %37 = arith.addf %32, %36 : vector<64x384xf32>
    %38 = arith.truncf %37 : vector<64x384xf32> to vector<64x384xbf16>
    %c0_15 = arith.constant 0 : index
    %c0_16 = arith.constant 0 : index
    %c0_17 = arith.constant 0 : index
    %39 = vector.load %arg7[%c0_15, %c0_16, %c0_17] : memref<1x64x384xbf16, #tpu.memory_space<vmem>>, vector<1x64x384xbf16>
    %40 = vector.shape_cast %39 : vector<1x64x384xbf16> to vector<64x384xbf16>
    %41 = vector.shape_cast %38 : vector<64x384xbf16> to vector<1x64x384xbf16>
    tpu.vector_store %arg7[%c0_15, %c0_16, %c0_17], %41 {strides = array<i32>} : memref<1x64x384xbf16, #tpu.memory_space<vmem>>, vector<1x64x384xbf16>,
    return
  }
  func.func @transform_0(%arg0: i32, %arg1: i32) -> (i32, i32, i32) {
    %c0_i32 = arith.constant 0 : i32
    %c0_i32_0 = arith.constant 0 : i32
    return %arg0, %arg1, %c0_i32 : i32, i32, i32
  }
  func.func @transform_1(%arg0: i32, %arg1: i32) -> (i32, i32) {
    %c0_i32 = arith.constant 0 : i32
    %c0_i32_0 = arith.constant 0 : i32
    %c0_i32_1 = arith.constant 0 : i32
    return %c0_i32, %c0_i32_0 : i32, i32
  }
  func.func @transform_2(%arg0: i32, %arg1: i32) -> (i32, i32) {
    %c0_i32 = arith.constant 0 : i32
    %c0_i32_0 = arith.constant 0 : i32
    %c0_i32_1 = arith.constant 0 : i32
    return %c0_i32, %c0_i32_0 : i32, i32
  }
  func.func @transform_3(%arg0: i32, %arg1: i32) -> (i32, i32) {
    %c0_i32 = arith.constant 0 : i32
    %c0_i32_0 = arith.constant 0 : i32
    %c0_i32_1 = arith.constant 0 : i32
    return %c0_i32, %c0_i32_0 : i32, i32
  }
  func.func @transform_4(%arg0: i32, %arg1: i32) -> (i32, i32) {
    %c0_i32 = arith.constant 0 : i32
    %c0_i32_0 = arith.constant 0 : i32
    %c0_i32_1 = arith.constant 0 : i32
    return %c0_i32, %c0_i32_0 : i32, i32
  }
  func.func @transform_5(%arg0: i32, %arg1: i32) -> (i32, i32, i32) {
    %c0_i32 = arith.constant 0 : i32
    %c0_i32_0 = arith.constant 0 : i32
    return %arg0, %arg1, %c0_i32 : i32, i32, i32
  }
}

module attributes {stable_mosaic.version = 11 : i64} {
  func.func @attn_mlp_kernel(%arg0: i32, %arg1: i32, %arg2: memref<1x64x128xf32, #tpu.memory_space<vmem>>, %arg3: memref<1x64x128xbf16, #tpu.memory_space<vmem>>, %arg4: memref<1x128x128xbf16, #tpu.memory_space<vmem>>, %arg5: memref<1x128x128xbf16, #tpu.memory_space<vmem>>, %arg6: memref<128x128xbf16, #tpu.memory_space<vmem>>, %arg7: memref<1x128xf32, #tpu.memory_space<vmem>>, %arg8: memref<1x128xf32, #tpu.memory_space<vmem>>, %arg9: memref<1x128xf32, #tpu.memory_space<vmem>>, %arg10: memref<128x512xbf16, #tpu.memory_space<vmem>>, %arg11: memref<1x512xf32, #tpu.memory_space<vmem>>, %arg12: memref<512x128xbf16, #tpu.memory_space<vmem>>, %arg13: memref<1x128xf32, #tpu.memory_space<vmem>>, %arg14: memref<1x64x128xf32, #tpu.memory_space<vmem>>, %arg15: memref<1x64x128xf32, #tpu.memory_space<vmem>>, %arg16: memref<1x64x128xf32, #tpu.memory_space<vmem>>) attributes {dimension_semantics = [#tpu.dimension_semantics<parallel>, #tpu.dimension_semantics<parallel>], iteration_bounds = array<i64: 2, 2>, scalar_prefetch = 0 : i64, scratch_operands = 0 : i64, tpu.core_type = #tpu.core_type<tc>, window_params = [{transform_indices = @transform_0, window_bounds = array<i64: 1, 64, 128>}, {transform_indices = @transform_1, window_bounds = array<i64: 1, 64, 128>}, {transform_indices = @transform_2, window_bounds = array<i64: 1, 128, 128>}, {transform_indices = @transform_3, window_bounds = array<i64: 1, 128, 128>}, {pipeline_mode = #tpu.pipeline_mode<synchronous>, transform_indices = @transform_4, window_bounds = array<i64: 128, 128>}, {pipeline_mode = #tpu.pipeline_mode<synchronous>, transform_indices = @transform_5, window_bounds = array<i64: 1, 128>}, {pipeline_mode = #tpu.pipeline_mode<synchronous>, transform_indices = @transform_6, window_bounds = array<i64: 1, 128>}, {pipeline_mode = #tpu.pipeline_mode<synchronous>, transform_indices = @transform_7, window_bounds = array<i64: 1, 128>}, {pipeline_mode = #tpu.pipeline_mode<synchronous>, transform_indices = @transform_8, window_bounds = array<i64: 128, 512>}, {pipeline_mode = #tpu.pipeline_mode<synchronous>, transform_indices = @transform_9, window_bounds = array<i64: 1, 512>}, {pipeline_mode = #tpu.pipeline_mode<synchronous>, transform_indices = @transform_10, window_bounds = array<i64: 512, 128>}, {pipeline_mode = #tpu.pipeline_mode<synchronous>, transform_indices = @transform_11, window_bounds = array<i64: 1, 128>}, {transform_indices = @transform_12, window_bounds = array<i64: 1, 64, 128>}, {transform_indices = @transform_13, window_bounds = array<i64: 1, 64, 128>}, {transform_indices = @transform_14, window_bounds = array<i64: 1, 64, 128>}]} {
    %c0 = arith.constant 0 : index
    %c0_0 = arith.constant 0 : index
    %c0_1 = arith.constant 0 : index
    %0 = vector.load %arg2[%c0, %c0_0, %c0_1] : memref<1x64x128xf32, #tpu.memory_space<vmem>>, vector<1x64x128xf32>
    %1 = vector.shape_cast %0 : vector<1x64x128xf32> to vector<64x128xf32>
    %c0_2 = arith.constant 0 : index
    %c0_3 = arith.constant 0 : index
    %c0_4 = arith.constant 0 : index
    %2 = vector.load %arg3[%c0_2, %c0_3, %c0_4] : memref<1x64x128xbf16, #tpu.memory_space<vmem>>, vector<1x64x128xbf16>
    %3 = vector.shape_cast %2 : vector<1x64x128xbf16> to vector<64x128xbf16>
    %c0_5 = arith.constant 0 : index
    %c0_6 = arith.constant 0 : index
    %c0_7 = arith.constant 0 : index
    %4 = vector.load %arg4[%c0_5, %c0_6, %c0_7] : memref<1x128x128xbf16, #tpu.memory_space<vmem>>, vector<1x128x128xbf16>
    %5 = vector.shape_cast %4 : vector<1x128x128xbf16> to vector<128x128xbf16>
    %c0_8 = arith.constant 0 : index
    %c0_9 = arith.constant 0 : index
    %c0_10 = arith.constant 0 : index
    %6 = vector.load %arg5[%c0_8, %c0_9, %c0_10] : memref<1x128x128xbf16, #tpu.memory_space<vmem>>, vector<1x128x128xbf16>
    %7 = vector.shape_cast %6 : vector<1x128x128xbf16> to vector<128x128xbf16>
    %8 = vector.shape_cast %3 : vector<64x128xbf16> to vector<64x2x64xbf16>
    %9 = tpu.transpose %8, [1, 0, 2] : vector<64x2x64xbf16> -> vector<2x64x64xbf16>
    %10 = vector.shape_cast %5 : vector<128x128xbf16> to vector<128x2x64xbf16>
    %11 = tpu.transpose %10, [1, 0, 2] : vector<128x2x64xbf16> -> vector<2x128x64xbf16>
    %12 = vector.shape_cast %7 : vector<128x128xbf16> to vector<128x2x64xbf16>
    %13 = tpu.transpose %12, [1, 0, 2] : vector<128x2x64xbf16> -> vector<2x128x64xbf16>
    "tpu.trace_start"() <{level = 10 : i32, message = "hqd,hkd->hqk"}> : () -> ()
    %cst = arith.constant dense<0.000000e+00> : vector<2x64x128xf32>
    %14 = tpu.matmul %9, %11, %cst {dimension_numbers = #tpu.dot_dimension_numbers<[2], [2], [1], [1], [0, 0, 0, 1, 1, 1], [0], [0]>} : vector<2x64x64xbf16>, vector<2x128x64xbf16>, vector<2x64x128xf32> -> vector<2x64x128xf32>
    "tpu.trace_stop"() : () -> ()
    %cst_11 = arith.constant 1.250000e-01 : f32
    %15 = vector.broadcast %cst_11 : f32 to vector<2x64x128xf32>
    %16 = arith.mulf %14, %15 : vector<2x64x128xf32>
    %c64_i32 = arith.constant 64 : i32
    %17 = arith.muli %arg1, %c64_i32 : i32
    %18 = tpu.iota {dimensions = array<i32: 0>} : vector<64x128xi32>
    %19 = vector.broadcast %17 : i32 to vector<64x128xi32>
    %20 = arith.addi %19, %18 : vector<64x128xi32>
    %21 = tpu.iota {dimensions = array<i32: 1>} : vector<64x128xi32>
    %22 = arith.cmpi sle, %21, %20 : vector<64x128xi32>
    %23 = vector.shape_cast %22 : vector<64x128xi1> to vector<1x64x128xi1>
    %cst_12 = arith.constant -1.000000e+30 : f32
    %24 = vector.shape_cast %23 : vector<1x64x128xi1> to vector<1x64x128xi1>
    %25 = vector.broadcast %24 : vector<1x64x128xi1> to vector<2x64x128xi1>
    %26 = vector.broadcast %cst_12 : f32 to vector<2x64x128xf32>
    %27 = arith.select %25, %16, %26 : vector<2x64x128xi1>, vector<2x64x128xf32>
    %cst_13 = arith.constant dense<0xFF800000> : vector<2x64xf32>
    %28 = vector.multi_reduction <maximumf>, %27, %cst_13 [2] : vector<2x64x128xf32> to vector<2x64xf32>
    %29 = vector.shape_cast %28 : vector<2x64xf32> to vector<2x64x1xf32>
    %30 = vector.broadcast %29 : vector<2x64x1xf32> to vector<2x64x128xf32>
    %31 = arith.subf %27, %30 : vector<2x64x128xf32>
    %32 = math.exp %31 : vector<2x64x128xf32>
    %cst_14 = arith.constant dense<0.000000e+00> : vector<2x64xf32>
    %33 = vector.multi_reduction <add>, %32, %cst_14 [2] : vector<2x64x128xf32> to vector<2x64xf32>
    %34 = vector.shape_cast %33 : vector<2x64xf32> to vector<2x64x1xf32>
    %35 = tpu.reciprocal %34 {approx = true} : vector<2x64x1xf32> -> vector<2x64x1xf32>
    %36 = vector.broadcast %35 : vector<2x64x1xf32> to vector<2x64x128xf32>
    %37 = arith.mulf %32, %36 : vector<2x64x128xf32>
    %38 = arith.truncf %37 : vector<2x64x128xf32> to vector<2x64x128xbf16>
    "tpu.trace_start"() <{level = 10 : i32, message = "hqk,hkd->hqd"}> : () -> ()
    %cst_15 = arith.constant dense<0.000000e+00> : vector<2x64x64xf32>
    %39 = tpu.matmul %38, %13, %cst_15 {dimension_numbers = #tpu.dot_dimension_numbers<[2], [1], [1], [2], [0, 0, 0, 1, 1, 2], [0], [0]>} : vector<2x64x128xbf16>, vector<2x128x64xbf16>, vector<2x64x64xf32> -> vector<2x64x64xf32>
    "tpu.trace_stop"() : () -> ()
    %40 = tpu.transpose %39, [1, 0, 2] : vector<2x64x64xf32> -> vector<64x2x64xf32>
    %41 = vector.shape_cast %40 : vector<64x2x64xf32> to vector<64x128xf32>
    %42 = arith.truncf %41 : vector<64x128xf32> to vector<64x128xbf16>
    %c0_16 = arith.constant 0 : index
    %c0_17 = arith.constant 0 : index
    %43 = vector.load %arg6[%c0_16, %c0_17] : memref<128x128xbf16, #tpu.memory_space<vmem>>, vector<128x128xbf16>
    %cst_18 = arith.constant dense<0.000000e+00> : vector<64x128xf32>
    %44 = tpu.matmul %42, %43, %cst_18 {dimension_numbers = #tpu.dot_dimension_numbers<[1], [0], [0], [1], [0, 0, 1, 1], [], []>} : vector<64x128xbf16>, vector<128x128xbf16>, vector<64x128xf32> -> vector<64x128xf32>
    %c0_19 = arith.constant 0 : index
    %c0_20 = arith.constant 0 : index
    %45 = vector.load %arg7[%c0_19, %c0_20] : memref<1x128xf32, #tpu.memory_space<vmem>>, vector<1x128xf32>
    %46 = vector.shape_cast %45 : vector<1x128xf32> to vector<128xf32>
    %47 = vector.shape_cast %46 : vector<128xf32> to vector<1x128xf32>
    %48 = vector.broadcast %47 : vector<1x128xf32> to vector<64x128xf32>
    %49 = arith.addf %44, %48 : vector<64x128xf32>
    %50 = arith.addf %1, %49 : vector<64x128xf32>
    %c0_21 = arith.constant 0 : index
    %c0_22 = arith.constant 0 : index
    %51 = vector.load %arg8[%c0_21, %c0_22] : memref<1x128xf32, #tpu.memory_space<vmem>>, vector<1x128xf32>
    %52 = vector.shape_cast %51 : vector<1x128xf32> to vector<128xf32>
    %c0_23 = arith.constant 0 : index
    %c0_24 = arith.constant 0 : index
    %53 = vector.load %arg9[%c0_23, %c0_24] : memref<1x128xf32, #tpu.memory_space<vmem>>, vector<1x128xf32>
    %54 = vector.shape_cast %53 : vector<1x128xf32> to vector<128xf32>
    %cst_25 = arith.constant dense<0.000000e+00> : vector<64xf32>
    %55 = vector.multi_reduction <add>, %50, %cst_25 [1] : vector<64x128xf32> to vector<64xf32>
    %56 = vector.shape_cast %55 : vector<64xf32> to vector<64x1xf32>
    %cst_26 = arith.constant 1.280000e+02 : f32
    %57 = vector.broadcast %cst_26 : f32 to vector<64x1xf32>
    %58 = arith.divf %56, %57 : vector<64x1xf32>
    %59 = vector.broadcast %58 : vector<64x1xf32> to vector<64x128xf32>
    %60 = arith.subf %50, %59 : vector<64x128xf32>
    %61 = arith.mulf %60, %60 : vector<64x128xf32>
    %cst_27 = arith.constant dense<0.000000e+00> : vector<64xf32>
    %62 = vector.multi_reduction <add>, %61, %cst_27 [1] : vector<64x128xf32> to vector<64xf32>
    %63 = vector.shape_cast %62 : vector<64xf32> to vector<64x1xf32>
    %cst_28 = arith.constant 1.280000e+02 : f32
    %64 = vector.broadcast %cst_28 : f32 to vector<64x1xf32>
    %65 = arith.divf %63, %64 : vector<64x1xf32>
    %66 = vector.broadcast %58 : vector<64x1xf32> to vector<64x128xf32>
    %67 = arith.subf %50, %66 : vector<64x128xf32>
    %cst_29 = arith.constant 9.99999974E-6 : f32
    %68 = vector.broadcast %cst_29 : f32 to vector<64x1xf32>
    %69 = arith.addf %65, %68 : vector<64x1xf32>
    %70 = math.rsqrt %69 : vector<64x1xf32>
    %71 = vector.broadcast %70 : vector<64x1xf32> to vector<64x128xf32>
    %72 = arith.mulf %67, %71 : vector<64x128xf32>
    %73 = vector.shape_cast %52 : vector<128xf32> to vector<1x128xf32>
    %74 = vector.broadcast %73 : vector<1x128xf32> to vector<64x128xf32>
    %75 = arith.mulf %72, %74 : vector<64x128xf32>
    %76 = vector.shape_cast %54 : vector<128xf32> to vector<1x128xf32>
    %77 = vector.broadcast %76 : vector<1x128xf32> to vector<64x128xf32>
    %78 = arith.addf %75, %77 : vector<64x128xf32>
    %79 = arith.truncf %78 : vector<64x128xf32> to vector<64x128xbf16>
    %c0_30 = arith.constant 0 : index
    %c0_31 = arith.constant 0 : index
    %80 = vector.load %arg10[%c0_30, %c0_31] : memref<128x512xbf16, #tpu.memory_space<vmem>>, vector<128x512xbf16>
    %cst_32 = arith.constant dense<0.000000e+00> : vector<64x512xf32>
    %81 = tpu.matmul %79, %80, %cst_32 {dimension_numbers = #tpu.dot_dimension_numbers<[1], [0], [0], [1], [0, 0, 1, 1], [], []>} : vector<64x128xbf16>, vector<128x512xbf16>, vector<64x512xf32> -> vector<64x512xf32>
    %c0_33 = arith.constant 0 : index
    %c0_34 = arith.constant 0 : index
    %82 = vector.load %arg11[%c0_33, %c0_34] : memref<1x512xf32, #tpu.memory_space<vmem>>, vector<1x512xf32>
    %83 = vector.shape_cast %82 : vector<1x512xf32> to vector<512xf32>
    %84 = vector.shape_cast %83 : vector<512xf32> to vector<1x512xf32>
    %85 = vector.broadcast %84 : vector<1x512xf32> to vector<64x512xf32>
    %86 = arith.addf %81, %85 : vector<64x512xf32>
    %cst_35 = arith.constant 5.000000e-01 : f32
    %87 = vector.broadcast %cst_35 : f32 to vector<64x512xf32>
    %88 = arith.mulf %87, %86 : vector<64x512xf32>
    %cst_36 = arith.constant 0.707106769 : f32
    %89 = vector.broadcast %cst_36 : f32 to vector<64x512xf32>
    %90 = arith.mulf %86, %89 : vector<64x512xf32>
    %91 = math.erf %90 : vector<64x512xf32>
    %cst_37 = arith.constant 1.000000e+00 : f32
    %92 = vector.broadcast %cst_37 : f32 to vector<64x512xf32>
    %93 = arith.addf %92, %91 : vector<64x512xf32>
    %94 = arith.mulf %88, %93 : vector<64x512xf32>
    %95 = arith.truncf %94 : vector<64x512xf32> to vector<64x512xbf16>
    %c0_38 = arith.constant 0 : index
    %c0_39 = arith.constant 0 : index
    %96 = vector.load %arg12[%c0_38, %c0_39] : memref<512x128xbf16, #tpu.memory_space<vmem>>, vector<512x128xbf16>
    %cst_40 = arith.constant dense<0.000000e+00> : vector<64x128xf32>
    %97 = tpu.matmul %95, %96, %cst_40 {dimension_numbers = #tpu.dot_dimension_numbers<[1], [0], [0], [1], [0, 0, 1, 1], [], []>} : vector<64x512xbf16>, vector<512x128xbf16>, vector<64x128xf32> -> vector<64x128xf32>
    %c0_41 = arith.constant 0 : index
    %c0_42 = arith.constant 0 : index
    %98 = vector.load %arg13[%c0_41, %c0_42] : memref<1x128xf32, #tpu.memory_space<vmem>>, vector<1x128xf32>
    %99 = vector.shape_cast %98 : vector<1x128xf32> to vector<128xf32>
    %100 = vector.shape_cast %99 : vector<128xf32> to vector<1x128xf32>
    %101 = vector.broadcast %100 : vector<1x128xf32> to vector<64x128xf32>
    %102 = arith.addf %97, %101 : vector<64x128xf32>
    %103 = arith.addf %50, %102 : vector<64x128xf32>
    %c0_43 = arith.constant 0 : index
    %c0_44 = arith.constant 0 : index
    %c0_45 = arith.constant 0 : index
    %104 = vector.load %arg14[%c0_43, %c0_44, %c0_45] : memref<1x64x128xf32, #tpu.memory_space<vmem>>, vector<1x64x128xf32>
    %105 = vector.shape_cast %104 : vector<1x64x128xf32> to vector<64x128xf32>
    %106 = vector.shape_cast %103 : vector<64x128xf32> to vector<1x64x128xf32>
    tpu.vector_store %arg14[%c0_43, %c0_44, %c0_45], %106 {strides = array<i32>} : memref<1x64x128xf32, #tpu.memory_space<vmem>>, vector<1x64x128xf32>,
    %c0_46 = arith.constant 0 : index
    %c0_47 = arith.constant 0 : index
    %c0_48 = arith.constant 0 : index
    %107 = vector.load %arg15[%c0_46, %c0_47, %c0_48] : memref<1x64x128xf32, #tpu.memory_space<vmem>>, vector<1x64x128xf32>
    %108 = vector.shape_cast %107 : vector<1x64x128xf32> to vector<64x128xf32>
    %109 = vector.shape_cast %49 : vector<64x128xf32> to vector<1x64x128xf32>
    tpu.vector_store %arg15[%c0_46, %c0_47, %c0_48], %109 {strides = array<i32>} : memref<1x64x128xf32, #tpu.memory_space<vmem>>, vector<1x64x128xf32>,
    %c0_49 = arith.constant 0 : index
    %c0_50 = arith.constant 0 : index
    %c0_51 = arith.constant 0 : index
    %110 = vector.load %arg16[%c0_49, %c0_50, %c0_51] : memref<1x64x128xf32, #tpu.memory_space<vmem>>, vector<1x64x128xf32>
    %111 = vector.shape_cast %110 : vector<1x64x128xf32> to vector<64x128xf32>
    %112 = vector.shape_cast %102 : vector<64x128xf32> to vector<1x64x128xf32>
    tpu.vector_store %arg16[%c0_49, %c0_50, %c0_51], %112 {strides = array<i32>} : memref<1x64x128xf32, #tpu.memory_space<vmem>>, vector<1x64x128xf32>,
    return
  }
  func.func @transform_0(%arg0: i32, %arg1: i32) -> (i32, i32, i32) {
    %c0_i32 = arith.constant 0 : i32
    %c0_i32_0 = arith.constant 0 : i32
    return %arg0, %arg1, %c0_i32 : i32, i32, i32
  }
  func.func @transform_1(%arg0: i32, %arg1: i32) -> (i32, i32, i32) {
    %c0_i32 = arith.constant 0 : i32
    %c0_i32_0 = arith.constant 0 : i32
    return %arg0, %arg1, %c0_i32 : i32, i32, i32
  }
  func.func @transform_2(%arg0: i32, %arg1: i32) -> (i32, i32, i32) {
    %c0_i32 = arith.constant 0 : i32
    %c1_i32 = arith.constant 1 : i32
    %c0_i32_0 = arith.constant 0 : i32
    return %arg0, %c0_i32, %c1_i32 : i32, i32, i32
  }
  func.func @transform_3(%arg0: i32, %arg1: i32) -> (i32, i32, i32) {
    %c0_i32 = arith.constant 0 : i32
    %c2_i32 = arith.constant 2 : i32
    %c0_i32_0 = arith.constant 0 : i32
    return %arg0, %c0_i32, %c2_i32 : i32, i32, i32
  }
  func.func @transform_4(%arg0: i32, %arg1: i32) -> (i32, i32) {
    %c0_i32 = arith.constant 0 : i32
    %c0_i32_0 = arith.constant 0 : i32
    %c0_i32_1 = arith.constant 0 : i32
    return %c0_i32, %c0_i32_0 : i32, i32
  }
  func.func @transform_5(%arg0: i32, %arg1: i32) -> (i32, i32) {
    %c0_i32 = arith.constant 0 : i32
    %c0_i32_0 = arith.constant 0 : i32
    %c0_i32_1 = arith.constant 0 : i32
    return %c0_i32, %c0_i32_0 : i32, i32
  }
  func.func @transform_6(%arg0: i32, %arg1: i32) -> (i32, i32) {
    %c0_i32 = arith.constant 0 : i32
    %c0_i32_0 = arith.constant 0 : i32
    %c0_i32_1 = arith.constant 0 : i32
    return %c0_i32, %c0_i32_0 : i32, i32
  }
  func.func @transform_7(%arg0: i32, %arg1: i32) -> (i32, i32) {
    %c0_i32 = arith.constant 0 : i32
    %c0_i32_0 = arith.constant 0 : i32
    %c0_i32_1 = arith.constant 0 : i32
    return %c0_i32, %c0_i32_0 : i32, i32
  }
  func.func @transform_8(%arg0: i32, %arg1: i32) -> (i32, i32) {
    %c0_i32 = arith.constant 0 : i32
    %c0_i32_0 = arith.constant 0 : i32
    %c0_i32_1 = arith.constant 0 : i32
    return %c0_i32, %c0_i32_0 : i32, i32
  }
  func.func @transform_9(%arg0: i32, %arg1: i32) -> (i32, i32) {
    %c0_i32 = arith.constant 0 : i32
    %c0_i32_0 = arith.constant 0 : i32
    %c0_i32_1 = arith.constant 0 : i32
    return %c0_i32, %c0_i32_0 : i32, i32
  }
  func.func @transform_10(%arg0: i32, %arg1: i32) -> (i32, i32) {
    %c0_i32 = arith.constant 0 : i32
    %c0_i32_0 = arith.constant 0 : i32
    %c0_i32_1 = arith.constant 0 : i32
    return %c0_i32, %c0_i32_0 : i32, i32
  }
  func.func @transform_11(%arg0: i32, %arg1: i32) -> (i32, i32) {
    %c0_i32 = arith.constant 0 : i32
    %c0_i32_0 = arith.constant 0 : i32
    %c0_i32_1 = arith.constant 0 : i32
    return %c0_i32, %c0_i32_0 : i32, i32
  }
  func.func @transform_12(%arg0: i32, %arg1: i32) -> (i32, i32, i32) {
    %c0_i32 = arith.constant 0 : i32
    %c0_i32_0 = arith.constant 0 : i32
    return %arg0, %arg1, %c0_i32 : i32, i32, i32
  }
  func.func @transform_13(%arg0: i32, %arg1: i32) -> (i32, i32, i32) {
    %c0_i32 = arith.constant 0 : i32
    %c0_i32_0 = arith.constant 0 : i32
    return %arg0, %arg1, %c0_i32 : i32, i32, i32
  }
  func.func @transform_14(%arg0: i32, %arg1: i32) -> (i32, i32, i32) {
    %c0_i32 = arith.constant 0 : i32
    %c0_i32_0 = arith.constant 0 : i32
    return %arg0, %arg1, %c0_i32 : i32, i32, i32
  }
}

module attributes {stable_mosaic.version = 11 : i64} {
  func.func @lnf_lmhead_kernel(%arg0: i32, %arg1: memref<2x128xf32, #tpu.memory_space<vmem>>, %arg2: memref<1x128xf32, #tpu.memory_space<vmem>>, %arg3: memref<1x128xf32, #tpu.memory_space<vmem>>, %arg4: memref<128x128xbf16, #tpu.memory_space<vmem>>, %arg5: memref<2x128xf32, #tpu.memory_space<vmem>>) attributes {dimension_semantics = [#tpu.dimension_semantics<parallel>], iteration_bounds = array<i64: 4>, scalar_prefetch = 0 : i64, scratch_operands = 0 : i64, tpu.core_type = #tpu.core_type<tc>, window_params = [{pipeline_mode = #tpu.pipeline_mode<synchronous>, transform_indices = @transform_0, window_bounds = array<i64: 2, 128>}, {pipeline_mode = #tpu.pipeline_mode<synchronous>, transform_indices = @transform_1, window_bounds = array<i64: 1, 128>}, {pipeline_mode = #tpu.pipeline_mode<synchronous>, transform_indices = @transform_2, window_bounds = array<i64: 1, 128>}, {transform_indices = @transform_3, window_bounds = array<i64: 128, 128>}, {transform_indices = @transform_4, window_bounds = array<i64: 2, 128>}]} {
    %c0 = arith.constant 0 : index
    %c0_0 = arith.constant 0 : index
    %0 = vector.load %arg1[%c0, %c0_0] : memref<2x128xf32, #tpu.memory_space<vmem>>, vector<2x128xf32>
    %c0_1 = arith.constant 0 : index
    %c0_2 = arith.constant 0 : index
    %1 = vector.load %arg2[%c0_1, %c0_2] : memref<1x128xf32, #tpu.memory_space<vmem>>, vector<1x128xf32>
    %2 = vector.shape_cast %1 : vector<1x128xf32> to vector<128xf32>
    %c0_3 = arith.constant 0 : index
    %c0_4 = arith.constant 0 : index
    %3 = vector.load %arg3[%c0_3, %c0_4] : memref<1x128xf32, #tpu.memory_space<vmem>>, vector<1x128xf32>
    %4 = vector.shape_cast %3 : vector<1x128xf32> to vector<128xf32>
    %cst = arith.constant dense<0.000000e+00> : vector<2xf32>
    %5 = vector.multi_reduction <add>, %0, %cst [1] : vector<2x128xf32> to vector<2xf32>
    %6 = vector.shape_cast %5 : vector<2xf32> to vector<2x1xf32>
    %cst_5 = arith.constant 1.280000e+02 : f32
    %7 = vector.broadcast %cst_5 : f32 to vector<2x1xf32>
    %8 = arith.divf %6, %7 : vector<2x1xf32>
    %9 = vector.broadcast %8 : vector<2x1xf32> to vector<2x128xf32>
    %10 = arith.subf %0, %9 : vector<2x128xf32>
    %11 = arith.mulf %10, %10 : vector<2x128xf32>
    %cst_6 = arith.constant dense<0.000000e+00> : vector<2xf32>
    %12 = vector.multi_reduction <add>, %11, %cst_6 [1] : vector<2x128xf32> to vector<2xf32>
    %13 = vector.shape_cast %12 : vector<2xf32> to vector<2x1xf32>
    %cst_7 = arith.constant 1.280000e+02 : f32
    %14 = vector.broadcast %cst_7 : f32 to vector<2x1xf32>
    %15 = arith.divf %13, %14 : vector<2x1xf32>
    %16 = vector.broadcast %8 : vector<2x1xf32> to vector<2x128xf32>
    %17 = arith.subf %0, %16 : vector<2x128xf32>
    %cst_8 = arith.constant 9.99999974E-6 : f32
    %18 = vector.broadcast %cst_8 : f32 to vector<2x1xf32>
    %19 = arith.addf %15, %18 : vector<2x1xf32>
    %20 = math.rsqrt %19 : vector<2x1xf32>
    %21 = vector.broadcast %20 : vector<2x1xf32> to vector<2x128xf32>
    %22 = arith.mulf %17, %21 : vector<2x128xf32>
    %23 = vector.shape_cast %2 : vector<128xf32> to vector<1x128xf32>
    %24 = vector.broadcast %23 : vector<1x128xf32> to vector<2x128xf32>
    %25 = arith.mulf %22, %24 : vector<2x128xf32>
    %26 = vector.shape_cast %4 : vector<128xf32> to vector<1x128xf32>
    %27 = vector.broadcast %26 : vector<1x128xf32> to vector<2x128xf32>
    %28 = arith.addf %25, %27 : vector<2x128xf32>
    %29 = arith.truncf %28 : vector<2x128xf32> to vector<2x128xbf16>
    %c0_9 = arith.constant 0 : index
    %c0_10 = arith.constant 0 : index
    %30 = vector.load %arg4[%c0_9, %c0_10] : memref<128x128xbf16, #tpu.memory_space<vmem>>, vector<128x128xbf16>
    %cst_11 = arith.constant dense<0.000000e+00> : vector<2x128xf32>
    %31 = tpu.matmul %29, %30, %cst_11 {dimension_numbers = #tpu.dot_dimension_numbers<[1], [1], [0], [0], [0, 0, 1, 0], [], []>} : vector<2x128xbf16>, vector<128x128xbf16>, vector<2x128xf32> -> vector<2x128xf32>
    %c0_12 = arith.constant 0 : index
    %c0_13 = arith.constant 0 : index
    %32 = vector.load %arg5[%c0_12, %c0_13] : memref<2x128xf32, #tpu.memory_space<vmem>>, vector<2x128xf32>
    tpu.vector_store %arg5[%c0_12, %c0_13], %31 {strides = array<i32>} : memref<2x128xf32, #tpu.memory_space<vmem>>, vector<2x128xf32>,
    return
  }
  func.func @transform_0(%arg0: i32) -> (i32, i32) {
    %c0_i32 = arith.constant 0 : i32
    %c0_i32_0 = arith.constant 0 : i32
    %c0_i32_1 = arith.constant 0 : i32
    return %c0_i32, %c0_i32_0 : i32, i32
  }
  func.func @transform_1(%arg0: i32) -> (i32, i32) {
    %c0_i32 = arith.constant 0 : i32
    %c0_i32_0 = arith.constant 0 : i32
    %c0_i32_1 = arith.constant 0 : i32
    return %c0_i32, %c0_i32_0 : i32, i32
  }
  func.func @transform_2(%arg0: i32) -> (i32, i32) {
    %c0_i32 = arith.constant 0 : i32
    %c0_i32_0 = arith.constant 0 : i32
    %c0_i32_1 = arith.constant 0 : i32
    return %c0_i32, %c0_i32_0 : i32, i32
  }
  func.func @transform_3(%arg0: i32) -> (i32, i32) {
    %c0_i32 = arith.constant 0 : i32
    %c0_i32_0 = arith.constant 0 : i32
    return %arg0, %c0_i32 : i32, i32
  }
  func.func @transform_4(%arg0: i32) -> (i32, i32) {
    %c0_i32 = arith.constant 0 : i32
    %c0_i32_0 = arith.constant 0 : i32
    return %c0_i32, %arg0 : i32, i32
  }
}

</mosaic_0001>

<bundles_post_ra>
// kernel: gpt_forward.5
= control target key start
LH: loop header
LB: loop body
LE: loop exit
PB: predicated region body
PF: predicated region fallthrough
CT: control target
= control target key end

     0   :  { %s1126_s18 = smov 0   ;;  %s1128_s19 = smov 0   ;;  %s1478_s0 = inlined_call_operand.vmem [shape: f32[2,128,128], index: 0, kind: input, shape index: {}]   ;;  %s1479_s1 = inlined_call_operand.vmem [shape: f32[1,128], index: 1, kind: input, shape index: {}]   ;;  %s1480_s2 = inlined_call_operand.vmem [shape: f32[1,128], index: 2, kind: input, shape index: {}]   ;;  %s1481_s3 = inlined_call_operand.vmem [shape: bf16[128,384], index: 3, kind: input, shape index: {}]   ;;  %s1482_s4 = inlined_call_operand.vmem [shape: f32[1,384], index: 4, kind: input, shape index: {}]   ;;  %s1483_s5 = inlined_call_operand.vmem [shape: bf16[2,128,384], index: 5, kind: output, shape index: {}]  }
   0x1   :  { %s1130_s20 = smov 0   ;;  %s1132_s21 = smov 0  }
   0x2   :  { %s1134_s22 = smov 0  }
   0x3 LB: > { %s24_s23 = sadd.s32 1, %s1085_s20  ;;  %s27_s24 = sadd.s32 1, %s1089_s21  ;;  %s1093_s22 = sphi %s1134_s22, %s15_s22   ;;  %s1089_s21 = sphi %s1132_s21, %s1487_s21   ;;  %s1085_s20 = sphi %s1130_s20, %s1486_s20   ;;  %s1081_s19 = sphi %s1128_s19, %s1485_s19   ;;  %s1077_s18 = sphi %s1126_s18, %s1484_s18  }
   0x4   : > { %p25_p0 = scmp.ge.s32.totalorder %s24_s23, 2  ;;  %p856_p1 = scmp.ge.s32.totalorder %s1093_s22, 1 }
   0x5   : > { %p208_p2 = scmp.lt.s32.totalorder %s1093_s22, 5 }
   0x6   : > { %s1489_s23 = smov (%p25_p0, %s24_s23), 0  ;;  %s1491_s24 = smov (!%p25_p0, %s27_s24), %s1089_s21 }
   0x7   : > { %p209_p3 = pnand %p856_p1, %p208_p2  ;;  %p29_p4 = scmp.ge.s32.totalorder %s1491_s24, 2 }
   0x8   : > { %s857_s25 = sshll.u32 (!%p209_p3), %s1077_s18, 3  ;;  %p246_p5 = scmp.lt.s32.totalorder (!%p209_p3), %s1081_s19, 1 }
   0x9   : > { %s1493_s24 = smov (%p29_p4, %s1491_s24), 0  ;;  %212 = sbr.rel (%p209_p3) target bundleno = 565 (0x235), region = 40 }
   0xa   : > { %p248_p6 = scmp.lt.s32.totalorder (!%p209_p3), %s857_s25, 15 }
   0xe   : > { %s1495_s19 = smov (!%p246_p5, %s1081_s19), 1  ;;  %s1497_s25 = smov (!%p248_p6, %s857_s25), 15  ;;  %v1095_v7 = vmov 128.0   ;;  %v948_v43 = vld [vmem:[%s1481_s3 + $0xa8] sm:$0xf] }
   0xf   : > { %s858_s26 = sshll.u32 %s1495_s19, 4  ;;  %s993_s27 = smul.u32 48, %s1495_s19  ;;  %1037 = vrcp.f32 %v1095_v7  ;;  %v982_v44 = vld [vmem:[%s1481_s3 + $0xb0] sm:$0xf0]  ;;  %v981_v45 = vld [vmem:[%s1481_s3 + $0xac] sm:$0xf] }
  0x10   : > { %s251_s28 = sadd.s32 %s858_s26, %s1497_s25  ;;  %s992_s29 = smul.u32 3, %s1497_s25  ;;  %v949_v46 = vor.u32 %v982_v44, %v948_v43  ;;  %v950_v47 = vld [vmem:[%s1481_s3 + $0xb4] sm:$0xf0]  ;;  %v956_v48 = vld [vmem:[%s1481_s3 + $0xb0] sm:$0xf] }
  0x11   : > { %s859_s30 = sshll.u32 %s251_s28, 3  ;;  %v983_v49 = vld [vmem:[%s1481_s3 + $0xb8] sm:$0xf0]  ;;  %v953_v50 = vor.u32 %v981_v45, %v950_v47  ;;  %v936_v52 = vld [vmem:[%s1481_s3 + $0x90] sm:$0xf] }
  0x12   : > { %s1159_s8 = scalar_lea.vmem %s1478_s0, %s859_s30  ;;  %s1161_s9 = sadd.s32 %s993_s27, %s992_s29  ;;  %v957_v51 = vor.u32 %v983_v49, %v956_v48  ;;  %637 = vmatpush.bf16.msra.mxu0 %v949_v46  ;;  %984 = vmatpush.bf16.msra.mxu3 %v949_v46  ;;  %v979_v53 = vld [vmem:[%s1481_s3 + $0x98] sm:$0xf0]  ;;  %v978_v54 = vld [vmem:[%s1481_s3 + $0x94] sm:$0xf]  ;;  %v938_v56 = vld [vmem:[%s1481_s3 + $0x9c] sm:$0xf0] }
  0x13   : > { %v270_v0 = vld [vmem:[%s1159_s8 + $0x20] sm:$0xff]  ;;  %v268_v1 = vld [vmem:[%s1159_s8 + $0x10] sm:$0xff]  ;;  %v271_v3 = vld [vmem:[%s1159_s8 + $0x28] sm:$0xff]  ;;  %666 = vmatpush.bf16.msra.mxu1 %v953_v50  ;;  %v937_v55 = vor.u32 %v979_v53, %v936_v52  ;;  %v941_v59 = vor.u32 %v978_v54, %v938_v56  ;;  %s861_s17 = sshll.u32 %s1161_s9, 2 }
  0x14   : > { %v266_v2 = vld [vmem:[%s1159_s8] sm:$0xff]  ;;  %284 = vadd.xlane.f32.xlu2 %v270_v0  ;;  %280 = vadd.xlane.f32.xlu1 %v268_v1  ;;  %v269_v4 = vld [vmem:[%s1159_s8 + $0x18] sm:$0xff]  ;;  %v267_v5 = vld [vmem:[%s1159_s8 + $0x8] sm:$0xff]  ;;  %s1421_s25 = scalar_lea.vmem %s1483_s5, %s861_s17 }
  0x15   : > { %276 = vadd.xlane.f32.xlu0 %v266_v2  ;;  %v272_v6 = vld [vmem:[%s1159_s8 + $0x30] sm:$0xff]  ;;  %v1038_v8 = vpop.eup %1037  ;;  %v1188_v30 = vld [vmem:[%s1159_s8 + $0x38] sm:$0xff]  ;;  %695 = vmatpush.bf16.msra.mxu2 %v957_v51  ;;  %v980_v58 = vld [vmem:[%s1481_s3 + $0xa0] sm:$0xf0] }
  0x16   : > { %v293_v9 = vmul.f32 128.0, %v1038_v8  ;;  %vm297_vm0 = vweird.f32 %v1038_v8  ;;  %v944_v57 = vld [vmem:[%s1481_s3 + $0x98] sm:$0xf]  ;;  %638 = vmatpush.bf16.msra.mxu0 %v937_v55  ;;  %985 = vmatpush.bf16.msra.mxu3 %v937_v55  ;;  %v976_v62 = vld [vmem:[%s1481_s3 + $0x80] sm:$0xf0] }
  0x17   : > { %v945_v60 = vor.u32 %v980_v58, %v944_v57  ;;  %667 = vmatpush.bf16.msra.mxu1 %v941_v59  ;;  %v924_v61 = vld [vmem:[%s1481_s3 + $0x78] sm:$0xf]  ;;  %v975_v63 = vld [vmem:[%s1481_s3 + $0x7c] sm:$0xf]  ;;  %v973_v7 = vld [vmem:[%s1481_s3 + $0x68] sm:$0xf0] }
  0x18   : > { %v294_v10 = vsub.f32 1.0, %v293_v9  ;;  %v964_v43 = vld [vmem:[%s1481_s3 + $0x20] sm:$0xf0]  ;;  %v963_v44 = vld [vmem:[%s1481_s3 + $0x1c] sm:$0xf] }
  0x19   : > { %696 = vmatpush.bf16.msra.mxu2 %v945_v60  ;;  %v878_v46 = vld [vmem:[%s1481_s3 + $0x24] sm:$0xf0]  ;;  %v884_v47 = vld [vmem:[%s1481_s3 + $0x20] sm:$0xf]  ;;  %v965_v48 = vld [vmem:[%s1481_s3 + $0x28] sm:$0xf0] }
  0x1a   : > { %v295_v11 = vmul.f32 %v1038_v8, %v294_v10  ;;  %v914_v10 = vld [vmem:[%s1481_s3 + $0x6c] sm:$0xf0]  ;;  %v881_v50 = vor.u32 %v963_v44, %v878_v46  ;;  %v885_v51 = vor.u32 %v965_v48, %v884_v47  ;;  %v864_v53 = vld [vmem:[%s1481_s3] sm:$0xf]  ;;  %v961_v54 = vld [vmem:[%s1481_s3 + $0x8] sm:$0xf0] }
  0x1b   : > { %v960_v55 = vld [vmem:[%s1481_s3 + $0x4] sm:$0xf]  ;;  %v865_v57 = vor.u32 %v961_v54, %v864_v53  ;;  %v866_v58 = vld [vmem:[%s1481_s3 + $0xc] sm:$0xf0]  ;;  %v872_v59 = vld [vmem:[%s1481_s3 + $0x8] sm:$0xf] }
  0x1c   : > { %286 = vadd.xlane.f32.xlu2 %v271_v3  ;;  %282 = vadd.xlane.f32.xlu1 %v269_v4  ;;  %v296_v12 = vadd.f32 %v1038_v8, %v295_v11  ;;  %v920_v11 = vld [vmem:[%s1481_s3 + $0x68] sm:$0xf]  ;;  %v869_v60 = vor.u32 %v960_v55, %v866_v58 }
  0x1d   : > { %278 = vadd.xlane.f32.xlu0 %v267_v5 }
  0x1e   : > { %v1170_v13 = vsel %vm297_vm0, %v1038_v8, %v296_v12  ;;  %v972_v8 = vld [vmem:[%s1481_s3 + $0x64] sm:$0xf]  ;;  %v974_v12 = vld [vmem:[%s1481_s3 + $0x70] sm:$0xf0] }
  0x24   : > { %288 = vadd.xlane.f32.xlu2 %v272_v6 }
  0x87   : > { %v285_v14 = vpop.xlane.xlu2 %284  ;;  %v281_v15 = vpop.xlane.xlu1 %280 }
  0x88   : > { %v277_v16 = vpop.xlane.xlu0 %276  ;;  %v303_v26 = vmul.f32 %v1170_v13, %v285_v14  ;;  %v301_v27 = vmul.f32 %v1170_v13, %v281_v15  ;;  %v917_v14 = vor.u32 %v972_v8, %v914_v10  ;;  %v921_v15 = vor.u32 %v974_v12, %v920_v11 }
  0x89   : > { %v299_v17 = vmul.f32 %v1170_v13, %v277_v16  ;;  %v900_v16 = vld [vmem:[%s1481_s3 + $0x48] sm:$0xf] }
  0x8a   : > { %v1192_v32 = vsub.f32 %v270_v0, %v303_v26  ;;  %v1194_v33 = vsub.f32 %v268_v1, %v301_v27  ;;  %v925_v0 = vor.u32 %v976_v62, %v924_v61  ;;  %v926_v1 = vld [vmem:[%s1481_s3 + $0x84] sm:$0xf0]  ;;  %v888_v27 = vld [vmem:[%s1481_s3 + $0x30] sm:$0xf]  ;;  %v962_v61 = vld [vmem:[%s1481_s3 + $0x10] sm:$0xf0] }
  0x8b   : > { %v1173_v18 = vsub.f32 %v266_v2, %v299_v17  ;;  %v932_v2 = vld [vmem:[%s1481_s3 + $0x80] sm:$0xf]  ;;  %v970_v17 = vld [vmem:[%s1481_s3 + $0x50] sm:$0xf0]  ;;  %v873_v62 = vor.u32 %v962_v61, %v872_v59 }
  0x8c   : > { %v319_v38 = vmul.f32 %v1192_v32, %v1192_v32  ;;  %v317_v39 = vmul.f32 %v1194_v33, %v1194_v33  ;;  %639 = vmatpush.bf16.msra.mxu0 %v925_v0  ;;  %986 = vmatpush.bf16.msra.mxu3 %v925_v0 }
  0x8d   : > { %v315_v19 = vmul.f32 %v1173_v18, %v1173_v18 }
  0x8f   : > { %323 = vadd.xlane.f32.xlu0 %v315_v19  ;;  %v287_v20 = vpop.xlane.xlu2 %286  ;;  %v283_v21 = vpop.xlane.xlu1 %282  ;;  %v969_v19 = vld [vmem:[%s1481_s3 + $0x4c] sm:$0xf] }
  0x90   : > { %v302_v22 = vmul.f32 %v1170_v13, %v283_v21  ;;  %v279_v23 = vpop.xlane.xlu0 %278  ;;  %v304_v37 = vmul.f32 %v1170_v13, %v287_v20  ;;  %v901_v20 = vor.u32 %v970_v17, %v900_v16  ;;  %v902_v21 = vld [vmem:[%s1481_s3 + $0x54] sm:$0xf0] }
  0x91   : > { %v300_v24 = vmul.f32 %v1170_v13, %v279_v23  ;;  %v971_v23 = vld [vmem:[%s1481_s3 + $0x58] sm:$0xf0] }
  0x92   : > { %v1179_v25 = vsub.f32 %v269_v4, %v302_v22  ;;  %v1207_v41 = vsub.f32 %v271_v3, %v304_v37  ;;  %v977_v3 = vld [vmem:[%s1481_s3 + $0x88] sm:$0xf0]  ;;  %v929_v4 = vor.u32 %v975_v63, %v926_v1  ;;  %v908_v22 = vld [vmem:[%s1481_s3 + $0x50] sm:$0xf]  ;;  %v896_v37 = vld [vmem:[%s1481_s3 + $0x38] sm:$0xf] }
  0x93   : > { %v1183_v28 = vsub.f32 %v267_v5, %v300_v24  ;;  %v933_v5 = vor.u32 %v977_v3, %v932_v2  ;;  %v905_v24 = vor.u32 %v969_v19, %v902_v21  ;;  %v909_v26 = vor.u32 %v971_v23, %v908_v22 }
  0x94   : > { %v318_v29 = vmul.f32 %v1179_v25, %v1179_v25  ;;  %v320_v42 = vmul.f32 %v1207_v41, %v1207_v41  ;;  %668 = vmatpush.bf16.msra.mxu1 %v929_v4 }
  0x95   : > { %v316_v31 = vmul.f32 %v1183_v28, %v1183_v28  ;;  %697 = vmatpush.bf16.msra.mxu2 %v933_v5 }
  0x96   : > { %329 = vadd.xlane.f32.xlu2 %v318_v29  ;;  %v967_v29 = vld [vmem:[%s1481_s3 + $0x38] sm:$0xf0] }
  0x97   : > { %290 = vadd.xlane.f32.xlu0 %v1188_v30  ;;  %325 = vadd.xlane.f32.xlu1 %v316_v31  ;;  %v289_v34 = vpop.xlane.xlu2 %288  ;;  %v966_v31 = vld [vmem:[%s1481_s3 + $0x34] sm:$0xf] }
  0x98   : > { %v305_v35 = vmul.f32 %v1170_v13, %v289_v34  ;;  %669 = vmatpush.bf16.msra.mxu1 %v917_v14  ;;  %v889_v34 = vor.u32 %v967_v29, %v888_v27 }
  0x99   : > { %698 = vmatpush.bf16.msra.mxu2 %v921_v15 }
  0x9a   : > { %v1198_v36 = vsub.f32 %v272_v6, %v305_v35  ;;  %v912_v6 = vld [vmem:[%s1481_s3 + $0x60] sm:$0xf] }
  0x9b   : > { %v913_v9 = vor.u32 %v973_v7, %v912_v6  ;;  %v890_v35 = vld [vmem:[%s1481_s3 + $0x3c] sm:$0xf0] }
  0x9c   : > { %v321_v40 = vmul.f32 %v1198_v36, %v1198_v36  ;;  %670 = vmatpush.bf16.msra.mxu1 %v905_v24 }
  0x9d   : > { %640 = vmatpush.bf16.msra.mxu0 %v913_v9  ;;  %987 = vmatpush.bf16.msra.mxu3 %v913_v9 }
  0x9e   : > { %335 = vadd.xlane.f32.xlu2 %v321_v40  ;;  %699 = vmatpush.bf16.msra.mxu2 %v909_v26 }
  0x9f   : > { %331 = vadd.xlane.f32.xlu0 %v319_v38  ;;  %327 = vadd.xlane.f32.xlu1 %v317_v39  ;;  %v968_v38 = vld [vmem:[%s1481_s3 + $0x40] sm:$0xf0]  ;;  %v893_v39 = vor.u32 %v966_v31, %v890_v35 }
  0xa0   : > { %v897_v40 = vor.u32 %v968_v38, %v896_v37 }
  0xa1   : > { %641 = vmatpush.bf16.msra.mxu0 %v901_v20  ;;  %988 = vmatpush.bf16.msra.mxu3 %v901_v20 }
  0xa2   : > { %671 = vmatpush.bf16.msra.mxu1 %v893_v39  ;;  %700 = vmatpush.bf16.msra.mxu2 %v897_v40 }
  0xa5   : > { %642 = vmatpush.bf16.msra.mxu0 %v889_v34  ;;  %989 = vmatpush.bf16.msra.mxu3 %v889_v34 }
  0xa6   : > { %672 = vmatpush.bf16.msra.mxu1 %v881_v50  ;;  %701 = vmatpush.bf16.msra.mxu2 %v885_v51 }
  0xa7   : > { %333 = vadd.xlane.f32.xlu1 %v320_v42  ;;  %v876_v42 = vld [vmem:[%s1481_s3 + $0x18] sm:$0xf] }
  0xa8   : > { %v877_v45 = vor.u32 %v964_v43, %v876_v42 }
  0xaa   : > { %643 = vmatpush.bf16.msra.mxu0 %v877_v45  ;;  %990 = vmatpush.bf16.msra.mxu3 %v877_v45  ;;  %v1374_v45 = vld [vmem:[%s1479_s1] ss:$0 sm:$0xff] }
  0xab   : > { %673 = vmatpush.bf16.msra.mxu1 %v869_v60  ;;  %702 = vmatpush.bf16.msra.mxu2 %v873_v62 }
  0xae   : > { %644 = vmatpush.bf16.msra.mxu0 %v865_v57  ;;  %991 = vmatpush.bf16.msra.mxu3 %v865_v57  ;;  %v1382_v57 = vld [vmem:[%s1480_s2] ss:$0 sm:$0xff] }
 0x102   : > { %v324_v49 = vpop.xlane.xlu0 %323 }
 0x103   : > { %v339_v52 = vmul.f32 %v324_v49, %v1170_v13 }
 0x105   : > { %v347_v56 = vadd.f32 1e-05, %v339_v52 }
 0x107   : > { %1039 = vrsqrt.f32 %v347_v56  ;;  %vm361_vm2 = vweird.f32 %v347_v56 }
 0x109   : > { %v330_v63 = vpop.xlane.xlu2 %329 }
 0x10a   : > { %v342_v0 = vmul.f32 %v330_v63, %v1170_v13  ;;  %v326_v1 = vpop.xlane.xlu1 %325  ;;  %v291_v2 = vpop.xlane.xlu0 %290 }
 0x10b   : > { %v340_v3 = vmul.f32 %v326_v1, %v1170_v13  ;;  %v306_v4 = vmul.f32 %v1170_v13, %v291_v2 }
 0x10c   : > { %v350_v5 = vadd.f32 1e-05, %v342_v0 }
 0x10d   : > { %v1040_v6 = vpop.eup %1039  ;;  %v348_v7 = vadd.f32 1e-05, %v340_v3  ;;  %v1360_v8 = vsub.f32 %v1188_v30, %v306_v4 }
 0x10e   : > { %v356_v9 = vmul.f32 %v1040_v6, %v347_v56  ;;  %1041 = vrsqrt.f32 %v350_v5  ;;  %vm362_vm1 = vweird.f32 %v1040_v6  ;;  %vm391_vm6 = vweird.f32 %v350_v5 }
 0x10f   : > { %1043 = vrsqrt.f32 %v348_v7  ;;  %v322_v10 = vmul.f32 %v1360_v8, %v1360_v8  ;;  %vm363_vm3 = vmor %vm361_vm2, %vm362_vm1  ;;  %vm371_vm4 = vweird.f32 %v348_v7 }
 0x110   : > { %v357_v11 = vmul.f32 %v1040_v6, %v356_v9 }
 0x111   : > { %337 = vadd.xlane.f32.xlu0 %v322_v10 }
 0x112   : > { %v358_v12 = vmul.f32 0.5, %v357_v11  ;;  %v328_v14 = vpop.xlane.xlu1 %327  ;;  %v332_v15 = vpop.xlane.xlu0 %331 }
 0x113   : > { %v341_v16 = vmul.f32 %v328_v14, %v1170_v13  ;;  %v343_v17 = vmul.f32 %v332_v15, %v1170_v13 }
 0x114   : > { %v1042_v19 = vpop.eup %1041  ;;  %v359_v20 = vsub.f32 1.5, %v358_v12 }
 0x115   : > { %v1044_v21 = vpop.eup %1043  ;;  %v386_v30 = vmul.f32 %v1042_v19, %v350_v5  ;;  %v349_v22 = vadd.f32 1e-05, %v341_v16  ;;  %v1366_v23 = vadd.f32 1e-05, %v343_v17  ;;  %vm392_vm7 = vweird.f32 %v1042_v19 }
 0x116   : > { %v360_v24 = vmul.f32 %v1040_v6, %v359_v20  ;;  %v366_v26 = vmul.f32 %v1044_v21, %v348_v7  ;;  %vm372_vm5 = vweird.f32 %v1044_v21  ;;  %vm393_vm9 = vmor %vm391_vm6, %vm392_vm7 }
 0x117   : > { %v387_v27 = vmul.f32 %v1042_v19, %v386_v30  ;;  %1045 = vrsqrt.f32 %v349_v22  ;;  %vm373_vm8 = vmor %vm371_vm4, %vm372_vm5  ;;  %vm381_vm10 = vweird.f32 %v349_v22  ;;  %vm401_vm15 = vweird.f32 %v1366_v23 }
 0x118   : > { %v367_v29 = vmul.f32 %v1044_v21, %v366_v26  ;;  %1047 = vrsqrt.f32 %v1366_v23  ;;  %v364_v34 = vsel %vm363_vm3, %v1040_v6, %v360_v24  ;;  %v336_v26 = vpop.xlane.xlu2 %335 }
 0x119   : > { %v388_v31 = vmul.f32 0.5, %v387_v27  ;;  %v435_v43 = vmul.f32 %v364_v34, %v1173_v18  ;;  %v345_v27 = vmul.f32 %v336_v26, %v1170_v13 }
 0x11a   : > { %v368_v35 = vmul.f32 0.5, %v367_v29  ;;  %v334_v37 = vpop.xlane.xlu1 %333 }
 0x11b   : > { %v389_v38 = vsub.f32 1.5, %v388_v31  ;;  %v344_v39 = vmul.f32 %v334_v37, %v1170_v13  ;;  %v446_v18 = vmul.f32 %v1374_v45, %v435_v43 }
 0x11c   : > { %v369_v40 = vsub.f32 1.5, %v368_v35 }
 0x11d   : > { %v1046_v42 = vpop.eup %1045  ;;  %v352_v44 = vadd.f32 1e-05, %v344_v39  ;;  %v390_v47 = vmul.f32 %v1042_v19, %v389_v38  ;;  %v457_v0 = vadd.f32 %v1382_v57, %v446_v18 }
 0x11e   : > { %v1048_v46 = vpop.eup %1047  ;;  %v370_v48 = vmul.f32 %v1044_v21, %v369_v40  ;;  %v376_v49 = vmul.f32 %v1046_v42, %v349_v22  ;;  %vm382_vm11 = vweird.f32 %v1046_v42 }
 0x11f   : > { %v396_v50 = vmul.f32 %v1048_v46, %v1366_v23  ;;  %1049 = vrsqrt.f32 %v352_v44  ;;  %v394_v54 = vsel %vm393_vm9, %v1042_v19, %v390_v47  ;;  %vm383_vm12 = vmor %vm381_vm10, %vm382_vm11  ;;  %vm411_vm13 = vweird.f32 %v352_v44 }
 0x120   : > { %v374_v51 = vsel %vm373_vm8, %v1044_v21, %v370_v48  ;;  %v377_v52 = vmul.f32 %v1046_v42, %v376_v49  ;;  %v438_v60 = vmul.f32 %v394_v54, %v1179_v25  ;;  %vm402_vm0 = vweird.f32 %v1048_v46 }
 0x121   : > { %v436_v53 = vmul.f32 %v374_v51, %v1183_v28  ;;  %v397_v56 = vmul.f32 %v1048_v46, %v396_v50  ;;  %vm403_vm2 = vmor %vm401_vm15, %vm402_vm0 }
 0x122   : > { %v378_v55 = vmul.f32 0.5, %v377_v52  ;;  %v449_v6 = vmul.f32 %v1374_v45, %v438_v60 }
 0x123   : > { %v447_v58 = vmul.f32 %v1374_v45, %v436_v53  ;;  %v398_v63 = vmul.f32 0.5, %v397_v56 }
 0x124   : > { %v379_v59 = vsub.f32 1.5, %v378_v55 }
 0x125   : > { %v458_v28 = vadd.f32 %v1382_v57, %v447_v58  ;;  %v1050_v61 = vpop.eup %1049  ;;  %v399_v7 = vsub.f32 1.5, %v398_v63 }
 0x126   : > { %v380_v62 = vmul.f32 %v1046_v42, %v379_v59  ;;  %v406_v1 = vmul.f32 %v1050_v61, %v352_v44  ;;  %vm412_vm14 = vweird.f32 %v1050_v61 }
 0x127   : > { %v465_v3 = vpack.c.bf16 %v458_v28, %v457_v0  ;;  %v400_v12 = vmul.f32 %v1048_v46, %v399_v7  ;;  %vm413_vm1 = vmor %vm411_vm13, %vm412_vm14 }
 0x128   : > { %v384_v2 = vsel %vm383_vm12, %v1046_v42, %v380_v62  ;;  %v407_v5 = vmul.f32 %v1050_v61, %v406_v1 }
 0x129   : > { %v437_v4 = vmul.f32 %v384_v2, %v1194_v33  ;;  %645 = vmatmul.bf16.vlgmr.msra.gmra.mxu0 %v465_v3  ;;  %674 = vmatmul.bf16.vlgmr.msra.gmra.mxu1 %v465_v3  ;;  %v460_v33 = vadd.f32 %v1382_v57, %v449_v6  ;;  %v404_v17 = vsel %vm403_vm2, %v1048_v46, %v400_v12 }
 0x12a   : > { %v408_v25 = vmul.f32 0.5, %v407_v5  ;;  %703 = vmatmul.bf16.vlgmr.msra.gmra.mxu2 %v465_v3  ;;  %v439_v20 = vmul.f32 %v404_v17, %v1192_v32 }
 0x12b   : > { %v448_v9 = vmul.f32 %v1374_v45, %v437_v4 }
 0x12c   : > { %v409_v10 = vsub.f32 1.5, %v408_v25  ;;  %v450_v30 = vmul.f32 %v1374_v45, %v439_v20 }
 0x12d   : > { %v459_v11 = vadd.f32 %v1382_v57, %v448_v9 }
 0x12e   : > { %v410_v14 = vmul.f32 %v1050_v61, %v409_v10  ;;  %v461_v23 = vadd.f32 %v1382_v57, %v450_v30 }
 0x12f   : > { %v466_v15 = vpack.c.bf16 %v460_v33, %v459_v11 }
 0x130   : > { %v414_v16 = vsel %vm413_vm1, %v1050_v61, %v410_v14 }
 0x131   : > { %650 = vmatmul.bf16.vlgmr.msra.gmra.mxu3 %v466_v15  ;;  %v440_v19 = vmul.f32 %v414_v16, %v1207_v41  ;;  %v353_v41 = vadd.f32 1e-05, %v345_v27 }
 0x133   : > { %v451_v21 = vmul.f32 %v1374_v45, %v440_v19  ;;  %1051 = vrsqrt.f32 %v353_v41  ;;  %vm421_vm3 = vweird.f32 %v353_v41 }
 0x135   : > { %v462_v22 = vadd.f32 %v1382_v57, %v451_v21 }
 0x137   : > { %v467_v24 = vpack.c.bf16 %v462_v22, %v461_v23 }
 0x139   : > { %679 = vmatmul.bf16.gmra.mxu1 %v466_v15  ;;  %v1052_v32 = vpop.eup %1051 }
 0x13a   : > { %708 = vmatmul.bf16.gmra.mxu2 %v466_v15  ;;  %v416_v29 = vmul.f32 %v1052_v32, %v353_v41  ;;  %vm422_vm4 = vweird.f32 %v1052_v32 }
 0x13b   : > { %vm423_vm5 = vmor %vm421_vm3, %vm422_vm4 }
 0x13c   : > { %v417_v31 = vmul.f32 %v1052_v32, %v416_v29 }
 0x13e   : > { %v418_v38 = vmul.f32 0.5, %v417_v31 }
 0x140   : > { %v419_v39 = vsub.f32 1.5, %v418_v38 }
 0x141   : > { %655 = vmatmul.bf16.gmra.mxu3 %v467_v24 }
 0x142   : > { %v420_v42 = vmul.f32 %v1052_v32, %v419_v39 }
 0x144   : > { %v424_v46 = vsel %vm423_vm5, %v1052_v32, %v420_v42 }
 0x145   : > { %v441_v49 = vmul.f32 %v424_v46, %v1198_v36  ;;  %v501_v36 = vld [vmem:[%s1482_s4] sm:$0x7] }
 0x146   : > { %v1411_v56 = vperm.slane %v501_v36, 0  ;;  %v1413_v58 = vperm.slane %v501_v36, 1  ;;  %v1423_v28 = vperm.slane %v501_v36, 2 }
 0x147   : > { %v452_v52 = vmul.f32 %v1374_v45, %v441_v49 }
 0x149   : > { %684 = vmatmul.bf16.gmra.mxu1 %v467_v24  ;;  %v463_v18 = vadd.f32 %v1382_v57, %v452_v52 }
 0x14a   : > { %713 = vmatmul.bf16.gmra.mxu2 %v467_v24 }
 0x184   : > { %v338_v34 = vpop.xlane.xlu0 %337 }
 0x185   : > { %v346_v35 = vmul.f32 %v338_v34, %v1170_v13 }
 0x187   : > { %v354_v37 = vadd.f32 1e-05, %v346_v35 }
 0x189   : > { %1053 = vrsqrt.f32 %v354_v37  ;;  %vm431_vm7 = vweird.f32 %v354_v37 }
 0x18f   : > { %v1054_v40 = vpop.eup %1053 }
 0x190   : > { %v426_v43 = vmul.f32 %v1054_v40, %v354_v37  ;;  %vm432_vm6 = vweird.f32 %v1054_v40 }
 0x191   : > { %vm433_vm8 = vmor %vm431_vm7, %vm432_vm6 }
 0x192   : > { %v427_v44 = vmul.f32 %v1054_v40, %v426_v43 }
 0x194   : > { %v428_v47 = vmul.f32 0.5, %v427_v44 }
 0x196   : > { %v429_v48 = vsub.f32 1.5, %v428_v47 }
 0x198   : > { %v430_v50 = vmul.f32 %v1054_v40, %v429_v48 }
 0x19a   : > { %v434_v13 = vsel %vm433_vm8, %v1054_v40, %v430_v50 }
 0x19b   : > { %v442_v51 = vmul.f32 %v434_v13, %v1360_v8 }
 0x19d   : > { %v453_v53 = vmul.f32 %v1374_v45, %v442_v51 }
 0x19f   : > { %v464_v54 = vadd.f32 %v1382_v57, %v453_v53 }
 0x1a1   : > { %v468_v55 = vpack.c.bf16 %v464_v54, %v463_v18 }
 0x1a3   : > { %660 = vmatmul.bf16.gmra.mxu3 %v468_v55  ;;  %689 = vmatmul.bf16.gmra.mxu1 %v468_v55 }
 0x1a4   : > { %718 = vmatmul.bf16.gmra.mxu2 %v468_v55 }
 0x1a6   : > { %v646_v8 = vpop.f32.mrf.mxu0  ;;  %v675_v59 = vpop.f32.mrf.mxu1 }
 0x1a7   : > { %v647_v45 = vadd.f32 %v646_v8, %v1411_v56  ;;  %v676_v60 = vadd.f32 %v675_v59, %v1413_v58 }
 0x1a9   : > { %v724_v57 = vpack.c.bf16 %v676_v60, %v647_v45 }
 0x1ab   : > { %740 = vst [vmem:[%s1421_s25] sm:$0xff] %v724_v57 }
 0x1ad   : > { %v704_v61 = vpop.f32.mrf.mxu2 }
 0x1ae   : > { %v705_v62 = vadd.f32 %v704_v61, %v1423_v28  ;;  %v648_v63 = vpop.f32.mrf.mxu0  ;;  %v677_v0 = vpop.f32.mrf.mxu1 }
 0x1af   : > { %v649_v1 = vadd.f32 %v648_v63, %v1411_v56  ;;  %v678_v2 = vadd.f32 %v677_v0, %v1413_v58 }
 0x1b0   : > { %v725_v3 = vpack.c.bf16 %v705_v62, %v705_v62 }
 0x1b1   : > { %v726_v4 = vpack.c.bf16 %v678_v2, %v649_v1 }
 0x1b2   : > { %741 = vst [vmem:[%s1421_s25 + $0x8] sm:$0xf] %v725_v3 }
 0x1b3   : > { %742 = vst [vmem:[%s1421_s25 + $0xc] sm:$0xff] %v726_v4 }
 0x1b4   : > { %v651_v5 = vpop.f32.mrf.mxu3 }
 0x1b5   : > { %v706_v6 = vpop.f32.mrf.mxu2  ;;  %v652_v9 = vadd.f32 %v651_v5, %v1411_v56 }
 0x1b6   : > { %v707_v7 = vadd.f32 %v706_v6, %v1423_v28  ;;  %v680_v25 = vpop.f32.mrf.mxu1 }
 0x1b7   : > { %v681_v10 = vadd.f32 %v680_v25, %v1413_v58 }
 0x1b8   : > { %v727_v11 = vpack.c.bf16 %v707_v7, %v707_v7 }
 0x1b9   : > { %v728_v33 = vpack.c.bf16 %v681_v10, %v652_v9 }
 0x1ba   : > { %743 = vst [vmem:[%s1421_s25 + $0x14] sm:$0xf] %v727_v11 }
 0x1bb   : > { %744 = vst [vmem:[%s1421_s25 + $0x18] sm:$0xff] %v728_v33 }
 0x1bc   : > { %v653_v12 = vpop.f32.mrf.mxu3 }
 0x1bd   : > { %v709_v14 = vpop.f32.mrf.mxu2  ;;  %v654_v17 = vadd.f32 %v653_v12, %v1411_v56 }
 0x1be   : > { %v710_v15 = vadd.f32 %v709_v14, %v1423_v28  ;;  %v682_v16 = vpop.f32.mrf.mxu1 }
 0x1bf   : > { %v683_v19 = vadd.f32 %v682_v16, %v1413_v58 }
 0x1c0   : > { %v729_v20 = vpack.c.bf16 %v710_v15, %v710_v15 }
 0x1c1   : > { %v730_v21 = vpack.c.bf16 %v683_v19, %v654_v17 }
 0x1c2   : > { %745 = vst [vmem:[%s1421_s25 + $0x20] sm:$0xf] %v729_v20 }
 0x1c3   : > { %746 = vst [vmem:[%s1421_s25 + $0x24] sm:$0xff] %v730_v21 }
 0x1c4   : > { %v656_v30 = vpop.f32.mrf.mxu3 }
 0x1c5   : > { %v711_v22 = vpop.f32.mrf.mxu2  ;;  %v657_v26 = vadd.f32 %v656_v30, %v1411_v56 }
 0x1c6   : > { %v712_v23 = vadd.f32 %v711_v22, %v1423_v28  ;;  %v685_v24 = vpop.f32.mrf.mxu1 }
 0x1c7   : > { %v686_v27 = vadd.f32 %v685_v24, %v1413_v58 }
 0x1c8   : > { %v731_v41 = vpack.c.bf16 %v712_v23, %v712_v23 }
 0x1c9   : > { %v732_v32 = vpack.c.bf16 %v686_v27, %v657_v26 }
 0x1ca   : > { %747 = vst [vmem:[%s1421_s25 + $0x2c] sm:$0xf] %v731_v41 }
 0x1cb   : > { %748 = vst [vmem:[%s1421_s25 + $0x30] sm:$0xff] %v732_v32 }
 0x1cc   : > { %v658_v29 = vpop.f32.mrf.mxu3 }
 0x1cd   : > { %v714_v31 = vpop.f32.mrf.mxu2  ;;  %v659_v37 = vadd.f32 %v658_v29, %v1411_v56 }
 0x1ce   : > { %v715_v34 = vadd.f32 %v714_v31, %v1423_v28  ;;  %v687_v35 = vpop.f32.mrf.mxu1 }
 0x1cf   : > { %v688_v38 = vadd.f32 %v687_v35, %v1413_v58 }
 0x1d0   : > { %v733_v39 = vpack.c.bf16 %v715_v34, %v715_v34 }
 0x1d1   : > { %v734_v40 = vpack.c.bf16 %v688_v38, %v659_v37 }
 0x1d2   : > { %749 = vst [vmem:[%s1421_s25 + $0x38] sm:$0xf] %v733_v39 }
 0x1d3   : > { %750 = vst [vmem:[%s1421_s25 + $0x3c] sm:$0xff] %v734_v40 }
 0x1d5   : > { %v716_v42 = vpop.f32.mrf.mxu2 }
 0x1d6   : > { %v717_v43 = vadd.f32 %v716_v42, %v1423_v28 }
 0x1d8   : > { %v735_v44 = vpack.c.bf16 %v717_v43, %v717_v43 }
 0x1da   : > { %751 = vst [vmem:[%s1421_s25 + $0x44] sm:$0xf] %v735_v44 }
 0x220   : > { %v690_v46 = vpop.f32.mrf.mxu1 }
 0x221   : > { %v691_v48 = vadd.f32 %v690_v46, %v1413_v58 }
 0x226   : > { %v661_v47 = vpop.f32.mrf.mxu3 }
 0x227   : > { %v662_v49 = vadd.f32 %v661_v47, %v1411_v56  ;;  %v719_v50 = vpop.f32.mrf.mxu2 }
 0x228   : > { %v720_v13 = vadd.f32 %v719_v50, %v1423_v28  ;;  %v692_v53 = vpop.f32.mrf.mxu1 }
 0x229   : > { %v736_v51 = vpack.c.bf16 %v691_v48, %v662_v49  ;;  %v693_v54 = vadd.f32 %v692_v53, %v1413_v58 }
 0x22a   : > { %v737_v52 = vpack.c.bf16 %v720_v13, %v720_v13 }
 0x22b   : > { %752 = vst [vmem:[%s1421_s25 + $0x48] sm:$0xff] %v736_v51 }
 0x22c   : > { %753 = vst [vmem:[%s1421_s25 + $0x50] sm:$0xf] %v737_v52 }
 0x22e   : > { %v663_v18 = vpop.f32.mrf.mxu3 }
 0x22f   : > { %v664_v55 = vadd.f32 %v663_v18, %v1411_v56  ;;  %v721_v36 = vpop.f32.mrf.mxu2 }
 0x230   : > { %v722_v8 = vadd.f32 %v721_v36, %v1423_v28 }
 0x231   : > { %v738_v59 = vpack.c.bf16 %v693_v54, %v664_v55 }
 0x232   : > { %v739_v45 = vpack.c.bf16 %v722_v8, %v722_v8 }
 0x233   : > { %754 = vst [vmem:[%s1421_s25 + $0x54] sm:$0xff] %v738_v59 }
 0x234   : > { %755 = vst [vmem:[%s1421_s25 + $0x5c] sm:$0xf] %v739_v45 }
 0x235 PF: > { %s15_s22 = sadd.s32 1, %s1093_s22   ;;  %s1484_s18 = smov %s1085_s20 }
 0x236   : > { %p12_p7 = scmp.ge.s32.totalorder %s15_s22, 6   ;;  %s1485_s19 = smov %s1089_s21 }
 0x237   : > { %s1486_s20 = smov %s1489_s23  ;;  %s1487_s21 = smov %s1493_s24 }
 0x238   :  { %14 = sbr.rel (!%p12_p7) target bundleno = 3 (0x3), region = 70 }

// kernel: gpt_forward.9
= control target key start
LH: loop header
LB: loop body
LE: loop exit
PB: predicated region body
PF: predicated region fallthrough
CT: control target
= control target key end

     0   :  { %s470_s15 = smov 0   ;;  %s503_s0 = inlined_call_operand.vmem [shape: f32[2,128], index: 0, kind: input, shape index: {}]   ;;  %s504_s1 = inlined_call_operand.vmem [shape: f32[1,128], index: 1, kind: input, shape index: {}]   ;;  %s505_s2 = inlined_call_operand.vmem [shape: f32[1,128], index: 2, kind: input, shape index: {}]   ;;  %s506_s3 = inlined_call_operand.vmem [shape: bf16[512,128], index: 3, kind: input, shape index: {}]   ;;  %s507_s4 = inlined_call_operand.vmem [shape: f32[2,512], index: 4, kind: output, shape index: {}]  }
   0x1 LB: > { %s476_s16 = sadd.s32 4294967295, %s442_s15   ;;  %p375_p0 = scmp.ge.s32.totalorder %s442_s15, 1  ;;  %s442_s15 = sphi %s470_s15, %s14_s15  }
   0x2   : > { %p163_p1 = scmp.lt.s32.totalorder %s442_s15, 5 }
   0x4   : > { %p164_p2 = pnand %p375_p0, %p163_p1 }
   0x5   : > { %s376_s19 = sshll.u32 (!%p164_p2), %s476_s16, 4  ;;  %p194_p4 = scmp.lt.s32.totalorder (!%p164_p2), %s476_s16, 3 }
   0x6   : > { %167 = sbr.rel (%p164_p2) target bundleno = 416 (0x1a0), region = 36  ;;  %p189_p3 = scmp.lt.s32.totalorder (!%p164_p2), %s376_s19, 63 }
   0xb   : > { %v198_v0 = vld [vmem:[%s503_s0] sm:$0x3]  ;;  %vm201_vm0 = vcmask 1041408   ;;  %s509_s19 = smov (!%p189_p3, %s376_s19), 63  ;;  %v444_v2 = vmov 128.0   ;;  %s511_s16 = smov (!%p194_p4, %s476_s16), 3 }
   0xc   : > { %v202_v1 = vsel %vm201_vm0, %v198_v0, 0.0  ;;  %s377_s20 = sshll.u32 %s509_s19, 2  ;;  %432 = vrcp.f32 %v444_v2  ;;  %v430_v31 = vld [vmem:[%s504_s1] ss:$0 sm:$0xff]  ;;  %s378_s28 = sshll.u32 %s511_s16, 1 }
   0xd   : > { %203 = vadd.xlane.f32.xlu0 %v202_v1  ;;  %s192_s23 = scalar_lea.vmem %s506_s3, %s377_s20  ;;  %v431_v34 = vld [vmem:[%s505_s2] ss:$0 sm:$0xff]  ;;  %s197_s5 = scalar_lea.vmem %s507_s4, %s378_s28 }
   0xe   : > { %v420_v3 = vld [vmem:[%s192_s23 + $0x38] sm:$0xff]  ;;  %v419_v6 = vld [vmem:[%s192_s23 + $0x30] sm:$0xff]  ;;  %v418_v9 = vld [vmem:[%s192_s23 + $0x28] sm:$0xff] }
   0xf   : > { %304 = vmatpush.bf16.xpose.msra.mxu0 %v420_v3  ;;  %v417_v12 = vld [vmem:[%s192_s23 + $0x20] sm:$0xff]  ;;  %v416_v18 = vld [vmem:[%s192_s23 + $0x18] sm:$0xff]  ;;  %v415_v19 = vld [vmem:[%s192_s23 + $0x10] sm:$0xff] }
  0x10   : > { %v414_v20 = vld [vmem:[%s192_s23 + $0x8] sm:$0xff]  ;;  %v413_v21 = vld [vmem:[%s192_s23] sm:$0xff] }
  0x12   : > { %v433_v4 = vpop.eup %432 }
  0x13   : > { %v206_v5 = vmul.f32 128.0, %v433_v4  ;;  %vm210_vm1 = vweird.f32 %v433_v4 }
  0x15   : > { %v207_v7 = vsub.f32 1.0, %v206_v5 }
  0x17   : > { %305 = vmatpush.bf16.xpose.msra.mxu0 %v419_v6  ;;  %v208_v8 = vmul.f32 %v433_v4, %v207_v7 }
  0x19   : > { %v209_v10 = vadd.f32 %v433_v4, %v208_v8 }
  0x1b   : > { %v211_v11 = vsel %vm210_vm1, %v433_v4, %v209_v10 }
  0x1f   : > { %306 = vmatpush.bf16.xpose.msra.mxu0 %v418_v9 }
  0x27   : > { %307 = vmatpush.bf16.xpose.msra.mxu0 %v417_v12 }
  0x2f   : > { %308 = vmatpush.bf16.xpose.msra.mxu0 %v416_v18 }
  0x37   : > { %309 = vmatpush.bf16.xpose.msra.mxu0 %v415_v19 }
  0x3f   : > { %310 = vmatpush.bf16.xpose.msra.mxu0 %v414_v20 }
  0x47   : > { %311 = vmatpush.bf16.xpose.msra.mxu0 %v413_v21 }
  0x80   : > { %v204_v13 = vpop.xlane.xlu0 %203 }
  0x81   : > { %v212_v14 = vmul.f32 %v211_v11, %v204_v13 }
  0x83   : > { %v213_v15 = vsub.f32 %v198_v0, %v212_v14 }
  0x85   : > { %v214_v16 = vmul.f32 %v213_v15, %v213_v15 }
  0x87   : > { %v215_v17 = vsel %vm201_vm0, %v214_v16, 0.0 }
  0x88   : > { %216 = vadd.xlane.f32.xlu0 %v215_v17 }
  0xfb   : > { %v217_v22 = vpop.xlane.xlu0 %216 }
  0xfc   : > { %v218_v23 = vmul.f32 %v217_v22, %v211_v11 }
  0xfe   : > { %v219_v24 = vadd.f32 1e-05, %v218_v23 }
 0x100   : > { %434 = vrsqrt.f32 %v219_v24  ;;  %vm226_vm3 = vweird.f32 %v219_v24 }
 0x106   : > { %v435_v25 = vpop.eup %434 }
 0x107   : > { %v221_v26 = vmul.f32 %v435_v25, %v219_v24  ;;  %vm227_vm2 = vweird.f32 %v435_v25 }
 0x108   : > { %vm228_vm4 = vmor %vm226_vm3, %vm227_vm2 }
 0x109   : > { %v222_v27 = vmul.f32 %v435_v25, %v221_v26 }
 0x10b   : > { %v223_v28 = vmul.f32 0.5, %v222_v27 }
 0x10d   : > { %v224_v29 = vsub.f32 1.5, %v223_v28 }
 0x10f   : > { %v225_v30 = vmul.f32 %v435_v25, %v224_v29 }
 0x111   : > { %v229_v32 = vsel %vm228_vm4, %v435_v25, %v225_v30 }
 0x112   : > { %v230_v33 = vmul.f32 %v229_v32, %v213_v15 }
 0x114   : > { %v234_v35 = vmul.f32 %v430_v31, %v230_v33 }
 0x116   : > { %v238_v36 = vadd.f32 %v431_v34, %v234_v35 }
 0x118   : > { %v239_v37 = vpack.c.bf16 %v238_v36, %v238_v36 }
 0x11a   : > { %312 = vmatmul.bf16.vlgmr.msra.gmra.mxu0 %v239_v37 }
 0x197   : > { %v313_v38 = vpop.f32.mrf.mxu0 }
 0x198   : > { %317 = vst [vmem:[%s197_s5] sm:$0x3] %v313_v38 }
 0x19f   : > { %v315_v39 = vpop.f32.mrf.mxu0 }
 0x1a0 PF: > { %s14_s15 = sadd.s32 1, %s442_s15  }
 0x1a1   : > { %p11_p5 = scmp.ge.s32.totalorder %s14_s15, 6  }
 0x1a3   :  { %13 = sbr.rel (!%p11_p5) target bundleno = 1 (0x1), region = 66 }

// kernel: gpt_forward.6
= control target key start
LH: loop header
LB: loop body
LE: loop exit
PB: predicated region body
PF: predicated region fallthrough
CT: control target
= control target key end

     0   :  { %s14747_s0 = inlined_call_operand.vmem [shape: f32[2,128,128], index: 0, kind: input, shape index: {}, may-alias: {0,12}]   ;;  %s14748_s1 = inlined_call_operand.vmem [shape: bf16[2,128,384], index: 1, kind: input, shape index: {}, may-alias: {1,2,3}]   ;;  %s14749_s2 = inlined_call_operand.vmem [shape: bf16[2,128,384], index: 2, kind: input, shape index: {}, may-alias: {1,2,3}]   ;;  %s14750_s3 = inlined_call_operand.vmem [shape: bf16[2,128,384], index: 3, kind: input, shape index: {}, may-alias: {1,2,3}]   ;;  %s14751_s4 = inlined_call_operand.vmem [shape: bf16[128,128], index: 4, kind: input, shape index: {}]   ;;  %s14752_s5 = inlined_call_operand.vmem [shape: f32[1,128], index: 5, kind: input, shape index: {}]   ;;  %s14753_s6 = inlined_call_operand.vmem [shape: f32[1,128], index: 6, kind: input, shape index: {}]   ;;  %s14754_s7 = inlined_call_operand.vmem [shape: f32[1,128], index: 7, kind: input, shape index: {}]   ;;  %s14755_s8 = inlined_call_operand.vmem [shape: bf16[128,512], index: 8, kind: input, shape index: {}]   ;;  %s14756_s9 = inlined_call_operand.vmem [shape: f32[1,512], index: 9, kind: input, shape index: {}]   ;;  %s14757_s10 = inlined_call_operand.vmem [shape: bf16[512,128], index: 10, kind: input, shape index: {}]   ;;  %s14758_s11 = inlined_call_operand.vmem [shape: f32[1,128], index: 11, kind: input, shape index: {}]   ;;  %s14759_s12 = inlined_call_operand.vmem [shape: f32[2,128,128], index: 12, kind: output, shape index: {0}, may-alias: {0,12}]   ;;  %s14760_s13 = inlined_call_operand.hbm [shape: f32[2,128,128], index: 13, kind: output, shape index: {1}]   ;;  %s14761_s14 = inlined_call_operand.hbm [shape: f32[2,128,128], index: 14, kind: output, shape index: {2}]  }
   0x1   :  { %14832 = sst [smem:[#allocation43_spill]] %s14747_s0 }
   0x2   :  { %14833 = sst [smem:[#allocation44_spill]] %s14748_s1 }
   0x3   :  { %14834 = sst [smem:[#allocation45_spill]] %s14749_s2 }
   0x4   :  { %14835 = sst [smem:[#allocation46_spill]] %s14750_s3 }
   0x5   :  { %14836 = sst [smem:[#allocation47_spill]] %s14754_s7 }
   0x6   :  { %14837 = sst [smem:[#allocation48_spill]] %s14756_s9 }
   0x7   :  { %14838 = sst [smem:[#allocation49_spill]] %s14757_s10 }
   0x8   :  { %14839 = sst [smem:[#allocation50_spill]] %s14758_s11 }
   0x9   :  { %14840 = sst [smem:[#allocation51_spill]] %s14759_s12 }
   0xa   :  { %14841 = sst [smem:[#allocation52_spill]] %s14760_s13 }
   0xb   :  { %14842 = sst [smem:[#allocation53_spill]] %s14761_s14 }
   0xc   :  { %20 = vsyncpa [#allocation6], 0 }
   0xd   :  { %22 = vsyncpa [#allocation6 + $0x1], 0 }
   0xe   :  { %23 = vsyncpa [#allocation8], 0 }
   0xf   :  { %25 = vsyncpa [#allocation8 + $0x1], 0  ;;  %s9488_s29 = smov 0   ;;  %s9490_s30 = smov 0  }
  0x10   :  { %s9492_s15 = smov 0   ;;  %s9494_s16 = smov 0  }
  0x11   :  { %s9496_s17 = smov 0   ;;  %s9498_s18 = smov 0  }
  0x12   :  { %s9500_s19 = smov 0   ;;  %s9502_s20 = smov 0  }
  0x13   :  { %s9504_s21 = smov 0   ;;  %s9506_s22 = smov 0  }
  0x14 LB: > { %s8508_s23 = sadd.s32 4294967295, %s9405_s22   ;;  %s8509_s24 = sadd.s32 4294967294, %s9405_s22   ;;  %s9405_s22 = sphi %s9506_s22, %s31_s22   ;;  %s9401_s21 = sphi %s9504_s21, %s15190_s21   ;;  %s9397_s20 = sphi %s9502_s20, %s15189_s20   ;;  %s9393_s19 = sphi %s9500_s19, %s15188_s19   ;;  %s9389_s18 = sphi %s9498_s18, %s15187_s18   ;;  %s9385_s17 = sphi %s9496_s17, %s15186_s17   ;;  %s9381_s16 = sphi %s9494_s16, %s15185_s16   ;;  %s9377_s15 = sphi %s9492_s15, %s15184_s15   ;;  %s9373_s30 = sphi %s9490_s30, %s15183_s30   ;;  %s9369_s29 = sphi %s9488_s29, %s15182_s29  }
  0x15   : > { %s40_s25 = sadd.s32 1, %s9397_s20  ;;  %s43_s26 = sadd.s32 1, %s9401_s21 }
  0x16   : > { %p41_p0 = scmp.ge.s32.totalorder %s40_s25, 2  ;;  %s80_s27 = sadd.s32 1, %s9385_s17 }
  0x17   : > { %p87_p1 = scmp.ne.s32.totalorder %s9385_s17, %s9381_s16  ;;  %p88_p2 = scmp.eq.s32.totalorder %s9405_s22, 0 }
  0x18   : > { %s15192_s25 = smov (%p41_p0, %s40_s25), 0  ;;  %s15194_s26 = smov (!%p41_p0, %s43_s26), %s9401_s21 }
  0x19   : > { %14843 = sst [smem:[#allocation11_spill]] %s15192_s25  ;;  %s76_s28 = ssub.s32 %s9397_s20, %s15192_s25 }
  0x1a   : > { %p9551_p3 = por %p88_p2, %p87_p1  ;;  %p45_p4 = scmp.ge.s32.totalorder %s15194_s26, 2 }
  0x1b   : > { %s106_s13 = sadd.s32 1, %s9377_s15  ;;  %p113_p5 = scmp.ne.s32.totalorder %s9377_s15, %s9373_s30 }
  0x1c   : > { %p367_p6 = scmp.eq.s32.totalorder %s8508_s23, 3  ;;  %s15196_s26 = smov (%p45_p4, %s15194_s26), 0 }
  0x1d   : > { %14845 = sst [smem:[#allocation12_spill]] %s15196_s26  ;;  %p9560_p7 = por %p113_p5, %p88_p2 }
  0x1e   : > { %p9564_p8 = por %p367_p6, %p87_p1  ;;  %s75_s25 = ssub.s32 %s9401_s21, %s15196_s26 }
  0x1f   : > { %p372_p9 = scmp.ne.s32.totalorder %s9381_s16, %s9369_s29  ;;  %s77_s10 = sor.u32 %s76_s28, %s75_s25 }
  0x20   : > { %p104_p10 = scmp.eq.s32.totalorder %s75_s25, 0  ;;  %p78_p11 = scmp.eq.s32.totalorder %s77_s10, 0 }
  0x21   : > { %p373_p12 = scmp.eq.s32.totalorder %s8509_s24, 3  ;;  %p8511_p0 = scmp.ge.s32.totalorder %s9405_s22, 4 }
  0x22   : > { %s9573_s9 = scalar_select %p104_p10, %s9377_s15, %s106_s13  }
  0x23   : > { %s9576_s23 = scalar_select %p78_p11, %s9385_s17, %s80_s27  }
  0x24   : > { %14848 = sst [smem:[#allocation13_spill]] %s9573_s9  ;;  %p9578_p13 = por %p373_p12, %p372_p9 }
  0x25   : > { %14849 = sst [smem:[#allocation14_spill]] %s9576_s23  ;;  %441 = sbr.rel (%p8511_p0) target bundleno = 112 (0x70), region = 48 }
  0x26   : > { %s14850_s7 = scalar_select %p9578_p13, 1, 0 }
  0x28   : > { %14851 = sst [smem:[#allocation15_spill]] %s14850_s7 }
  0x2a   : > { %457 = sbr.rel (!%p9551_p3) target bundleno = 60 (0x3c), region = 56  ;;  %s459_s25 = sand.u32 (%p9551_p3), 1, %s9385_s17  }
  0x2b   : > { %s8983_s10 = smul.u32 (%p9551_p3), 24, %s9397_s20  ;;  %s8512_s24 = sshll.u32 (%p9551_p3), %s459_s25, 5 }
  0x2c   : > { %s8984_s13 = smul.u32 (%p9551_p3), 48, %s9401_s21  ;;  %s14852_s1 = sld [smem:[#allocation44_spill]] (%p9551_p3) }
  0x2d   : > { %s461_s7 = scalar_lea.vmem (%p9551_p3), [#allocation2], %s8512_s24 }
  0x2e   : > { %s465_s28 = sadd.s32 (%p9551_p3), %s8984_s13, %s8983_s10 }
  0x2f   : > { %s8515_s27 = sshll.u32 %s465_s28, 2 }
  0x32   : > { %s467_s9 = scalar_lea.vmem %s14852_s1, %s8515_s27 }
  0x33   : > { %v484_v0 = vld [vmem:[%s467_s9] sm:$0xf]  ;;  %v486_v1 = vld [vmem:[%s467_s9 + $0xc] sm:$0xf]  ;;  %v488_v2 = vld [vmem:[%s467_s9 + $0x18] sm:$0xf] }
  0x34   : > { %485 = vst [vmem:[%s461_s7] sm:$0xf] %v484_v0  ;;  %v490_v3 = vld [vmem:[%s467_s9 + $0x24] sm:$0xf]  ;;  %v492_v4 = vld [vmem:[%s467_s9 + $0x30] sm:$0xf] }
  0x35   : > { %487 = vst [vmem:[%s461_s7 + $0x4] sm:$0xf] %v486_v1  ;;  %v494_v5 = vld [vmem:[%s467_s9 + $0x3c] sm:$0xf]  ;;  %v496_v6 = vld [vmem:[%s467_s9 + $0x48] sm:$0xf] }
  0x36   : > { %489 = vst [vmem:[%s461_s7 + $0x8] sm:$0xf] %v488_v2  ;;  %v498_v7 = vld [vmem:[%s467_s9 + $0x54] sm:$0xf] }
  0x37   : > { %491 = vst [vmem:[%s461_s7 + $0xc] sm:$0xf] %v490_v3 }
  0x38   : > { %493 = vst [vmem:[%s461_s7 + $0x10] sm:$0xf] %v492_v4 }
  0x39   : > { %495 = vst [vmem:[%s461_s7 + $0x14] sm:$0xf] %v494_v5 }
  0x3a   : > { %497 = vst [vmem:[%s461_s7 + $0x18] sm:$0xf] %v496_v6 }
  0x3b   : > { %499 = vst [vmem:[%s461_s7 + $0x1c] sm:$0xf] %v498_v7 }
  0x3c PF: > { %539 = sbr.rel (!%p9560_p7) target bundleno = 86 (0x56), region = 97  ;;  %s541_s14 = sand.u32 (%p9560_p7), 1, %s9377_s15  }
  0x3d   : > { %s8517_s26 = smul.u32 (%p9560_p7), 192, %s9401_s21  ;;  %s8516_s23 = sshll.u32 (%p9560_p7), %s541_s14, 6 }
  0x3e   : > { %s14853_s2 = sld [smem:[#allocation45_spill]] (%p9560_p7)  ;;  %s543_s7 = scalar_lea.vmem (%p9560_p7), [#allocation3], %s8516_s23 }
  0x44   : > { %s9598_s24 = scalar_lea.vmem %s14853_s2, %s8517_s26 }
  0x45   : > { %v8518_v8 = vld [vmem:[%s9598_s24 + $0x4] sm:$0xf]  ;;  %v8519_v9 = vld [vmem:[%s9598_s24 + $0x10] sm:$0xf]  ;;  %v8520_v10 = vld [vmem:[%s9598_s24 + $0x1c] sm:$0xf] }
  0x46   : > { %565 = vst [vmem:[%s543_s7] sm:$0xf] %v8518_v8  ;;  %v8521_v11 = vld [vmem:[%s9598_s24 + $0x28] sm:$0xf]  ;;  %v8522_v12 = vld [vmem:[%s9598_s24 + $0x34] sm:$0xf] }
  0x47   : > { %567 = vst [vmem:[%s543_s7 + $0x4] sm:$0xf] %v8519_v9  ;;  %v8523_v13 = vld [vmem:[%s9598_s24 + $0x40] sm:$0xf]  ;;  %v8524_v14 = vld [vmem:[%s9598_s24 + $0x4c] sm:$0xf] }
  0x48   : > { %569 = vst [vmem:[%s543_s7 + $0x8] sm:$0xf] %v8520_v10  ;;  %v8525_v15 = vld [vmem:[%s9598_s24 + $0x58] sm:$0xf]  ;;  %v8526_v16 = vld [vmem:[%s9598_s24 + $0x64] sm:$0xf] }
  0x49   : > { %571 = vst [vmem:[%s543_s7 + $0xc] sm:$0xf] %v8521_v11  ;;  %v8527_v17 = vld [vmem:[%s9598_s24 + $0x70] sm:$0xf]  ;;  %v8528_v18 = vld [vmem:[%s9598_s24 + $0x7c] sm:$0xf] }
  0x4a   : > { %573 = vst [vmem:[%s543_s7 + $0x10] sm:$0xf] %v8522_v12  ;;  %v8529_v19 = vld [vmem:[%s9598_s24 + $0x88] sm:$0xf]  ;;  %v8530_v20 = vld [vmem:[%s9598_s24 + $0x94] sm:$0xf] }
  0x4b   : > { %575 = vst [vmem:[%s543_s7 + $0x14] sm:$0xf] %v8523_v13  ;;  %v8531_v21 = vld [vmem:[%s9598_s24 + $0xa0] sm:$0xf]  ;;  %v8532_v22 = vld [vmem:[%s9598_s24 + $0xac] sm:$0xf] }
  0x4c   : > { %577 = vst [vmem:[%s543_s7 + $0x18] sm:$0xf] %v8524_v14  ;;  %v8533_v23 = vld [vmem:[%s9598_s24 + $0xb8] sm:$0xf] }
  0x4d   : > { %579 = vst [vmem:[%s543_s7 + $0x1c] sm:$0xf] %v8525_v15 }
  0x4e   : > { %581 = vst [vmem:[%s543_s7 + $0x20] sm:$0xf] %v8526_v16 }
  0x4f   : > { %583 = vst [vmem:[%s543_s7 + $0x24] sm:$0xf] %v8527_v17 }
  0x50   : > { %585 = vst [vmem:[%s543_s7 + $0x28] sm:$0xf] %v8528_v18 }
  0x51   : > { %587 = vst [vmem:[%s543_s7 + $0x2c] sm:$0xf] %v8529_v19 }
  0x52   : > { %589 = vst [vmem:[%s543_s7 + $0x30] sm:$0xf] %v8530_v20 }
  0x53   : > { %591 = vst [vmem:[%s543_s7 + $0x34] sm:$0xf] %v8531_v21 }
  0x54   : > { %593 = vst [vmem:[%s543_s7 + $0x38] sm:$0xf] %v8532_v22 }
  0x55   : > { %595 = vst [vmem:[%s543_s7 + $0x3c] sm:$0xf] %v8533_v23 }
  0x56 PF: > { %651 = sbr.rel (!%p9560_p7) target bundleno = 112 (0x70), region = 138  ;;  %s653_s9 = sand.u32 (%p9560_p7), 1, %s9377_s15  }
  0x57   : > { %s8535_s13 = smul.u32 (%p9560_p7), 192, %s9401_s21  ;;  %s8534_s28 = sshll.u32 (%p9560_p7), %s653_s9, 6 }
  0x58   : > { %s14854_s3 = sld [smem:[#allocation46_spill]] (%p9560_p7)  ;;  %s655_s12 = scalar_lea.vmem (%p9560_p7), [#allocation4], %s8534_s28 }
  0x5e   : > { %s9623_s26 = scalar_lea.vmem %s14854_s3, %s8535_s13 }
  0x5f   : > { %v8536_v24 = vld [vmem:[%s9623_s26 + $0x8] sm:$0xf]  ;;  %v8537_v25 = vld [vmem:[%s9623_s26 + $0x14] sm:$0xf]  ;;  %v8538_v26 = vld [vmem:[%s9623_s26 + $0x20] sm:$0xf] }
  0x60   : > { %677 = vst [vmem:[%s655_s12] sm:$0xf] %v8536_v24  ;;  %v8539_v27 = vld [vmem:[%s9623_s26 + $0x2c] sm:$0xf]  ;;  %v8540_v28 = vld [vmem:[%s9623_s26 + $0x38] sm:$0xf] }
  0x61   : > { %679 = vst [vmem:[%s655_s12 + $0x4] sm:$0xf] %v8537_v25  ;;  %v8541_v29 = vld [vmem:[%s9623_s26 + $0x44] sm:$0xf]  ;;  %v8542_v30 = vld [vmem:[%s9623_s26 + $0x50] sm:$0xf] }
  0x62   : > { %681 = vst [vmem:[%s655_s12 + $0x8] sm:$0xf] %v8538_v26  ;;  %v8543_v31 = vld [vmem:[%s9623_s26 + $0x5c] sm:$0xf]  ;;  %v8544_v32 = vld [vmem:[%s9623_s26 + $0x68] sm:$0xf] }
  0x63   : > { %683 = vst [vmem:[%s655_s12 + $0xc] sm:$0xf] %v8539_v27  ;;  %v8545_v33 = vld [vmem:[%s9623_s26 + $0x74] sm:$0xf]  ;;  %v8546_v34 = vld [vmem:[%s9623_s26 + $0x80] sm:$0xf] }
  0x64   : > { %685 = vst [vmem:[%s655_s12 + $0x10] sm:$0xf] %v8540_v28  ;;  %v8547_v35 = vld [vmem:[%s9623_s26 + $0x8c] sm:$0xf]  ;;  %v8548_v36 = vld [vmem:[%s9623_s26 + $0x98] sm:$0xf] }
  0x65   : > { %687 = vst [vmem:[%s655_s12 + $0x14] sm:$0xf] %v8541_v29  ;;  %v8549_v37 = vld [vmem:[%s9623_s26 + $0xa4] sm:$0xf]  ;;  %v8550_v38 = vld [vmem:[%s9623_s26 + $0xb0] sm:$0xf] }
  0x66   : > { %689 = vst [vmem:[%s655_s12 + $0x18] sm:$0xf] %v8542_v30  ;;  %v8551_v39 = vld [vmem:[%s9623_s26 + $0xbc] sm:$0xf] }
  0x67   : > { %691 = vst [vmem:[%s655_s12 + $0x1c] sm:$0xf] %v8543_v31 }
  0x68   : > { %693 = vst [vmem:[%s655_s12 + $0x20] sm:$0xf] %v8544_v32 }
  0x69   : > { %695 = vst [vmem:[%s655_s12 + $0x24] sm:$0xf] %v8545_v33 }
  0x6a   : > { %697 = vst [vmem:[%s655_s12 + $0x28] sm:$0xf] %v8546_v34 }
  0x6b   : > { %699 = vst [vmem:[%s655_s12 + $0x2c] sm:$0xf] %v8547_v35 }
  0x6c   : > { %701 = vst [vmem:[%s655_s12 + $0x30] sm:$0xf] %v8548_v36 }
  0x6d   : > { %703 = vst [vmem:[%s655_s12 + $0x34] sm:$0xf] %v8549_v37 }
  0x6e   : > { %705 = vst [vmem:[%s655_s12 + $0x38] sm:$0xf] %v8550_v38 }
  0x6f   : > { %707 = vst [vmem:[%s655_s12 + $0x3c] sm:$0xf] %v8551_v39 }
  0x70 PF: > { %p8552_p1 = scmp.ge.s32.totalorder %s9405_s22, 1  ;;  %p762_p2 = scmp.lt.s32.totalorder %s9405_s22, 5 }
  0x72   : > { %p763_p3 = pnand %p8552_p1, %p762_p2 }
  0x74   : > { %766 = sbr.rel (%p763_p3) target bundleno = 2295 (0x8f7), region = 179 }
  0x79   : > { %s776_s23 = sand.u32 1, %s9373_s30   ;;  %s9407_s24 = smov 64   ;;  %v9408_v63 = vmov 1983009808   ;;  %v9409_v12 = vmov 1934713408  }
  0x7a   : > { %s9644_s25 = sshll.u32 %s776_s23, 6  ;;  %s9704_s30 = sand.u32 1, %s9381_s16   ;;  %v1005_v0 = vunpack.c.l.s4 %v9408_v63  ;;  %v1012_v13 = vunpack.c.l.s4 %v9409_v12  ;;  %vm1009_vm0 = vcmask 1047556   ;;  %vm4448_vm1 = vcmask 523264  }
  0x7b   : > { %s9647_s10 = scalar_lea.vmem [#allocation3], %s9644_s25  ;;  %s8553_s7 = sshll.u32 %s9704_s30, 5 }
  0x7c   : > { %v9650_v40 = vld [vmem:[%s9647_s10 + $0x38] sm:$0xf]  ;;  %v9653_v41 = vld [vmem:[%s9647_s10 + $0x30] sm:$0xf]  ;;  %v909_v42 = vld [vmem:[%s9647_s10 + $0x28] sm:$0xf]  ;;  %v9764_v4 = vunpack.c.0.s8 %v1005_v0  ;;  %v9770_v20 = vunpack.c.0.s8 %v1012_v13 }
  0x7d   : > { %1672 = vrot.lane.b32.xlu0 %v9650_v40, %s9407_s24  ;;  %1668 = vrot.lane.b32.xlu1 %v9653_v41, %s9407_s24  ;;  %v9662_v43 = vld [vmem:[%s9647_s10 + $0x3c] sm:$0xf]  ;;  %v9665_v44 = vld [vmem:[%s9647_s10 + $0x34] sm:$0xf]  ;;  %s9725_s9 = scalar_lea.vmem [#allocation2], %s8553_s7  ;;  %v1739_v3 = vshrl.u32 %v909_v42, 16 }
  0x7e   : > { %1664 = vrot.lane.b32.xlu2 %v909_v42, %s9407_s24  ;;  %v910_v45 = vld [vmem:[%s9647_s10 + $0x2c] sm:$0xf]  ;;  %v9674_v46 = vld [vmem:[%s9647_s10 + $0x24] sm:$0xf]  ;;  %v9677_v47 = vld [vmem:[%s9647_s10 + $0x20] sm:$0xf] }
  0x7f   : > { %v9680_v48 = vld [vmem:[%s9647_s10 + $0x18] sm:$0xf]  ;;  %v9689_v49 = vld [vmem:[%s9647_s10 + $0x1c] sm:$0xf]  ;;  %v9692_v50 = vld [vmem:[%s9647_s10 + $0x10] sm:$0xf] }
  0x80   : > { %v9695_v51 = vld [vmem:[%s9647_s10 + $0x14] sm:$0xf]  ;;  %v9707_v52 = vld [vmem:[%s9647_s10 + $0xc] sm:$0xf]  ;;  %v9710_v53 = vld [vmem:[%s9647_s10 + $0x8] sm:$0xf] }
  0x81   : > { %v9714_v54 = vld [vmem:[%s9647_s10] sm:$0xf]  ;;  %v9723_v55 = vld [vmem:[%s9647_s10 + $0x4] sm:$0xf]  ;;  %v9740_v58 = vld [vmem:[%s9725_s9 + $0x8] sm:$0xf] }
  0x82   : > { %v9728_v56 = vld [vmem:[%s9725_s9] sm:$0xf]  ;;  %v9731_v57 = vld [vmem:[%s9725_s9 + $0x4] sm:$0xf]  ;;  %14857 = vst [vmem:[#allocation18_spill] sm:$0xff] %v9740_v58  ;;  %v1745_v9 = vshrl.u32 %v910_v45, 16 }
  0x83   : > { %14855 = vst [vmem:[#allocation16_spill] sm:$0xff] %v9728_v56  ;;  %v9743_v59 = vld [vmem:[%s9725_s9 + $0xc] sm:$0xf]  ;;  %v9750_v60 = vld [vmem:[%s9725_s9 + $0x14] sm:$0xf]  ;;  %v1763_v22 = vshrl.u32 %v9650_v40, 16 }
  0x84   : > { %14856 = vst [vmem:[#allocation17_spill] sm:$0xff] %v9731_v57  ;;  %v9753_v61 = vld [vmem:[%s9725_s9 + $0x18] sm:$0xf]  ;;  %v9760_v62 = vld [vmem:[%s9725_s9 + $0x10] sm:$0xf]  ;;  %v1751_v23 = vshrl.u32 %v9653_v41, 16 }
  0x85   : > { %1674 = vrot.lane.b32.xlu0 %v9662_v43, %s9407_s24  ;;  %1670 = vrot.lane.b32.xlu1 %v9665_v44, %s9407_s24  ;;  %14858 = vst [vmem:[#allocation19_spill] sm:$0xff] %v9743_v59  ;;  %v1769_v25 = vshrl.u32 %v9662_v43, 16  ;;  %v1757_v26 = vshrl.u32 %v9665_v44, 16  ;;  %v9780_v29 = vld [vmem:[%s9725_s9 + $0x1c] sm:$0xf]  ;;  %v1733_v30 = vshrl.u32 %v9674_v46, 16 }
  0x86   : > { %1666 = vrot.lane.b32.xlu2 %v910_v45, %s9407_s24  ;;  %14859 = vst [vmem:[#allocation20_spill] sm:$0xff] %v9750_v60  ;;  %s10867_s13 = scalar_lea.vmem [#allocation4], %s9644_s25  ;;  %s8572_s28 = sshll.u32 %s9389_s18, 6 }
  0x87   : > { %14860 = vst [vmem:[#allocation21_spill] sm:$0xff] %v9753_v61  ;;  %p860_p4 = scmp.lt.s32.totalorder %s9393_s19, 1  ;;  %s15048_s0 = sld [smem:[#allocation43_spill]] }
  0x88   : > { %14861 = vst [vmem:[#allocation22_spill] sm:$0xff] %v9760_v62  ;;  %s15060_s27 = sld [smem:[#allocation48_spill]] }
  0x89   : > { %14862 = vst [vmem:[#allocation23_spill] sm:$0xff] %v9780_v29  ;;  %s861_s25 = scalar_select %p860_p4, %s9393_s19, 1 }
  0x8a   : > { %s15165_s14 = sld [smem:[#allocation51_spill]] }
  0x8b   : > { %s8559_s7 = sshll.u32 %s861_s25, 4  ;;  %s15059_s25 = sld [smem:[#allocation47_spill]] }
  0x8d   : > { %1662 = vrot.lane.b32.xlu1 %v9674_v46, %s9407_s24  ;;  %1660 = vrot.lane.b32.xlu0 %v9677_v47, %s9407_s24 }
  0x8e   : > { %1656 = vrot.lane.b32.xlu2 %v9680_v48, %s9407_s24 }
  0x95   : > { %1658 = vrot.lane.b32.xlu0 %v9689_v49, %s9407_s24  ;;  %1652 = vrot.lane.b32.xlu1 %v9692_v50, %s9407_s24 }
  0x96   : > { %1654 = vrot.lane.b32.xlu2 %v9695_v51, %s9407_s24 }
  0x9d   : > { %1650 = vrot.lane.b32.xlu1 %v9707_v52, %s9407_s24  ;;  %1648 = vrot.lane.b32.xlu0 %v9710_v53, %s9407_s24 }
  0x9e   : > { %1644 = vrot.lane.b32.xlu2 %v9714_v54, %s9407_s24 }
  0xa5   : > { %1646 = vrot.lane.b32.xlu0 %v9723_v55, %s9407_s24  ;;  %939 = vrot.lane.b32.xlu1 %v9728_v56, %s9407_s24 }
  0xa6   : > { %941 = vrot.lane.b32.xlu2 %v9731_v57, %s9407_s24 }
  0xad   : > { %943 = vrot.lane.b32.xlu0 %v9740_v58, %s9407_s24  ;;  %945 = vrot.lane.b32.xlu1 %v9743_v59, %s9407_s24 }
  0xae   : > { %947 = vrot.lane.b32.xlu2 %v9760_v62, %s9407_s24 }
  0xb5   : > { %949 = vrot.lane.b32.xlu0 %v9750_v60, %s9407_s24  ;;  %951 = vrot.lane.b32.xlu1 %v9753_v61, %s9407_s24 }
  0xb6   : > { %953 = vrot.lane.b32.xlu2 %v9780_v29, %s9407_s24 }
  0xd8   : > { %v1665_v1 = vpop.permute.xlu2 %1664 }
  0xd9   : > { %v1738_v2 = vpack.i.b16 %v1665_v1, %v909_v42  ;;  %v1740_v5 = vshrl.u32 %v1665_v1, 16 }
  0xdb   : > { %v2156_v6 = vperm.slane %v1738_v2, %v9764_v4  ;;  %v1741_v7 = vpack.i.b16 %v1740_v5, %v1739_v3 }
  0xdd   : > { %v2157_v10 = vrot.slane %v2156_v6, 4  ;;  %v2175_v15 = vperm.slane %v1741_v7, %v9764_v4  ;;  %v2162_v5 = vperm.slane %v2156_v6, %v9770_v20 }
  0xdf   : > { %v2158_v17 = vsel %vm1009_vm0, 0, %v2157_v10  ;;  %v2176_v21 = vrot.slane %v2175_v15, 4  ;;  %v2181_v7 = vperm.slane %v2175_v15, %v9770_v20 }
  0xe0   : > { %v1667_v8 = vpop.permute.xlu2 %1666  ;;  %v2166_v24 = vperm.slane %v2158_v17, %v9770_v20 }
  0xe1   : > { %v1744_v11 = vpack.i.b16 %v1667_v8, %v910_v45  ;;  %v1746_v14 = vshrl.u32 %v1667_v8, 16  ;;  %v2177_v37 = vsel %vm1009_vm0, 0, %v2176_v21 }
  0xe2   : > { %v2169_v42 = vrot.slane %v2166_v24, 4  ;;  %v2185_v8 = vperm.slane %v2177_v37, %v9770_v20 }
  0xe3   : > { %v2194_v16 = vperm.slane %v1744_v11, %v9764_v4  ;;  %v1747_v18 = vpack.i.b16 %v1746_v14, %v1745_v9 }
  0xe4   : > { %v2188_v3 = vrot.slane %v2185_v8, 4 }
  0xe5   : > { %v2195_v19 = vrot.slane %v2194_v16, 4  ;;  %v2213_v28 = vperm.slane %v1747_v18, %v9764_v4  ;;  %v2170_v18 = vsel %vm1009_vm0, 0, %v2169_v42 }
  0xe7   : > { %v2196_v27 = vsel %vm1009_vm0, 0, %v2195_v19  ;;  %v2214_v2 = vrot.slane %v2213_v28, 4  ;;  %v2200_v19 = vperm.slane %v2194_v16, %v9770_v20  ;;  %v2219_v63 = vperm.slane %v2213_v28, %v9770_v20 }
  0xe8   : > { %v2204_v45 = vperm.slane %v2196_v27, %v9770_v20  ;;  %v1657_v56 = vpop.permute.xlu2 %1656 }
  0xe9   : > { %v2215_v27 = vsel %vm1009_vm0, 0, %v2214_v2  ;;  %v2205_v8 = vrot.slane %v2200_v19, 4 }
  0xea   : > { %v2207_v21 = vrot.slane %v2204_v45, 4  ;;  %v2223_v45 = vperm.slane %v2215_v27, %v9770_v20  ;;  %v2224_v27 = vrot.slane %v2219_v63, 4 }
  0xeb   : > { %v2206_v0 = vsel %vm1009_vm0, 0, %v2205_v8 }
  0xec   : > { %v9840_v38 = vsel %vm1009_vm0, %v2207_v21, %v2200_v19 }
  0xed   : > { %14863 = vst [vmem:[#allocation24_spill] sm:$0xff] %v9840_v38 }
  0xef   : > { %v1673_v9 = vpop.permute.xlu0 %1672  ;;  %v1669_v10 = vpop.permute.xlu1 %1668 }
  0xf0   : > { %v1762_v11 = vpack.i.b16 %v1673_v9, %v9650_v40  ;;  %v1764_v12 = vshrl.u32 %v1673_v9, 16  ;;  %v1750_v13 = vpack.i.b16 %v1669_v10, %v9653_v41  ;;  %v1752_v14 = vshrl.u32 %v1669_v10, 16 }
  0xf1   : > { %v2167_v40 = vrot.slane %v2162_v5, 4  ;;  %v2186_v9 = vrot.slane %v2181_v7, 4 }
  0xf2   : > { %v1765_v6 = vpack.i.b16 %v1764_v12, %v1763_v22  ;;  %v2308_v15 = vperm.slane %v1762_v11, %v9764_v4  ;;  %v1753_v24 = vpack.i.b16 %v1752_v14, %v1751_v23  ;;  %v2232_v1 = vperm.slane %v1750_v13, %v9764_v4 }
  0xf3   : > { %v9815_v22 = vsel %vm1009_vm0, %v2169_v42, %v2162_v5  ;;  %v2725_v23 = vrot.slane %v2170_v18, 4  ;;  %v2208_v12 = vsel %vm1009_vm0, 0, %v2207_v21  ;;  %v2168_v14 = vsel %vm1009_vm0, 0, %v2167_v40 }
  0xf4   : > { %v2309_v41 = vrot.slane %v2308_v15, 4  ;;  %v2327_v10 = vperm.slane %v1765_v6, %v9764_v4  ;;  %v2251_v11 = vperm.slane %v1753_v24, %v9764_v4  ;;  %v9823_v13 = vsel %vm1009_vm0, 0, %v2186_v9 }
  0xf5   : > { %v9827_v42 = vsel %vm1009_vm0, 0, %v2188_v3  ;;  %v2233_v18 = vrot.slane %v2232_v1, 4  ;;  %v9832_v24 = vsel %vm1009_vm0, %v2188_v3, %v2181_v7  ;;  %v2226_v40 = vrot.slane %v2223_v45, 4 }
  0xf6   : > { %v2310_v2 = vsel %vm1009_vm0, 0, %v2309_v41  ;;  %v2328_v28 = vrot.slane %v2327_v10, 4  ;;  %v2759_v16 = vrot.slane %v2208_v12, 4  ;;  %v9836_v17 = vsel %vm1009_vm0, %v2725_v23, %v2168_v14 }
  0xf7   : > { %v2318_v41 = vperm.slane %v2310_v2, %v9770_v20  ;;  %v1675_v9 = vpop.permute.xlu0 %1674  ;;  %v1671_v37 = vpop.permute.xlu1 %1670  ;;  %v2252_v6 = vrot.slane %v2251_v11, 4  ;;  %v2314_v3 = vperm.slane %v2308_v15, %v9770_v20  ;;  %v2238_v45 = vperm.slane %v2232_v1, %v9770_v20 }
  0xf8   : > { %v2329_v7 = vsel %vm1009_vm0, 0, %v2328_v28  ;;  %v2333_v2 = vperm.slane %v2327_v10, %v9770_v20  ;;  %v2234_v12 = vsel %vm1009_vm0, 0, %v2233_v18  ;;  %v9849_v23 = vsel %vm1009_vm0, 0, %v2224_v27 }
  0xf9   : > { %14864 = vst [vmem:[#allocation25_spill] sm:$0xff] %v9849_v23  ;;  %v1768_v8 = vpack.i.b16 %v1675_v9, %v9662_v43  ;;  %v2321_v14 = vrot.slane %v2318_v41, 4  ;;  %v9853_v19 = vsel %vm1009_vm0, 0, %v2226_v40  ;;  %v9858_v15 = vsel %vm1009_vm0, %v2759_v16, %v2206_v0 }
  0xfa   : > { %14865 = vst [vmem:[#allocation26_spill] sm:$0xff] %v9853_v19  ;;  %v2337_v1 = vperm.slane %v2329_v7, %v9770_v20  ;;  %v2253_v10 = vsel %vm1009_vm0, 0, %v2252_v6  ;;  %v9863_v28 = vsel %vm1009_vm0, %v2226_v40, %v2219_v63  ;;  %v2319_v27 = vrot.slane %v2314_v3, 4 }
  0xfb   : > { %14866 = vst [vmem:[#allocation27_spill] sm:$0xff] %v9863_v28  ;;  %v2242_v41 = vperm.slane %v2234_v12, %v9770_v20  ;;  %v2243_v5 = vrot.slane %v2238_v45, 4  ;;  %v1770_v35 = vshrl.u32 %v1675_v9, 16  ;;  %v2338_v34 = vrot.slane %v2333_v2, 4 }
  0xfc   : > { %v2346_v21 = vperm.slane %v1768_v8, %v9764_v4  ;;  %v1756_v0 = vpack.i.b16 %v1671_v37, %v9665_v44  ;;  %v1758_v16 = vshrl.u32 %v1671_v37, 16  ;;  %v2322_v7 = vsel %vm1009_vm0, 0, %v2321_v14 }
  0xfd   : > { %v2261_v6 = vperm.slane %v2253_v10, %v9770_v20  ;;  %v1771_v40 = vpack.i.b16 %v1770_v35, %v1769_v25  ;;  %v2340_v33 = vrot.slane %v2337_v1, 4  ;;  %v2320_v8 = vsel %vm1009_vm0, 0, %v2319_v27 }
  0xfe   : > { %v2347_v12 = vrot.slane %v2346_v21, 4  ;;  %v2270_v9 = vperm.slane %v1756_v0, %v9764_v4  ;;  %v2245_v36 = vrot.slane %v2242_v41, 4  ;;  %v1759_v10 = vpack.i.b16 %v1758_v16, %v1757_v26 }
  0xff   : > { %v1663_v18 = vpop.permute.xlu1 %1662  ;;  %v2365_v37 = vperm.slane %v1771_v40, %v9764_v4  ;;  %v9881_v63 = vsel %vm1009_vm0, 0, %v2338_v34  ;;  %v9884_v43 = vsel %vm1009_vm0, %v2321_v14, %v2314_v3  ;;  %v2244_v25 = vsel %vm1009_vm0, 0, %v2243_v5  ;;  %v1661_v32 = vpop.permute.xlu0 %1660 }
 0x100   : > { %v1732_v39 = vpack.i.b16 %v1663_v18, %v9674_v46  ;;  %v2257_v35 = vperm.slane %v2251_v11, %v9770_v20  ;;  %v2861_v1 = vrot.slane %v2322_v7, 4  ;;  %v2264_v0 = vrot.slane %v2261_v6, 4 }
 0x101   : > { %v2348_v27 = vsel %vm1009_vm0, 0, %v2347_v12  ;;  %v2271_v41 = vrot.slane %v2270_v9, 4  ;;  %v9890_v40 = vsel %vm1009_vm0, 0, %v2340_v33  ;;  %v2366_v44 = vrot.slane %v2365_v37, 4 }
 0x102   : > { %v1734_v26 = vshrl.u32 %v1663_v18, 16  ;;  %v2118_v34 = vperm.slane %v1732_v39, %v9764_v4  ;;  %v2246_v5 = vsel %vm1009_vm0, 0, %v2245_v36  ;;  %v2352_v11 = vperm.slane %v2346_v21, %v9770_v20 }
 0x103   : > { %v2289_v14 = vperm.slane %v1759_v10, %v9764_v4  ;;  %v9899_v16 = vsel %vm1009_vm0, %v2340_v33, %v2333_v2  ;;  %v2262_v7 = vrot.slane %v2257_v35, 4  ;;  %v9902_v6 = vsel %vm1009_vm0, %v2245_v36, %v2238_v45 }
 0x104   : > { %v2356_v18 = vperm.slane %v2348_v27, %v9770_v20  ;;  %v9906_v39 = vsel %vm1009_vm0, %v2861_v1, %v2320_v8  ;;  %v9910_v3 = vsel %vm1009_vm0, 0, %v2264_v0  ;;  %v2272_v21 = vsel %vm1009_vm0, 0, %v2271_v41 }
 0x105   : > { %v2793_v10 = vrot.slane %v2246_v5, 4  ;;  %v2367_v33 = vsel %vm1009_vm0, 0, %v2366_v44  ;;  %v1735_v2 = vpack.i.b16 %v1734_v26, %v1733_v30  ;;  %v2119_v36 = vrot.slane %v2118_v34, 4 }
 0x106   : > { %v2357_v45 = vrot.slane %v2352_v11, 4  ;;  %v2371_v27 = vperm.slane %v2365_v37, %v9770_v20  ;;  %v2276_v8 = vperm.slane %v2270_v9, %v9770_v20  ;;  %v2290_v1 = vrot.slane %v2289_v14, 4 }
 0x107   : > { %v9919_v12 = vsel %vm1009_vm0, 0, %v2262_v7  ;;  %v2359_v41 = vrot.slane %v2356_v18, 4  ;;  %v2280_v5 = vperm.slane %v2272_v21, %v9770_v20  ;;  %v9925_v44 = vsel %vm1009_vm0, %v2264_v0, %v2257_v35  ;;  %v1659_v0 = vpop.permute.xlu0 %1658 }
 0x108   : > { %v2375_v30 = vperm.slane %v2367_v33, %v9770_v20  ;;  %v1726_v37 = vpack.i.b16 %v1661_v32, %v9677_v47  ;;  %v9931_v9 = vsel %vm1009_vm0, %v2793_v10, %v2244_v25  ;;  %v2120_v26 = vsel %vm1009_vm0, 0, %v2119_v36 }
 0x109   : > { %v2137_v7 = vperm.slane %v1735_v2, %v9764_v4  ;;  %v1728_v31 = vshrl.u32 %v1661_v32, 16  ;;  %v2358_v18 = vsel %vm1009_vm0, 0, %v2357_v45  ;;  %v2376_v21 = vrot.slane %v2371_v27, 4 }
 0x10a   : > { %v2281_v61 = vrot.slane %v2276_v8, 4  ;;  %v2291_v35 = vsel %vm1009_vm0, 0, %v2290_v1  ;;  %v2360_v46 = vsel %vm1009_vm0, 0, %v2359_v41  ;;  %v2283_v33 = vrot.slane %v2280_v5, 4 }
 0x10b   : > { %v2295_v29 = vperm.slane %v2289_v14, %v9770_v20  ;;  %v2128_v25 = vperm.slane %v2120_v26, %v9770_v20  ;;  %v2378_v10 = vrot.slane %v2375_v30, 4  ;;  %v9941_v36 = vsel %vm1009_vm0, %v2359_v41, %v2352_v11 }
 0x10c   : > { %v14867_v32 = vshrl.u32 %v9677_v47, 16  ;;  %v2080_v45 = vperm.slane %v1726_v37, %v9764_v4  ;;  %v2299_v62 = vperm.slane %v2291_v35, %v9770_v20  ;;  %v2138_v1 = vrot.slane %v2137_v7, 4 }
 0x10d   : > { %v1720_v60 = vpack.i.b16 %v1659_v0, %v9689_v49  ;;  %v1722_v59 = vshrl.u32 %v1659_v0, 16  ;;  %v9949_v5 = vsel %vm1009_vm0, 0, %v2376_v21  ;;  %v2895_v14 = vrot.slane %v2360_v46, 4 }
 0x10e   : > { %v1729_v2 = vpack.i.b16 %v1728_v31, %v14867_v32  ;;  %v2282_v30 = vsel %vm1009_vm0, 0, %v2281_v61  ;;  %v2081_v26 = vrot.slane %v2080_v45, 4  ;;  %v2284_v47 = vsel %vm1009_vm0, 0, %v2283_v33 }
 0x10f   : > { %v2124_v31 = vperm.slane %v2118_v34, %v9770_v20  ;;  %v2131_v41 = vrot.slane %v2128_v25, 4  ;;  %v2300_v37 = vrot.slane %v2295_v29, 4  ;;  %v9957_v35 = vsel %vm1009_vm0, %v2283_v33, %v2276_v8 }
 0x110   : > { %v2099_v0 = vperm.slane %v1729_v2, %v9764_v4  ;;  %v14868_v21 = vshrl.u32 %v9689_v49, 16  ;;  %v9963_v61 = vsel %vm1009_vm0, 0, %v2378_v10  ;;  %v2302_v32 = vrot.slane %v2299_v62, 4 }
 0x111   : > { %v2139_v11 = vsel %vm1009_vm0, 0, %v2138_v1  ;;  %v2042_v58 = vperm.slane %v1720_v60, %v9764_v4  ;;  %v9968_v34 = vsel %vm1009_vm0, %v2895_v14, %v2358_v18  ;;  %v2827_v25 = vrot.slane %v2284_v47, 4 }
 0x112   : > { %v1723_v46 = vpack.i.b16 %v1722_v59, %v14868_v21  ;;  %v2143_v8 = vperm.slane %v2137_v7, %v9770_v20  ;;  %v2082_v33 = vsel %vm1009_vm0, 0, %v2081_v26  ;;  %v9973_v49 = vsel %vm1009_vm0, %v2378_v10, %v2371_v27 }
 0x113   : > { %v2129_v59 = vrot.slane %v2124_v31, 4  ;;  %v2132_v2 = vsel %vm1009_vm0, 0, %v2131_v41  ;;  %v2043_v62 = vrot.slane %v2042_v58, 4  ;;  %v2147_v60 = vperm.slane %v2139_v11, %v9770_v20 }
 0x114   : > { %v2100_v21 = vrot.slane %v2099_v0, 4  ;;  %v2061_v18 = vperm.slane %v1723_v46, %v9764_v4  ;;  %v9982_v7 = vsel %vm1009_vm0, 0, %v2300_v37  ;;  %v9985_v27 = vsel %vm1009_vm0, 0, %v2302_v32 }
 0x115   : > { %v2090_v10 = vperm.slane %v2082_v33, %v9770_v20  ;;  %v9989_v26 = vsel %vm1009_vm0, %v2827_v25, %v2282_v30  ;;  %v2148_v47 = vrot.slane %v2143_v8, 4  ;;  %v2691_v1 = vrot.slane %v2132_v2, 4 }
 0x116   : > { %v2044_v11 = vsel %vm1009_vm0, 0, %v2043_v62  ;;  %v2130_v57 = vsel %vm1009_vm0, 0, %v2129_v59  ;;  %v9994_v46 = vsel %vm1009_vm0, %v2131_v41, %v2124_v31  ;;  %v2086_v37 = vperm.slane %v2080_v45, %v9770_v20 }
 0x117   : > { %14869 = vst [vmem:[#allocation28_spill] sm:$0xff] %v9994_v46  ;;  %v2062_v14 = vrot.slane %v2061_v18, 4  ;;  %v2150_v38 = vrot.slane %v2147_v60, 4  ;;  %v2101_v28 = vsel %vm1009_vm0, 0, %v2100_v21  ;;  %v1714_v33 = vpack.i.b16 %v1657_v56, %v9680_v48 }
 0x118   : > { %v1716_v19 = vshrl.u32 %v1657_v56, 16  ;;  %v10000_v30 = vsel %vm1009_vm0, %v2302_v32, %v2295_v29  ;;  %v2093_v2 = vrot.slane %v2090_v10, 4  ;;  %v2052_v59 = vperm.slane %v2044_v11, %v9770_v20  ;;  %v1655_v10 = vpop.permute.xlu2 %1654 }
 0x119   : > { %v10005_v31 = vsel %vm1009_vm0, 0, %v2148_v47  ;;  %v10010_v41 = vsel %vm1009_vm0, %v2691_v1, %v2130_v57  ;;  %v2105_v62 = vperm.slane %v2099_v0, %v9770_v20  ;;  %v2109_v56 = vperm.slane %v2101_v28, %v9770_v20 }
 0x11a   : > { %14870 = vst [vmem:[#allocation29_spill] sm:$0xff] %v10005_v31  ;;  %v2063_v29 = vsel %vm1009_vm0, 0, %v2062_v14  ;;  %v14872_v32 = vshrl.u32 %v9680_v48, 16  ;;  %v2004_v21 = vperm.slane %v1714_v33, %v9764_v4  ;;  %v10019_v47 = vsel %vm1009_vm0, 0, %v2150_v38 }
 0x11b   : > { %14871 = vst [vmem:[#allocation30_spill] sm:$0xff] %v10010_v41  ;;  %v2091_v11 = vrot.slane %v2086_v37, 4  ;;  %v2048_v45 = vperm.slane %v2042_v58, %v9770_v20  ;;  %v1708_v57 = vpack.i.b16 %v1655_v10, %v9695_v51  ;;  %v2094_v0 = vsel %vm1009_vm0, 0, %v2093_v2 }
 0x11c   : > { %v1717_v60 = vpack.i.b16 %v1716_v19, %v14872_v32  ;;  %14873 = vst [vmem:[#allocation31_spill] sm:$0xff] %v10019_v47  ;;  %v2055_v1 = vrot.slane %v2052_v59, 4  ;;  %v2005_v28 = vrot.slane %v2004_v21, 4  ;;  %v2110_v25 = vrot.slane %v2105_v62, 4 }
 0x11d   : > { %v2067_v48 = vperm.slane %v2061_v18, %v9770_v20  ;;  %v2071_v19 = vperm.slane %v2063_v29, %v9770_v20  ;;  %v1710_v33 = vshrl.u32 %v1655_v10, 16  ;;  %v10028_v32 = vsel %vm1009_vm0, %v2150_v38, %v2143_v8 }
 0x11e   : > { %v2023_v14 = vperm.slane %v1717_v60, %v9764_v4  ;;  %14874 = vst [vmem:[#allocation32_spill] sm:$0xff] %v10028_v32  ;;  %v2112_v46 = vrot.slane %v2109_v56, 4  ;;  %v10031_v58 = vsel %vm1009_vm0, %v2093_v2, %v2086_v37  ;;  %v1966_v31 = vperm.slane %v1708_v57, %v9764_v4 }
 0x11f   : > { %v2657_v41 = vrot.slane %v2094_v0, 4  ;;  %v2053_v23 = vrot.slane %v2048_v45, 4  ;;  %v2006_v60 = vsel %vm1009_vm0, 0, %v2005_v28  ;;  %v2092_v18 = vsel %vm1009_vm0, 0, %v2091_v11 }
 0x120   : > { %v2056_v29 = vsel %vm1009_vm0, 0, %v2055_v1  ;;  %v2024_v10 = vrot.slane %v2023_v14, 4  ;;  %v14875_v38 = vshrl.u32 %v9695_v51, 16  ;;  %v10041_v56 = vsel %vm1009_vm0, 0, %v2110_v25 }
 0x121   : > { %v2072_v2 = vrot.slane %v2067_v48, 4  ;;  %v2074_v57 = vrot.slane %v2071_v19, 4  ;;  %v10046_v0 = vsel %vm1009_vm0, 0, %v2112_v46  ;;  %v2010_v28 = vperm.slane %v2004_v21, %v9770_v20 }
 0x122   : > { %v1711_v8 = vpack.i.b16 %v1710_v33, %v14875_v38  ;;  %v2014_v11 = vperm.slane %v2006_v60, %v9770_v20  ;;  %v1967_v59 = vrot.slane %v1966_v31, 4  ;;  %v10051_v32 = vsel %vm1009_vm0, %v2657_v41, %v2092_v18  ;;  %v1653_v38 = vpop.permute.xlu1 %1652 }
 0x123   : > { %v10054_v51 = vsel %vm1009_vm0, %v2112_v46, %v2105_v62  ;;  %v2054_v25 = vsel %vm1009_vm0, 0, %v2053_v23  ;;  %v2623_v33 = vrot.slane %v2056_v29, 4  ;;  %v10058_v19 = vsel %vm1009_vm0, %v2055_v1, %v2048_v45 }
 0x124   : > { %14876 = vst [vmem:[#allocation33_spill] sm:$0xff] %v10058_v19  ;;  %v2025_v37 = vsel %vm1009_vm0, 0, %v2024_v10  ;;  %v1985_v21 = vperm.slane %v1711_v8, %v9764_v4  ;;  %v1702_v60 = vpack.i.b16 %v1653_v38, %v9692_v50  ;;  %v10065_v41 = vsel %vm1009_vm0, 0, %v2072_v2 }
 0x125   : > { %14877 = vst [vmem:[#allocation34_spill] sm:$0xff] %v10065_v41  ;;  %v10068_v46 = vsel %vm1009_vm0, 0, %v2074_v57  ;;  %v2029_v23 = vperm.slane %v2023_v14, %v9770_v20  ;;  %v2015_v62 = vrot.slane %v2010_v28, 4  ;;  %v2017_v18 = vrot.slane %v2014_v11, 4 }
 0x126   : > { %v1968_v45 = vsel %vm1009_vm0, 0, %v1967_v59  ;;  %v1704_v1 = vshrl.u32 %v1653_v38, 16  ;;  %v10075_v10 = vsel %vm1009_vm0, %v2623_v33, %v2054_v25  ;;  %v10078_v8 = vsel %vm1009_vm0, %v2074_v57, %v2067_v48 }
 0x127   : > { %14878 = vst [vmem:[#allocation35_spill] sm:$0xff] %v10078_v8  ;;  %v2033_v2 = vperm.slane %v2025_v37, %v9770_v20  ;;  %v1972_v47 = vperm.slane %v1966_v31, %v9770_v20  ;;  %v1986_v41 = vrot.slane %v1985_v21, 4  ;;  %v1928_v14 = vperm.slane %v1702_v60, %v9764_v4 }
 0x128   : > { %v2866_v59 = vperm.slane %v9906_v39, %v9764_v4  ;;  %v2034_v38 = vrot.slane %v2029_v23, 4  ;;  %v1976_v29 = vperm.slane %v1968_v45, %v9770_v20  ;;  %v14879_v25 = vrot.slane %v9890_v40, 4 }
 0x129   : > { %v2016_v37 = vsel %vm1009_vm0, 0, %v2015_v62  ;;  %v2018_v31 = vsel %vm1009_vm0, 0, %v2017_v18  ;;  %v10094_v57 = vsel %vm1009_vm0, %v2017_v18, %v2010_v28  ;;  %v14880_v33 = vshrl.u32 %v9692_v50, 16 }
 0x12a   : > { %v2879_v48 = vsel %vm1009_vm0, %v14879_v25, %v9881_v63  ;;  %v2036_v60 = vrot.slane %v2033_v2, 4  ;;  %v1991_v11 = vperm.slane %v1985_v21, %v9770_v20  ;;  %v2900_v40 = vperm.slane %v9968_v34, %v9764_v4 }
 0x12b   : > { %v1705_v39 = vpack.i.b16 %v1704_v1, %v14880_v33  ;;  %v2883_v45 = vperm.slane %v2879_v48, %v9764_v4  ;;  %v1977_v19 = vrot.slane %v1972_v47, 4  ;;  %v1987_v63 = vsel %vm1009_vm0, 0, %v1986_v41 }
 0x12c   : > { %v1929_v62 = vrot.slane %v1928_v14, 4  ;;  %v2867_v25 = vrot.slane %v2866_v59, 4  ;;  %v10104_v8 = vsel %vm1009_vm0, 0, %v2034_v38  ;;  %v2589_v28 = vrot.slane %v2018_v31, 4 }
 0x12d   : > { %v1979_v18 = vrot.slane %v1976_v29, 4  ;;  %v1947_v21 = vperm.slane %v1705_v39, %v9764_v4  ;;  %v2877_v1 = vperm.slane %v9899_v16, %v9764_v4  ;;  %v2884_v2 = vrot.slane %v2883_v45, 4 }
 0x12e   : > { %v2901_v34 = vrot.slane %v2900_v40, 4  ;;  %v10112_v48 = vsel %vm1009_vm0, 0, %v2036_v60  ;;  %v1995_v41 = vperm.slane %v1987_v63, %v9770_v20  ;;  %v1996_v59 = vrot.slane %v1991_v11, 4 }
 0x12f   : > { %v10116_v38 = vsel %vm1009_vm0, %v1979_v18, %v1972_v47  ;;  %v1930_v33 = vsel %vm1009_vm0, 0, %v1929_v62  ;;  %v14882_v29 = vperm.slane %v9884_v43, %v9764_v4  ;;  %v2885_v16 = vsel %vm1009_vm0, %v2884_v2, %v2877_v1  ;;  %v1651_v2 = vpop.permute.xlu1 %1650 }
 0x130   : > { %14881 = vst [vmem:[#allocation36_spill] sm:$0xff] %v10116_v38  ;;  %v14883_v39 = vrot.slane %v9963_v61, 4  ;;  %v10129_v40 = vsel %vm1009_vm0, %v2036_v60, %v2029_v23  ;;  %v1978_v47 = vsel %vm1009_vm0, 0, %v1977_v19  ;;  %v1980_v63 = vsel %vm1009_vm0, 0, %v1979_v18 }
 0x131   : > { %v2868_v31 = vsel %vm1009_vm0, %v2867_v25, %v14882_v29  ;;  %v2889_v62 = vperm.slane %v2885_v16, %v9770_v20  ;;  %v10135_v43 = vsel %vm1009_vm0, %v2589_v28, %v2016_v37  ;;  %v1948_v1 = vrot.slane %v1947_v21, 4 }
 0x132   : > { %v2913_v45 = vsel %vm1009_vm0, %v14883_v39, %v9949_v5  ;;  %v14884_v61 = vperm.slane %v9941_v36, %v9764_v4  ;;  %v1938_v19 = vperm.slane %v1930_v33, %v9770_v20  ;;  %v2872_v60 = vperm.slane %v2868_v31, %v9770_v20  ;;  %v1649_v33 = vpop.permute.xlu0 %1648 }
 0x133   : > { %v2917_v18 = vperm.slane %v2913_v45, %v9764_v4  ;;  %v10148_v37 = vsel %vm1009_vm0, 0, %v1996_v59  ;;  %v1998_v28 = vrot.slane %v1995_v41, 4  ;;  %v2555_v29 = vrot.slane %v1980_v63, 4 }
 0x134   : > { %v2902_v5 = vsel %vm1009_vm0, %v2901_v34, %v14884_v61  ;;  %14885 = vst [vmem:[#allocation37_spill] sm:$0xff] %v10148_v37  ;;  %v1934_v16 = vperm.slane %v1928_v14, %v9770_v20  ;;  %v2911_v34 = vperm.slane %v9973_v49, %v9764_v4  ;;  %v3012_v61 = vshrl.u32 %v2889_v62, 16 }
 0x135   : > { %v2906_v36 = vperm.slane %v2902_v5, %v9770_v20  ;;  %v2918_v39 = vrot.slane %v2917_v18, 4  ;;  %v1949_v31 = vsel %vm1009_vm0, 0, %v1948_v1  ;;  %v1696_v45 = vpack.i.b16 %v1651_v2, %v9707_v52 }
 0x136   : > { %v1698_v23 = vshrl.u32 %v1651_v2, 16  ;;  %v1690_v59 = vpack.i.b16 %v1649_v33, %v9710_v53  ;;  %v1941_v50 = vrot.slane %v1938_v19, 4  ;;  %v3010_v63 = vpack.i.b16 %v2889_v62, %v2872_v60 }
 0x137   : > { %v2919_v41 = vsel %vm1009_vm0, %v2918_v39, %v2911_v34  ;;  %v3011_v14 = vshrl.u32 %v2872_v60, 16  ;;  %v10159_v5 = vsel %vm1009_vm0, 0, %v1998_v28  ;;  %v10162_v49 = vsel %vm1009_vm0, %v2555_v29, %v1978_v47 }
 0x138   : > { %14886 = vst [vmem:[#allocation38_spill] sm:$0xff] %v10162_v49  ;;  %v2923_v18 = vperm.slane %v2919_v41, %v9770_v20  ;;  %v1890_v1 = vperm.slane %v1696_v45, %v9764_v4  ;;  %v10167_v25 = vsel %vm1009_vm0, %v1998_v28, %v1991_v11  ;;  %v1957_v2 = vperm.slane %v1949_v31, %v9770_v20 }
 0x139   : > { %14887 = vst [vmem:[#allocation39_spill] sm:$0xff] %v10167_v25  ;;  %v3013_v19 = vpack.i.b16 %v3012_v61, %v3011_v14  ;;  %v3017_v38 = vshrl.u32 %v2906_v36, 16  ;;  %v14888_v60 = vshrl.u32 %v9707_v52, 16  ;;  %v1852_v37 = vperm.slane %v1690_v59, %v9764_v4 }
 0x13a   : > { %v3016_v34 = vpack.i.b16 %v2923_v18, %v2906_v36  ;;  %v3018_v62 = vshrl.u32 %v2923_v18, 16  ;;  %v1939_v47 = vrot.slane %v1934_v16, 4  ;;  %v1942_v29 = vsel %vm1009_vm0, 0, %v1941_v50 }
 0x13b   : > { %v1699_v39 = vpack.i.b16 %v1698_v23, %v14888_v60  ;;  %v1953_v41 = vperm.slane %v1947_v21, %v9770_v20  ;;  %v4438_v45 = vunpack.c.l.b16 %v3010_v63  ;;  %v1891_v28 = vrot.slane %v1890_v1, 4 }
 0x13c   : > { %v4439_v49 = vunpack.c.l.b16 %v3016_v34  ;;  %v3019_v11 = vpack.i.b16 %v3018_v62, %v3017_v38  ;;  %v1692_v25 = vshrl.u32 %v1649_v33, 16  ;;  %v1960_v31 = vrot.slane %v1957_v2, 4 }
 0x13d   : > { %v4540_v61 = vunpack.c.l.b16 %v3013_v19  ;;  %v1896_v36 = vperm.slane %v1890_v1, %v9770_v20  ;;  %v2798_v52 = vperm.slane %v9931_v9, %v9764_v4  ;;  %v1909_v59 = vperm.slane %v1699_v39, %v9764_v4 }
 0x13e   : > { %v4447_v23 = vpack.c.b16 %v4439_v49, %v4438_v45  ;;  %v4541_v14 = vunpack.c.l.b16 %v3019_v11  ;;  %v1853_v18 = vrot.slane %v1852_v37, 4  ;;  %v1958_v21 = vrot.slane %v1953_v41, 4 }
 0x13f   : > { %v2521_v63 = vrot.slane %v1942_v29, 4  ;;  %v1892_v2 = vsel %vm1009_vm0, 0, %v1891_v28  ;;  %v14889_v1 = vshrl.u32 %v9710_v53, 16  ;;  %v1940_v9 = vsel %vm1009_vm0, 0, %v1939_v47 }
 0x140   : > { %v4483_v38 = vsel %vm4448_vm1, %v4447_v23, 0  ;;  %v4549_v33 = vpack.c.b16 %v4541_v14, %v4540_v61  ;;  %v10186_v49 = vsel %vm1009_vm0, 0, %v1960_v31  ;;  %v10189_v34 = vsel %vm1009_vm0, %v1941_v50, %v1934_v16 }
 0x141   : > { %v1693_v19 = vpack.i.b16 %v1692_v25, %v14889_v1  ;;  %4485 = vmatpush.bf16.xpose.msra.mxu0 %v4483_v38  ;;  %v2799_v62 = vrot.slane %v2798_v52, 4  ;;  %v1901_v29 = vrot.slane %v1896_v36, 4  ;;  %v1910_v45 = vrot.slane %v1909_v59, 4 }
 0x142   : > { %v4584_v39 = vsel %vm4448_vm1, %v4549_v33, 0  ;;  %v1854_v11 = vsel %vm1009_vm0, 0, %v1853_v18  ;;  %v1900_v53 = vperm.slane %v1892_v2, %v9770_v20  ;;  %v10195_v25 = vperm.slane %v1909_v59, %v9770_v20  ;;  %v1647_v2 = vpop.permute.xlu0 %1646 }
 0x143   : > { %4586 = vmatpush.bf16.xpose.msra.mxu1 %v4584_v39  ;;  %v10198_v47 = vperm.slane %v1852_v37, %v9770_v20  ;;  %v14890_v50 = vrot.slane %v9910_v3, 4  ;;  %v10205_v28 = vsel %vm1009_vm0, 0, %v1958_v21  ;;  %v10210_v52 = vsel %vm1009_vm0, %v2521_v63, %v1940_v9 }
 0x144   : > { %v1871_v23 = vperm.slane %v1693_v19, %v9764_v4  ;;  %v10214_v14 = vsel %vm1009_vm0, %v1960_v31, %v1953_v41  ;;  %v1862_v3 = vperm.slane %v1854_v11, %v9770_v20  ;;  %v10221_v59 = vsel %vm1009_vm0, 0, %v1901_v29 }
 0x145   : > { %v2811_v16 = vsel %vm1009_vm0, %v14890_v50, %v9919_v12  ;;  %v2809_v12 = vperm.slane %v9925_v44, %v9764_v4  ;;  %v1911_v18 = vsel %vm1009_vm0, 0, %v1910_v45  ;;  %v2832_v63 = vperm.slane %v9989_v26, %v9764_v4 }
 0x146   : > { %v2815_v21 = vperm.slane %v2811_v16, %v9764_v4  ;;  %v1903_v38 = vrot.slane %v1900_v53, 4  ;;  %v1920_v41 = vrot.slane %v10195_v25, 4  ;;  %v1863_v31 = vrot.slane %v10198_v47, 4 }
 0x147   : > { %v14891_v33 = vperm.slane %v9902_v6, %v9764_v4  ;;  %v1872_v1 = vrot.slane %v1871_v23, 4  ;;  %v2833_v9 = vrot.slane %v2832_v63, 4  ;;  %v14892_v39 = vrot.slane %v9985_v27, 4 }
 0x148   : > { %v2816_v19 = vrot.slane %v2815_v21, 4  ;;  %v1919_v26 = vperm.slane %v1911_v18, %v9770_v20  ;;  %v1865_v45 = vrot.slane %v1862_v3, 4  ;;  %v1684_v53 = vpack.i.b16 %v1647_v2, %v9723_v55 }
 0x149   : > { %v2800_v44 = vsel %vm1009_vm0, %v2799_v62, %v14891_v33  ;;  %v2845_v29 = vsel %vm1009_vm0, %v14892_v39, %v9982_v7  ;;  %v14893_v50 = vperm.slane %v9957_v35, %v9764_v4  ;;  %v1686_v21 = vshrl.u32 %v1647_v2, 16 }
 0x14a   : > { %v2849_v11 = vperm.slane %v2845_v29, %v9764_v4  ;;  %v2804_v6 = vperm.slane %v2800_v44, %v9770_v20  ;;  %v2817_v62 = vsel %vm1009_vm0, %v2816_v19, %v2809_v12  ;;  %v1904_v27 = vsel %vm1009_vm0, 0, %v1903_v38 }
 0x14b   : > { %v2834_v16 = vsel %vm1009_vm0, %v2833_v9, %v14893_v50  ;;  %v2821_v7 = vperm.slane %v2817_v62, %v9770_v20  ;;  %v2843_v3 = vperm.slane %v10000_v30, %v9764_v4  ;;  %v10251_v63 = vsel %vm1009_vm0, %v1903_v38, %v1896_v36 }
 0x14c   : > { %v2850_v18 = vrot.slane %v2849_v11, 4  ;;  %v1873_v33 = vsel %vm1009_vm0, 0, %v1872_v1  ;;  %v2838_v12 = vperm.slane %v2834_v16, %v9770_v20  ;;  %v1814_v35 = vperm.slane %v1684_v53, %v9764_v4 }
 0x14d   : > { %v10257_v44 = vsel %vm1009_vm0, 0, %v1920_v41  ;;  %v1864_v2 = vsel %vm1009_vm0, 0, %v1863_v31  ;;  %v3000_v9 = vshrl.u32 %v2821_v7, 16  ;;  %v2998_v39 = vpack.i.b16 %v2821_v7, %v2804_v6 }
 0x14e   : > { %v2851_v19 = vsel %vm1009_vm0, %v2850_v18, %v2843_v3  ;;  %v2999_v29 = vshrl.u32 %v2804_v6, 16  ;;  %v14894_v36 = vshrl.u32 %v9723_v55, 16  ;;  %v1922_v1 = vrot.slane %v1919_v26, 4  ;;  %v1645_v3 = vpop.permute.xlu2 %1644 }
 0x14f   : > { %v2855_v30 = vperm.slane %v2851_v19, %v9770_v20  ;;  %v1881_v53 = vperm.slane %v1873_v33, %v9770_v20  ;;  %v1815_v41 = vrot.slane %v1814_v35, 4  ;;  %v3005_v31 = vshrl.u32 %v2838_v12, 16 }
 0x150   : > { %v1687_v38 = vpack.i.b16 %v1686_v21, %v14894_v36  ;;  %v3001_v50 = vpack.i.b16 %v3000_v9, %v2999_v29  ;;  %v2487_v18 = vrot.slane %v1904_v27, 4  ;;  %v1866_v19 = vsel %vm1009_vm0, 0, %v1865_v45 }
 0x151   : > { %v3004_v62 = vpack.i.b16 %v2855_v30, %v2838_v12  ;;  %v3006_v16 = vshrl.u32 %v2855_v30, 16  ;;  %v1877_v6 = vperm.slane %v1871_v23, %v9770_v20  ;;  %v1678_v55 = vpack.i.b16 %v1645_v3, %v9714_v54 }
 0x152   : > { %v4436_v21 = vunpack.c.l.b16 %v2998_v39  ;;  %v1833_v36 = vperm.slane %v1687_v38, %v9764_v4  ;;  %v1884_v11 = vrot.slane %v1881_v53, 4  ;;  %v10273_v33 = vsel %vm1009_vm0, %v1865_v45, %v10198_v47 }
 0x153   : > { %v4437_v26 = vunpack.c.l.b16 %v3004_v62  ;;  %v3007_v7 = vpack.i.b16 %v3006_v16, %v3005_v31  ;;  %v1816_v12 = vsel %vm1009_vm0, 0, %v1815_v41  ;;  %v1820_v27 = vperm.slane %v1814_v35, %v9770_v20 }
 0x154   : > { %v10278_v9 = vsel %vm1009_vm0, 0, %v1922_v1  ;;  %v4538_v30 = vunpack.c.l.b16 %v3001_v50  ;;  %v10282_v39 = vsel %vm1009_vm0, %v2487_v18, %v10221_v59  ;;  %v1882_v38 = vrot.slane %v1877_v6, 4  ;;  %v940_v18 = vpop.permute.xlu1 %939 }
 0x155   : > { %v4446_v23 = vpack.c.b16 %v4437_v26, %v4436_v21  ;;  %v4539_v29 = vunpack.c.l.b16 %v3007_v7  ;;  %v2453_v53 = vrot.slane %v1866_v19, 4  ;;  %v1776_v62 = vperm.slane %v1678_v55, %v9764_v4 }
 0x156   : > { %v1824_v41 = vperm.slane %v1816_v12, %v9770_v20  ;;  %v1834_v35 = vrot.slane %v1833_v36, 4  ;;  %v10289_v31 = vsel %vm1009_vm0, %v1922_v1, %v10195_v25  ;;  %v10292_v50 = vsel %vm1009_vm0, 0, %v1884_v11 }
 0x157   : > { %v4480_v47 = vsel %vm4448_vm1, %v4446_v23, 0  ;;  %v4548_v45 = vpack.c.b16 %v4539_v29, %v4538_v30  ;;  %v1825_v59 = vrot.slane %v1820_v27, 4  ;;  %v1680_v16 = vshrl.u32 %v1645_v3, 16 }
 0x158   : > { %4486 = vmatpush.bf16.xpose.msra.mxu0 %v4480_v47  ;;  %v10298_v55 = vperm.slane %v1833_v36, %v9770_v20  ;;  %v2730_v21 = vperm.slane %v9836_v17, %v9764_v4  ;;  %v10304_v1 = vsel %vm1009_vm0, 0, %v1882_v38  ;;  %v10307_v26 = vsel %vm1009_vm0, %v2453_v53, %v1864_v2 }
 0x159   : > { %v4581_v19 = vsel %vm4448_vm1, %v4548_v45, 0  ;;  %v1777_v3 = vrot.slane %v1776_v62, 4  ;;  %v10310_v7 = vsel %vm1009_vm0, %v1884_v11, %v1877_v6  ;;  %v1827_v36 = vrot.slane %v1824_v41, 4 }
 0x15a   : > { %4587 = vmatpush.bf16.xpose.msra.mxu1 %v4581_v19  ;;  %v1835_v23 = vsel %vm1009_vm0, 0, %v1834_v35  ;;  %v10315_v17 = vsel %vm1009_vm0, 0, %v1825_v59  ;;  %v14895_v30 = vshrl.u32 %v9714_v54, 16  ;;  %v2731_v38 = vrot.slane %v2730_v21, 4  ;;  %v942_v59 = vpop.permute.xlu2 %941  ;;  %v14898_v19 = vld [vmem:[#allocation25_spill] sm:$0xff]  ;;  %v14899_v21 = vld [vmem:[#allocation26_spill] sm:$0xff] }
 0x15b   : > { %v14896_v2 = vrot.slane %v9827_v42, 4  ;;  %v1844_v11 = vrot.slane %v10298_v55, 4  ;;  %v10325_v6 = vperm.slane %v1776_v62, %v9770_v20  ;;  %v2741_v47 = vperm.slane %v9832_v24, %v9764_v4 }
 0x15c   : > { %v1681_v29 = vpack.i.b16 %v1680_v16, %v14895_v30  ;;  %v1843_v54 = vperm.slane %v1835_v23, %v9770_v20  ;;  %v1778_v41 = vsel %vm1009_vm0, 0, %v1777_v3  ;;  %v14897_v42 = vperm.slane %v9815_v22, %v9764_v4 }
 0x15d   : > { %v2743_v53 = vsel %vm1009_vm0, %v14896_v2, %v9823_v13  ;;  %v2764_v35 = vperm.slane %v9858_v15, %v9764_v4  ;;  %v10339_v62 = vsel %vm1009_vm0, 0, %v1827_v36  ;;  %v14900_v23 = vrot.slane %v14899_v21, 4  ;;  %v9253_v2 = vld [vmem:[%s9725_s9 + $0x4] sm:$0xf] }
 0x15e   : > { %v2747_v45 = vperm.slane %v2743_v53, %v9764_v4  ;;  %v2732_v13 = vsel %vm1009_vm0, %v2731_v38, %v14897_v42  ;;  %v1795_v22 = vperm.slane %v1681_v29, %v9764_v4  ;;  %v963_v15 = vpack.i.b16 %v942_v59, %v9253_v2 }
 0x15f   : > { %v2736_v24 = vperm.slane %v2732_v13, %v9770_v20  ;;  %v2777_v3 = vsel %vm1009_vm0, %v14900_v23, %v14898_v19  ;;  %v2765_v30 = vrot.slane %v2764_v35, 4  ;;  %v10350_v53 = vsel %vm1009_vm0, %v1827_v36, %v1820_v27  ;;  %v14902_v13 = vld [vmem:[#allocation27_spill] sm:$0xff]  ;;  %v14903_v19 = vld [vmem:[#allocation24_spill] sm:$0xff] }
 0x160   : > { %v2748_v16 = vrot.slane %v2747_v45, 4  ;;  %v2781_v38 = vperm.slane %v2777_v3, %v9764_v4  ;;  %14901 = vst [vmem:[#allocation25_spill] sm:$0xff] %v10350_v53  ;;  %v2775_v45 = vperm.slane %v14902_v13, %v9764_v4  ;;  %v965_v25 = vshrl.u32 %v942_v59, 16  ;;  %v9254_v3 = vld [vmem:[%s9725_s9] sm:$0xf] }
 0x161   : > { %v14904_v29 = vperm.slane %v14903_v19, %v9764_v4  ;;  %v2987_v23 = vshrl.u32 %v2736_v24, 16  ;;  %v957_v2 = vpack.i.b16 %v940_v18, %v9254_v3  ;;  %v1786_v27 = vperm.slane %v1778_v41, %v9770_v20 }
 0x162   : > { %v2749_v42 = vsel %vm1009_vm0, %v2748_v16, %v2741_v47  ;;  %v2782_v47 = vrot.slane %v2781_v38, 4  ;;  %v14905_v16 = vld [vmem:[#allocation17_spill] sm:$0xff]  ;;  %v1796_v59 = vrot.slane %v1795_v22, 4  ;;  %v10367_v19 = vsel %vm1009_vm0, 0, %v1844_v11 }
 0x163   : > { %v2753_v21 = vperm.slane %v2749_v42, %v9770_v20  ;;  %v2766_v35 = vsel %vm1009_vm0, %v2765_v30, %v14904_v29  ;;  %v14906_v12 = vshrl.u32 %v14905_v16, 16  ;;  %v1046_v42 = vperm.slane %v963_v15, %v9764_v4  ;;  %14907 = vst [vmem:[#allocation26_spill] sm:$0xff] %v10367_v19 }
 0x164   : > { %v2770_v36 = vperm.slane %v2766_v35, %v9770_v20  ;;  %v1846_v30 = vrot.slane %v1843_v54, 4  ;;  %v2783_v29 = vsel %vm1009_vm0, %v2782_v47, %v2775_v45  ;;  %v1007_v38 = vperm.slane %v957_v2, %v9764_v4 }
 0x165   : > { %v966_v13 = vpack.i.b16 %v965_v25, %v14906_v12  ;;  %v2986_v60 = vpack.i.b16 %v2753_v21, %v2736_v24  ;;  %v2988_v37 = vshrl.u32 %v2753_v21, 16  ;;  %v2787_v41 = vperm.slane %v2783_v29, %v9770_v20 }
 0x166   : > { %v2993_v3 = vshrl.u32 %v2770_v36, 16  ;;  %v1047_v35 = vrot.slane %v1046_v42, 4  ;;  %v2419_v12 = vrot.slane %v10339_v62, 4  ;;  %v1789_v24 = vrot.slane %v1786_v27, 4 }
 0x167   : > { %v2989_v61 = vpack.i.b16 %v2988_v37, %v2987_v23  ;;  %v1065_v15 = vperm.slane %v966_v13, %v9764_v4  ;;  %v1797_v11 = vsel %vm1009_vm0, 0, %v1796_v59  ;;  %v2992_v54 = vpack.i.b16 %v2787_v41, %v2770_v36 }
 0x168   : > { %v4434_v21 = vunpack.c.l.b16 %v2986_v60  ;;  %v2994_v45 = vshrl.u32 %v2787_v41, 16  ;;  %v10378_v47 = vsel %vm1009_vm0, 0, %v1846_v30  ;;  %v1787_v37 = vrot.slane %v10325_v6, 4 }
 0x169   : > { %14908 = vst [vmem:[#allocation27_spill] sm:$0xff] %v10378_v47  ;;  %v1048_v23 = vsel %vm1009_vm0, 0, %v1047_v35  ;;  %v959_v2 = vshrl.u32 %v940_v18, 16  ;;  %v4435_v16 = vunpack.c.l.b16 %v2992_v54  ;;  %v4536_v25 = vunpack.c.l.b16 %v2989_v61  ;;  %v14910_v35 = vld [vmem:[#allocation16_spill] sm:$0xff] }
 0x16a   : > { %v2995_v29 = vpack.i.b16 %v2994_v45, %v2993_v3  ;;  %v1008_v62 = vrot.slane %v1007_v38, 4  ;;  %v1790_v27 = vsel %vm1009_vm0, 0, %v1789_v24  ;;  %v10384_v13 = vperm.slane %v1795_v22, %v9770_v20 }
 0x16b   : > { %v1805_v60 = vperm.slane %v1797_v11, %v9770_v20  ;;  %v1066_v36 = vrot.slane %v1065_v15, 4  ;;  %v10389_v59 = vsel %vm1009_vm0, %v1846_v30, %v10298_v55  ;;  %v4445_v41 = vpack.c.b16 %v4435_v16, %v4434_v21 }
 0x16c   : > { %14909 = vst [vmem:[#allocation24_spill] sm:$0xff] %v10389_v59  ;;  %v4537_v19 = vunpack.c.l.b16 %v2995_v29  ;;  %v1056_v18 = vperm.slane %v1048_v23, %v9770_v20  ;;  %v1788_v3 = vsel %vm1009_vm0, 0, %v1787_v37  ;;  %v10395_v61 = vsel %vm1009_vm0, %v1789_v24, %v10325_v6 }
 0x16d   : > { %v14911_v22 = vshrl.u32 %v14910_v35, 16  ;;  %v1010_v11 = vsel %vm1009_vm0, 0, %v1008_v62  ;;  %v2385_v45 = vrot.slane %v1790_v27, 4  ;;  %v4477_v53 = vsel %vm4448_vm1, %v4445_v41, 0 }
 0x16e   : > { %v4547_v55 = vpack.c.b16 %v4537_v19, %v4536_v25  ;;  %v1052_v30 = vperm.slane %v1046_v42, %v9770_v20  ;;  %v1806_v21 = vrot.slane %v10384_v13, 4  ;;  %v10403_v23 = vrot.slane %v1805_v60, 4  ;;  %4487 = vmatpush.bf16.xpose.msra.mxu0 %v4477_v53 }
 0x16f   : > { %v960_v54 = vpack.i.b16 %v959_v2, %v14911_v22  ;;  %v1067_v37 = vsel %vm1009_vm0, 0, %v1066_v36  ;;  %v10407_v6 = vperm.slane %v1065_v15, %v9770_v20  ;;  %v1059_v2 = vrot.slane %v1056_v18, 4 }
 0x170   : > { %v4578_v24 = vsel %vm4448_vm1, %v4547_v55, 0  ;;  %v10411_v16 = vperm.slane %v1007_v38, %v9770_v20  ;;  %v1018_v19 = vperm.slane %v1010_v11, %v9770_v20  ;;  %v10416_v42 = vsel %vm1009_vm0, %v2419_v12, %v10315_v17 }
 0x171   : > { %4588 = vmatpush.bf16.xpose.msra.mxu1 %v4578_v24  ;;  %v1027_v53 = vperm.slane %v960_v54, %v9764_v4  ;;  %v2662_v15 = vperm.slane %v10051_v32, %v9764_v4  ;;  %v10425_v38 = vsel %vm1009_vm0, %v2385_v45, %v1788_v3  ;;  %v1057_v62 = vrot.slane %v1052_v30, 4 }
 0x172   : > { %v1075_v27 = vperm.slane %v1067_v37, %v9770_v20  ;;  %v10429_v17 = vsel %vm1009_vm0, 0, %v1806_v21  ;;  %v10433_v12 = vsel %vm1009_vm0, 0, %v10403_v23  ;;  %v14912_v32 = vrot.slane %v10046_v0, 4  ;;  %v14914_v37 = vld [vmem:[#allocation30_spill] sm:$0xff] }
 0x173   : > { %v2663_v60 = vrot.slane %v2662_v15, 4  ;;  %v10440_v41 = vsel %vm1009_vm0, 0, %v1059_v2  ;;  %v1019_v3 = vrot.slane %v10411_v16, 4  ;;  %v10444_v35 = vrot.slane %v1018_v19, 4 }
 0x174   : > { %v2675_v36 = vsel %vm1009_vm0, %v14912_v32, %v10041_v56  ;;  %v1028_v22 = vrot.slane %v1027_v53, 4  ;;  %v14913_v54 = vperm.slane %v10031_v58, %v9764_v4  ;;  %v2673_v0 = vperm.slane %v10054_v51, %v9764_v4  ;;  %v14916_v51 = vld [vmem:[#allocation31_spill] sm:$0xff] }
 0x175   : > { %v2679_v56 = vperm.slane %v2675_v36, %v9764_v4  ;;  %v10454_v45 = vsel %vm1009_vm0, 0, %v1057_v62  ;;  %v10456_v55 = vrot.slane %v1075_v27, 4  ;;  %v2696_v24 = vperm.slane %v14914_v37, %v9764_v4 }
 0x176   : > { %v2664_v11 = vsel %vm1009_vm0, %v2663_v60, %v14913_v54  ;;  %v10462_v19 = vsel %vm1009_vm0, %v1059_v2, %v1052_v30  ;;  %v14915_v60 = vld [vmem:[#allocation29_spill] sm:$0xff]  ;;  %v14917_v32 = vrot.slane %v14916_v51, 4  ;;  %v10470_v62 = vsel %vm1009_vm0, 0, %v1019_v3 }
 0x177   : > { %v2668_v21 = vperm.slane %v2664_v11, %v9770_v20  ;;  %v2680_v15 = vrot.slane %v2679_v56, 4  ;;  %v10474_v27 = vsel %vm1009_vm0, 0, %v10444_v35  ;;  %v2697_v54 = vrot.slane %v2696_v24, 4  ;;  %v14918_v56 = vld [vmem:[#allocation32_spill] sm:$0xff] }
 0x178   : > { %v2709_v36 = vsel %vm1009_vm0, %v14917_v32, %v14915_v60  ;;  %v10478_v30 = vsel %vm1009_vm0, 0, %v1028_v22  ;;  %v2707_v37 = vperm.slane %v14918_v56, %v9764_v4  ;;  %v2594_v60 = vperm.slane %v10135_v43, %v9764_v4  ;;  %v14919_v32 = vld [vmem:[#allocation28_spill] sm:$0xff] }
 0x179   : > { %v2713_v11 = vperm.slane %v2709_v36, %v9764_v4  ;;  %v2681_v2 = vsel %vm1009_vm0, %v2680_v15, %v2673_v0  ;;  %v10486_v3 = vperm.slane %v1027_v53, %v9770_v20  ;;  %v14920_v24 = vperm.slane %v14919_v32, %v9764_v4 }
 0x17a   : > { %v2685_v51 = vperm.slane %v2681_v2, %v9770_v20  ;;  %v2975_v22 = vshrl.u32 %v2668_v21, 16  ;;  %v2595_v56 = vrot.slane %v2594_v60, 4  ;;  %v1037_v43 = vperm.slane %v10478_v30, %v9770_v20 }
 0x17b   : > { %v2698_v36 = vsel %vm1009_vm0, %v2697_v54, %v14920_v24  ;;  %v2714_v15 = vrot.slane %v2713_v11, 4  ;;  %v14921_v2 = vrot.slane %v10112_v48, 4  ;;  %v14922_v54 = vperm.slane %v10094_v57, %v9764_v4  ;;  %v14923_v57 = vld [vmem:[#allocation34_spill] sm:$0xff] }
 0x17c   : > { %v2702_v0 = vperm.slane %v2698_v36, %v9770_v20  ;;  %v2974_v29 = vpack.i.b16 %v2685_v51, %v2668_v21  ;;  %v2976_v53 = vshrl.u32 %v2685_v51, 16  ;;  %v2605_v11 = vperm.slane %v10129_v40, %v9764_v4 }
 0x17d   : > { %v2607_v58 = vsel %vm1009_vm0, %v14921_v2, %v10104_v8  ;;  %v2715_v32 = vsel %vm1009_vm0, %v2714_v15, %v2707_v37  ;;  %v2596_v24 = vsel %vm1009_vm0, %v2595_v56, %v14922_v54  ;;  %v2628_v37 = vperm.slane %v10075_v10, %v9764_v4 }
 0x17e   : > { %v2611_v60 = vperm.slane %v2607_v58, %v9764_v4  ;;  %v2719_v21 = vperm.slane %v2715_v32, %v9770_v20  ;;  %v4432_v30 = vunpack.c.l.b16 %v2974_v29  ;;  %v2977_v51 = vpack.i.b16 %v2976_v53, %v2975_v22  ;;  %v14925_v58 = vld [vmem:[#allocation35_spill] sm:$0xff]  ;;  %v944_v22 = vpop.permute.xlu0 %943 }
 0x17f   : > { %v2981_v48 = vshrl.u32 %v2702_v0, 16  ;;  %v2600_v8 = vperm.slane %v2596_v24, %v9770_v20  ;;  %v14924_v15 = vrot.slane %v10068_v46, 4  ;;  %v2639_v32 = vperm.slane %v14925_v58, %v9764_v4 }
 0x180   : > { %v2612_v36 = vrot.slane %v2611_v60, 4  ;;  %v2980_v40 = vpack.i.b16 %v2719_v21, %v2702_v0  ;;  %v2982_v2 = vshrl.u32 %v2719_v21, 16  ;;  %v4534_v53 = vunpack.c.l.b16 %v2977_v51  ;;  %v9255_v60 = vld [vmem:[%s9725_s9 + $0x8] sm:$0xf] }
 0x181   : > { %v2641_v56 = vsel %vm1009_vm0, %v14924_v15, %v14923_v57  ;;  %v2629_v24 = vrot.slane %v2628_v37, 4  ;;  %v969_v25 = vpack.i.b16 %v944_v22, %v9255_v60  ;;  %v14926_v57 = vld [vmem:[#allocation33_spill] sm:$0xff]  ;;  %v2963_v15 = vshrl.u32 %v2600_v8, 16 }
 0x182   : > { %v2645_v29 = vperm.slane %v2641_v56, %v9764_v4  ;;  %v2613_v54 = vsel %vm1009_vm0, %v2612_v36, %v2605_v11  ;;  %v4433_v10 = vunpack.c.l.b16 %v2980_v40  ;;  %v2983_v18 = vpack.i.b16 %v2982_v2, %v2981_v48  ;;  %v14928_v2 = vld [vmem:[#allocation18_spill] sm:$0xff] }
 0x183   : > { %v2617_v46 = vperm.slane %v2613_v54, %v9770_v20  ;;  %v14927_v0 = vperm.slane %v14926_v57, %v9764_v4  ;;  %v971_v58 = vshrl.u32 %v944_v22, 16  ;;  %v1084_v56 = vperm.slane %v969_v25, %v9764_v4 }
 0x184   : > { %v2646_v59 = vrot.slane %v2645_v29, 4  ;;  %v4444_v51 = vpack.c.b16 %v4433_v10, %v4432_v30  ;;  %v4535_v47 = vunpack.c.l.b16 %v2983_v18  ;;  %v14929_v29 = vshrl.u32 %v14928_v2, 16 }
 0x185   : > { %v2630_v21 = vsel %vm1009_vm0, %v2629_v24, %v14927_v0  ;;  %v2962_v37 = vpack.i.b16 %v2617_v46, %v2600_v8  ;;  %v2964_v40 = vshrl.u32 %v2617_v46, 16  ;;  %v1085_v57 = vrot.slane %v1084_v56, 4  ;;  %v946_v0 = vpop.permute.xlu1 %945  ;;  %v9256_v46 = vld [vmem:[%s9725_s9 + $0xc] sm:$0xf] }
 0x186   : > { %v2634_v11 = vperm.slane %v2630_v21, %v9770_v20  ;;  %v2647_v36 = vsel %vm1009_vm0, %v2646_v59, %v2639_v32  ;;  %v972_v54 = vpack.i.b16 %v971_v58, %v14929_v29  ;;  %v4474_v24 = vsel %vm4448_vm1, %v4444_v51, 0 }
 0x187   : > { %v2651_v48 = vperm.slane %v2647_v36, %v9770_v20  ;;  %v4546_v60 = vpack.c.b16 %v4535_v47, %v4534_v53  ;;  %4488 = vmatpush.bf16.xpose.msra.mxu0 %v4474_v24  ;;  %v4430_v18 = vunpack.c.l.b16 %v2962_v37  ;;  %v2965_v30 = vpack.i.b16 %v2964_v40, %v2963_v15 }
 0x188   : > { %v2969_v22 = vshrl.u32 %v2634_v11, 16  ;;  %v1086_v8 = vsel %vm1009_vm0, 0, %v1085_v57  ;;  %v1103_v32 = vperm.slane %v972_v54, %v9764_v4  ;;  %v975_v21 = vpack.i.b16 %v946_v0, %v9256_v46 }
 0x189   : > { %v2968_v25 = vpack.i.b16 %v2651_v48, %v2634_v11  ;;  %v2970_v10 = vshrl.u32 %v2651_v48, 16  ;;  %v4575_v59 = vsel %vm4448_vm1, %v4546_v60, 0  ;;  %v1040_v58 = vrot.slane %v1037_v43, 4 }
 0x18a   : > { %4589 = vmatpush.bf16.xpose.msra.mxu1 %v4575_v59  ;;  %v4532_v53 = vunpack.c.l.b16 %v2965_v30  ;;  %v10541_v11 = vsel %vm1009_vm0, %v10403_v23, %v10384_v13  ;;  %v2402_v15 = vrot.slane %v10433_v12, 4  ;;  %v1094_v36 = vperm.slane %v1086_v8, %v9770_v20 }
 0x18b   : > { %v4431_v51 = vunpack.c.l.b16 %v2968_v25  ;;  %v2971_v47 = vpack.i.b16 %v2970_v10, %v2969_v22  ;;  %v1104_v48 = vrot.slane %v1103_v32, 4  ;;  %v14930_v37 = vrot.slane %v10407_v6, 4 }
 0x18c   : > { %v1079_v43 = vsel %vm1009_vm0, 0, %v10456_v55  ;;  %v1346_v54 = vperm.slane %v10462_v19, %v9764_v4  ;;  %v14931_v13 = vrot.slane %v10440_v41, 4  ;;  %v14932_v24 = vrot.slane %v10474_v27, 4 }
 0x18d   : > { %v1077_v40 = vsel %vm1009_vm0, 0, %v14930_v37  ;;  %v4443_v2 = vpack.c.b16 %v4431_v51, %v4430_v18  ;;  %v4533_v29 = vunpack.c.l.b16 %v2971_v47  ;;  %v1122_v22 = vperm.slane %v975_v21, %v9764_v4 }
 0x18e   : > { %v1348_v23 = vsel %vm1009_vm0, %v14931_v13, %v10454_v45  ;;  %v1314_v60 = vsel %vm1009_vm0, %v14932_v24, %v10470_v62  ;;  %v10564_v57 = vsel %vm1009_vm0, %v10456_v55, %v10407_v6  ;;  %v1038_v25 = vrot.slane %v10486_v3, 4 }
 0x18f   : > { %v1041_v18 = vsel %vm1009_vm0, 0, %v1040_v58  ;;  %v4545_v30 = vpack.c.b16 %v4533_v29, %v4532_v53  ;;  %v4471_v41 = vsel %vm4448_vm1, %v4443_v2, 0  ;;  %v1090_v45 = vperm.slane %v1084_v56, %v9770_v20 }
 0x190   : > { %v1097_v10 = vrot.slane %v1094_v36, 4  ;;  %v1105_v27 = vsel %vm1009_vm0, 0, %v1104_v48  ;;  %v1352_v62 = vperm.slane %v1348_v23, %v9764_v4  ;;  %v1364_v59 = vrot.slane %v1079_v43, 4  ;;  %4489 = vmatpush.bf16.xpose.msra.mxu0 %v4471_v41 }
 0x191   : > { %v1318_v8 = vperm.slane %v1314_v60, %v9764_v4  ;;  %v977_v6 = vshrl.u32 %v946_v0, 16  ;;  %v4572_v55 = vsel %vm4448_vm1, %v4545_v30, 0  ;;  %v10575_v46 = vperm.slane %v1103_v32, %v9770_v20 }
 0x192   : > { %v1123_v21 = vrot.slane %v1122_v22, 4  ;;  %v2526_v51 = vperm.slane %v10210_v52, %v9764_v4  ;;  %v1363_v56 = vperm.slane %v10564_v57, %v9764_v4  ;;  %v10584_v47 = vsel %vm1009_vm0, %v10444_v35, %v10411_v16  ;;  %4590 = vmatpush.bf16.xpose.msra.mxu1 %v4572_v55  ;;  %v14933_v16 = vld [vmem:[#allocation19_spill] sm:$0xff] }
 0x193   : > { %v1330_v53 = vrot.slane %v1041_v18, 4  ;;  %v1113_v0 = vperm.slane %v1105_v27, %v9770_v20  ;;  %v1039_v36 = vsel %vm1009_vm0, 0, %v1038_v25  ;;  %v10590_v32 = vsel %vm1009_vm0, %v1040_v58, %v10486_v3 }
 0x194   : > { %v1095_v48 = vrot.slane %v1090_v45, 4  ;;  %v1098_v52 = vsel %vm1009_vm0, 0, %v1097_v10  ;;  %v10593_v37 = vrot.slane %v1352_v62, 4  ;;  %v10596_v43 = vsel %vm1009_vm0, %v1364_v59, %v1077_v40 }
 0x195   : > { %v14934_v35 = vshrl.u32 %v14933_v16, 16  ;;  %v2527_v29 = vrot.slane %v2526_v51, 4  ;;  %v1312_v13 = vperm.slane %v10584_v47, %v9764_v4  ;;  %v10602_v23 = vrot.slane %v1318_v8, 4  ;;  %v14937_v51 = vld [vmem:[#allocation38_spill] sm:$0xff] }
 0x196   : > { %v1114_v3 = vrot.slane %v10575_v46, 4  ;;  %v1124_v58 = vsel %vm1009_vm0, 0, %v1123_v21  ;;  %v1329_v24 = vperm.slane %v10590_v32, %v9764_v4  ;;  %v10609_v60 = vsel %vm1009_vm0, %v1330_v53, %v1039_v36  ;;  %v14938_v53 = vld [vmem:[#allocation37_spill] sm:$0xff] }
 0x197   : > { %v978_v2 = vpack.i.b16 %v977_v6, %v14934_v35  ;;  %v10611_v40 = vrot.slane %v1113_v0, 4  ;;  %v1381_v25 = vrot.slane %v1098_v52, 4  ;;  %v1096_v18 = vsel %vm1009_vm0, 0, %v1095_v48 }
 0x198   : > { %v10615_v30 = vperm.slane %v1122_v22, %v9770_v20  ;;  %v14935_v41 = vperm.slane %v10189_v34, %v9764_v4  ;;  %v14936_v62 = vrot.slane %v10186_v49, 4  ;;  %v1132_v8 = vperm.slane %v1124_v58, %v9770_v20 }
 0x199   : > { %v10627_v6 = vperm.slane %v978_v2, %v9764_v4  ;;  %v2537_v55 = vperm.slane %v10214_v14, %v9764_v4  ;;  %v10633_v21 = vsel %vm1009_vm0, 0, %v1114_v3  ;;  %v2560_v49 = vperm.slane %v14937_v51, %v9764_v4  ;;  %v14940_v2 = vld [vmem:[#allocation39_spill] sm:$0xff] }
 0x19a   : > { %v2528_v27 = vsel %vm1009_vm0, %v2527_v29, %v14935_v41  ;;  %v2539_v59 = vsel %vm1009_vm0, %v14936_v62, %v10205_v28  ;;  %v14939_v28 = vrot.slane %v10159_v5, 4  ;;  %v10644_v36 = vsel %vm1009_vm0, 0, %v10611_v40 }
 0x19b   : > { %v2543_v22 = vperm.slane %v2539_v59, %v9764_v4  ;;  %v2532_v34 = vperm.slane %v2528_v27, %v9770_v20  ;;  %v10647_v14 = vsel %vm1009_vm0, %v1097_v10, %v1090_v45  ;;  %v10650_v48 = vsel %vm1009_vm0, %v1381_v25, %v1096_v18  ;;  %v14941_v25 = vld [vmem:[#allocation36_spill] sm:$0xff] }
 0x19c   : > { %v2573_v0 = vsel %vm1009_vm0, %v14939_v28, %v14938_v53  ;;  %v1133_v16 = vrot.slane %v10615_v30, 4  ;;  %v2561_v35 = vrot.slane %v2560_v49, 4  ;;  %v2571_v29 = vperm.slane %v14940_v2, %v9764_v4 }
 0x19d   : > { %v2544_v52 = vrot.slane %v2543_v22, 4  ;;  %v2577_v5 = vperm.slane %v2573_v0, %v9764_v4  ;;  %v10656_v3 = vrot.slane %v1132_v8, 4  ;;  %v1142_v58 = vrot.slane %v10627_v6, 4 }
 0x19e   : > { %v2458_v45 = vperm.slane %v10307_v26, %v9764_v4  ;;  %v14942_v18 = vperm.slane %v14941_v25, %v9764_v4  ;;  %v2951_v59 = vshrl.u32 %v2532_v34, 16  ;;  %v2469_v51 = vperm.slane %v10310_v7, %v9764_v4 }
 0x19f   : > { %v2545_v41 = vsel %vm1009_vm0, %v2544_v52, %v2537_v55  ;;  %v2578_v62 = vrot.slane %v2577_v5, 4  ;;  %v14943_v55 = vrot.slane %v10292_v50, 4  ;;  %v14944_v2 = vperm.slane %v10273_v33, %v9764_v4 }
 0x1a0   : > { %v2549_v10 = vperm.slane %v2545_v41, %v9770_v20  ;;  %v2562_v27 = vsel %vm1009_vm0, %v2561_v35, %v14942_v18  ;;  %v2459_v8 = vrot.slane %v2458_v45, 4  ;;  %v2492_v7 = vperm.slane %v10282_v39, %v9764_v4  ;;  %v950_v18 = vpop.permute.xlu0 %949 }
 0x1a1   : > { %v2566_v22 = vperm.slane %v2562_v27, %v9770_v20  ;;  %v2471_v26 = vsel %vm1009_vm0, %v14943_v55, %v10304_v1  ;;  %v2579_v49 = vsel %vm1009_vm0, %v2578_v62, %v2571_v29  ;;  %v1143_v50 = vsel %vm1009_vm0, 0, %v1142_v58 }
 0x1a2   : > { %v2950_v53 = vpack.i.b16 %v2549_v10, %v2532_v34  ;;  %v2952_v28 = vshrl.u32 %v2549_v10, 16  ;;  %v2475_v0 = vperm.slane %v2471_v26, %v9764_v4  ;;  %v2583_v52 = vperm.slane %v2579_v49, %v9770_v20 }
 0x1a3   : > { %v2957_v35 = vshrl.u32 %v2566_v22, 16  ;;  %v2460_v5 = vsel %vm1009_vm0, %v2459_v8, %v14944_v2  ;;  %v2493_v25 = vrot.slane %v2492_v7, 4  ;;  %v2503_v62 = vperm.slane %v10289_v31, %v9764_v4 }
 0x1a4   : > { %v2953_v1 = vpack.i.b16 %v2952_v28, %v2951_v59  ;;  %v2464_v29 = vperm.slane %v2460_v5, %v9770_v20  ;;  %v2476_v34 = vrot.slane %v2475_v0, 4  ;;  %v2956_v41 = vpack.i.b16 %v2583_v52, %v2566_v22  ;;  %v14947_v5 = vld [vmem:[#allocation20_spill] sm:$0xff] }
 0x1a5   : > { %v4428_v45 = vunpack.c.l.b16 %v2950_v53  ;;  %v2958_v10 = vshrl.u32 %v2583_v52, 16  ;;  %v14945_v39 = vrot.slane %v10278_v9, 4  ;;  %v14946_v22 = vperm.slane %v10251_v63, %v9764_v4  ;;  %v9257_v53 = vld [vmem:[%s9725_s9 + $0x14] sm:$0xf] }
 0x1a6   : > { %v4530_v27 = vunpack.c.l.b16 %v2953_v1  ;;  %v2477_v33 = vsel %vm1009_vm0, %v2476_v34, %v2469_v51  ;;  %v4429_v59 = vunpack.c.l.b16 %v2956_v41  ;;  %v2939_v51 = vshrl.u32 %v2464_v29, 16 }
 0x1a7   : > { %v2505_v58 = vsel %vm1009_vm0, %v14945_v39, %v10257_v44  ;;  %v2959_v8 = vpack.i.b16 %v2958_v10, %v2957_v35  ;;  %v2481_v55 = vperm.slane %v2477_v33, %v9770_v20  ;;  %v2494_v26 = vsel %vm1009_vm0, %v2493_v25, %v14946_v22 }
 0x1a8   : > { %v2509_v49 = vperm.slane %v2505_v58, %v9764_v4  ;;  %v987_v28 = vpack.i.b16 %v950_v18, %v9257_v53  ;;  %v989_v31 = vshrl.u32 %v950_v18, 16  ;;  %v4442_v0 = vpack.c.b16 %v4429_v59, %v4428_v45  ;;  %v9258_v53 = vld [vmem:[%s9725_s9 + $0x10] sm:$0xf] }
 0x1a9   : > { %v4531_v52 = vunpack.c.l.b16 %v2959_v8  ;;  %v2498_v9 = vperm.slane %v2494_v26, %v9770_v20  ;;  %v2940_v44 = vshrl.u32 %v2481_v55, 16  ;;  %v1151_v35 = vperm.slane %v1143_v50, %v9770_v20  ;;  %v948_v26 = vpop.permute.xlu2 %947 }
 0x1aa   : > { %v2510_v2 = vrot.slane %v2509_v49, 4  ;;  %v14948_v7 = vshrl.u32 %v14947_v5, 16  ;;  %v1198_v63 = vperm.slane %v987_v28, %v9764_v4  ;;  %v1136_v34 = vsel %vm1009_vm0, 0, %v10656_v3 }
 0x1ab   : > { %v4468_v41 = vsel %vm4448_vm1, %v4442_v0, 0  ;;  %v4544_v10 = vpack.c.b16 %v4531_v52, %v4530_v27  ;;  %v2938_v25 = vpack.i.b16 %v2481_v55, %v2464_v29  ;;  %v10710_v45 = vsel %vm1009_vm0, %v10611_v40, %v10575_v46 }
 0x1ac   : > { %v990_v1 = vpack.i.b16 %v989_v31, %v14948_v7  ;;  %v1147_v50 = vperm.slane %v10627_v6, %v9770_v20  ;;  %4490 = vmatpush.bf16.xpose.msra.mxu0 %v4468_v41  ;;  %v2511_v18 = vsel %vm1009_vm0, %v2510_v2, %v2503_v62  ;;  %v1199_v33 = vrot.slane %v1198_v63, 4 }
 0x1ad   : > { %v4569_v39 = vsel %vm4448_vm1, %v4544_v10, 0  ;;  %v2515_v58 = vperm.slane %v2511_v18, %v9770_v20  ;;  %v2941_v59 = vpack.i.b16 %v2940_v44, %v2939_v51  ;;  %v2945_v27 = vshrl.u32 %v2498_v9, 16 }
 0x1ae   : > { %v1134_v29 = vsel %vm1009_vm0, 0, %v1133_v16  ;;  %v1154_v46 = vrot.slane %v1151_v35, 4  ;;  %v1415_v40 = vrot.slane %v1136_v34, 4  ;;  %4591 = vmatpush.bf16.xpose.msra.mxu1 %v4569_v39  ;;  %v1217_v6 = vperm.slane %v990_v1, %v9764_v4 }
 0x1af   : > { %v2944_v8 = vpack.i.b16 %v2515_v58, %v2498_v9  ;;  %v4426_v55 = vunpack.c.l.b16 %v2938_v25  ;;  %v2946_v62 = vshrl.u32 %v2515_v58, 16  ;;  %v1200_v22 = vsel %vm1009_vm0, 0, %v1199_v33 }
 0x1b0   : > { %v1380_v49 = vperm.slane %v10647_v14, %v9764_v4  ;;  %v1386_v51 = vperm.slane %v10650_v48, %v9764_v4  ;;  %v1397_v16 = vperm.slane %v10710_v45, %v9764_v4  ;;  %v981_v28 = vpack.i.b16 %v948_v26, %v9258_v53 }
 0x1b1   : > { %v1398_v31 = vrot.slane %v10644_v36, 4  ;;  %v4427_v0 = vunpack.c.l.b16 %v2944_v8  ;;  %v2947_v52 = vpack.i.b16 %v2946_v62, %v2945_v27  ;;  %v4528_v9 = vunpack.c.l.b16 %v2941_v59  ;;  %v14949_v8 = vld [vmem:[#allocation22_spill] sm:$0xff] }
 0x1b2   : > { %v1152_v44 = vrot.slane %v1147_v50, 4  ;;  %v1416_v35 = vsel %vm1009_vm0, %v1415_v40, %v1134_v29  ;;  %v1208_v2 = vperm.slane %v1200_v22, %v9770_v20  ;;  %v1218_v5 = vrot.slane %v1217_v6, 4 }
 0x1b3   : > { %v1155_v7 = vsel %vm1009_vm0, 0, %v1154_v46  ;;  %v4441_v1 = vpack.c.b16 %v4427_v0, %v4426_v55  ;;  %v4529_v48 = vunpack.c.l.b16 %v2947_v52  ;;  %v983_v34 = vshrl.u32 %v948_v26, 16 }
 0x1b4   : > { %v10733_v41 = vrot.slane %v1386_v51, 4  ;;  %v1204_v10 = vperm.slane %v1198_v63, %v9770_v20  ;;  %v10737_v36 = vperm.slane %v1217_v6, %v9770_v20  ;;  %v1160_v25 = vperm.slane %v981_v28, %v9764_v4 }
 0x1b5   : > { %v10742_v18 = vsel %vm1009_vm0, %v1398_v31, %v10633_v21  ;;  %v10747_v33 = vsel %vm1009_vm0, %v10656_v3, %v10615_v30  ;;  %v4465_v39 = vsel %vm4448_vm1, %v4441_v1, 0  ;;  %v4543_v58 = vpack.c.b16 %v4529_v48, %v4528_v9 }
 0x1b6   : > { %v1420_v59 = vperm.slane %v1416_v35, %v9764_v4  ;;  %v1432_v63 = vrot.slane %v1155_v7, 4  ;;  %4491 = vmatpush.bf16.xpose.msra.mxu0 %v4465_v39  ;;  %v1211_v27 = vrot.slane %v1208_v2, 4  ;;  %v1219_v29 = vsel %vm1009_vm0, 0, %v1218_v5 }
 0x1b7   : > { %v1153_v40 = vsel %vm1009_vm0, 0, %v1152_v44  ;;  %v10754_v21 = vsel %vm1009_vm0, %v1154_v46, %v1147_v50  ;;  %v4566_v6 = vsel %vm4448_vm1, %v4543_v58, 0  ;;  %v14950_v30 = vshrl.u32 %v14949_v8, 16  ;;  %v14952_v58 = vld [vmem:[#allocation25_spill] sm:$0xff] }
 0x1b8   : > { %4592 = vmatpush.bf16.xpose.msra.mxu1 %v4566_v6  ;;  %v1209_v55 = vrot.slane %v1204_v10, 4  ;;  %v1228_v62 = vrot.slane %v10737_v36, 4  ;;  %v1161_v22 = vrot.slane %v1160_v25, 4  ;;  %v2390_v26 = vperm.slane %v10425_v38, %v9764_v4  ;;  %v14955_v6 = vld [vmem:[#allocation27_spill] sm:$0xff] }
 0x1b9   : > { %v984_v3 = vpack.i.b16 %v983_v34, %v14950_v30  ;;  %v1414_v51 = vperm.slane %v10747_v33, %v9764_v4  ;;  %v1227_v53 = vperm.slane %v1219_v29, %v9770_v20  ;;  %v2403_v50 = vsel %vm1009_vm0, %v2402_v15, %v10429_v17 }
 0x1ba   : > { %v2424_v46 = vperm.slane %v10416_v42, %v9764_v4  ;;  %v10771_v28 = vrot.slane %v1420_v59, 4  ;;  %v1431_v31 = vperm.slane %v10754_v21, %v9764_v4  ;;  %v10776_v38 = vsel %vm1009_vm0, %v1432_v63, %v1153_v40  ;;  %v14954_v40 = vld [vmem:[#allocation26_spill] sm:$0xff] }
 0x1bb   : > { %v1212_v0 = vsel %vm1009_vm0, 0, %v1211_v27  ;;  %v10780_v52 = vperm.slane %v984_v3, %v9764_v4  ;;  %v2391_v9 = vrot.slane %v2390_v26, 4  ;;  %v2401_v17 = vperm.slane %v10541_v11, %v9764_v4  ;;  %v14957_v3 = vld [vmem:[#allocation24_spill] sm:$0xff] }
 0x1bc   : > { %v2407_v12 = vperm.slane %v2403_v50, %v9764_v4  ;;  %v1210_v42 = vsel %vm1009_vm0, 0, %v1209_v55  ;;  %v10787_v15 = vsel %vm1009_vm0, 0, %v1228_v62  ;;  %v1162_v44 = vsel %vm1009_vm0, 0, %v1161_v22 }
 0x1bd   : > { %v2425_v35 = vrot.slane %v2424_v46, 4  ;;  %v10790_v2 = vrot.slane %v1227_v53, 4  ;;  %v10793_v5 = vperm.slane %v1160_v25, %v9770_v20  ;;  %v14951_v7 = vperm.slane %v10395_v61, %v9764_v4 }
 0x1be   : > { %v2408_v1 = vrot.slane %v2407_v12, 4  ;;  %v10800_v48 = vsel %vm1009_vm0, %v1211_v27, %v1204_v10  ;;  %v1483_v34 = vrot.slane %v1212_v0, 4  ;;  %v14953_v59 = vperm.slane %v14952_v58, %v9764_v4 }
 0x1bf   : > { %v2392_v11 = vsel %vm1009_vm0, %v2391_v9, %v14951_v7  ;;  %v1170_v25 = vperm.slane %v1162_v44, %v9770_v20  ;;  %v1180_v29 = vrot.slane %v10780_v52, 4  ;;  %v14956_v8 = vrot.slane %v14955_v6, 4 }
 0x1c0   : > { %v2396_v39 = vperm.slane %v2392_v11, %v9770_v20  ;;  %v2426_v63 = vsel %vm1009_vm0, %v2425_v35, %v14953_v59  ;;  %v2409_v61 = vsel %vm1009_vm0, %v2408_v1, %v2401_v17  ;;  %v2435_v55 = vperm.slane %v14957_v3, %v9764_v4  ;;  %v9259_v59 = vld [vmem:[%s9725_s9 + $0x1c] sm:$0xf] }
 0x1c1   : > { %v2437_v10 = vsel %vm1009_vm0, %v14956_v8, %v14954_v40  ;;  %v2413_v27 = vperm.slane %v2409_v61, %v9770_v20  ;;  %v2430_v30 = vperm.slane %v2426_v63, %v9770_v20  ;;  %v10821_v22 = vsel %vm1009_vm0, 0, %v10790_v2  ;;  %v14958_v8 = vld [vmem:[#allocation23_spill] sm:$0xff] }
 0x1c2   : > { %v2441_v62 = vperm.slane %v2437_v10, %v9764_v4  ;;  %v1171_v26 = vrot.slane %v10793_v5, 4  ;;  %v2927_v53 = vshrl.u32 %v2396_v39, 16  ;;  %v1320_v50 = vsel %vm1009_vm0, %v10602_v23, %v1312_v13  ;;  %v954_v13 = vpop.permute.xlu2 %953 }
 0x1c3   : > { %v1482_v46 = vperm.slane %v10800_v48, %v9764_v4  ;;  %v10832_v0 = vsel %vm1009_vm0, %v1483_v34, %v1210_v42  ;;  %v2926_v17 = vpack.i.b16 %v2413_v27, %v2396_v39  ;;  %v2928_v12 = vshrl.u32 %v2413_v27, 16 }
 0x1c4   : > { %v2442_v9 = vrot.slane %v2441_v62, 4  ;;  %v1324_v44 = vperm.slane %v1320_v50, %v9770_v20  ;;  %v1335_v35 = vperm.slane %v10609_v60, %v9764_v4  ;;  %v1354_v47 = vsel %vm1009_vm0, %v10593_v37, %v1346_v54 }
 0x1c5   : > { %v10842_v23 = vrot.slane %v1170_v25, 4  ;;  %v1181_v42 = vsel %vm1009_vm0, 0, %v1180_v29  ;;  %v2933_v11 = vshrl.u32 %v2430_v30, 16  ;;  %v2929_v34 = vpack.i.b16 %v2928_v12, %v2927_v53  ;;  %v952_v53 = vpop.permute.xlu1 %951 }
 0x1c6   : > { %v2443_v7 = vsel %vm1009_vm0, %v2442_v9, %v2435_v55  ;;  %v1336_v39 = vrot.slane %v1335_v35, 4  ;;  %v1369_v60 = vperm.slane %v10596_v43, %v9764_v4  ;;  %v4424_v58 = vunpack.c.l.b16 %v2926_v17  ;;  %v10870_v17 = vld [vmem:[%s10867_s13 + $0x38] sm:$0xf] }
 0x1c7   : > { %v2447_v1 = vperm.slane %v2443_v7, %v9770_v20  ;;  %v1358_v19 = vperm.slane %v1354_v47, %v9770_v20  ;;  %v999_v54 = vpack.i.b16 %v954_v13, %v9259_v59  ;;  %v1001_v37 = vshrl.u32 %v954_v13, 16  ;;  %3064 = vrot.lane.b32.xlu2 %v10870_v17, %s9407_s24  ;;  %v9260_v59 = vld [vmem:[%s9725_s9 + $0x18] sm:$0xf] }
 0x1c8   : > { %v1337_v29 = vsel %vm1009_vm0, %v1336_v39, %v1329_v24  ;;  %v1583_v61 = vshrl.u32 %v1324_v44, 16  ;;  %v1370_v6 = vrot.slane %v1369_v60, 4  ;;  %v14959_v43 = vshrl.u32 %v14958_v8, 16  ;;  %v10891_v8 = vld [vmem:[%s10867_s13 + $0x3c] sm:$0xf] }
 0x1c9   : > { %v2932_v63 = vpack.i.b16 %v2447_v1, %v2430_v30  ;;  %v2934_v25 = vshrl.u32 %v2447_v1, 16  ;;  %v1341_v40 = vperm.slane %v1337_v29, %v9770_v20  ;;  %v1274_v27 = vperm.slane %v999_v54, %v9764_v4 }
 0x1ca   : > { %v1002_v10 = vpack.i.b16 %v1001_v37, %v14959_v43  ;;  %v1174_v3 = vsel %vm1009_vm0, 0, %v10842_v23  ;;  %v4526_v62 = vunpack.c.l.b16 %v2929_v34  ;;  %v1189_v32 = vperm.slane %v1181_v42, %v9770_v20 }
 0x1cb   : > { %v4425_v30 = vunpack.c.l.b16 %v2932_v63  ;;  %v2935_v55 = vpack.i.b16 %v2934_v25, %v2933_v11  ;;  %v1371_v24 = vsel %vm1009_vm0, %v1370_v6, %v1363_v56  ;;  %v1584_v50 = vshrl.u32 %v1341_v40, 16 }
 0x1cc   : > { %v1589_v9 = vshrl.u32 %v1358_v19, 16  ;;  %v1375_v47 = vperm.slane %v1371_v24, %v9770_v20  ;;  %v1582_v13 = vpack.i.b16 %v1341_v40, %v1324_v44  ;;  %v1275_v57 = vrot.slane %v1274_v27, 4  ;;  %v14960_v40 = vld [vmem:[#allocation21_spill] sm:$0xff] }
 0x1cd   : > { %v4440_v12 = vpack.c.b16 %v4425_v30, %v4424_v58  ;;  %v4527_v35 = vunpack.c.l.b16 %v2935_v55  ;;  %v1585_v42 = vpack.i.b16 %v1584_v50, %v1583_v61  ;;  %v1293_v56 = vperm.slane %v1002_v10, %v9764_v4 }
 0x1ce   : > { %v995_v7 = vshrl.u32 %v952_v53, 16  ;;  %v1588_v34 = vpack.i.b16 %v1375_v47, %v1358_v19  ;;  %v1590_v39 = vshrl.u32 %v1375_v47, 16  ;;  %v1172_v60 = vsel %vm1009_vm0, 0, %v1171_v26 }
 0x1cf   : > { %v4462_v11 = vsel %vm4448_vm1, %v4440_v12, 0  ;;  %v4542_v1 = vpack.c.b16 %v4527_v35, %v4526_v62  ;;  %v1185_v58 = vperm.slane %v10780_v52, %v9770_v20  ;;  %v1449_v44 = vrot.slane %v1174_v3, 4  ;;  %3066 = vrot.lane.b32.xlu2 %v10891_v8, %s9407_s24 }
 0x1d0   : > { %4492 = vmatpush.bf16.xpose.msra.mxu0 %v4462_v11  ;;  %v993_v54 = vpack.i.b16 %v952_v53, %v9260_v59  ;;  %v4412_v63 = vunpack.c.l.b16 %v1582_v13  ;;  %v4413_v25 = vunpack.c.l.b16 %v1588_v34  ;;  %v1591_v29 = vpack.i.b16 %v1590_v39, %v1589_v9 }
 0x1d1   : > { %v4563_v37 = vsel %vm4448_vm1, %v4542_v1, 0  ;;  %v10885_v19 = vsel %vm1009_vm0, %v10790_v2, %v10737_v36  ;;  %v1500_v61 = vrot.slane %v10821_v22, 4  ;;  %v1294_v26 = vrot.slane %v1293_v56, 4 }
 0x1d2   : > { %4593 = vmatpush.bf16.xpose.msra.mxu1 %v4563_v37  ;;  %v14961_v52 = vshrl.u32 %v14960_v40, 16  ;;  %v1192_v43 = vrot.slane %v1189_v32, 4  ;;  %v4514_v10 = vunpack.c.l.b16 %v1585_v42  ;;  %v4515_v3 = vunpack.c.l.b16 %v1591_v29 }
 0x1d3   : > { %v1276_v30 = vsel %vm1009_vm0, 0, %v1275_v57  ;;  %v1488_v55 = vperm.slane %v10832_v0, %v9764_v4  ;;  %v1450_v36 = vsel %vm1009_vm0, %v1449_v44, %v1172_v60  ;;  %v1236_v2 = vperm.slane %v993_v54, %v9764_v4 }
 0x1d4   : > { %v996_v6 = vpack.i.b16 %v995_v7, %v14961_v52  ;;  %v1499_v62 = vperm.slane %v10885_v19, %v9764_v4  ;;  %v1190_v53 = vrot.slane %v1185_v58, 4  ;;  %v10904_v32 = vsel %vm1009_vm0, %v10842_v23, %v10793_v5  ;;  %v11028_v19 = vld [vmem:[%s10867_s13 + $0x28] sm:$0xf] }
 0x1d5   : > { %v4420_v24 = vpack.c.b16 %v4413_v25, %v4412_v63  ;;  %v1284_v0 = vperm.slane %v1276_v30, %v9770_v20  ;;  %v1295_v50 = vsel %vm1009_vm0, 0, %v1294_v26  ;;  %v1237_v9 = vrot.slane %v1236_v2, 4 }
 0x1d6   : > { %v1255_v22 = vperm.slane %v996_v6, %v9764_v4  ;;  %v1193_v35 = vsel %vm1009_vm0, 0, %v1192_v43  ;;  %v1454_v47 = vperm.slane %v1450_v36, %v9764_v4  ;;  %v4522_v13 = vpack.c.b16 %v4515_v3, %v4514_v10 }
 0x1d7   : > { %8564 = vmatmul.msk.bf16.vlgmr.msra.gmra.mxu0 %vm4448_vm1, %v4420_v24  ;;  %v10914_v5 = vperm.slane %v1274_v27, %v9770_v20  ;;  %v10916_v23 = vrot.slane %v1488_v55, 4  ;;  %v10920_v42 = vsel %vm1009_vm0, %v1500_v61, %v10787_v15  ;;  %v10923_v57 = vperm.slane %v1293_v56, %v9770_v20  ;;  %v10991_v24 = vld [vmem:[%s10867_s13 + $0x34] sm:$0xf] }
 0x1d8   : > { %v1256_v12 = vrot.slane %v1255_v22, 4  ;;  %v1238_v7 = vsel %vm1009_vm0, 0, %v1237_v9  ;;  %v1191_v11 = vsel %vm1009_vm0, 0, %v1190_v53  ;;  %v1448_v1 = vperm.slane %v10904_v32, %v9764_v4 }
 0x1d9   : > { %8568 = vmatmul.msk.bf16.vlgmr.msra.gmra.mxu1 %vm4448_vm1, %v4522_v13  ;;  %v1303_v27 = vperm.slane %v1295_v50, %v9770_v20  ;;  %v1388_v15 = vsel %vm1009_vm0, %v10733_v41, %v1380_v49  ;;  %v1461_v56 = vsel %vm1009_vm0, %v1192_v43, %v1185_v58  ;;  %v1466_v34 = vrot.slane %v1193_v35, 4  ;;  %v10954_v58 = vld [vmem:[%s10867_s13 + $0x30] sm:$0xf] }
 0x1da   : > { %v10937_v39 = vrot.slane %v1284_v0, 4  ;;  %v1257_v60 = vsel %vm1009_vm0, 0, %v1256_v12  ;;  %v1455_v44 = vrot.slane %v1454_v47, 4  ;;  %v1285_v59 = vrot.slane %v10914_v5, 4  ;;  %3060 = vrot.lane.b32.xlu2 %v10954_v58, %s9407_s24 }
 0x1db   : > { %v1246_v54 = vperm.slane %v1238_v7, %v9770_v20  ;;  %v1403_v37 = vperm.slane %v10742_v18, %v9764_v4  ;;  %v1304_v14 = vrot.slane %v10923_v57, 4  ;;  %v1392_v63 = vperm.slane %v1388_v15, %v9770_v20 }
 0x1dc   : > { %v1422_v49 = vsel %vm1009_vm0, %v10771_v28, %v1414_v51  ;;  %v1437_v41 = vperm.slane %v10776_v38, %v9764_v4  ;;  %v1465_v25 = vperm.slane %v1461_v56, %v9764_v4  ;;  %v10957_v29 = vrot.slane %v1303_v27, 4 }
 0x1dd   : > { %v1265_v18 = vperm.slane %v1257_v60, %v9770_v20  ;;  %v1404_v61 = vrot.slane %v1403_v37, 4  ;;  %v1467_v33 = vsel %vm1009_vm0, %v1466_v34, %v1191_v11  ;;  %v1288_v51 = vsel %vm1009_vm0, 0, %v10937_v39 }
 0x1de   : > { %v10966_v28 = vperm.slane %v1236_v2, %v9770_v20  ;;  %v1426_v38 = vperm.slane %v1422_v49, %v9770_v20  ;;  %v10969_v26 = vrot.slane %v1246_v54, 4  ;;  %v10972_v40 = vperm.slane %v1255_v22, %v9770_v20 }
 0x1df   : > { %v1405_v52 = vsel %vm1009_vm0, %v1404_v61, %v1397_v16  ;;  %v1438_v6 = vrot.slane %v1437_v41, 4  ;;  %v1286_v43 = vsel %vm1009_vm0, 0, %v1285_v59  ;;  %v1305_v10 = vsel %vm1009_vm0, 0, %v1304_v14 }
 0x1e0   : > { %v1409_v3 = vperm.slane %v1405_v52, %v9770_v20  ;;  %v1595_v30 = vshrl.u32 %v1392_v63, 16  ;;  %v1307_v55 = vsel %vm1009_vm0, 0, %v10957_v29  ;;  %v1551_v36 = vrot.slane %v1288_v51, 4 }
 0x1e1   : > { %v10983_v2 = vrot.slane %v1265_v18, 4  ;;  %v1439_v45 = vsel %vm1009_vm0, %v1438_v6, %v1431_v31  ;;  %v1601_v32 = vshrl.u32 %v1426_v38, 16  ;;  %v1247_v0 = vrot.slane %v10966_v28, 4 }
 0x1e2   : > { %v1443_v16 = vperm.slane %v1439_v45, %v9770_v20  ;;  %v1594_v22 = vpack.i.b16 %v1409_v3, %v1392_v63  ;;  %v1596_v53 = vshrl.u32 %v1409_v3, 16  ;;  %v1250_v50 = vsel %vm1009_vm0, 0, %v10969_v26  ;;  %3062 = vrot.lane.b32.xlu2 %v10991_v24, %s9407_s24  ;;  %v11044_v45 = vld [vmem:[%s10867_s13 + $0x18] sm:$0xf] }
 0x1e3   : > { %v1266_v9 = vrot.slane %v10972_v40, 4  ;;  %v1471_v12 = vperm.slane %v1467_v33, %v9764_v4  ;;  %v1269_v13 = vsel %vm1009_vm0, 0, %v10983_v2  ;;  %v1456_v7 = vsel %vm1009_vm0, %v1455_v44, %v1448_v1  ;;  %3048 = vrot.lane.b32.xlu1 %v11044_v45, %s9407_s24 }
 0x1e4   : > { %v1600_v35 = vpack.i.b16 %v1443_v16, %v1426_v38  ;;  %v4414_v21 = vunpack.c.l.b16 %v1594_v22  ;;  %v1597_v47 = vpack.i.b16 %v1596_v53, %v1595_v30  ;;  %v1602_v31 = vshrl.u32 %v1443_v16, 16 }
 0x1e5   : > { %v1472_v11 = vrot.slane %v1471_v12, 4  ;;  %v1505_v27 = vperm.slane %v10920_v42, %v9764_v4  ;;  %v1490_v60 = vsel %vm1009_vm0, %v10916_v23, %v1482_v46  ;;  %v1568_v59 = vrot.slane %v1307_v55, 4 }
 0x1e6   : > { %v4415_v15 = vunpack.c.l.b16 %v1600_v35  ;;  %v1603_v56 = vpack.i.b16 %v1602_v31, %v1601_v32  ;;  %v4516_v34 = vunpack.c.l.b16 %v1597_v47  ;;  %v1517_v54 = vrot.slane %v1250_v50, 4  ;;  %v11066_v31 = vld [vmem:[%s10867_s13 + $0x14] sm:$0xf] }
 0x1e7   : > { %v1473_v1 = vsel %vm1009_vm0, %v1472_v11, %v1465_v25  ;;  %v1506_v44 = vrot.slane %v1505_v27, 4  ;;  %v1248_v37 = vsel %vm1009_vm0, 0, %v1247_v0  ;;  %v1534_v42 = vrot.slane %v1269_v13, 4  ;;  %v11069_v13 = vld [vmem:[%s10867_s13 + $0xc] sm:$0xf] }
 0x1e8   : > { %v4421_v14 = vpack.c.b16 %v4415_v15, %v4414_v21  ;;  %v4517_v63 = vunpack.c.l.b16 %v1603_v56  ;;  %v1267_v49 = vsel %vm1009_vm0, 0, %v1266_v9  ;;  %v1460_v41 = vperm.slane %v1456_v7, %v9770_v20  ;;  %v11062_v9 = vld [vmem:[%s10867_s13 + $0x2c] sm:$0xf]  ;;  %14962 = vst [vmem:[#allocation17_spill] sm:$0xff] %v11069_v13 }
 0x1e9   : > { %v1494_v48 = vperm.slane %v1490_v60, %v9770_v20  ;;  %v1507_v46 = vsel %vm1009_vm0, %v1506_v44, %v1499_v62  ;;  %v1477_v25 = vperm.slane %v1473_v1, %v9770_v20  ;;  %v1552_v61 = vsel %vm1009_vm0, %v1551_v36, %v1286_v43  ;;  %v11041_v36 = vld [vmem:[%s10867_s13 + $0x24] sm:$0xf] }
 0x1ea   : > { %8565 = vmatmul.msk.bf16.gmra.mxu0 %vm4448_vm1, %v4421_v14  ;;  %v4523_v23 = vpack.c.b16 %v4517_v63, %v4516_v34  ;;  %v1511_v18 = vperm.slane %v1507_v46, %v9770_v20  ;;  %v1518_v33 = vsel %vm1009_vm0, %v1517_v54, %v1248_v37  ;;  %v1569_v51 = vsel %vm1009_vm0, %v1568_v59, %v1305_v10 }
 0x1eb   : > { %v1535_v38 = vsel %vm1009_vm0, %v1534_v42, %v1267_v49  ;;  %v1546_v62 = vsel %vm1009_vm0, %v10937_v39, %v10914_v5  ;;  %v1563_v52 = vsel %vm1009_vm0, %v10957_v29, %v10923_v57  ;;  %v1607_v6 = vshrl.u32 %v1460_v41, 16  ;;  %3056 = vrot.lane.b32.xlu2 %v11028_v19, %s9407_s24  ;;  %3054 = vrot.lane.b32.xlu0 %v11041_v36, %s9407_s24  ;;  %v11087_v42 = vld [vmem:[%s10867_s13 + $0x20] sm:$0xf] }
 0x1ec   : > { %8569 = vmatmul.msk.bf16.gmra.mxu1 %vm4448_vm1, %v4523_v23  ;;  %v1613_v43 = vshrl.u32 %v1494_v48, 16  ;;  %v1556_v10 = vperm.slane %v1552_v61, %v9764_v4  ;;  %v1522_v3 = vperm.slane %v1518_v33, %v9764_v4  ;;  %v1608_v30 = vshrl.u32 %v1477_v25, 16  ;;  %3042 = vrot.lane.b32.xlu1 %v11069_v13, %s9407_s24 }
 0x1ed   : > { %v1614_v55 = vshrl.u32 %v1511_v18, 16  ;;  %v1512_v5 = vsel %vm1009_vm0, %v10969_v26, %v10966_v28  ;;  %v1539_v57 = vperm.slane %v1535_v38, %v9764_v4  ;;  %v1573_v39 = vperm.slane %v1569_v51, %v9764_v4 }
 0x1ee   : > { %v1529_v29 = vsel %vm1009_vm0, %v10983_v2, %v10972_v40  ;;  %v1606_v16 = vpack.i.b16 %v1477_v25, %v1460_v41  ;;  %v1612_v22 = vpack.i.b16 %v1511_v18, %v1494_v48  ;;  %v1550_v28 = vperm.slane %v1546_v62, %v9764_v4  ;;  %v11093_v18 = vld [vmem:[%s10867_s13 + $0x1c] sm:$0xf] }
 0x1ef   : > { %v1567_v26 = vperm.slane %v1563_v52, %v9764_v4  ;;  %v1516_v53 = vperm.slane %v1512_v5, %v9764_v4  ;;  %v1523_v32 = vrot.slane %v1522_v3, 4  ;;  %v1609_v0 = vpack.i.b16 %v1608_v30, %v1607_v6  ;;  %v11099_v6 = vld [vmem:[%s10867_s13 + $0x10] sm:$0xf] }
 0x1f0   : > { %v1615_v50 = vpack.i.b16 %v1614_v55, %v1613_v43  ;;  %v1557_v12 = vrot.slane %v1556_v10, 4  ;;  %v1533_v35 = vperm.slane %v1529_v29, %v9764_v4  ;;  %v1540_v21 = vrot.slane %v1539_v57, 4  ;;  %v11105_v43 = vld [vmem:[%s10867_s13 + $0x8] sm:$0xf] }
 0x1f1   : > { %v1574_v40 = vrot.slane %v1573_v39, 4  ;;  %v4416_v2 = vunpack.c.l.b16 %v1606_v16  ;;  %v4417_v47 = vunpack.c.l.b16 %v1612_v22  ;;  %v4518_v7 = vunpack.c.l.b16 %v1609_v0 }
 0x1f2   : > { %v4519_v11 = vunpack.c.l.b16 %v1615_v50  ;;  %v1524_v27 = vsel %vm1009_vm0, %v1523_v32, %v1516_v53  ;;  %v1541_v15 = vsel %vm1009_vm0, %v1540_v21, %v1533_v35  ;;  %v1558_v56 = vsel %vm1009_vm0, %v1557_v12, %v1550_v28 }
 0x1f3   : > { %3058 = vrot.lane.b32.xlu2 %v11062_v9, %s9407_s24  ;;  %v1575_v34 = vsel %vm1009_vm0, %v1574_v40, %v1567_v26  ;;  %3046 = vrot.lane.b32.xlu0 %v11066_v31, %s9407_s24  ;;  %v4422_v60 = vpack.c.b16 %v4417_v47, %v4416_v2  ;;  %v1528_v59 = vperm.slane %v1524_v27, %v9770_v20  ;;  %v4632_v10 = vlaneseq }
 0x1f4   : > { %v4524_v54 = vpack.c.b16 %v4519_v11, %v4518_v7  ;;  %v1545_v1 = vperm.slane %v1541_v15, %v9770_v20  ;;  %v1562_v44 = vperm.slane %v1558_v56, %v9770_v20  ;;  %v1579_v37 = vperm.slane %v1575_v34, %v9770_v20 }
 0x1f5   : > { %v1619_v14 = vshrl.u32 %v1528_v59, 16  ;;  %v3155_v3 = vshrl.u32 %v10870_v17, 16  ;;  %v11112_v57 = vshrl.u32 %v4632_v10, 7  ;;  %v11114_v39 = vstv %s8572_s28  ;;  %s14812_s28 = sshll.u32 %s9704_s30, 6 }
 0x1f6   : > { %v1620_v63 = vshrl.u32 %v1545_v1, 16  ;;  %v1625_v49 = vshrl.u32 %v1562_v44, 16  ;;  %v1626_v41 = vshrl.u32 %v1579_v37, 16  ;;  %v1618_v48 = vpack.i.b16 %v1545_v1, %v1528_v59  ;;  %s12690_s23 = scalar_lea.vmem [#allocation5], %s14812_s28  ;;  %s15077_s28 = sld [smem:[#allocation49_spill]] }
 0x1f7   : > { %v1624_v46 = vpack.i.b16 %v1579_v37, %v1562_v44  ;;  %v4642_v26 = vadd.s32 %v11114_v39, %v11112_v57  ;;  %v11120_v53 = vand.u32 127, %v4632_v10  ;;  %v3161_v32 = vshrl.u32 %v10891_v8, 16 }
 0x1f8   : > { %v1621_v23 = vpack.i.b16 %v1620_v63, %v1619_v14  ;;  %v1627_v25 = vpack.i.b16 %v1626_v41, %v1625_v49  ;;  %v4418_v61 = vunpack.c.l.b16 %v1618_v48  ;;  %v3149_v12 = vshrl.u32 %v10991_v24, 16 }
 0x1f9   : > { %v4419_v33 = vunpack.c.l.b16 %v1624_v46  ;;  %14963 = vst [vmem:[#allocation16_spill] sm:$0xff] %v11120_v53  ;;  %v3131_v35 = vshrl.u32 %v11028_v19, 16  ;;  %v4634_v21 = vadd.s32 8, %v11112_v57  ;;  %vm4652_vm2 = vcmp.le.s32.totalorder %v11120_v53, %v4642_v26 }
 0x1fa   : > { %8566 = vmatmul.msk.bf16.gmra.mxu0 %vm4448_vm1, %v4422_v60  ;;  %v4520_v51 = vunpack.c.l.b16 %v1621_v23  ;;  %v4521_v38 = vunpack.c.l.b16 %v1627_v25 }
 0x1fb   : > { %3052 = vrot.lane.b32.xlu2 %v11087_v42, %s9407_s24  ;;  %v4423_v62 = vpack.c.b16 %v4419_v33, %v4418_v61  ;;  %v4643_v14 = vadd.s32 %v11114_v39, %v4634_v21 }
 0x1fc   : > { %8570 = vmatmul.msk.bf16.gmra.mxu1 %vm4448_vm1, %v4524_v54  ;;  %v4525_v52 = vpack.c.b16 %v4521_v38, %v4520_v51  ;;  %v4635_v51 = vadd.s32 16, %v11112_v57 }
 0x1fd   : > { %vm4653_vm3 = vcmp.le.s32.totalorder %v11120_v53, %v4643_v14 }
 0x1fe   : > { %v11166_v21 = vadd.s32 %v11114_v39, %v4635_v51 }
 0x200   : > { %vm4654_vm4 = vcmp.le.s32.totalorder %v11120_v53, %v11166_v21 }
 0x203   : > { %3050 = vrot.lane.b32.xlu2 %v11093_v18, %s9407_s24 }
 0x20a   : > { %8567 = vmatmul.msk.bf16.gmra.mxu0 %vm4448_vm1, %v4423_v62 }
 0x20b   : > { %3044 = vrot.lane.b32.xlu2 %v11099_v6, %s9407_s24 }
 0x20c   : > { %8571 = vmatmul.msk.bf16.gmra.mxu1 %vm4448_vm1, %v4525_v52 }
 0x213   : > { %3040 = vrot.lane.b32.xlu2 %v11105_v43, %s9407_s24 }
 0x221   : > { %v3065_v30 = vpop.permute.xlu2 %3064 }
 0x222   : > { %v3154_v55 = vpack.i.b16 %v3065_v30, %v10870_v17  ;;  %v3156_v5 = vshrl.u32 %v3065_v30, 16  ;;  %v3143_v17 = vshrl.u32 %v10954_v58, 16 }
 0x224   : > { %v3157_v29 = vpack.i.b16 %v3156_v5, %v3155_v3  ;;  %v3700_v16 = vperm.slane %v3154_v55, %v9764_v4 }
 0x226   : > { %v3701_v22 = vrot.slane %v3700_v16, 4  ;;  %v3719_v28 = vperm.slane %v3157_v29, %v9764_v4  ;;  %v3706_v40 = vperm.slane %v3700_v16, %v9770_v20 }
 0x228   : > { %v3702_v0 = vsel %vm1009_vm0, 0, %v3701_v22  ;;  %v3720_v50 = vrot.slane %v3719_v28, 4  ;;  %v3711_v63 = vrot.slane %v3706_v40, 4 }
 0x229   : > { %v3067_v2 = vpop.permute.xlu2 %3066  ;;  %v3710_v11 = vperm.slane %v3702_v0, %v9770_v20 }
 0x22a   : > { %v3160_v27 = vpack.i.b16 %v3067_v2, %v10891_v8  ;;  %v3162_v60 = vshrl.u32 %v3067_v2, 16  ;;  %v3721_v1 = vsel %vm1009_vm0, 0, %v3720_v50  ;;  %v3725_v8 = vperm.slane %v3719_v28, %v9770_v20 }
 0x22b   : > { %v3713_v23 = vrot.slane %v3710_v11, 4  ;;  %v3729_v61 = vperm.slane %v3721_v1, %v9770_v20  ;;  %v3712_v3 = vsel %vm1009_vm0, 0, %v3711_v63 }
 0x22c   : > { %v3738_v44 = vperm.slane %v3160_v27, %v9764_v4  ;;  %v3163_v49 = vpack.i.b16 %v3162_v60, %v3161_v32  ;;  %v3730_v30 = vrot.slane %v3725_v8, 4 }
 0x22d   : > { %v3714_v5 = vsel %vm1009_vm0, 0, %v3713_v23  ;;  %v3732_v32 = vrot.slane %v3729_v61, 4  ;;  %v11169_v11 = vsel %vm1009_vm0, %v3713_v23, %v3706_v40  ;;  %v915_v23 = vld [vmem:[%s10867_s13] sm:$0xf] }
 0x22e   : > { %v3739_v33 = vrot.slane %v3738_v44, 4  ;;  %v3757_v10 = vperm.slane %v3163_v49, %v9764_v4  ;;  %v3744_v29 = vperm.slane %v3738_v44, %v9770_v20  ;;  %v11179_v49 = vsel %vm1009_vm0, 0, %v3730_v30 }
 0x22f   : > { %v11193_v51 = vsel %vm1009_vm0, %v3732_v32, %v3725_v8 }
 0x230   : > { %v3740_v55 = vsel %vm1009_vm0, 0, %v3739_v33  ;;  %v3758_v22 = vrot.slane %v3757_v10, 4  ;;  %v3749_v40 = vrot.slane %v3744_v29, 4 }
 0x231   : > { %v3748_v16 = vperm.slane %v3740_v55, %v9770_v20 }
 0x232   : > { %v3750_v14 = vsel %vm1009_vm0, 0, %v3749_v40 }
 0x233   : > { %v3751_v27 = vrot.slane %v3748_v16, 4 }
 0x234   : > { %v3061_v28 = vpop.permute.xlu2 %3060 }
 0x235   : > { %v3142_v0 = vpack.i.b16 %v3061_v28, %v10954_v58  ;;  %v3144_v50 = vshrl.u32 %v3061_v28, 16  ;;  %v3752_v30 = vsel %vm1009_vm0, 0, %v3751_v27 }
 0x237   : > { %v3145_v44 = vpack.i.b16 %v3144_v50, %v3143_v17  ;;  %v3763_v17 = vperm.slane %v3757_v10, %v9770_v20  ;;  %v4637_v10 = vadd.s32 32, %v11112_v57  ;;  %v4287_v50 = vrot.slane %v3752_v30, 4 }
 0x239   : > { %v3643_v55 = vperm.slane %v3145_v44, %v9764_v4 }
 0x254   : > { %v4494_v34 = vpop.f32.mrf.mxu0 }
 0x255   : > { %v4615_v54 = vmul.f32 0.125, %v4494_v34  ;;  %v3759_v34 = vsel %vm1009_vm0, 0, %v3758_v22 }
 0x256   : > { %v4595_v37 = vpop.f32.mrf.mxu1  ;;  %v3767_v1 = vperm.slane %v3759_v34, %v9770_v20 }
 0x257   : > { %v4623_v48 = vmul.f32 0.125, %v4595_v37  ;;  %v11144_v46 = vsel %vm4652_vm2, %v4615_v54, -1e+30  ;;  %v4253_v54 = vrot.slane %v3714_v5, 4  ;;  %v3624_v37 = vperm.slane %v3142_v0, %v9764_v4 }
 0x258   : > { %14964 = vst [vmem:[#allocation30_spill] sm:$0xff] %v11144_v46  ;;  %4692 = vmax.xlane.f32.xlu0 %v11144_v46  ;;  %v3770_v16 = vrot.slane %v3767_v1, 4  ;;  %v3768_v0 = vrot.slane %v3763_v17, 4  ;;  %v4636_v1 = vadd.s32 24, %v11112_v57 }
 0x259   : > { %v11154_v52 = vsel %vm4652_vm2, %v4623_v48, -1e+30  ;;  %v11183_v48 = vsel %vm1009_vm0, 0, %v3732_v32  ;;  %v3625_v61 = vrot.slane %v3624_v37, 4  ;;  %v11199_v5 = vsel %vm1009_vm0, %v4253_v54, %v3712_v3  ;;  %v3063_v32 = vpop.permute.xlu2 %3062 }
 0x25a   : > { %14965 = vst [vmem:[#allocation29_spill] sm:$0xff] %v11154_v52  ;;  %4708 = vmax.xlane.f32.xlu1 %v11154_v52  ;;  %v3630_v28 = vperm.slane %v3624_v37, %v9770_v20  ;;  %v3150_v34 = vshrl.u32 %v3063_v32, 16  ;;  %v11208_v3 = vsel %vm1009_vm0, %v3751_v27, %v3744_v29  ;;  %v11214_v37 = vsel %vm1009_vm0, 0, %v3770_v16 }
 0x25b   : > { %v3626_v22 = vsel %vm1009_vm0, 0, %v3625_v61  ;;  %v3649_v29 = vperm.slane %v3643_v55, %v9770_v20  ;;  %v14974_v21 = vrot.slane %v11183_v48, 4 }
 0x25c   : > { %v4496_v26 = vpop.f32.mrf.mxu0  ;;  %v3634_v8 = vperm.slane %v3626_v22, %v9770_v20  ;;  %v3151_v40 = vpack.i.b16 %v3150_v34, %v3149_v12  ;;  %v3635_v30 = vrot.slane %v3630_v28, 4  ;;  %v11222_v22 = vadd.s32 %v11114_v39, %v4636_v1 }
 0x25d   : > { %v4616_v2 = vmul.f32 0.125, %v4496_v26  ;;  %v3644_v26 = vrot.slane %v3643_v55, 4  ;;  %v3654_v38 = vrot.slane %v3649_v29, 4 }
 0x25e   : > { %v4597_v60 = vpop.f32.mrf.mxu1  ;;  %vm4655_vm6 = vcmp.le.s32.totalorder %v11120_v53, %v11222_v22 }
 0x25f   : > { %v4624_v63 = vmul.f32 0.125, %v4597_v60  ;;  %v11176_v58 = vsel %vm4653_vm3, %v4616_v2, -1e+30  ;;  %v3148_v2 = vpack.i.b16 %v3063_v32, %v10991_v24  ;;  %v3637_v60 = vrot.slane %v3634_v8, 4 }
 0x260   : > { %14966 = vst [vmem:[#allocation31_spill] sm:$0xff] %v11176_v58  ;;  %4694 = vmax.xlane.f32.xlu2 %v11176_v58  ;;  %v3645_v54 = vsel %vm1009_vm0, 0, %v3644_v26  ;;  %v11225_v8 = vsel %vm1009_vm0, 0, %v3768_v0  ;;  %v11230_v32 = vsel %vm1009_vm0, %v4287_v50, %v3750_v14  ;;  %v11233_v24 = vadd.s32 %v11114_v39, %v4637_v10 }
 0x261   : > { %v11190_v33 = vsel %vm4653_vm3, %v4624_v63, -1e+30  ;;  %v3653_v63 = vperm.slane %v3645_v54, %v9770_v20  ;;  %v3662_v27 = vperm.slane %v3148_v2, %v9764_v4  ;;  %v3638_v55 = vsel %vm1009_vm0, 0, %v3637_v60  ;;  %v3057_v25 = vpop.permute.xlu2 %3056 }
 0x262   : > { %14967 = vst [vmem:[#allocation32_spill] sm:$0xff] %v11190_v33  ;;  %4710 = vmax.xlane.f32.xlu0 %v11190_v33  ;;  %v11240_v54 = vsel %vm1009_vm0, %v3770_v16, %v3763_v17  ;;  %v4638_v14 = vadd.s32 40, %v11112_v57  ;;  %v3681_v10 = vperm.slane %v3151_v40, %v9764_v4  ;;  %v3636_v50 = vsel %vm1009_vm0, 0, %v3635_v30 }
 0x263   : > { %v3656_v2 = vrot.slane %v3653_v63, 4  ;;  %v3663_v34 = vrot.slane %v3662_v27, 4  ;;  %v3668_v0 = vperm.slane %v3662_v27, %v9770_v20  ;;  %v11247_v62 = vsel %vm1009_vm0, %v3637_v60, %v3630_v28 }
 0x264   : > { %v4185_v27 = vrot.slane %v3638_v55, 4  ;;  %v3682_v16 = vrot.slane %v3681_v10, 4  ;;  %v3130_v40 = vpack.i.b16 %v3057_v25, %v11028_v19  ;;  %v3132_v15 = vshrl.u32 %v3057_v25, 16 }
 0x265   : > { %v3664_v63 = vsel %vm1009_vm0, 0, %v3663_v34  ;;  %v11252_v59 = vsel %vm1009_vm0, 0, %v3656_v2  ;;  %v3673_v56 = vrot.slane %v3668_v0, 4  ;;  %v3687_v28 = vperm.slane %v3681_v10, %v9770_v20 }
 0x266   : > { %v3672_v17 = vperm.slane %v3664_v63, %v9770_v20  ;;  %v3683_v7 = vsel %vm1009_vm0, 0, %v3682_v16  ;;  %v4639_v60 = vadd.s32 48, %v11112_v57  ;;  %vm4656_vm5 = vcmp.le.s32.totalorder %v11120_v53, %v11233_v24 }
 0x267   : > { %v4499_v61 = vpop.f32.mrf.mxu0  ;;  %v3133_v55 = vpack.i.b16 %v3132_v15, %v3131_v35  ;;  %v3548_v63 = vperm.slane %v3130_v40, %v9764_v4  ;;  %v11272_v16 = vadd.s32 %v11114_v39, %v4638_v14  ;;  %v11278_v19 = vsel %vm1009_vm0, %v3656_v2, %v3649_v29 }
 0x268   : > { %v4617_v41 = vmul.f32 0.125, %v4499_v61  ;;  %v3675_v30 = vrot.slane %v3672_v17, 4  ;;  %v3691_v61 = vperm.slane %v3683_v7, %v9770_v20  ;;  %v11267_v17 = vsel %vm1009_vm0, 0, %v3654_v38 }
 0x269   : > { %v4600_v12 = vpop.f32.mrf.mxu1  ;;  %v11275_v7 = vsel %vm1009_vm0, %v4185_v27, %v3636_v50  ;;  %v3674_v15 = vsel %vm1009_vm0, 0, %v3673_v56  ;;  %v3554_v40 = vperm.slane %v3548_v63, %v9770_v20  ;;  %v3567_v14 = vperm.slane %v3133_v55, %v9764_v4 }
 0x26a   : > { %v4625_v25 = vmul.f32 0.125, %v4600_v12  ;;  %v3676_v38 = vsel %vm1009_vm0, 0, %v3675_v30  ;;  %v3549_v12 = vrot.slane %v3548_v63, 4  ;;  %v3692_v10 = vrot.slane %v3687_v28, 4  ;;  %v3059_v63 = vpop.permute.xlu2 %3058 }
 0x26b   : > { %v3694_v1 = vrot.slane %v3691_v61, 4  ;;  %v11286_v50 = vadd.s32 %v11114_v39, %v4639_v60  ;;  %v11291_v29 = vsel %vm4654_vm4, %v4617_v41, -1e+30  ;;  %v11294_v56 = vsel %vm1009_vm0, %v3675_v30, %v3668_v0 }
 0x26c   : > { %14968 = vst [vmem:[#allocation28_spill] sm:$0xff] %v11291_v29  ;;  %v3550_v27 = vsel %vm1009_vm0, 0, %v3549_v12  ;;  %v3568_v35 = vrot.slane %v3567_v14, 4  ;;  %v4219_v55 = vrot.slane %v3676_v38, 4  ;;  %v11300_v60 = vperm.slane %v3567_v14, %v9770_v20 }
 0x26d   : > { %v3558_v61 = vperm.slane %v3550_v27, %v9770_v20  ;;  %v3136_v44 = vpack.i.b16 %v3059_v63, %v11062_v9  ;;  %v3559_v47 = vrot.slane %v3554_v40, 4  ;;  %v3138_v0 = vshrl.u32 %v3059_v63, 16 }
 0x26e   : > { %v3569_v41 = vsel %vm1009_vm0, 0, %v3568_v35  ;;  %vm4657_vm7 = vcmp.le.s32.totalorder %v11120_v53, %v11272_v16  ;;  %v11308_v12 = vsel %vm1009_vm0, 0, %v3692_v10  ;;  %v11311_v38 = vsel %vm1009_vm0, 0, %v3694_v1 }
 0x26f   : > { %v4501_v34 = vpop.f32.mrf.mxu0  ;;  %v3577_v27 = vperm.slane %v3569_v41, %v9770_v20  ;;  %v14969_v35 = vshrl.u32 %v11062_v9, 16  ;;  %v3586_v33 = vperm.slane %v3136_v44, %v9764_v4  ;;  %v11323_v58 = vsel %vm1009_vm0, %v4219_v55, %v3674_v15 }
 0x270   : > { %v4618_v2 = vmul.f32 0.125, %v4501_v34  ;;  %v4640_v34 = vadd.s32 56, %v11112_v57  ;;  %v3561_v57 = vrot.slane %v3558_v61, 4  ;;  %v11326_v13 = vsel %vm1009_vm0, %v3694_v1, %v3687_v28 }
 0x271   : > { %v4602_v26 = vpop.f32.mrf.mxu1  ;;  %v3139_v63 = vpack.i.b16 %v3138_v0, %v14969_v35  ;;  %v3578_v41 = vrot.slane %v11300_v60, 4  ;;  %v3560_v44 = vsel %vm1009_vm0, 0, %v3559_v47  ;;  %v3580_v15 = vrot.slane %v3577_v27, 4 }
 0x272   : > { %v11320_v46 = vmul.f32 0.125, %v4602_v26  ;;  %v11337_v26 = vadd.s32 %v11114_v39, %v4640_v34  ;;  %v3587_v55 = vrot.slane %v3586_v33, 4  ;;  %v11343_v1 = vsel %vm4655_vm6, %v4618_v2, -1e+30 }
 0x273   : > { %14972 = vst [vmem:[#allocation33_spill] sm:$0xff] %v11343_v1  ;;  %v3562_v28 = vsel %vm1009_vm0, 0, %v3561_v57  ;;  %v3592_v47 = vperm.slane %v3586_v33, %v9770_v20  ;;  %v3605_v39 = vperm.slane %v3139_v63, %v9764_v4  ;;  %v4258_v61 = vperm.slane %v11199_v5, %v9764_v4 }
 0x274   : > { %14971 = vst [vmem:[#allocation35_spill] sm:$0xff] %v11337_v26  ;;  %v11356_v34 = vsel %vm1009_vm0, 0, %v3578_v41  ;;  %v11359_v2 = vsel %vm1009_vm0, %v3561_v57, %v3554_v40  ;;  %v3588_v0 = vsel %vm1009_vm0, 0, %v3587_v55  ;;  %vm4658_vm8 = vcmp.le.s32.totalorder %v11120_v53, %v11286_v50 }
 0x275   : > { %v3596_v33 = vperm.slane %v3588_v0, %v9770_v20  ;;  %v3606_v27 = vrot.slane %v3605_v39, 4  ;;  %v4259_v35 = vrot.slane %v4258_v61, 4  ;;  %v11372_v40 = vsel %vm1009_vm0, 0, %v3580_v15 }
 0x276   : > { %v4117_v57 = vrot.slane %v3562_v28, 4  ;;  %v4292_v48 = vperm.slane %v11230_v32, %v9764_v4  ;;  %v4269_v55 = vperm.slane %v11193_v51, %v9764_v4  ;;  %v11381_v0 = vperm.slane %v3605_v39, %v9770_v20 }
 0x277   : > { %v4504_v30 = vpop.f32.mrf.mxu0  ;;  %v3607_v41 = vsel %vm1009_vm0, 0, %v3606_v27  ;;  %v3599_v61 = vrot.slane %v3596_v33, 4  ;;  %vm4659_vm9 = vcmp.le.s32.totalorder %v11120_v53, %v11337_v26  ;;  %v14988_v26 = vshrl.u32 %v11093_v18, 16 }
 0x278   : > { %v4619_v52 = vmul.f32 0.125, %v4504_v30  ;;  %3036 = vrot.lane.b32.xlu2 %v915_v23, %s9407_s24  ;;  %v3615_v51 = vperm.slane %v3607_v41, %v9770_v20  ;;  %v4293_v33 = vrot.slane %v4292_v48, 4  ;;  %v11397_v39 = vsel %vm1009_vm0, %v4117_v57, %v3560_v44 }
 0x279   : > { %v4605_v10 = vpop.f32.mrf.mxu1  ;;  %v4303_v48 = vperm.slane %v11240_v54, %v9764_v4  ;;  %v14978_v44 = vrot.slane %v11214_v37, 4  ;;  %v14980_v54 = vperm.slane %v11208_v3, %v9764_v4 }
 0x27a   : > { %v11332_v23 = vsel %vm4656_vm5, %v4619_v52, -1e+30  ;;  %v11348_v52 = vsel %vm4654_vm4, %v4625_v25, -1e+30  ;;  %v4271_v25 = vsel %vm1009_vm0, %v14974_v21, %v11179_v49  ;;  %v11366_v30 = vmul.f32 0.125, %v4605_v10 }
 0x27b   : > { %14970 = vst [vmem:[#allocation34_spill] sm:$0xff] %v11332_v23  ;;  %4700 = vmax.xlane.f32.xlu0 %v11332_v23  ;;  %v4275_v63 = vperm.slane %v4271_v25, %v9764_v4  ;;  %v3597_v10 = vrot.slane %v3592_v47, 4  ;;  %v14975_v21 = vperm.slane %v11169_v11, %v9764_v4  ;;  %v11401_v11 = vsel %vm1009_vm0, %v3580_v15, %v11300_v60 }
 0x27c   : > { %14973 = vst [vmem:[#allocation18_spill] sm:$0xff] %v11348_v52  ;;  %v4305_v57 = vsel %vm1009_vm0, %v14978_v44, %v11225_v8  ;;  %v3600_v60 = vsel %vm1009_vm0, 0, %v3599_v61  ;;  %v3616_v15 = vrot.slane %v11381_v0, 4  ;;  %v11431_v44 = vsel %vm1009_vm0, %v3599_v61, %v3592_v47 }
 0x27d   : > { %v4260_v28 = vsel %vm1009_vm0, %v4259_v35, %v14975_v21  ;;  %v4276_v25 = vrot.slane %v4275_v63, 4  ;;  %v3598_v63 = vsel %vm1009_vm0, 0, %v3597_v10  ;;  %v3053_v10 = vpop.permute.xlu2 %3052  ;;  %v4309_v37 = vperm.slane %v4305_v57, %v9764_v4 }
 0x27e   : > { %v3118_v8 = vpack.i.b16 %v3053_v10, %v11087_v42  ;;  %v14982_v47 = vshrl.u32 %v11087_v42, 16 }
 0x27f   : > { %v4506_v5 = vpop.f32.mrf.mxu0  ;;  %v4310_v35 = vrot.slane %v4309_v37, 4  ;;  %v4151_v37 = vrot.slane %v3600_v60, 4 }
 0x280   : > { %v4620_v49 = vmul.f32 0.125, %v4506_v5  ;;  %v11405_v5 = vperm.slane %v4260_v28, %v9770_v20  ;;  %v3055_v28 = vpop.permute.xlu0 %3054 }
 0x281   : > { %v4607_v14 = vpop.f32.mrf.mxu1  ;;  %v3124_v27 = vpack.i.b16 %v3055_v28, %v11041_v36  ;;  %v3126_v57 = vshrl.u32 %v3055_v28, 16 }
 0x282   : > { %v11390_v32 = vsel %vm4657_vm7, %v4620_v49, -1e+30  ;;  %14977 = vst [vmem:[#allocation38_spill] sm:$0xff] %v11405_v5  ;;  %v4277_v49 = vsel %vm1009_vm0, %v4276_v25, %v4269_v55  ;;  %v11415_v41 = vmul.f32 0.125, %v4607_v14  ;;  %v3618_v55 = vrot.slane %v3615_v51, 4 }
 0x283   : > { %14976 = vst [vmem:[#allocation19_spill] sm:$0xff] %v11390_v32  ;;  %4702 = vmax.xlane.f32.xlu1 %v11390_v32  ;;  %v11420_v21 = vperm.slane %v4277_v49, %v9770_v20  ;;  %v4294_v25 = vsel %vm1009_vm0, %v4293_v33, %v14980_v54  ;;  %v3120_v51 = vshrl.u32 %v3053_v10, 16  ;;  %v3472_v33 = vperm.slane %v3118_v8, %v9764_v4 }
 0x284   : > { %v11438_v54 = vsel %vm1009_vm0, 0, %v3616_v15  ;;  %v11441_v9 = vperm.slane %v4294_v25, %v9770_v20  ;;  %v3510_v32 = vperm.slane %v3124_v27, %v9764_v4  ;;  %v4311_v8 = vsel %vm1009_vm0, %v4310_v35, %v4303_v48 }
 0x285   : > { %14979 = vst [vmem:[#allocation37_spill] sm:$0xff] %v11420_v21  ;;  %v4402_v49 = vpack.i.b16 %v11420_v21, %v11405_v5  ;;  %v3121_v61 = vpack.i.b16 %v3120_v51, %v14982_v47  ;;  %v3473_v28 = vrot.slane %v3472_v33, 4  ;;  %v11456_v25 = vperm.slane %v4311_v8, %v9770_v20 }
 0x286   : > { %14981 = vst [vmem:[#allocation39_spill] sm:$0xff] %v11441_v9  ;;  %v14985_v27 = vshrl.u32 %v11041_v36, 16  ;;  %v11462_v51 = vsel %vm1009_vm0, 0, %v3618_v55  ;;  %v3511_v48 = vrot.slane %v3510_v32, 4  ;;  %v3478_v47 = vperm.slane %v3472_v33, %v9770_v20  ;;  %v3051_v33 = vpop.permute.xlu2 %3050 }
 0x287   : > { %v4509_v14 = vpop.f32.mrf.mxu0  ;;  %14984 = vst [vmem:[#allocation20_spill] sm:$0xff] %v11456_v25  ;;  %v3491_v42 = vperm.slane %v3121_v61, %v9764_v4  ;;  %v4890_v60 = vunpack.c.l.b16 %v4402_v49  ;;  %v3474_v35 = vsel %vm1009_vm0, 0, %v3473_v28  ;;  %v11470_v61 = vsel %vm1009_vm0, %v4151_v37, %v3598_v63 }
 0x288   : > { %v4621_v3 = vmul.f32 0.125, %v4509_v14  ;;  %v3127_v14 = vpack.i.b16 %v3126_v57, %v14985_v27  ;;  %v3482_v8 = vperm.slane %v3474_v35, %v9770_v20  ;;  %v3512_v57 = vsel %vm1009_vm0, 0, %v3511_v48 }
 0x289   : > { %v3492_v15 = vrot.slane %v3491_v42, 4  ;;  %v3497_v36 = vperm.slane %v3491_v42, %v9770_v20  ;;  %v3516_v49 = vperm.slane %v3510_v32, %v9770_v20  ;;  %v3520_v63 = vperm.slane %v3512_v57, %v9770_v20 }
 0x28a   : > { %v11449_v10 = vsel %vm4658_vm8, %v4621_v3, -1e+30  ;;  %v4408_v3 = vpack.i.b16 %v11456_v25, %v11441_v9  ;;  %v3485_v21 = vrot.slane %v3482_v8, 4  ;;  %v3529_v25 = vperm.slane %v3127_v14, %v9764_v4  ;;  %v4610_v8 = vpop.f32.mrf.mxu1 }
 0x28b   : > { %14983 = vst [vmem:[#allocation36_spill] sm:$0xff] %v11449_v10  ;;  %4704 = vmax.xlane.f32.xlu0 %v11449_v10  ;;  %v3493_v5 = vsel %vm1009_vm0, 0, %v3492_v15  ;;  %v3114_v37 = vshrl.u32 %v3051_v33, 16  ;;  %v11481_v42 = vsel %vm1009_vm0, %v3618_v55, %v11381_v0  ;;  %v3483_v32 = vrot.slane %v3478_v47, 4 }
 0x28c   : > { %v4891_v28 = vunpack.c.l.b16 %v4408_v3  ;;  %v3501_v35 = vperm.slane %v3493_v5, %v9770_v20  ;;  %v3486_v3 = vsel %vm1009_vm0, 0, %v3485_v21  ;;  %v3502_v14 = vrot.slane %v3497_v36, 4 }
 0x28d   : > { %v3521_v5 = vrot.slane %v3516_v49, 4  ;;  %v11493_v55 = vsel %vm1009_vm0, %v3485_v21, %v3478_v47  ;;  %v3112_v57 = vpack.i.b16 %v3051_v33, %v11093_v18  ;;  %v11504_v0 = vmul.f32 0.125, %v4610_v8 }
 0x28e   : > { %v4899_v48 = vpack.c.b16 %v4891_v28, %v4890_v60  ;;  %v3530_v60 = vrot.slane %v3529_v25, 4  ;;  %v4049_v28 = vrot.slane %v3486_v3, 4  ;;  %v3484_v21 = vsel %vm1009_vm0, 0, %v3483_v32 }
 0x28f   : > { %v4511_v27 = vpop.f32.mrf.mxu0  ;;  %v3535_v33 = vperm.slane %v3529_v25, %v9770_v20  ;;  %v11510_v3 = vsel %vm1009_vm0, 0, %v3502_v14  ;;  %v3522_v18 = vsel %vm1009_vm0, 0, %v3521_v5  ;;  %v14989_v10 = vshrl.u32 %v11044_v45, 16 }
 0x290   : > { %v4622_v9 = vmul.f32 0.125, %v4511_v27  ;;  %v3504_v27 = vrot.slane %v3501_v35, 4  ;;  %4908 = vmatpush.bf16.msra.mxu2 %v4899_v48  ;;  %8975 = vmatpush.bf16.msra.mxu3 %v4899_v48  ;;  %v3523_v35 = vrot.slane %v3520_v63, 4  ;;  %v3531_v47 = vsel %vm1009_vm0, 0, %v3530_v60  ;;  %v3049_v48 = vpop.permute.xlu1 %3048 }
 0x291   : > { %v3434_v63 = vperm.slane %v3112_v57, %v9764_v4  ;;  %v3106_v25 = vpack.i.b16 %v3049_v48, %v11044_v45  ;;  %v11523_v32 = vsel %vm1009_vm0, %v4049_v28, %v3484_v21  ;;  %v3108_v60 = vshrl.u32 %v3049_v48, 16 }
 0x292   : > { %v11487_v15 = vsel %vm4659_vm9, %v4622_v9, -1e+30  ;;  %v11500_v9 = vsel %vm4655_vm6, %v11320_v46, -1e+30  ;;  %v11513_v22 = vsel %vm1009_vm0, 0, %v3504_v27  ;;  %v11526_v8 = vsel %vm1009_vm0, %v3504_v27, %v3497_v36 }
 0x293   : > { %14986 = vst [vmem:[#allocation22_spill] sm:$0xff] %v11487_v15  ;;  %4696 = vmax.xlane.f32.xlu0 %v11291_v29  ;;  %4706 = vmax.xlane.f32.xlu1 %v11487_v15  ;;  %v3115_v15 = vpack.i.b16 %v3114_v37, %v14988_v26  ;;  %v3539_v26 = vperm.slane %v3531_v47, %v9770_v20  ;;  %v3524_v14 = vsel %vm1009_vm0, 0, %v3523_v35  ;;  %v3540_v5 = vrot.slane %v3535_v33, 4 }
 0x294   : > { %14987 = vst [vmem:[#allocation25_spill] sm:$0xff] %v11500_v9  ;;  %v3435_v29 = vrot.slane %v3434_v63, 4  ;;  %v11531_v57 = vsel %vm1009_vm0, %v3523_v35, %v3516_v49  ;;  %v3109_v28 = vpack.i.b16 %v3108_v60, %v14989_v10  ;;  %v3396_v21 = vperm.slane %v3106_v25, %v9764_v4 }
 0x295   : > { %v3453_v37 = vperm.slane %v3115_v15, %v9764_v4  ;;  %v3440_v15 = vperm.slane %v3434_v63, %v9770_v20  ;;  %v3542_v36 = vrot.slane %v3539_v26, 4  ;;  %v4083_v27 = vrot.slane %v3524_v14, 4 }
 0x296   : > { %v3436_v48 = vsel %vm1009_vm0, 0, %v3435_v29  ;;  %v3397_v63 = vrot.slane %v3396_v21, 4  ;;  %v11544_v45 = vsel %vm1009_vm0, 0, %v3540_v5  ;;  %v3402_v26 = vperm.slane %v3396_v21, %v9770_v20 }
 0x297   : > { %v3454_v47 = vrot.slane %v3453_v37, 4  ;;  %v3444_v23 = vperm.slane %v3436_v48, %v9770_v20  ;;  %v3459_v49 = vperm.slane %v3453_v37, %v9770_v20  ;;  %v3415_v25 = vperm.slane %v3109_v28, %v9764_v4 }
 0x298   : > { %v3445_v29 = vrot.slane %v3440_v15, 4  ;;  %v11552_v37 = vsel %vm1009_vm0, 0, %v3542_v36  ;;  %v11559_v10 = vsel %vm1009_vm0, %v4083_v27, %v3522_v18  ;;  %v11562_v21 = vsel %vm1009_vm0, %v3542_v36, %v3535_v33 }
 0x299   : > { %v3455_v46 = vsel %vm1009_vm0, 0, %v3454_v47  ;;  %v3447_v14 = vrot.slane %v3444_v23, 4  ;;  %v3398_v47 = vsel %vm1009_vm0, 0, %v3397_v63  ;;  %v3416_v48 = vrot.slane %v3415_v25, 4 }
 0x29a   : > { %v3463_v35 = vperm.slane %v3455_v46, %v9770_v20  ;;  %v3406_v46 = vperm.slane %v3398_v47, %v9770_v20  ;;  %v11556_v5 = vperm.slane %v3415_v25, %v9770_v20  ;;  %v3464_v28 = vrot.slane %v3459_v49, 4 }
 0x29b   : > { %4698 = vmax.xlane.f32.xlu0 %v11343_v1  ;;  %v3448_v23 = vsel %vm1009_vm0, 0, %v3447_v14  ;;  %v11570_v63 = vsel %vm1009_vm0, %v3447_v14, %v3440_v15  ;;  %v3407_v25 = vrot.slane %v3402_v26, 4  ;;  %v3446_v18 = vsel %vm1009_vm0, 0, %v3445_v29 }
 0x29c   : > { %v3466_v60 = vrot.slane %v3463_v35, 4  ;;  %v4015_v47 = vrot.slane %v3448_v23, 4  ;;  %v3409_v27 = vrot.slane %v3406_v46, 4  ;;  %v3417_v33 = vsel %vm1009_vm0, 0, %v3416_v48 }
 0x29d   : > { %v3425_v36 = vperm.slane %v3417_v33, %v9770_v20  ;;  %v11582_v15 = vsel %vm4656_vm5, %v11366_v30, -1e+30  ;;  %v4190_v14 = vperm.slane %v11275_v7, %v9764_v4  ;;  %v11587_v29 = vsel %vm1009_vm0, 0, %v3464_v28 }
 0x29e   : > { %v11567_v35 = vsel %vm1009_vm0, 0, %v3466_v60  ;;  %14990 = vst [vmem:[#allocation26_spill] sm:$0xff] %v11582_v15  ;;  %v11592_v48 = vsel %vm1009_vm0, %v3466_v60, %v3459_v49  ;;  %v11596_v33 = vsel %vm1009_vm0, %v4015_v47, %v3446_v18  ;;  %v11599_v24 = vsel %vm1009_vm0, 0, %v3407_v25 }
 0x29f   : > { %v11605_v7 = vsel %vm4658_vm8, %v11504_v0, -1e+30  ;;  %v4191_v30 = vrot.slane %v4190_v14, 4  ;;  %v11608_v28 = vsel %vm1009_vm0, 0, %v3409_v27  ;;  %v14992_v49 = vrot.slane %v11252_v59, 4  ;;  %v3047_v0 = vpop.permute.xlu0 %3046 }
 0x2a0   : > { %14991 = vst [vmem:[#allocation27_spill] sm:$0xff] %v11605_v7  ;;  %v4224_v47 = vperm.slane %v11323_v58, %v9764_v4  ;;  %v14993_v25 = vrot.slane %v11311_v38, 4  ;;  %v11623_v14 = vrot.slane %v3425_v36, 4  ;;  %v11626_v46 = vsel %vm1009_vm0, %v3409_v27, %v3402_v26  ;;  %v11639_v36 = vld [vmem:[%s10867_s13 + $0x4] sm:$0xf] }
 0x2a1   : > { %4714 = vmax.xlane.f32.xlu2 %v11500_v9  ;;  %v3426_v9 = vrot.slane %v11556_v5, 4  ;;  %v4203_v60 = vsel %vm1009_vm0, %v14992_v49, %v11267_v17  ;;  %v4201_v59 = vperm.slane %v11278_v19, %v9764_v4  ;;  %v3045_v17 = vpop.permute.xlu2 %3044  ;;  %v14994_v58 = vperm.slane %v11247_v62, %v9764_v4  ;;  %14995 = vst [vmem:[#allocation24_spill] sm:$0xff] %v11639_v36 }
 0x2a2   : > { %v4237_v50 = vsel %vm1009_vm0, %v14993_v25, %v11308_v12  ;;  %v4207_v12 = vperm.slane %v4203_v60, %v9764_v4  ;;  %v4225_v49 = vrot.slane %v4224_v47, 4  ;;  %v3100_v19 = vpack.i.b16 %v3047_v0, %v11066_v31 }
 0x2a3   : > { %4712 = vmax.xlane.f32.xlu0 %v11348_v52  ;;  %v11621_v18 = vsel %vm1009_vm0, 0, %v3426_v9  ;;  %v4192_v38 = vsel %vm1009_vm0, %v4191_v30, %v14994_v58  ;;  %v4235_v9 = vperm.slane %v11326_v13, %v9764_v4  ;;  %v4241_v26 = vperm.slane %v4237_v50, %v9764_v4 }
 0x2a4   : > { %v3102_v27 = vshrl.u32 %v3047_v0, 16  ;;  %v3094_v25 = vpack.i.b16 %v3045_v17, %v11099_v6  ;;  %v4208_v30 = vrot.slane %v4207_v12, 4  ;;  %v14996_v60 = vperm.slane %v11294_v56, %v9764_v4 }
 0x2a5   : > { %v3096_v47 = vshrl.u32 %v3045_v17, 16  ;;  %v11652_v58 = vperm.slane %v4192_v38, %v9770_v20  ;;  %v4242_v50 = vrot.slane %v4241_v26, 4  ;;  %v14998_v0 = vshrl.u32 %v11066_v31, 16 }
 0x2a6   : > { %v4226_v13 = vsel %vm1009_vm0, %v4225_v49, %v14996_v60  ;;  %v3358_v1 = vperm.slane %v3100_v19, %v9764_v4  ;;  %v4209_v12 = vsel %vm1009_vm0, %v4208_v30, %v4201_v59  ;;  %v15000_v17 = vshrl.u32 %v11099_v6, 16 }
 0x2a7   : > { %14997 = vst [vmem:[#allocation23_spill] sm:$0xff] %v11652_v58  ;;  %v3103_v23 = vpack.i.b16 %v3102_v27, %v14998_v0  ;;  %v11661_v56 = vperm.slane %v4226_v13, %v9770_v20  ;;  %v3320_v38 = vperm.slane %v3094_v25, %v9764_v4  ;;  %v11667_v26 = vperm.slane %v4209_v12, %v9770_v20 }
 0x2a8   : > { %v3097_v49 = vpack.i.b16 %v3096_v47, %v15000_v17  ;;  %v4243_v31 = vsel %vm1009_vm0, %v4242_v50, %v4235_v9  ;;  %v3359_v27 = vrot.slane %v3358_v1, 4  ;;  %v3364_v19 = vperm.slane %v3358_v1, %v9770_v20 }
 0x2a9   : > { %4720 = vmax.xlane.f32.xlu2 %v11605_v7  ;;  %14999 = vst [vmem:[#allocation21_spill] sm:$0xff] %v11661_v56  ;;  %v3981_v60 = vrot.slane %v11608_v28, 4  ;;  %v11673_v59 = vperm.slane %v4243_v31, %v9770_v20  ;;  %v3377_v30 = vperm.slane %v3103_v23, %v9764_v4  ;;  %v3321_v13 = vrot.slane %v3320_v38, 4 }
 0x2aa   : > { %15001 = vst [vmem:[#allocation40_spill] sm:$0xff] %v11667_v26  ;;  %v4390_v6 = vpack.i.b16 %v11667_v26, %v11652_v58  ;;  %v3360_v25 = vsel %vm1009_vm0, 0, %v3359_v27  ;;  %v3326_v47 = vperm.slane %v3320_v38, %v9770_v20  ;;  %v3339_v9 = vperm.slane %v3097_v49, %v9764_v4  ;;  %v3041_v38 = vpop.permute.xlu2 %3040 }
 0x2ab   : > { %4716 = vmax.xlane.f32.xlu0 %v11582_v15  ;;  %15002 = vst [vmem:[#allocation41_spill] sm:$0xff] %v11673_v59  ;;  %v4396_v1 = vpack.i.b16 %v11673_v59, %v11661_v56  ;;  %v3368_v28 = vperm.slane %v3360_v25, %v9770_v20  ;;  %v3378_v50 = vrot.slane %v3377_v30, 4  ;;  %v3383_v0 = vperm.slane %v3377_v30, %v9770_v20 }
 0x2ac   : > { %3038 = vrot.lane.b32.xlu1 %v11639_v36, %s9407_s24  ;;  %v4888_v12 = vunpack.c.l.b16 %v4390_v6  ;;  %v3369_v23 = vrot.slane %v3364_v19, 4  ;;  %v3322_v17 = vsel %vm1009_vm0, 0, %v3321_v13  ;;  %v11690_v31 = vsel %vm4657_vm7, %v11415_v41, -1e+30 }
 0x2ad   : > { %15003 = vst [vmem:[#allocation42_spill] sm:$0xff] %v11690_v31  ;;  %v4889_v49 = vunpack.c.l.b16 %v4396_v1  ;;  %v3371_v27 = vrot.slane %v3368_v28, 4  ;;  %v3379_v62 = vsel %vm1009_vm0, 0, %v3378_v50  ;;  %v3082_v25 = vpack.i.b16 %v3041_v38, %v11105_v43 }
 0x2ae   : > { %v11696_v30 = vsel %vm1009_vm0, 0, %v11623_v14  ;;  %v3387_v6 = vperm.slane %v3379_v62, %v9770_v20  ;;  %v3330_v13 = vperm.slane %v3322_v17, %v9770_v20  ;;  %v3340_v15 = vrot.slane %v3339_v9, 4 }
 0x2af   : > { %v4898_v16 = vpack.c.b16 %v4889_v49, %v4888_v12  ;;  %v3372_v41 = vsel %vm1009_vm0, 0, %v3371_v27  ;;  %v3388_v1 = vrot.slane %v3383_v0, 4  ;;  %v3331_v28 = vrot.slane %v3326_v47, 4 }
 0x2b0   : > { %v3370_v50 = vsel %vm1009_vm0, 0, %v3369_v23  ;;  %v3390_v7 = vrot.slane %v3387_v6, 4  ;;  %v11704_v36 = vsel %vm1009_vm0, %v3371_v27, %v3364_v19  ;;  %v3947_v53 = vrot.slane %v3372_v41, 4 }
 0x2b1   : > { %4909 = vmatpush.bf16.msra.mxu2 %v4898_v16  ;;  %8976 = vmatpush.bf16.msra.mxu3 %v4898_v16  ;;  %v3333_v62 = vrot.slane %v3330_v13, 4  ;;  %v3341_v17 = vsel %vm1009_vm0, 0, %v3340_v15  ;;  %v3084_v52 = vshrl.u32 %v3041_v38, 16  ;;  %v11710_v12 = vsel %vm1009_vm0, %v3981_v60, %v11599_v24  ;;  %v3043_v60 = vpop.permute.xlu1 %3042 }
 0x2b2   : > { %v11715_v23 = vsel %vm1009_vm0, %v11623_v14, %v11556_v5  ;;  %v3345_v49 = vperm.slane %v3339_v9, %v9770_v20  ;;  %v11720_v27 = vsel %vm1009_vm0, 0, %v3388_v1  ;;  %v3332_v38 = vsel %vm1009_vm0, 0, %v3331_v28  ;;  %v9261_v1 = vld [vmem:[%s10867_s13 + $0xc] sm:$0xf] }
 0x2b3   : > { %4718 = vmax.xlane.f32.xlu0 %v11690_v31  ;;  %v3244_v31 = vperm.slane %v3082_v25, %v9764_v4  ;;  %v3349_v24 = vperm.slane %v3341_v17, %v9770_v20  ;;  %v11727_v25 = vsel %vm1009_vm0, 0, %v3390_v7  ;;  %v11730_v5 = vsel %vm1009_vm0, %v3947_v53, %v3370_v50 }
 0x2b4   : > { %v15004_v14 = vshrl.u32 %v11105_v43, 16  ;;  %v3334_v13 = vsel %vm1009_vm0, 0, %v3333_v62  ;;  %v11736_v41 = vsel %vm1009_vm0, %v3333_v62, %v3326_v47  ;;  %v3088_v28 = vpack.i.b16 %v3043_v60, %v9261_v1 }
 0x2b5   : > { %v3245_v6 = vrot.slane %v3244_v31, 4  ;;  %v3352_v16 = vrot.slane %v3349_v24, 4  ;;  %v3350_v17 = vrot.slane %v3345_v49, 4  ;;  %v3090_v59 = vshrl.u32 %v3043_v60, 16 }
 0x2b6   : > { %v3085_v9 = vpack.i.b16 %v3084_v52, %v15004_v14  ;;  %v11742_v53 = vsel %vm1009_vm0, %v3390_v7, %v3383_v0  ;;  %v3250_v52 = vperm.slane %v3244_v31, %v9770_v20  ;;  %v3913_v62 = vrot.slane %v3334_v13, 4  ;;  %v15005_v14 = vld [vmem:[#allocation17_spill] sm:$0xff] }
 0x2b7   : > { %v3246_v15 = vsel %vm1009_vm0, 0, %v3245_v6  ;;  %v15006_v1 = vshrl.u32 %v15005_v14, 16  ;;  %v3282_v0 = vperm.slane %v3088_v28, %v9764_v4  ;;  %v11757_v31 = vsel %vm1009_vm0, 0, %v3350_v17 }
 0x2b8   : > { %v3263_v19 = vperm.slane %v3085_v9, %v9764_v4  ;;  %v3254_v50 = vperm.slane %v3246_v15, %v9770_v20  ;;  %v11752_v9 = vsel %vm1009_vm0, 0, %v3352_v16  ;;  %v4122_v13 = vperm.slane %v11397_v39, %v9764_v4 }
 0x2b9   : > { %v3091_v6 = vpack.i.b16 %v3090_v59, %v15006_v1  ;;  %v3255_v14 = vrot.slane %v3250_v52, 4  ;;  %v11769_v28 = vsel %vm1009_vm0, %v3352_v16, %v3345_v49  ;;  %v3930_v17 = vrot.slane %v11752_v9, 4 }
 0x2ba   : > { %v3264_v24 = vrot.slane %v3263_v19, 4  ;;  %v3257_v60 = vrot.slane %v3254_v50, 4  ;;  %v3269_v7 = vperm.slane %v3263_v19, %v9770_v20  ;;  %v3283_v50 = vrot.slane %v3282_v0, 4 }
 0x2bb   : > { %v3301_v43 = vperm.slane %v3091_v6, %v9764_v4  ;;  %v11766_v19 = vsel %vm1009_vm0, %v3913_v62, %v3332_v38  ;;  %v4123_v38 = vrot.slane %v4122_v13, 4  ;;  %v3256_v62 = vsel %vm1009_vm0, 0, %v3255_v14 }
 0x2bc   : > { %v3265_v15 = vsel %vm1009_vm0, 0, %v3264_v24  ;;  %v3258_v59 = vsel %vm1009_vm0, 0, %v3257_v60  ;;  %v3288_v24 = vperm.slane %v3282_v0, %v9770_v20  ;;  %v3274_v6 = vrot.slane %v3269_v7, 4 }
 0x2bd   : > { %v3273_v1 = vperm.slane %v3265_v15, %v9770_v20  ;;  %v3284_v39 = vsel %vm1009_vm0, 0, %v3283_v50  ;;  %v3302_v56 = vrot.slane %v3301_v43, 4  ;;  %v11775_v26 = vsel %vm1009_vm0, %v3257_v60, %v3250_v52 }
 0x2be   : > { %v3845_v15 = vrot.slane %v3258_v59, 4  ;;  %v3292_v58 = vperm.slane %v3284_v39, %v9770_v20  ;;  %v11781_v16 = vperm.slane %v3301_v43, %v9770_v20  ;;  %v4133_v0 = vperm.slane %v11401_v11, %v9764_v4 }
 0x2bf   : > { %v3276_v47 = vrot.slane %v3273_v1, 4  ;;  %v3303_v49 = vsel %vm1009_vm0, 0, %v3302_v56  ;;  %v3293_v50 = vrot.slane %v3288_v24, 4  ;;  %v11790_v59 = vsel %vm1009_vm0, 0, %v3274_v6 }
 0x2c0   : > { %v3295_v52 = vrot.slane %v3292_v58, 4  ;;  %v3311_v60 = vperm.slane %v3303_v49, %v9770_v20  ;;  %v3844_v13 = vperm.slane %v11775_v26, %v9764_v4  ;;  %v15007_v56 = vrot.slane %v11372_v40, 4 }
 0x2c1   : > { %v11786_v1 = vsel %vm1009_vm0, 0, %v3276_v47  ;;  %v4156_v11 = vperm.slane %v11470_v61, %v9764_v4  ;;  %v11801_v14 = vsel %vm1009_vm0, %v3845_v15, %v3256_v62  ;;  %v11804_v58 = vsel %vm1009_vm0, %v3276_v47, %v3269_v7 }
 0x2c2   : > { %v4135_v43 = vsel %vm1009_vm0, %v15007_v56, %v11356_v34  ;;  %v11807_v6 = vsel %vm1009_vm0, 0, %v3295_v52  ;;  %v15008_v39 = vperm.slane %v11359_v2, %v9764_v4  ;;  %v3862_v40 = vrot.slane %v11786_v1, 4 }
 0x2c3   : > { %v3312_v34 = vrot.slane %v11781_v16, 4  ;;  %v4139_v61 = vperm.slane %v4135_v43, %v9764_v4  ;;  %v4157_v56 = vrot.slane %v4156_v11, 4  ;;  %v11817_v15 = vsel %vm1009_vm0, 0, %v3293_v50 }
 0x2c4   : > { %v4124_v49 = vsel %vm1009_vm0, %v4123_v38, %v15008_v39  ;;  %v11819_v47 = vrot.slane %v3311_v60, 4  ;;  %v11822_v7 = vsel %vm1009_vm0, %v3295_v52, %v3288_v24  ;;  %v15009_v2 = vrot.slane %v11462_v51, 4 }
 0x2c5   : > { %v3879_v62 = vrot.slane %v11807_v6, 4  ;;  %v11830_v39 = vperm.slane %v4124_v49, %v9770_v20  ;;  %v4140_v43 = vrot.slane %v4139_v61, 4  ;;  %v15010_v50 = vperm.slane %v11431_v44, %v9764_v4 }
 0x2c6   : > { %v4169_v38 = vsel %vm1009_vm0, %v15009_v2, %v11438_v54  ;;  %v4167_v24 = vperm.slane %v11481_v42, %v9764_v4  ;;  %v4054_v54 = vperm.slane %v11523_v32, %v9764_v4  ;;  %v4065_v49 = vperm.slane %v11526_v8, %v9764_v4 }
 0x2c7   : > { %v4158_v60 = vsel %vm1009_vm0, %v4157_v56, %v15010_v50  ;;  %v4173_v51 = vperm.slane %v4169_v38, %v9764_v4  ;;  %v4141_v52 = vsel %vm1009_vm0, %v4140_v43, %v4133_v0  ;;  %v15011_v44 = vrot.slane %v11513_v22, 4 }
 0x2c8   : > { %v11837_v11 = vperm.slane %v4158_v60, %v9770_v20  ;;  %v4088_v56 = vperm.slane %v11559_v10, %v9764_v4  ;;  %v11854_v42 = vperm.slane %v4141_v52, %v9770_v20  ;;  %v4055_v38 = vrot.slane %v4054_v54, 4 }
 0x2c9   : > { %v4067_v61 = vsel %vm1009_vm0, %v15011_v44, %v11510_v3  ;;  %v4174_v2 = vrot.slane %v4173_v51, 4  ;;  %v4099_v0 = vperm.slane %v11562_v21, %v9764_v4  ;;  %v15012_v8 = vrot.slane %v11552_v37, 4 }
 0x2ca   : > { %v4071_v32 = vperm.slane %v4067_v61, %v9764_v4  ;;  %v4089_v50 = vrot.slane %v4088_v56, 4  ;;  %v3986_v3 = vperm.slane %v11710_v12, %v9764_v4  ;;  %v4378_v43 = vpack.i.b16 %v11854_v42, %v11830_v39 }
 0x2cb   : > { %v4101_v22 = vsel %vm1009_vm0, %v15012_v8, %v11544_v45  ;;  %v4175_v10 = vsel %vm1009_vm0, %v4174_v2, %v4167_v24  ;;  %v15013_v60 = vperm.slane %v11493_v55, %v9764_v4  ;;  %v15014_v45 = vperm.slane %v11531_v57, %v9764_v4 }
 0x2cc   : > { %v4072_v54 = vrot.slane %v4071_v32, 4  ;;  %v11873_v21 = vperm.slane %v4175_v10, %v9770_v20  ;;  %v4105_v24 = vperm.slane %v4101_v22, %v9764_v4  ;;  %v4886_v52 = vunpack.c.l.b16 %v4378_v43 }
 0x2cd   : > { %v4056_v51 = vsel %vm1009_vm0, %v4055_v38, %v15013_v60  ;;  %v4090_v12 = vsel %vm1009_vm0, %v4089_v50, %v15014_v45  ;;  %v3987_v55 = vrot.slane %v3986_v3, 4  ;;  %v3997_v61 = vperm.slane %v11715_v23, %v9764_v4 }
 0x2ce   : > { %v11876_v37 = vperm.slane %v4056_v51, %v9770_v20  ;;  %v4073_v44 = vsel %vm1009_vm0, %v4072_v54, %v4065_v49  ;;  %v4384_v56 = vpack.i.b16 %v11873_v21, %v11837_v11  ;;  %v4106_v38 = vrot.slane %v4105_v24, 4 }
 0x2cf   : > { %v11889_v2 = vperm.slane %v4073_v44, %v9770_v20  ;;  %v15015_v57 = vrot.slane %v11696_v30, 4  ;;  %v11896_v50 = vperm.slane %v4090_v12, %v9770_v20  ;;  %v15016_v49 = vperm.slane %v11626_v46, %v9764_v4 }
 0x2d0   : > { %v4020_v22 = vperm.slane %v11596_v33, %v9764_v4  ;;  %v4887_v3 = vunpack.c.l.b16 %v4384_v56  ;;  %v4107_v10 = vsel %vm1009_vm0, %v4106_v38, %v4099_v0  ;;  %v15017_v51 = vrot.slane %v11567_v35, 4 }
 0x2d1   : > { %v3999_v32 = vsel %vm1009_vm0, %v15015_v57, %v11621_v18  ;;  %v3988_v23 = vsel %vm1009_vm0, %v3987_v55, %v15016_v49  ;;  %v4366_v30 = vpack.i.b16 %v11889_v2, %v11876_v37  ;;  %v4031_v18 = vperm.slane %v11592_v48, %v9764_v4 }
 0x2d2   : > { %v4003_v8 = vperm.slane %v3999_v32, %v9764_v4  ;;  %v11911_v43 = vperm.slane %v4107_v10, %v9770_v20  ;;  %v4021_v60 = vrot.slane %v4020_v22, 4  ;;  %v4033_v54 = vsel %vm1009_vm0, %v15017_v51, %v11587_v29 }
 0x2d3   : > { %v4897_v33 = vpack.c.b16 %v4887_v3, %v4886_v52  ;;  %v11918_v45 = vperm.slane %v3988_v23, %v9770_v20  ;;  %v4037_v0 = vperm.slane %v4033_v54, %v9764_v4  ;;  %v3918_v12 = vperm.slane %v11766_v19, %v9764_v4  ;;  %v4695_v1 = vpop.xlane.xlu2 %4694 }
 0x2d4   : > { %v4004_v46 = vrot.slane %v4003_v8, 4  ;;  %v4372_v48 = vpack.i.b16 %v11911_v43, %v11896_v50  ;;  %v4884_v24 = vunpack.c.l.b16 %v4366_v30  ;;  %v15018_v35 = vperm.slane %v11570_v63, %v9764_v4 }
 0x2d5   : > { %4910 = vmatpush.bf16.msra.mxu2 %v4897_v33  ;;  %8977 = vmatpush.bf16.msra.mxu3 %v4897_v33  ;;  %v4038_v55 = vrot.slane %v4037_v0, 4  ;;  %v3919_v56 = vrot.slane %v3918_v12, 4  ;;  %v3929_v19 = vperm.slane %v11769_v28, %v9764_v4  ;;  %v3931_v63 = vsel %vm1009_vm0, %v3930_v17, %v11757_v31  ;;  %v11981_v0 = vpop.xlane.xlu0 %4692 }
 0x2d6   : > { %v4005_v44 = vsel %vm1009_vm0, %v4004_v46, %v3997_v61  ;;  %v4022_v29 = vsel %vm1009_vm0, %v4021_v60, %v15018_v35  ;;  %v4885_v38 = vunpack.c.l.b16 %v4372_v48  ;;  %v3952_v61 = vperm.slane %v11730_v5, %v9764_v4 }
 0x2d7   : > { %v11931_v52 = vperm.slane %v4005_v44, %v9770_v20  ;;  %v11936_v57 = vperm.slane %v4022_v29, %v9770_v20  ;;  %v4039_v32 = vsel %vm1009_vm0, %v4038_v55, %v4031_v18  ;;  %v15019_v28 = vperm.slane %v11736_v41, %v9764_v4 }
 0x2d8   : > { %v3935_v8 = vperm.slane %v3931_v63, %v9764_v4  ;;  %v3315_v9 = vsel %vm1009_vm0, 0, %v11819_v47  ;;  %v4896_v22 = vpack.c.b16 %v4885_v38, %v4884_v24  ;;  %v11955_v31 = vperm.slane %v4039_v32, %v9770_v20 }
 0x2d9   : > { %v4354_v49 = vpack.i.b16 %v11931_v52, %v11918_v45  ;;  %v3920_v23 = vsel %vm1009_vm0, %v3919_v56, %v15019_v28  ;;  %v3953_v5 = vrot.slane %v3952_v61, 4  ;;  %v3963_v10 = vperm.slane %v11742_v53, %v9764_v4 }
 0x2da   : > { %v11958_v17 = vperm.slane %v3920_v23, %v9770_v20  ;;  %v3936_v3 = vrot.slane %v3935_v8, 4  ;;  %v15020_v41 = vrot.slane %v11727_v25, 4  ;;  %4911 = vmatpush.bf16.msra.mxu2 %v4896_v22  ;;  %8978 = vmatpush.bf16.msra.mxu3 %v4896_v22  ;;  %v4360_v18 = vpack.i.b16 %v11955_v31, %v11936_v57 }
 0x2db   : > { %v4882_v46 = vunpack.c.l.b16 %v4354_v49  ;;  %v15021_v60 = vperm.slane %v11704_v36, %v9764_v4  ;;  %v3313_v53 = vsel %vm1009_vm0, 0, %v3312_v34  ;;  %v3896_v25 = vrot.slane %v3315_v9, 4  ;;  %v15022_v49 = vld [vmem:[#allocation31_spill] sm:$0xff] }
 0x2dc   : > { %v3965_v30 = vsel %vm1009_vm0, %v15020_v41, %v11720_v27  ;;  %v3880_v27 = vsel %vm1009_vm0, %v3879_v62, %v11817_v15  ;;  %v3937_v33 = vsel %vm1009_vm0, %v3936_v3, %v3929_v19  ;;  %v4883_v12 = vunpack.c.l.b16 %v4360_v18 }
 0x2dd   : > { %v3954_v51 = vsel %vm1009_vm0, %v3953_v5, %v15021_v60  ;;  %v3969_v54 = vperm.slane %v3965_v30, %v9764_v4  ;;  %v11984_v36 = vperm.slane %v3937_v33, %v9770_v20  ;;  %v3850_v24 = vperm.slane %v11801_v14, %v9764_v4  ;;  %v12025_v8 = vpop.xlane.xlu0 %4710 }
 0x2de   : > { %v3878_v34 = vperm.slane %v11822_v7, %v9764_v4  ;;  %v3891_v6 = vsel %vm1009_vm0, %v11819_v47, %v11781_v16  ;;  %v11994_v15 = vperm.slane %v3954_v51, %v9770_v20  ;;  %v3863_v62 = vsel %vm1009_vm0, %v3862_v40, %v11790_v59 }
 0x2df   : > { %v3970_v48 = vrot.slane %v3969_v54, 4  ;;  %v4895_v44 = vpack.c.b16 %v4883_v12, %v4882_v46  ;;  %v4342_v14 = vpack.i.b16 %v11984_v36, %v11958_v17  ;;  %v3851_v29 = vrot.slane %v3850_v24, 4  ;;  %v15023_v46 = vld [vmem:[#allocation23_spill] sm:$0xff]  ;;  %v15024_v54 = vld [vmem:[#allocation40_spill] sm:$0xff]  ;;  %v15026_v12 = vld [vmem:[#allocation41_spill] sm:$0xff] }
 0x2e0   : > { %v3861_v16 = vperm.slane %v11804_v58, %v9764_v4  ;;  %v3867_v47 = vperm.slane %v3863_v62, %v9764_v4  ;;  %v3884_v55 = vperm.slane %v3880_v27, %v9764_v4  ;;  %v3897_v40 = vsel %vm1009_vm0, %v3896_v25, %v3313_v53  ;;  %v15025_v27 = vld [vmem:[#allocation21_spill] sm:$0xff] }
 0x2e1   : > { %v3971_v35 = vsel %vm1009_vm0, %v3970_v48, %v3963_v10  ;;  %4912 = vmatpush.bf16.msra.mxu2 %v4895_v44  ;;  %8979 = vmatpush.bf16.msra.mxu3 %v4895_v44  ;;  %v3852_v59 = vsel %vm1009_vm0, %v3851_v29, %v3844_v13  ;;  %v4880_v19 = vunpack.c.l.b16 %v4342_v14  ;;  %v3895_v61 = vperm.slane %v3891_v6, %v9764_v4 }
 0x2e2   : > { %v12004_v7 = vperm.slane %v3971_v35, %v9770_v20  ;;  %v3868_v38 = vrot.slane %v3867_v47, 4  ;;  %v3885_v58 = vrot.slane %v3884_v55, 4  ;;  %v12018_v63 = vperm.slane %v3852_v59, %v9770_v20  ;;  %v12049_v35 = vpop.xlane.xlu1 %4708 }
 0x2e3   : > { %v3901_v32 = vperm.slane %v3897_v40, %v9764_v4  ;;  %v4725_v28 = vsub.f32 %v15022_v49, %v4695_v1  ;;  %v4391_v60 = vshrl.u32 %v15023_v46, 16  ;;  %v4392_v53 = vshrl.u32 %v15024_v54, 16  ;;  %v15027_v1 = vld [vmem:[#allocation34_spill] sm:$0xff] }
 0x2e4   : > { %v4348_v56 = vpack.i.b16 %v12004_v7, %v11994_v15  ;;  %v3869_v13 = vsel %vm1009_vm0, %v3868_v38, %v3861_v16  ;;  %v3886_v23 = vsel %vm1009_vm0, %v3885_v58, %v3878_v34  ;;  %v4397_v25 = vshrl.u32 %v15025_v27, 16  ;;  %v9262_v27 = vld [vmem:[%s10867_s13] sm:$0xf] }
 0x2e5   : > { %v12028_v9 = vperm.slane %v3869_v13, %v9770_v20  ;;  %v3902_v22 = vrot.slane %v3901_v32, 4  ;;  %v4742_v5 = vmul.f32 1.442695, %v4725_v28  ;;  %v12031_v10 = vperm.slane %v3886_v23, %v9770_v20 }
 0x2e6   : > { %v4881_v26 = vunpack.c.l.b16 %v4348_v56  ;;  %v4398_v48 = vshrl.u32 %v15026_v12, 16  ;;  %v4379_v24 = vshrl.u32 %v11830_v39, 16  ;;  %v4380_v34 = vshrl.u32 %v11854_v42, 16 }
 0x2e7   : > { %v3903_v41 = vsel %vm1009_vm0, %v3902_v22, %v3895_v61  ;;  %v4330_v30 = vpack.i.b16 %v12028_v9, %v12018_v63  ;;  %9107 = vpow2.f32 %v4742_v5  ;;  %v4393_v6 = vpack.i.b16 %v4392_v53, %v4391_v60 }
 0x2e8   : > { %v4894_v3 = vpack.c.b16 %v4881_v26, %v4880_v19  ;;  %v12037_v18 = vperm.slane %v3903_v41, %v9770_v20  ;;  %v4385_v62 = vshrl.u32 %v11837_v11, 16  ;;  %v4386_v44 = vshrl.u32 %v11873_v21, 16  ;;  %v15028_v11 = vld [vmem:[#allocation30_spill] sm:$0xff]  ;;  %v15029_v41 = vld [vmem:[#allocation19_spill] sm:$0xff] }
 0x2e9   : > { %v4878_v51 = vunpack.c.l.b16 %v4330_v30  ;;  %v4399_v16 = vpack.i.b16 %v4398_v48, %v4397_v25  ;;  %v4381_v47 = vpack.i.b16 %v4380_v34, %v4379_v24  ;;  %v4973_v40 = vunpack.c.l.b16 %v4393_v6 }
 0x2ea   : > { %4913 = vmatpush.bf16.msra.mxu2 %v4894_v3  ;;  %8980 = vmatpush.bf16.msra.mxu3 %v4894_v3  ;;  %v4336_v33 = vpack.i.b16 %v12037_v18, %v12031_v10  ;;  %v4387_v56 = vpack.i.b16 %v4386_v44, %v4385_v62  ;;  %v4724_v21 = vsub.f32 %v15028_v11, %v11981_v0  ;;  %v4367_v32 = vshrl.u32 %v11876_v37, 16  ;;  %v15031_v44 = vld [vmem:[#allocation36_spill] sm:$0xff] }
 0x2eb   : > { %v4974_v42 = vunpack.c.l.b16 %v4399_v16  ;;  %v4971_v19 = vunpack.c.l.b16 %v4381_v47  ;;  %v4368_v49 = vshrl.u32 %v11889_v2, 16  ;;  %v4373_v28 = vshrl.u32 %v11896_v50, 16  ;;  %v15030_v50 = vld [vmem:[#allocation32_spill] sm:$0xff] }
 0x2ec   : > { %v4879_v14 = vunpack.c.l.b16 %v4336_v33  ;;  %v4972_v58 = vunpack.c.l.b16 %v4387_v56  ;;  %v4374_v13 = vshrl.u32 %v11911_v43, 16  ;;  %v4740_v0 = vmul.f32 1.442695, %v4724_v21  ;;  %v3037_v33 = vpop.permute.xlu2 %3036 }
 0x2ed   : > { %v12051_v55 = vpop.eup %9107  ;;  %v12057_v61 = vpack.c.b16 %v4974_v42, %v4973_v40  ;;  %v4369_v23 = vpack.i.b16 %v4368_v49, %v4367_v32  ;;  %v4355_v43 = vshrl.u32 %v11918_v45, 16  ;;  %v4356_v54 = vshrl.u32 %v11931_v52, 16 }
 0x2ee   : > { %v4701_v29 = vpop.xlane.xlu0 %4700  ;;  %v4893_v39 = vpack.c.b16 %v4879_v14, %v4878_v51  ;;  %4774 = vadd.xlane.f32.xlu2 %v12051_v55  ;;  %v12062_v26 = vpack.c.b16 %v4972_v58, %v4971_v19  ;;  %v4375_v22 = vpack.i.b16 %v4374_v13, %v4373_v28  ;;  %v4733_v51 = vsub.f32 %v15030_v50, %v12025_v8  ;;  %v15032_v13 = vld [vmem:[#allocation28_spill] sm:$0xff] }
 0x2ef   : > { %v4728_v59 = vsub.f32 %v15027_v1, %v4701_v29  ;;  %v4969_v3 = vunpack.c.l.b16 %v4369_v23  ;;  %v4361_v53 = vshrl.u32 %v11936_v57, 16  ;;  %v3071_v25 = vshrl.u32 %v9262_v27, 16  ;;  %v15033_v23 = vld [vmem:[#allocation22_spill] sm:$0xff] }
 0x2f0   : > { %4914 = vmatpush.bf16.msra.mxu2 %v4893_v39  ;;  %8981 = vmatpush.bf16.msra.mxu3 %v4893_v39  ;;  %v4970_v46 = vunpack.c.l.b16 %v4375_v22  ;;  %v4357_v12 = vpack.i.b16 %v4356_v54, %v4355_v43  ;;  %v4362_v48 = vshrl.u32 %v11955_v31, 16  ;;  %v4758_v24 = vmul.f32 1.442695, %v4733_v51 }
 0x2f1   : > { %v4748_v38 = vmul.f32 1.442695, %v4728_v59  ;;  %v3072_v6 = vshrl.u32 %v3037_v33, 16  ;;  %v4343_v8 = vshrl.u32 %v11958_v17, 16  ;;  %v4344_v62 = vshrl.u32 %v11984_v36, 16 }
 0x2f2   : > { %v12068_v2 = vpack.c.b16 %v4970_v46, %v4969_v3  ;;  %v4363_v52 = vpack.i.b16 %v4362_v48, %v4361_v53  ;;  %v4967_v29 = vunpack.c.l.b16 %v4357_v12  ;;  %v4349_v57 = vshrl.u32 %v11994_v15, 16  ;;  %v15034_v12 = vld [vmem:[#allocation29_spill] sm:$0xff] }
 0x2f3   : > { %9109 = vpow2.f32 %v4748_v38  ;;  %v3070_v1 = vpack.i.b16 %v3037_v33, %v9262_v27  ;;  %v4345_v31 = vpack.i.b16 %v4344_v62, %v4343_v8  ;;  %v3073_v17 = vpack.i.b16 %v3072_v6, %v3071_v25  ;;  %v4612_v33 = vpop.f32.mrf.mxu1 }
 0x2f4   : > { %9111 = vpow2.f32 %v4740_v0  ;;  %v4968_v36 = vunpack.c.l.b16 %v4363_v52  ;;  %v4350_v59 = vshrl.u32 %v12004_v7, 16  ;;  %v4331_v56 = vshrl.u32 %v12018_v63, 16 }
 0x2f5   : > { %v4965_v40 = vunpack.c.l.b16 %v4345_v31  ;;  %v4332_v15 = vshrl.u32 %v12028_v9, 16  ;;  %v4337_v19 = vshrl.u32 %v12031_v10, 16  ;;  %v4338_v11 = vshrl.u32 %v12037_v18, 16 }
 0x2f6   : > { %v4703_v5 = vpop.xlane.xlu1 %4702  ;;  %v12091_v39 = vpack.c.b16 %v4968_v36, %v4967_v29  ;;  %v4351_v42 = vpack.i.b16 %v4350_v59, %v4349_v57  ;;  %v3168_v21 = vperm.slane %v3070_v1, %v9764_v4  ;;  %v3187_v7 = vperm.slane %v3073_v17, %v9764_v4  ;;  %v15036_v57 = vld [vmem:[#allocation18_spill] sm:$0xff] }
 0x2f7   : > { %v4729_v30 = vsub.f32 %v15029_v41, %v4703_v5  ;;  %v4333_v38 = vpack.i.b16 %v4332_v15, %v4331_v56  ;;  %v4339_v28 = vpack.i.b16 %v4338_v11, %v4337_v19  ;;  %v4732_v48 = vsub.f32 %v15034_v12, %v12049_v35  ;;  %v15039_v11 = vld [vmem:[#allocation33_spill] sm:$0xff] }
 0x2f8   : > { %v4966_v49 = vunpack.c.l.b16 %v4351_v42  ;;  %v3188_v46 = vrot.slane %v3187_v7, 4  ;;  %v3193_v8 = vperm.slane %v3187_v7, %v9770_v20  ;;  %v4630_v52 = vmul.f32 0.125, %v4612_v33  ;;  %v15040_v7 = vld [vmem:[#allocation24_spill] sm:$0xff] }
 0x2f9   : > { %v12066_v60 = vpop.eup %9109  ;;  %v4750_v37 = vmul.f32 1.442695, %v4729_v30  ;;  %v4963_v22 = vunpack.c.l.b16 %v4333_v38  ;;  %v4964_v10 = vunpack.c.l.b16 %v4339_v28  ;;  %v3169_v30 = vrot.slane %v3168_v21, 4 }
 0x2fa   : > { %4780 = vadd.xlane.f32.xlu1 %v12066_v60  ;;  %v12081_v45 = vpop.eup %9111  ;;  %v12101_v5 = vpack.c.b16 %v4966_v49, %v4965_v40  ;;  %v3189_v43 = vsel %vm1009_vm0, 0, %v3188_v46  ;;  %v4756_v31 = vmul.f32 1.442695, %v4732_v48  ;;  %v3198_v59 = vrot.slane %v3193_v8, 4 }
 0x2fb   : > { %9113 = vpow2.f32 %v4750_v37  ;;  %v12107_v37 = vpack.c.b16 %v4964_v10, %v4963_v22  ;;  %v3170_v50 = vsel %vm1009_vm0, 0, %v3169_v30  ;;  %v3197_v27 = vperm.slane %v3189_v43, %v9770_v20 }
 0x2fc   : > { %9115 = vpow2.f32 %v4758_v24  ;;  %v3178_v54 = vperm.slane %v3170_v50, %v9770_v20  ;;  %v3174_v24 = vperm.slane %v3168_v21, %v9770_v20  ;;  %v12130_v42 = vsel %vm4659_vm9, %v4630_v52, -1e+30 }
 0x2fd   : > { %v3200_v62 = vrot.slane %v3197_v27, 4  ;;  %v3077_v49 = vshrl.u32 %v15040_v7, 16  ;;  %v3199_v28 = vsel %vm1009_vm0, 0, %v3198_v59 }
 0x2fe   : > { %v4705_v34 = vpop.xlane.xlu0 %4704  ;;  %v3179_v17 = vrot.slane %v3174_v24, 4 }
 0x2ff   : > { %v4730_v14 = vsub.f32 %v15031_v44, %v4705_v34  ;;  %v3181_v34 = vrot.slane %v3178_v54, 4  ;;  %v15035_v44 = vld [vmem:[#allocation25_spill] sm:$0xff]  ;;  %v3201_v35 = vsel %vm1009_vm0, 0, %v3200_v62  ;;  %v3789_v12 = vsel %vm1009_vm0, %v3200_v62, %v3193_v8 }
 0x300   : > { %v3180_v38 = vsel %vm1009_vm0, 0, %v3179_v17  ;;  %v3793_v17 = vperm.slane %v3789_v12, %v9764_v4  ;;  %v15045_v12 = vld [vmem:[#allocation37_spill] sm:$0xff] }
 0x301   : > { %v12084_v16 = vpop.eup %9113  ;;  %v4752_v47 = vmul.f32 1.442695, %v4730_v14  ;;  %v3182_v36 = vsel %vm1009_vm0, 0, %v3181_v34  ;;  %v3772_v33 = vsel %vm1009_vm0, %v3181_v34, %v3174_v24 }
 0x302   : > { %4782 = vadd.xlane.f32.xlu0 %v12084_v16  ;;  %4772 = vadd.xlane.f32.xlu1 %v12081_v45  ;;  %v12099_v0 = vpop.eup %9115  ;;  %v3777_v19 = vrot.slane %v3182_v36, 4  ;;  %v3776_v62 = vperm.slane %v3772_v33, %v9764_v4 }
 0x303   : > { %9117 = vpow2.f32 %v4752_v47 }
 0x304   : > { %v3778_v10 = vsel %vm1009_vm0, %v3777_v19, %v3180_v38 }
 0x305   : > { %v3782_v48 = vperm.slane %v3778_v10, %v9764_v4 }
 0x306   : > { %v4697_v58 = vpop.xlane.xlu0 %4696  ;;  %v4707_v32 = vpop.xlane.xlu1 %4706 }
 0x307   : > { %v4726_v63 = vsub.f32 %v15032_v13, %v4697_v58  ;;  %v4731_v9 = vsub.f32 %v15033_v23, %v4707_v32  ;;  %v3794_v58 = vrot.slane %v3201_v35, 4  ;;  %v15041_v13 = vld [vmem:[#allocation27_spill] sm:$0xff]  ;;  %v15043_v35 = vld [vmem:[#allocation42_spill] sm:$0xff]  ;;  %v3783_v56 = vrot.slane %v3782_v48, 4 }
 0x308   : > { %v4404_v48 = vshrl.u32 %v15045_v12, 16 }
 0x309   : > { %v12103_v18 = vpop.eup %9117  ;;  %v4744_v3 = vmul.f32 1.442695, %v4726_v63  ;;  %v4754_v41 = vmul.f32 1.442695, %v4731_v9  ;;  %v3795_v50 = vsel %vm1009_vm0, %v3794_v58, %v3199_v28 }
 0x30a   : > { %4784 = vadd.xlane.f32.xlu0 %v12103_v18  ;;  %4790 = vadd.xlane.f32.xlu1 %v12099_v0  ;;  %v3799_v52 = vperm.slane %v3795_v50, %v9764_v4 }
 0x30b   : > { %9119 = vpow2.f32 %v4744_v3 }
 0x30c   : > { %9121 = vpow2.f32 %v4754_v41  ;;  %v3800_v15 = vrot.slane %v3799_v52, 4  ;;  %v15046_v52 = vld [vmem:[#allocation39_spill] sm:$0xff] }
 0x30e   : > { %v4699_v51 = vpop.xlane.xlu0 %4698 }
 0x30f   : > { %v4727_v21 = vsub.f32 %v15039_v11, %v4699_v51 }
 0x311   : > { %v12112_v53 = vpop.eup %9119  ;;  %v4746_v46 = vmul.f32 1.442695, %v4727_v21 }
 0x312   : > { %v12115_v25 = vpop.eup %9121  ;;  %4776 = vadd.xlane.f32.xlu2 %v12112_v53 }
 0x313   : > { %4786 = vadd.xlane.f32.xlu0 %v12115_v25 }
 0x314   : > { %v4715_v6 = vpop.xlane.xlu2 %4714 }
 0x315   : > { %v4735_v14 = vsub.f32 %v15035_v44, %v4715_v6 }
 0x316   : > { %v4713_v29 = vpop.xlane.xlu0 %4712 }
 0x317   : > { %v4734_v47 = vsub.f32 %v15036_v57, %v4713_v29  ;;  %v4762_v1 = vmul.f32 1.442695, %v4735_v14  ;;  %v15042_v29 = vld [vmem:[#allocation26_spill] sm:$0xff] }
 0x319   : > { %v4760_v40 = vmul.f32 1.442695, %v4734_v47  ;;  %9123 = vpow2.f32 %v4762_v1 }
 0x31b   : > { %9125 = vpow2.f32 %v4760_v40  ;;  %4722 = vmax.xlane.f32.xlu0 %v12130_v42 }
 0x31c   : > { %9127 = vpow2.f32 %v4756_v31  ;;  %v4721_v32 = vpop.xlane.xlu2 %4720 }
 0x31d   : > { %v4738_v63 = vsub.f32 %v15041_v13, %v4721_v32 }
 0x31e   : > { %v4717_v23 = vpop.xlane.xlu0 %4716  ;;  %v3039_v9 = vpop.permute.xlu1 %3038 }
 0x31f   : > { %v12138_v22 = vpop.eup %9123  ;;  %v3076_v3 = vpack.i.b16 %v3039_v9, %v15040_v7  ;;  %v3078_v41 = vshrl.u32 %v3039_v9, 16  ;;  %v4768_v30 = vmul.f32 1.442695, %v4738_v63  ;;  %v4736_v57 = vsub.f32 %v15042_v29, %v4717_v23 }
 0x320   : > { %4794 = vadd.xlane.f32.xlu2 %v12138_v22  ;;  %v3784_v23 = vsel %vm1009_vm0, %v3783_v56, %v3776_v62  ;;  %v4409_v29 = vshrl.u32 %v15046_v52, 16 }
 0x321   : > { %v12144_v51 = vpop.eup %9125  ;;  %v3079_v43 = vpack.i.b16 %v3078_v41, %v3077_v49  ;;  %v3206_v54 = vperm.slane %v3076_v3, %v9764_v4  ;;  %9129 = vpow2.f32 %v4768_v30  ;;  %v4764_v19 = vmul.f32 1.442695, %v4736_v57 }
 0x322   : > { %v12147_v27 = vpop.eup %9127  ;;  %4792 = vadd.xlane.f32.xlu1 %v12144_v51  ;;  %9131 = vpow2.f32 %v4746_v46  ;;  %v3801_v3 = vsel %vm1009_vm0, %v3800_v15, %v3793_v17 }
 0x323   : > { %v3207_v6 = vrot.slane %v3206_v54, 4  ;;  %v3212_v44 = vperm.slane %v3206_v54, %v9770_v20  ;;  %v3225_v14 = vperm.slane %v3079_v43, %v9764_v4  ;;  %4788 = vadd.xlane.f32.xlu0 %v12147_v27  ;;  %v15044_v54 = vld [vmem:[#allocation38_spill] sm:$0xff] }
 0x324   : > { %v4403_v33 = vshrl.u32 %v15044_v54, 16 }
 0x325   : > { %v3208_v24 = vsel %vm1009_vm0, 0, %v3207_v6  ;;  %v3226_v34 = vrot.slane %v3225_v14, 4  ;;  %v3231_v8 = vperm.slane %v3225_v14, %v9770_v20  ;;  %v3217_v1 = vrot.slane %v3212_v44, 4 }
 0x326   : > { %v3216_v47 = vperm.slane %v3208_v24, %v9770_v20  ;;  %v4719_v31 = vpop.xlane.xlu0 %4718  ;;  %v3788_v6 = vperm.slane %v3784_v23, %v9770_v20  ;;  %v4405_v56 = vpack.i.b16 %v4404_v48, %v4403_v33 }
 0x327   : > { %v12163_v36 = vpop.eup %9129  ;;  %v3227_v59 = vsel %vm1009_vm0, 0, %v3226_v34  ;;  %v4737_v40 = vsub.f32 %v15043_v35, %v4719_v31  ;;  %v3236_v38 = vrot.slane %v3231_v8, 4  ;;  %v3218_v7 = vsel %vm1009_vm0, 0, %v3217_v1 }
 0x328   : > { %v3219_v11 = vrot.slane %v3216_v47, 4  ;;  %v3235_v21 = vperm.slane %v3227_v59, %v9770_v20  ;;  %4800 = vadd.xlane.f32.xlu2 %v12163_v36  ;;  %v12169_v32 = vpop.eup %9131 }
 0x329   : > { %v4766_v58 = vmul.f32 1.442695, %v4737_v40  ;;  %v3237_v9 = vsel %vm1009_vm0, 0, %v3236_v38  ;;  %v4975_v38 = vunpack.c.l.b16 %v4405_v56 }
 0x32a   : > { %v3220_v49 = vsel %vm1009_vm0, 0, %v3219_v11  ;;  %v3238_v28 = vrot.slane %v3235_v21, 4  ;;  %v3806_v13 = vsel %vm1009_vm0, %v3219_v11, %v3212_v44  ;;  %v3805_v44 = vperm.slane %v3801_v3, %v9770_v20 }
 0x32b   : > { %v3811_v63 = vrot.slane %v3220_v49, 4  ;;  %9133 = vpow2.f32 %v4766_v58  ;;  %4778 = vadd.xlane.f32.xlu0 %v12169_v32  ;;  %v3810_v50 = vperm.slane %v3806_v13, %v9764_v4  ;;  %v4319_v13 = vshrl.u32 %v3788_v6, 16 }
 0x32c   : > { %9135 = vpow2.f32 %v4764_v19  ;;  %v3239_v10 = vsel %vm1009_vm0, 0, %v3238_v28  ;;  %v3823_v30 = vsel %vm1009_vm0, %v3238_v28, %v3231_v8  ;;  %v15047_v8 = vld [vmem:[#allocation20_spill] sm:$0xff]  ;;  %v4318_v35 = vpack.i.b16 %v3805_v44, %v3788_v6 }
 0x32d   : > { %v3812_v41 = vsel %vm1009_vm0, %v3811_v63, %v3218_v7  ;;  %v3828_v46 = vrot.slane %v3239_v10, 4  ;;  %v3827_v24 = vperm.slane %v3823_v30, %v9764_v4  ;;  %v4410_v62 = vshrl.u32 %v15047_v8, 16 }
 0x32e   : > { %v3816_v43 = vperm.slane %v3812_v41, %v9764_v4  ;;  %v4876_v21 = vunpack.c.l.b16 %v4318_v35  ;;  %v4320_v63 = vshrl.u32 %v3805_v44, 16 }
 0x32f   : > { %v3829_v14 = vsel %vm1009_vm0, %v3828_v46, %v3237_v9  ;;  %v4411_v15 = vpack.i.b16 %v4410_v62, %v4409_v29 }
 0x330   : > { %v3817_v57 = vrot.slane %v3816_v43, 4  ;;  %v3833_v34 = vperm.slane %v3829_v14, %v9764_v4  ;;  %v4321_v10 = vpack.i.b16 %v4320_v63, %v4319_v13 }
 0x331   : > { %v12192_v47 = vpop.eup %9133  ;;  %v4976_v58 = vunpack.c.l.b16 %v4411_v15 }
 0x332   : > { %v12194_v1 = vpop.eup %9135  ;;  %4798 = vadd.xlane.f32.xlu1 %v12192_v47  ;;  %v3818_v31 = vsel %vm1009_vm0, %v3817_v57, %v3810_v50  ;;  %v3834_v17 = vrot.slane %v3833_v34, 4  ;;  %v4961_v41 = vunpack.c.l.b16 %v4321_v10 }
 0x333   : > { %4796 = vadd.xlane.f32.xlu0 %v12194_v1  ;;  %v3822_v59 = vperm.slane %v3818_v31, %v9770_v20  ;;  %v4984_v28 = vpack.c.b16 %v4976_v58, %v4975_v38 }
 0x334   : > { %v3835_v40 = vsel %vm1009_vm0, %v3834_v17, %v3827_v24 }
 0x335   : > { %v3839_v19 = vperm.slane %v3835_v40, %v9770_v20  ;;  %v4325_v23 = vshrl.u32 %v3822_v59, 16 }
 0x337   : > { %v4324_v11 = vpack.i.b16 %v3839_v19, %v3822_v59  ;;  %v4326_v9 = vshrl.u32 %v3839_v19, 16 }
 0x339   : > { %v4877_v7 = vunpack.c.l.b16 %v4324_v11  ;;  %v4327_v3 = vpack.i.b16 %v4326_v9, %v4325_v23 }
 0x33b   : > { %v4892_v49 = vpack.c.b16 %v4877_v7, %v4876_v21  ;;  %v4962_v30 = vunpack.c.l.b16 %v4327_v3 }
 0x33d   : > { %8982 = vmatpush.bf16.msra.mxu3 %v4892_v49  ;;  %4915 = vmatpush.bf16.msra.mxu2 %v4892_v49  ;;  %v4977_v46 = vpack.c.b16 %v4962_v30, %v4961_v41 }
 0x341   : > { %4993 = vmatpush.bf16.msrb.mxu3 %v4984_v28 }
 0x345   : > { %4994 = vmatpush.bf16.msrb.mxu3 %v12057_v61 }
 0x349   : > { %4995 = vmatpush.bf16.msrb.mxu3 %v12062_v26 }
 0x34d   : > { %4996 = vmatpush.bf16.msrb.mxu3 %v12068_v2 }
 0x351   : > { %4997 = vmatpush.bf16.msrb.mxu3 %v12091_v39 }
 0x355   : > { %4998 = vmatpush.bf16.msrb.mxu3 %v12101_v5 }
 0x359   : > { %4999 = vmatpush.bf16.msrb.mxu3 %v12107_v37 }
 0x35d   : > { %5000 = vmatpush.bf16.msrb.mxu3 %v4977_v46 }
 0x361   : > { %v4775_v26 = vpop.xlane.xlu2 %4774 }
 0x36d   : > { %v4781_v61 = vpop.xlane.xlu1 %4780 }
 0x36e   : > { %9137 = vrcp.f32 %v4781_v61 }
 0x36f   : > { %9139 = vrcp.f32 %v4775_v26 }
 0x374   : > { %v9138_v43 = vpop.eup %9137 }
 0x375   : > { %v4783_v2 = vpop.xlane.xlu0 %4782  ;;  %v4773_v50 = vpop.xlane.xlu1 %4772  ;;  %v4824_v39 = vmul.f32 %v9138_v43, %v12066_v60 }
 0x376   : > { %9141 = vrcp.f32 %v4783_v2  ;;  %v9140_v54 = vpop.eup %9139 }
 0x377   : > { %9143 = vrcp.f32 %v4773_v50  ;;  %v4821_v5 = vmul.f32 %v9140_v54, %v12051_v55  ;;  %v4840_v6 = vpack.c.bf16 %v4824_v39, %v4824_v39 }
 0x379   : > { %v4837_v14 = vpack.c.bf16 %v4821_v5, %v4821_v5  ;;  %v4864_v57 = vunpack.c.l.b16 %v4840_v6 }
 0x37b   : > { %v4861_v8 = vunpack.c.l.b16 %v4837_v14 }
 0x37c   : > { %v9142_v33 = vpop.eup %9141 }
 0x37d   : > { %v9144_v12 = vpop.eup %9143  ;;  %v4785_v48 = vpop.xlane.xlu0 %4784  ;;  %v4825_v37 = vmul.f32 %v9142_v33, %v12084_v16 }
 0x37e   : > { %v4820_v44 = vmul.f32 %v9144_v12, %v12081_v45  ;;  %9145 = vrcp.f32 %v4785_v48  ;;  %v4791_v59 = vpop.xlane.xlu1 %4790 }
 0x37f   : > { %v4841_v52 = vpack.c.bf16 %v4825_v37, %v4825_v37 }
 0x380   : > { %v4836_v29 = vpack.c.bf16 %v4820_v44, %v4820_v44 }
 0x381   : > { %v4865_v24 = vunpack.c.l.b16 %v4841_v52 }
 0x382   : > { %v4860_v34 = vunpack.c.l.b16 %v4836_v29 }
 0x383   : > { %v4870_v62 = vpack.c.b16 %v4865_v24, %v4864_v57 }
 0x384   : > { %v4868_v60 = vpack.c.b16 %v4861_v8, %v4860_v34  ;;  %v9146_v31 = vpop.eup %9145 }
 0x385   : > { %4926 = vmatmul.bf16.vlgmr.msra.gmra.mxu3 %v4870_v62  ;;  %v4826_v16 = vmul.f32 %v9146_v31, %v12103_v18  ;;  %v4777_v11 = vpop.xlane.xlu2 %4776 }
 0x386   : > { %v4787_v55 = vpop.xlane.xlu0 %4786  ;;  %4916 = vmatmul.bf16.vlgmr.msra.gmra.mxu2 %v4868_v60 }
 0x387   : > { %9147 = vrcp.f32 %v4787_v55  ;;  %v4842_v40 = vpack.c.bf16 %v4826_v16, %v4826_v16 }
 0x388   : > { %9149 = vrcp.f32 %v4791_v59 }
 0x389   : > { %v4866_v21 = vunpack.c.l.b16 %v4842_v40 }
 0x38d   : > { %v9148_v17 = vpop.eup %9147 }
 0x38e   : > { %v4723_v45 = vpop.xlane.xlu0 %4722  ;;  %v4827_v35 = vmul.f32 %v9148_v17, %v12115_v25  ;;  %v9150_v49 = vpop.eup %9149 }
 0x38f   : > { %v4739_v56 = vsub.f32 %v12130_v42, %v4723_v45  ;;  %v4829_v25 = vmul.f32 %v9150_v49, %v12099_v0 }
 0x390   : > { %v4843_v15 = vpack.c.bf16 %v4827_v35, %v4827_v35 }
 0x391   : > { %v4770_v19 = vmul.f32 1.442695, %v4739_v56  ;;  %v4845_v9 = vpack.c.bf16 %v4829_v25, %v4829_v25 }
 0x392   : > { %v4867_v38 = vunpack.c.l.b16 %v4843_v15 }
 0x393   : > { %9151 = vpow2.f32 %v4770_v19  ;;  %v4795_v28 = vpop.xlane.xlu2 %4794  ;;  %v4946_v30 = vunpack.c.l.b16 %v4845_v9 }
 0x394   : > { %v4871_v58 = vpack.c.b16 %v4867_v38, %v4866_v21 }
 0x395   : > { %v4793_v13 = vpop.xlane.xlu1 %4792 }
 0x396   : > { %v4789_v7 = vpop.xlane.xlu0 %4788  ;;  %4931 = vmatmul.bf16.gmra.mxu3 %v4871_v58 }
 0x397   : > { %9153 = vrcp.f32 %v4789_v7 }
 0x398   : > { %9155 = vrcp.f32 %v4777_v11 }
 0x399   : > { %v9152_v18 = vpop.eup %9151  ;;  %9157 = vrcp.f32 %v4795_v28 }
 0x39a   : > { %4802 = vadd.xlane.f32.xlu0 %v9152_v18  ;;  %9159 = vrcp.f32 %v4793_v13 }
 0x39b   : > { %v4801_v60 = vpop.xlane.xlu2 %4800 }
 0x39d   : > { %v9154_v42 = vpop.eup %9153 }
 0x39e   : > { %v4779_v63 = vpop.xlane.xlu0 %4778  ;;  %v4828_v23 = vmul.f32 %v9154_v42, %v12147_v27  ;;  %v9156_v10 = vpop.eup %9155 }
 0x39f   : > { %9161 = vrcp.f32 %v4779_v63  ;;  %v4822_v46 = vmul.f32 %v9156_v10, %v12112_v53  ;;  %v9158_v61 = vpop.eup %9157 }
 0x3a0   : > { %v4844_v3 = vpack.c.bf16 %v4828_v23, %v4828_v23  ;;  %v9160_v26 = vpop.eup %9159  ;;  %v4831_v27 = vmul.f32 %v9158_v61, %v12138_v22 }
 0x3a1   : > { %v4838_v43 = vpack.c.bf16 %v4822_v46, %v4822_v46  ;;  %v4830_v39 = vmul.f32 %v9160_v26, %v12144_v51 }
 0x3a2   : > { %v4945_v41 = vunpack.c.l.b16 %v4844_v3  ;;  %v4847_v53 = vpack.c.bf16 %v4831_v27, %v4831_v27 }
 0x3a3   : > { %v4862_v5 = vunpack.c.l.b16 %v4838_v43  ;;  %v4846_v6 = vpack.c.bf16 %v4830_v39, %v4830_v39 }
 0x3a4   : > { %v4953_v2 = vpack.c.b16 %v4946_v30, %v4945_v41  ;;  %v4948_v14 = vunpack.c.l.b16 %v4847_v53 }
 0x3a5   : > { %v9162_v50 = vpop.eup %9161  ;;  %v4799_v12 = vpop.xlane.xlu1 %4798  ;;  %v4947_v44 = vunpack.c.l.b16 %v4846_v6 }
 0x3a6   : > { %5001 = vmatmul.bf16.vlgmr.msrb.gmra.mxu3 %v4953_v2  ;;  %v4823_v0 = vmul.f32 %v9162_v50, %v12169_v32  ;;  %v4797_v48 = vpop.xlane.xlu0 %4796  ;;  %9163 = vrcp.f32 %v4799_v12 }
 0x3a7   : > { %9165 = vrcp.f32 %v4797_v48  ;;  %v4954_v32 = vpack.c.b16 %v4948_v14, %v4947_v44 }
 0x3a8   : > { %v4839_v54 = vpack.c.bf16 %v4823_v0, %v4823_v0  ;;  %9167 = vrcp.f32 %v4801_v60 }
 0x3aa   : > { %v4863_v33 = vunpack.c.l.b16 %v4839_v54 }
 0x3ac   : > { %v4869_v37 = vpack.c.b16 %v4863_v33, %v4862_v5  ;;  %v9164_v52 = vpop.eup %9163 }
 0x3ad   : > { %v9166_v29 = vpop.eup %9165  ;;  %v4833_v22 = vmul.f32 %v9164_v52, %v12192_v47 }
 0x3ae   : > { %4921 = vmatmul.bf16.gmra.mxu2 %v4869_v37  ;;  %v4832_v51 = vmul.f32 %v9166_v29, %v12194_v1  ;;  %v9168_v16 = vpop.eup %9167 }
 0x3af   : > { %v4849_v24 = vpack.c.bf16 %v4833_v22, %v4833_v22  ;;  %v4834_v59 = vmul.f32 %v9168_v16, %v12163_v36 }
 0x3b0   : > { %v4848_v57 = vpack.c.bf16 %v4832_v51, %v4832_v51 }
 0x3b1   : > { %v4950_v8 = vunpack.c.l.b16 %v4849_v24  ;;  %v4850_v1 = vpack.c.bf16 %v4834_v59, %v4834_v59 }
 0x3b2   : > { %v4949_v34 = vunpack.c.l.b16 %v4848_v57 }
 0x3b3   : > { %v4951_v56 = vunpack.c.l.b16 %v4850_v1 }
 0x3b4   : > { %v4955_v62 = vpack.c.b16 %v4950_v8, %v4949_v34 }
 0x3b6   : > { %5006 = vmatmul.bf16.gmra.mxu3 %v4954_v32 }
 0x3c6   : > { %5011 = vmatmul.bf16.gmra.mxu3 %v4955_v62 }
 0x408   : > { %v4927_v55 = vpop.f32.mrf.mxu3 }
 0x409   : > { %v4917_v11 = vpop.f32.mrf.mxu2  ;;  %v5231_v49 = vrot.slane %v4927_v55, 4  ;;  %v12239_v2 = vperm.slane %v4927_v55, %v9764_v4 }
 0x40a   : > { %v5022_v38 = vrot.slane %v4917_v11, 4  ;;  %v5028_v7 = vperm.slane %v4917_v11, %v9764_v4 }
 0x40b   : > { %v5232_v9 = vsel %vm1009_vm0, 0.0, %v5231_v49  ;;  %v5253_v8 = vrot.slane %v12239_v2, 4 }
 0x40c   : > { %v5024_v58 = vsel %vm1009_vm0, 0.0, %v5022_v38  ;;  %v5045_v13 = vrot.slane %v5028_v7, 4  ;;  %v12242_v50 = vperm.slane %v5232_v9, %v9764_v4 }
 0x40d   : > { %v4803_v31 = vpop.xlane.xlu0 %4802 }
 0x40e   : > { %9169 = vrcp.f32 %v4803_v31  ;;  %v5265_v62 = vrot.slane %v12242_v50, 4 }
 0x410   : > { %v4929_v17 = vpop.f32.mrf.mxu3 }
 0x411   : > { %v4919_v36 = vpop.f32.mrf.mxu2  ;;  %v5283_v28 = vrot.slane %v4929_v17, 4  ;;  %v12250_v12 = vperm.slane %v4929_v17, %v9764_v4 }
 0x412   : > { %v5075_v42 = vrot.slane %v4919_v36, 4  ;;  %v5080_v33 = vperm.slane %v4919_v36, %v9764_v4 }
 0x413   : > { %v5284_v46 = vsel %vm1009_vm0, 0.0, %v5283_v28  ;;  %v5305_v16 = vrot.slane %v12250_v12, 4 }
 0x414   : > { %v9170_v45 = vpop.eup %9169  ;;  %v5076_v0 = vsel %vm1009_vm0, 0.0, %v5075_v42  ;;  %v12253_v48 = vperm.slane %v5284_v46, %v9764_v4  ;;  %v5097_v55 = vrot.slane %v5080_v33, 4 }
 0x415   : > { %v4835_v35 = vmul.f32 %v9170_v45, %v9152_v18  ;;  %v5032_v18 = vperm.slane %v5024_v58, %v9764_v4  ;;  %v5084_v6 = vperm.slane %v5076_v0, %v9764_v4 }
 0x416   : > { %v5317_v17 = vrot.slane %v12253_v48, 4 }
 0x417   : > { %v4851_v40 = vpack.c.bf16 %v4835_v35, %v4835_v35  ;;  %v5057_v30 = vrot.slane %v5032_v18, 4  ;;  %v5109_v31 = vrot.slane %v5084_v6, 4 }
 0x419   : > { %v12224_v47 = vpop.f32.mrf.mxu3  ;;  %v4952_v15 = vunpack.c.l.b16 %v4851_v40 }
 0x41b   : > { %v4956_v19 = vpack.c.b16 %v4952_v15, %v4951_v56 }
 0x41d   : > { %5016 = vmatmul.bf16.gmra.mxu3 %v4956_v19 }
 0x421   : > { %v12226_v21 = vpop.f32.mrf.mxu3 }
 0x429   : > { %v5002_v25 = vpop.f32.mrf.mxu3 }
 0x42a   : > { %v5033_v63 = vrot.slane %v5002_v25, 4  ;;  %v5038_v23 = vperm.slane %v5002_v25, %v9764_v4 }
 0x42c   : > { %v5034_v10 = vsel %vm1009_vm0, 0.0, %v5033_v63  ;;  %v5043_v3 = vrot.slane %v5038_v23, 4  ;;  %v5046_v41 = vsel %vm1009_vm0, %v5038_v23, %v5045_v13 }
 0x42d   : > { %v5042_v61 = vperm.slane %v5034_v10, %v9764_v4  ;;  %v5054_v26 = vperm.slane %v5046_v41, %v9770_v20 }
 0x42e   : > { %v5044_v43 = vsel %vm1009_vm0, %v5043_v3, %v5028_v7 }
 0x42f   : > { %v5050_v54 = vperm.slane %v5044_v43, %v9770_v20  ;;  %v5055_v39 = vrot.slane %v5042_v61, 4  ;;  %v5058_v27 = vsel %vm1009_vm0, %v5042_v61, %v5057_v30  ;;  %v5069_v5 = vrot.slane %v5054_v26, 4 }
 0x430   : > { %v5066_v37 = vperm.slane %v5058_v27, %v9770_v20 }
 0x431   : > { %v5056_v53 = vsel %vm1009_vm0, %v5055_v39, %v5032_v18  ;;  %v5067_v44 = vrot.slane %v5050_v54, 4  ;;  %v5070_v14 = vsel %vm1009_vm0, 0.0, %v5069_v5  ;;  %v4922_v52 = vpop.f32.mrf.mxu2  ;;  %v5004_v32 = vpop.f32.mrf.mxu3  ;;  %v12260_v29 = vsel %vm1009_vm0, %v5069_v5, %v5050_v54 }
 0x432   : > { %v5444_v51 = vrot.slane %v5070_v14, 4  ;;  %v5062_v22 = vperm.slane %v5056_v53, %v9770_v20  ;;  %v5127_v24 = vrot.slane %v4922_v52, 4  ;;  %v5085_v34 = vrot.slane %v5004_v32, 4 }
 0x433   : > { %v5068_v57 = vsel %vm1009_vm0, 0.0, %v5067_v44  ;;  %v5073_v60 = vrot.slane %v5066_v37, 4  ;;  %v5443_v59 = vperm.slane %v12260_v29, %v9764_v4  ;;  %v5090_v1 = vperm.slane %v5004_v32, %v9764_v4 }
 0x434   : > { %v5445_v45 = vsel %vm1009_vm0, %v5444_v51, %v5068_v57  ;;  %v5086_v35 = vsel %vm1009_vm0, 0.0, %v5085_v34  ;;  %v5071_v40 = vrot.slane %v5062_v22, 4  ;;  %v5128_v56 = vsel %vm1009_vm0, 0.0, %v5127_v24 }
 0x435   : > { %v5132_v15 = vperm.slane %v4922_v52, %v9764_v4  ;;  %v5094_v19 = vperm.slane %v5086_v35, %v9764_v4  ;;  %v12277_v11 = vsel %vm1009_vm0, 0.0, %v5073_v60  ;;  %v12280_v38 = vsel %vm1009_vm0, %v5073_v60, %v5062_v22 }
 0x436   : > { %v5095_v58 = vrot.slane %v5090_v1, 4  ;;  %v5098_v7 = vsel %vm1009_vm0, %v5090_v1, %v5097_v55  ;;  %v5449_v49 = vperm.slane %v5445_v45, %v9764_v4  ;;  %v5136_v42 = vperm.slane %v5128_v56, %v9764_v4 }
 0x437   : > { %v5106_v36 = vperm.slane %v5098_v7, %v9770_v20  ;;  %v5107_v18 = vrot.slane %v5094_v19, 4  ;;  %v5110_v28 = vsel %vm1009_vm0, %v5094_v19, %v5109_v31  ;;  %v5455_v43 = vrot.slane %v12277_v11, 4 }
 0x438   : > { %v5096_v63 = vsel %vm1009_vm0, %v5095_v58, %v5080_v33  ;;  %v5118_v23 = vperm.slane %v5110_v28, %v9770_v20  ;;  %v5149_v54 = vrot.slane %v5132_v15, 4  ;;  %v5072_v5 = vsel %vm1009_vm0, 0.0, %v5071_v40 }
 0x439   : > { %v4924_v25 = vpop.f32.mrf.mxu2  ;;  %v5007_v13 = vpop.f32.mrf.mxu3  ;;  %v5102_v10 = vperm.slane %v5096_v63, %v9770_v20  ;;  %v5108_v3 = vsel %vm1009_vm0, %v5107_v18, %v5084_v6  ;;  %v5121_v41 = vrot.slane %v5106_v36, 4  ;;  %v12297_v33 = vrot.slane %v5449_v49, 4 }
 0x43a   : > { %v5179_v9 = vrot.slane %v4924_v25, 4  ;;  %v5184_v30 = vperm.slane %v4924_v25, %v9764_v4  ;;  %v5114_v46 = vperm.slane %v5108_v3, %v9770_v20  ;;  %v5125_v61 = vrot.slane %v5118_v23, 4 }
 0x43b   : > { %v5137_v0 = vrot.slane %v5007_v13, 4  ;;  %v5119_v39 = vrot.slane %v5102_v10, 4  ;;  %v5122_v27 = vsel %vm1009_vm0, 0.0, %v5121_v41  ;;  %v12300_v37 = vsel %vm1009_vm0, %v5121_v41, %v5102_v10 }
 0x43c   : > { %v5180_v26 = vsel %vm1009_vm0, 0.0, %v5179_v9  ;;  %v5482_v6 = vrot.slane %v5122_v27, 4  ;;  %v5161_v53 = vrot.slane %v5136_v42, 4  ;;  %v5201_v52 = vrot.slane %v5184_v30, 4 }
 0x43d   : > { %v5120_v44 = vsel %vm1009_vm0, 0.0, %v5119_v39  ;;  %v5188_v14 = vperm.slane %v5180_v26, %v9764_v4  ;;  %v5123_v32 = vrot.slane %v5114_v46, 4  ;;  %v12305_v51 = vsel %vm1009_vm0, 0.0, %v5125_v61 }
 0x43e   : > { %v5138_v22 = vsel %vm1009_vm0, 0.0, %v5137_v0  ;;  %v5142_v57 = vperm.slane %v5007_v13, %v9764_v4  ;;  %v5481_v24 = vperm.slane %v12300_v37, %v9764_v4  ;;  %v5483_v34 = vsel %vm1009_vm0, %v5482_v6, %v5120_v44 }
 0x43f   : > { %v12313_v60 = vsel %vm1009_vm0, %v5125_v61, %v5114_v46  ;;  %v5146_v55 = vperm.slane %v5138_v22, %v9764_v4  ;;  %v5493_v56 = vrot.slane %v12305_v51, 4  ;;  %v5487_v28 = vperm.slane %v5483_v34, %v9764_v4 }
 0x440   : > { %v5147_v45 = vrot.slane %v5142_v57, 4  ;;  %v5150_v35 = vsel %vm1009_vm0, %v5142_v57, %v5149_v54  ;;  %v12334_v26 = vsel %vm1009_vm0, 0.0, %v5123_v32  ;;  %v5213_v0 = vrot.slane %v5188_v14, 4 }
 0x441   : > { %v5009_v31 = vpop.f32.mrf.mxu3  ;;  %v5158_v19 = vperm.slane %v5150_v35, %v9770_v20  ;;  %v5159_v11 = vrot.slane %v5146_v55, 4  ;;  %v5162_v58 = vsel %vm1009_vm0, %v5146_v55, %v5161_v53  ;;  %v5454_v54 = vperm.slane %v12280_v38, %v9764_v4 }
 0x442   : > { %v5189_v1 = vrot.slane %v5009_v31, 4  ;;  %v5194_v40 = vperm.slane %v5009_v31, %v9764_v4  ;;  %v5148_v7 = vsel %vm1009_vm0, %v5147_v45, %v5132_v15  ;;  %v5170_v49 = vperm.slane %v5162_v58, %v9770_v20 }
 0x443   : > { %v5154_v25 = vperm.slane %v5148_v7, %v9770_v20  ;;  %v5160_v13 = vsel %vm1009_vm0, %v5159_v11, %v5136_v42  ;;  %v5173_v63 = vrot.slane %v5158_v19, 4  ;;  %v12338_v39 = vrot.slane %v5487_v28, 4 }
 0x444   : > { %v5190_v36 = vsel %vm1009_vm0, 0.0, %v5189_v1  ;;  %v5199_v18 = vrot.slane %v5194_v40, 4  ;;  %v5166_v23 = vperm.slane %v5160_v13, %v9770_v20  ;;  %v5202_v15 = vsel %vm1009_vm0, %v5194_v40, %v5201_v52 }
 0x445   : > { %v5198_v9 = vperm.slane %v5190_v36, %v9764_v4  ;;  %v5171_v3 = vrot.slane %v5154_v25, 4  ;;  %v5174_v41 = vsel %vm1009_vm0, 0.0, %v5173_v63  ;;  %v5177_v46 = vrot.slane %v5170_v49, 4 }
 0x446   : > { %v5200_v10 = vsel %vm1009_vm0, %v5199_v18, %v5184_v30  ;;  %v5520_v42 = vrot.slane %v5174_v41, 4  ;;  %v5210_v27 = vperm.slane %v5202_v15, %v9770_v20  ;;  %v5456_v53 = vsel %vm1009_vm0, %v5455_v43, %v5072_v5 }
 0x447   : > { %v5206_v61 = vperm.slane %v5200_v10, %v9770_v20  ;;  %v5172_v30 = vsel %vm1009_vm0, 0.0, %v5171_v3  ;;  %v12344_v44 = vsel %vm1009_vm0, %v5173_v63, %v5154_v25  ;;  %v5211_v32 = vrot.slane %v5198_v9, 4 }
 0x448   : > { %v5521_v52 = vsel %vm1009_vm0, %v5520_v42, %v5172_v30  ;;  %v5214_v22 = vsel %vm1009_vm0, %v5198_v9, %v5213_v0  ;;  %v5175_v57 = vrot.slane %v5166_v23, 4  ;;  %v12349_v38 = vsel %vm1009_vm0, 0.0, %v5177_v46 }
 0x449   : > { %v5012_v6 = vpop.f32.mrf.mxu3  ;;  %v5223_v34 = vrot.slane %v5206_v61, 4  ;;  %v5225_v55 = vrot.slane %v5210_v27, 4  ;;  %v5212_v31 = vsel %vm1009_vm0, %v5211_v32, %v5188_v14  ;;  %v5222_v45 = vperm.slane %v5214_v22, %v9770_v20 }
 0x44a   : > { %v5241_v35 = vrot.slane %v5012_v6, 4  ;;  %v5246_v43 = vperm.slane %v5012_v6, %v9764_v4  ;;  %v5525_v5 = vperm.slane %v5521_v52, %v9764_v4  ;;  %v5218_v1 = vperm.slane %v5212_v31, %v9770_v20 }
 0x44b   : > { %v5224_v40 = vsel %vm1009_vm0, 0.0, %v5223_v34  ;;  %v5226_v19 = vsel %vm1009_vm0, 0.0, %v5225_v55  ;;  %v5519_v11 = vperm.slane %v12344_v44, %v9764_v4  ;;  %v12361_v58 = vsel %vm1009_vm0, %v5177_v46, %v5166_v23 }
 0x44c   : > { %v5558_v14 = vrot.slane %v5226_v19, 4  ;;  %v5242_v7 = vsel %vm1009_vm0, 0.0, %v5241_v35  ;;  %v5531_v49 = vrot.slane %v12349_v38, 4  ;;  %v5251_v18 = vrot.slane %v5246_v43, 4 }
 0x44d   : > { %v5250_v36 = vperm.slane %v5242_v7, %v9764_v4  ;;  %v5460_v28 = vperm.slane %v5456_v53, %v9764_v4  ;;  %v5176_v25 = vsel %vm1009_vm0, 0.0, %v5175_v57  ;;  %v5229_v13 = vrot.slane %v5222_v45, 4 }
 0x44e   : > { %v5559_v63 = vsel %vm1009_vm0, %v5558_v14, %v5224_v40  ;;  %v5254_v23 = vsel %vm1009_vm0, %v5246_v43, %v5253_v8  ;;  %v12372_v9 = vrot.slane %v5525_v5, 4  ;;  %v5227_v10 = vrot.slane %v5218_v1, 4 }
 0x44f   : > { %v12375_v15 = vsel %vm1009_vm0, %v5225_v55, %v5206_v61  ;;  %v5252_v3 = vsel %vm1009_vm0, %v5251_v18, %v12239_v2  ;;  %v5262_v46 = vperm.slane %v5254_v23, %v9770_v20  ;;  %v5263_v0 = vrot.slane %v5250_v36, 4 }
 0x450   : > { %v5258_v41 = vperm.slane %v5252_v3, %v9770_v20  ;;  %v5266_v42 = vsel %vm1009_vm0, %v5250_v36, %v5265_v62  ;;  %v5563_v8 = vperm.slane %v5559_v63, %v9764_v4  ;;  %v5462_v61 = vsel %vm1009_vm0, %v12297_v33, %v5443_v59 }
 0x451   : > { %v5274_v30 = vperm.slane %v5266_v42, %v9770_v20  ;;  %v5467_v2 = vrot.slane %v5460_v28, 4  ;;  %v12392_v27 = vsel %vm1009_vm0, 0.0, %v5229_v13  ;;  %v5264_v6 = vsel %vm1009_vm0, %v5263_v0, %v12242_v50  ;;  %v5014_v5 = vpop.f32.mrf.mxu3 }
 0x452   : > { %v5275_v53 = vrot.slane %v5258_v41, 4  ;;  %v5277_v52 = vrot.slane %v5262_v46, 4  ;;  %v5557_v62 = vperm.slane %v12375_v15, %v9764_v4  ;;  %v5270_v32 = vperm.slane %v5264_v6, %v9770_v20 }
 0x453   : > { %v5281_v22 = vrot.slane %v5274_v30, 4  ;;  %v5468_v29 = vsel %vm1009_vm0, %v5467_v2, %v5454_v54  ;;  %v12401_v57 = vsel %vm1009_vm0, %v5229_v13, %v5218_v1  ;;  %v12408_v50 = vperm.slane %v5462_v61, %v9770_v20 }
 0x454   : > { %v5278_v59 = vsel %vm1009_vm0, 0.0, %v5277_v52  ;;  %v12405_v33 = vsel %vm1009_vm0, %v5277_v52, %v5258_v41  ;;  %v12411_v38 = vsel %vm1009_vm0, 0.0, %v5227_v10  ;;  %v5569_v34 = vrot.slane %v12392_v27, 4 }
 0x455   : > { %v12414_v55 = vrot.slane %v5563_v8, 4  ;;  %v5596_v31 = vrot.slane %v5278_v59, 4  ;;  %v5276_v54 = vsel %vm1009_vm0, 0.0, %v5275_v53  ;;  %v5279_v45 = vrot.slane %v5270_v32, 4 }
 0x456   : > { %v12418_v35 = vperm.slane %v5468_v29, %v9770_v20  ;;  %v5492_v43 = vperm.slane %v12313_v60, %v9764_v4  ;;  %v12423_v1 = vsel %vm1009_vm0, 0.0, %v5281_v22  ;;  %v5595_v40 = vperm.slane %v12405_v33, %v9764_v4 }
 0x457   : > { %v5494_v19 = vsel %vm1009_vm0, %v5493_v56, %v12334_v26  ;;  %v5500_v14 = vsel %vm1009_vm0, %v12338_v39, %v5481_v24  ;;  %v12437_v60 = vsel %vm1009_vm0, %v5281_v22, %v5270_v32  ;;  %v5475_v7 = vrot.slane %v12408_v50, 4 }
 0x458   : > { %v5498_v36 = vperm.slane %v5494_v19, %v9764_v4  ;;  %v12442_v18 = vperm.slane %v5500_v14, %v9770_v20  ;;  %v5597_v51 = vsel %vm1009_vm0, %v5596_v31, %v5276_v54  ;;  %v5293_v28 = vrot.slane %v5014_v5, 4 }
 0x459   : > { %v5298_v56 = vperm.slane %v5014_v5, %v9764_v4  ;;  %v5532_v37 = vsel %vm1009_vm0, %v5531_v49, %v5176_v25  ;;  %v5280_v26 = vsel %vm1009_vm0, 0.0, %v5279_v45  ;;  %v5607_v24 = vrot.slane %v12423_v1, 4 }
 0x45a   : > { %v5505_v39 = vrot.slane %v5498_v36, 4  ;;  %v5536_v13 = vperm.slane %v5532_v37, %v9764_v4  ;;  %v5513_v63 = vrot.slane %v12442_v18, 4  ;;  %v5294_v23 = vsel %vm1009_vm0, 0.0, %v5293_v28 }
 0x45b   : > { %v5303_v10 = vrot.slane %v5298_v56, 4  ;;  %v5306_v3 = vsel %vm1009_vm0, %v5298_v56, %v5305_v16  ;;  %v5601_v41 = vperm.slane %v5597_v51, %v9764_v4  ;;  %v5302_v25 = vperm.slane %v5294_v23, %v9764_v4 }
 0x45c   : > { %v5506_v49 = vsel %vm1009_vm0, %v5505_v39, %v5492_v43  ;;  %v5314_v46 = vperm.slane %v5306_v3, %v9770_v20  ;;  %v5476_v0 = vsel %vm1009_vm0, %v12418_v35, %v5475_v7  ;;  %v5543_v30 = vrot.slane %v5536_v13, 4 }
 0x45d   : > { %v12462_v42 = vperm.slane %v5506_v49, %v9770_v20  ;;  %v5304_v8 = vsel %vm1009_vm0, %v5303_v10, %v12250_v12  ;;  %v5315_v61 = vrot.slane %v5302_v25, 4  ;;  %v5318_v2 = vsel %vm1009_vm0, %v5302_v25, %v5317_v17 }
 0x45e   : > { %v5310_v16 = vperm.slane %v5304_v8, %v9770_v20  ;;  %v5329_v6 = vrot.slane %v5314_v46, 4  ;;  %v5326_v52 = vperm.slane %v5318_v2, %v9770_v20  ;;  %v5530_v32 = vperm.slane %v12361_v58, %v9764_v4 }
 0x45f   : > { %v5514_v53 = vsel %vm1009_vm0, %v12462_v42, %v5513_v63  ;;  %v5538_v12 = vsel %vm1009_vm0, %v12372_v9, %v5519_v11  ;;  %v5316_v29 = vsel %vm1009_vm0, %v5315_v61, %v12253_v48  ;;  %v5613_v58 = vrot.slane %v5601_v41, 4 }
 0x460   : > { %v9083_v22 = vpack.i.bf16 %v5514_v53, %v5476_v0  ;;  %v5327_v17 = vrot.slane %v5310_v16, 4  ;;  %v5330_v59 = vsel %vm1009_vm0, 0.0, %v5329_v6  ;;  %v5322_v31 = vperm.slane %v5316_v29, %v9770_v20 }
 0x461   : > { %v5333_v54 = vrot.slane %v5326_v52, 4  ;;  %v5629_v45 = vsel %vm1009_vm0, %v5329_v6, %v5310_v16  ;;  %v5634_v43 = vrot.slane %v5330_v59, 4  ;;  %v5542_v11 = vperm.slane %v5538_v12, %v9770_v20 }
 0x462   : > { %9084 = vrot.lane.b32.xlu1 %v9083_v22, %s9407_s24  ;;  %v5328_v44 = vsel %vm1009_vm0, 0.0, %v5327_v17  ;;  %v5544_v9 = vsel %vm1009_vm0, %v5543_v30, %v5530_v32  ;;  %v5331_v5 = vrot.slane %v5322_v31, 4  ;;  %v5568_v19 = vperm.slane %v12401_v57, %v9764_v4 }
 0x463   : > { %v5334_v48 = vsel %vm1009_vm0, 0.0, %v5333_v54  ;;  %v5635_v1 = vsel %vm1009_vm0, %v5634_v43, %v5328_v44  ;;  %v5633_v14 = vperm.slane %v5629_v45, %v9764_v4  ;;  %v5570_v51 = vsel %vm1009_vm0, %v5569_v34, %v12411_v38 }
 0x464   : > { %v5639_v7 = vperm.slane %v5635_v1, %v9764_v4  ;;  %v5645_v36 = vrot.slane %v5334_v48, 4  ;;  %v5332_v28 = vsel %vm1009_vm0, 0.0, %v5331_v5  ;;  %v5548_v56 = vperm.slane %v5544_v9, %v9770_v20  ;;  %v8907_v9 = vld [vmem:[%s14751_s4 + $0x20] sm:$0xff] }
 0x465   : > { %v5574_v37 = vperm.slane %v5570_v51, %v9764_v4  ;;  %v5576_v57 = vsel %vm1009_vm0, %v12414_v55, %v5557_v62  ;;  %v5608_v63 = vsel %vm1009_vm0, %v5607_v24, %v5280_v26  ;;  %v5614_v27 = vsel %vm1009_vm0, %v5613_v58, %v5595_v40  ;;  %v8908_v58 = vld [vmem:[%s14751_s4 + $0x28] sm:$0xff] }
 0x466   : > { %v5651_v39 = vrot.slane %v5639_v7, 4  ;;  %v5580_v13 = vperm.slane %v5576_v57, %v9770_v20  ;;  %v5640_v38 = vsel %vm1009_vm0, %v5333_v54, %v5322_v31  ;;  %v5551_v34 = vrot.slane %v5542_v11, 4 }
 0x467   : > { %v5581_v23 = vrot.slane %v5574_v37, 4  ;;  %v5612_v10 = vperm.slane %v5608_v63, %v9764_v4  ;;  %v5618_v3 = vperm.slane %v5614_v27, %v9770_v20  ;;  %v5646_v62 = vsel %vm1009_vm0, %v5645_v36, %v5332_v28 }
 0x468   : > { %v5589_v15 = vrot.slane %v5580_v13, 4  ;;  %v5652_v55 = vsel %vm1009_vm0, %v5651_v39, %v5633_v14  ;;  %v5606_v33 = vperm.slane %v12437_v60, %v9764_v4  ;;  %v5650_v40 = vperm.slane %v5646_v62, %v9764_v4 }
 0x469   : > { %v5582_v26 = vsel %vm1009_vm0, %v5581_v23, %v5568_v19  ;;  %v5619_v24 = vrot.slane %v5612_v10, 4  ;;  %v5473_v41 = vrot.slane %v12418_v35, 4  ;;  %v5656_v25 = vperm.slane %v5652_v55, %v9770_v20  ;;  %v8906_v19 = vld [vmem:[%s14751_s4 + $0x18] sm:$0xff] }
 0x46a   : > { %v5586_v49 = vperm.slane %v5582_v26, %v9770_v20  ;;  %v5552_v46 = vsel %vm1009_vm0, %v5548_v56, %v5551_v34  ;;  %v5644_v8 = vperm.slane %v5640_v38, %v9764_v4  ;;  %v5657_v30 = vrot.slane %v5650_v40, 4 }
 0x46b   : > { %v5620_v0 = vsel %vm1009_vm0, %v5619_v24, %v5606_v33  ;;  %v5627_v61 = vrot.slane %v5618_v3, 4  ;;  %v5665_v2 = vrot.slane %v5656_v25, 4  ;;  %v12537_v12 = vsel %vm1009_vm0, %v5473_v41, %v12408_v50  ;;  %v8910_v50 = vld [vmem:[%s14751_s4 + $0x38] sm:$0xff] }
 0x46c   : > { %v5590_v16 = vsel %vm1009_vm0, %v5586_v49, %v5589_v15  ;;  %v5624_v60 = vperm.slane %v5620_v0, %v9770_v20  ;;  %v5658_v35 = vsel %vm1009_vm0, %v5657_v30, %v5644_v8  ;;  %v5511_v29 = vrot.slane %v12462_v42, 4  ;;  %5855 = vmatpush.bf16.msrb.mxu2 %v8910_v50  ;;  %v8909_v42 = vld [vmem:[%s14751_s4 + $0x30] sm:$0xff] }
 0x46d   : > { %v9088_v6 = vpack.i.bf16 %v5590_v16, %v5552_v46  ;;  %v5662_v53 = vperm.slane %v5658_v35, %v9770_v20  ;;  %v5549_v59 = vrot.slane %v5548_v56, 4  ;;  %v5587_v54 = vrot.slane %v5586_v49, 4 }
 0x46e   : > { %v5628_v52 = vsel %vm1009_vm0, %v5624_v60, %v5627_v61  ;;  %v12543_v17 = vsel %vm1009_vm0, %v5511_v29, %v12442_v18  ;;  %v5625_v43 = vrot.slane %v5624_v60, 4  ;;  %v5340_v1 = vperm.slane %v12224_v47, %v9764_v4  ;;  %v8905_v61 = vld [vmem:[%s14751_s4 + $0x10] sm:$0xff] }
 0x46f   : > { %9089 = vrot.lane.b32.xlu2 %v9088_v6, %s9407_s24  ;;  %v5666_v32 = vsel %vm1009_vm0, %v5662_v53, %v5665_v2  ;;  %v12546_v31 = vsel %vm1009_vm0, %v5549_v59, %v5542_v11  ;;  %v12549_v45 = vsel %vm1009_vm0, %v5587_v54, %v5580_v13  ;;  %v5663_v44 = vrot.slane %v5662_v53, 4 }
 0x470   : > { %v9093_v22 = vpack.i.bf16 %v5666_v32, %v5628_v52  ;;  %v12558_v18 = vsel %vm1009_vm0, %v5625_v43, %v5618_v3  ;;  %5856 = vmatpush.bf16.msrb.mxu2 %v8909_v42  ;;  %v5335_v11 = vrot.slane %v12224_v47, 4  ;;  %v5357_v36 = vrot.slane %v5340_v1, 4  ;;  %v8904_v32 = vld [vmem:[%s14751_s4 + $0x8] sm:$0xff] }
 0x471   : > { %v12568_v5 = vsel %vm1009_vm0, %v5663_v44, %v5656_v25  ;;  %v5387_v51 = vrot.slane %v12226_v21, 4  ;;  %v5392_v3 = vperm.slane %v12226_v21, %v9764_v4 }
 0x472   : > { %9094 = vrot.lane.b32.xlu0 %v9093_v22, %s9407_s24  ;;  %v5336_v48 = vsel %vm1009_vm0, 0.0, %v5335_v11 }
 0x473   : > { %v5344_v14 = vperm.slane %v5336_v48, %v9764_v4  ;;  %v5388_v27 = vsel %vm1009_vm0, 0.0, %v5387_v51  ;;  %v5409_v0 = vrot.slane %v5392_v3, 4 }
 0x474   : > { %5857 = vmatpush.bf16.msrb.mxu2 %v8908_v58  ;;  %v5396_v40 = vperm.slane %v5388_v27, %v9764_v4 }
 0x475   : > { %v5369_v39 = vrot.slane %v5344_v14, 4 }
 0x476   : > { %v5421_v2 = vrot.slane %v5396_v40, 4 }
 0x478   : > { %5858 = vmatpush.bf16.msrb.mxu2 %v8907_v9 }
 0x47c   : > { %5859 = vmatpush.bf16.msrb.mxu2 %v8906_v19 }
 0x480   : > { %5860 = vmatpush.bf16.msrb.mxu2 %v8905_v61 }
 0x484   : > { %5861 = vmatpush.bf16.msrb.mxu2 %v8904_v32 }
 0x4a0   : > { %v5017_v7 = vpop.f32.mrf.mxu3 }
 0x4a1   : > { %v5345_v28 = vrot.slane %v5017_v7, 4  ;;  %v5350_v56 = vperm.slane %v5017_v7, %v9764_v4 }
 0x4a3   : > { %v5346_v37 = vsel %vm1009_vm0, 0.0, %v5345_v28  ;;  %v5355_v57 = vrot.slane %v5350_v56, 4  ;;  %v5358_v47 = vsel %vm1009_vm0, %v5350_v56, %v5357_v36 }
 0x4a4   : > { %v5354_v13 = vperm.slane %v5346_v37, %v9764_v4  ;;  %v5366_v63 = vperm.slane %v5358_v47, %v9770_v20 }
 0x4a5   : > { %v5356_v38 = vsel %vm1009_vm0, %v5355_v57, %v5340_v1 }
 0x4a6   : > { %v5362_v34 = vperm.slane %v5356_v38, %v9770_v20  ;;  %v5367_v23 = vrot.slane %v5354_v13, 4  ;;  %v5370_v10 = vsel %vm1009_vm0, %v5354_v13, %v5369_v39  ;;  %v5381_v15 = vrot.slane %v5366_v63, 4 }
 0x4a7   : > { %v5378_v55 = vperm.slane %v5370_v10, %v9770_v20  ;;  %v8903_v10 = vld [vmem:[%s14751_s4] sm:$0xff] }
 0x4a8   : > { %v5368_v62 = vsel %vm1009_vm0, %v5367_v23, %v5344_v14  ;;  %v5379_v26 = vrot.slane %v5362_v34, 4  ;;  %v5382_v33 = vsel %vm1009_vm0, 0.0, %v5381_v15  ;;  %v5019_v24 = vpop.f32.mrf.mxu3  ;;  %v5667_v9 = vsel %vm1009_vm0, %v5381_v15, %v5362_v34  ;;  %5862 = vmatpush.bf16.msrb.mxu2 %v8903_v10 }
 0x4a9   : > { %v5672_v41 = vrot.slane %v5382_v33, 4  ;;  %v5397_v25 = vrot.slane %v5019_v24, 4  ;;  %v5402_v46 = vperm.slane %v5019_v24, %v9764_v4  ;;  %v5374_v8 = vperm.slane %v5368_v62, %v9770_v20 }
 0x4aa   : > { %v5380_v49 = vsel %vm1009_vm0, 0.0, %v5379_v26  ;;  %v5385_v21 = vrot.slane %v5378_v55, 4  ;;  %v5671_v47 = vperm.slane %v5667_v9, %v9764_v4 }
 0x4ab   : > { %v5673_v30 = vsel %vm1009_vm0, %v5672_v41, %v5380_v49  ;;  %v5398_v16 = vsel %vm1009_vm0, 0.0, %v5397_v25  ;;  %v5407_v60 = vrot.slane %v5402_v46, 4  ;;  %v5410_v35 = vsel %vm1009_vm0, %v5402_v46, %v5409_v0 }
 0x4ac   : > { %v5406_v6 = vperm.slane %v5398_v16, %v9764_v4  ;;  %v5418_v52 = vperm.slane %v5410_v35, %v9770_v20  ;;  %v5677_v22 = vperm.slane %v5673_v30, %v9764_v4  ;;  %v5383_v50 = vrot.slane %v5374_v8, 4 }
 0x4ad   : > { %v5408_v53 = vsel %vm1009_vm0, %v5407_v60, %v5392_v3  ;;  %v5386_v42 = vsel %vm1009_vm0, 0.0, %v5385_v21  ;;  %v5678_v63 = vsel %vm1009_vm0, %v5385_v21, %v5374_v8 }
 0x4ae   : > { %v5414_v29 = vperm.slane %v5408_v53, %v9770_v20  ;;  %v5419_v59 = vrot.slane %v5406_v6, 4  ;;  %v5422_v54 = vsel %vm1009_vm0, %v5406_v6, %v5421_v2  ;;  %v5433_v58 = vrot.slane %v5418_v52, 4 }
 0x4af   : > { %v5430_v43 = vperm.slane %v5422_v54, %v9770_v20  ;;  %v5683_v14 = vrot.slane %v5386_v42, 4  ;;  %v5689_v7 = vrot.slane %v5677_v22, 4  ;;  %v5384_v28 = vsel %vm1009_vm0, 0.0, %v5383_v50 }
 0x4b0   : > { %v5420_v44 = vsel %vm1009_vm0, %v5419_v59, %v5396_v40  ;;  %v5431_v11 = vrot.slane %v5414_v29, 4  ;;  %v5434_v1 = vsel %vm1009_vm0, 0.0, %v5433_v58  ;;  %v5705_v57 = vsel %vm1009_vm0, %v5433_v58, %v5414_v29 }
 0x4b1   : > { %v5426_v48 = vperm.slane %v5420_v44, %v9770_v20  ;;  %v5437_v19 = vrot.slane %v5430_v43, 4  ;;  %v5710_v51 = vrot.slane %v5434_v1, 4  ;;  %v5709_v34 = vperm.slane %v5705_v57, %v9764_v4 }
 0x4b2   : > { %v5432_v36 = vsel %vm1009_vm0, 0.0, %v5431_v11  ;;  %v5684_v15 = vsel %vm1009_vm0, %v5683_v14, %v5384_v28  ;;  %v5690_v3 = vsel %vm1009_vm0, %v5689_v7, %v5671_v47  ;;  %v5682_v40 = vperm.slane %v5678_v63, %v9764_v4 }
 0x4b3   : > { %v5435_v56 = vrot.slane %v5426_v48, 4  ;;  %v5438_v37 = vsel %vm1009_vm0, 0.0, %v5437_v19  ;;  %v5711_v39 = vsel %vm1009_vm0, %v5710_v51, %v5432_v36  ;;  %v5716_v23 = vsel %vm1009_vm0, %v5437_v19, %v5426_v48 }
 0x4b4   : > { %v5721_v13 = vrot.slane %v5438_v37, 4  ;;  %v5715_v38 = vperm.slane %v5711_v39, %v9764_v4  ;;  %v5688_v55 = vperm.slane %v5684_v15, %v9764_v4  ;;  %v5694_v26 = vperm.slane %v5690_v3, %v9770_v20 }
 0x4b5   : > { %v5436_v27 = vsel %vm1009_vm0, 0.0, %v5435_v56  ;;  %v5720_v25 = vperm.slane %v5716_v23, %v9764_v4 }
 0x4b6   : > { %v5727_v62 = vrot.slane %v5715_v38, 4  ;;  %v5722_v33 = vsel %vm1009_vm0, %v5721_v13, %v5436_v27  ;;  %v5695_v41 = vrot.slane %v5688_v55, 4  ;;  %v5703_v21 = vrot.slane %v5694_v26, 4 }
 0x4b7   : > { %v5726_v24 = vperm.slane %v5722_v33, %v9764_v4 }
 0x4b8   : > { %v5728_v49 = vsel %vm1009_vm0, %v5727_v62, %v5709_v34  ;;  %v5696_v8 = vsel %vm1009_vm0, %v5695_v41, %v5682_v40 }
 0x4b9   : > { %v5732_v46 = vperm.slane %v5728_v49, %v9770_v20  ;;  %v5733_v0 = vrot.slane %v5726_v24, 4  ;;  %v5700_v30 = vperm.slane %v5696_v8, %v9770_v20 }
 0x4bb   : > { %v5734_v16 = vsel %vm1009_vm0, %v5733_v0, %v5720_v25  ;;  %v5741_v60 = vrot.slane %v5732_v46, 4  ;;  %v5704_v2 = vsel %vm1009_vm0, %v5700_v30, %v5703_v21  ;;  %v5701_v44 = vrot.slane %v5700_v30, 4 }
 0x4bc   : > { %v5738_v61 = vperm.slane %v5734_v16, %v9770_v20 }
 0x4be   : > { %v5742_v6 = vsel %vm1009_vm0, %v5738_v61, %v5741_v60 }
 0x4bf   : > { %v9098_v35 = vpack.i.bf16 %v5742_v6, %v5704_v2 }
 0x4c1   : > { %9099 = vrot.lane.b32.xlu1 %v9098_v35, %s9407_s24  ;;  %s12665_s24 = sshll.u32 %s9389_s18, 3  ;;  %s8270_s18 = sshll.u32 %s12690_s23, 4  ;;  %s8271_s18 = int_to_ptr.vmem [resolvable:$true] %s8270_s18 }
 0x4c2   : > { %p862_p5 = scmp.lt.s32.totalorder %s12665_s24, 15 }
 0x4c4   : > { %s863_s10 = scalar_select %p862_p5, %s12665_s24, 15 }
 0x4c6   : > { %s12671_s9 = sadd.s32 %s8559_s7, %s863_s10 }
 0x4c7   : > { %s14813_s13 = sshll.u32 %s12671_s9, 3  ;;  %s15164_s10 = sshll.u32 %s12671_s9, 3 }
 0x4c8   : > { %s12680_s26 = scalar_lea.vmem %s15048_s0, %s14813_s13  ;;  %s14618_s13 = scalar_lea.vmem %s15165_s14, %s15164_s10 }
 0x4c9   : > { %v9090_v4 = vpop.permute.xlu2 %9089  ;;  %v884_v47 = vld [vmem:[%s12680_s26 + $0x8] sm:$0xff]  ;;  %v885_v27 = vld [vmem:[%s12680_s26 + $0x10] sm:$0xff]  ;;  %v886_v10 = vld [vmem:[%s12680_s26 + $0x18] sm:$0xff]  ;;  %s15167_s9 = sshll.u32 %s9704_s30, 6 }
 0x4ca   : > { %v9092_v53 = vunpack.i.h.bf16 %v9090_v4  ;;  %v9091_v52 = vunpack.i.l.bf16 %v9090_v4  ;;  %v887_v55 = vld [vmem:[%s12680_s26 + $0x20] sm:$0xff]  ;;  %v888_v40 = vld [vmem:[%s12680_s26 + $0x28] sm:$0xff]  ;;  %v889_v0 = vld [vmem:[%s12680_s26 + $0x30] sm:$0xff]  ;;  %s14629_s0 = scalar_lea.vmem [#allocation7], %s15167_s9 }
 0x4cc   : > { %v5777_v32 = vsel %vm4448_vm1, %v12546_v31, %v9091_v52  ;;  %v5778_v22 = vsel %vm4448_vm1, %v12549_v45, %v9092_v53  ;;  %v5702_v31 = vsel %vm1009_vm0, %v5701_v44, %v5694_v26 }
 0x4cd   : > { %v5784_v29 = vpack.c.bf16 %v5778_v22, %v5777_v32 }
 0x4d4   : > { %v9085_v59 = vpop.permute.xlu1 %9084 }
 0x4d5   : > { %v9087_v54 = vunpack.i.h.bf16 %v9085_v59  ;;  %v9086_v20 = vunpack.i.l.bf16 %v9085_v59 }
 0x4d7   : > { %v5775_v50 = vsel %vm4448_vm1, %v12537_v12, %v9086_v20  ;;  %v5776_v42 = vsel %vm4448_vm1, %v12543_v17, %v9087_v54  ;;  %v5739_v17 = vrot.slane %v5738_v61, 4  ;;  %v890_v20 = vld [vmem:[%s12680_s26 + $0x38] sm:$0xff] }
 0x4d8   : > { %v5783_v43 = vpack.c.bf16 %v5776_v42, %v5775_v50 }
 0x4d9   : > { %v5740_v1 = vsel %vm1009_vm0, %v5739_v17, %v5732_v46  ;;  %v9410_v46 = vmov 128.0  }
 0x4da   : > { %5863 = vmatmul.bf16.vlgmr.msrb.gmra.mxu2 %v5783_v43  ;;  %9171 = vrcp.f32 %v9410_v46 }
 0x4e0   : > { %v9172_v16 = vpop.eup %9171 }
 0x4e1   : > { %v5911_v60 = vmul.f32 128.0, %v9172_v16  ;;  %vm5915_vm10 = vweird.f32 %v9172_v16 }
 0x4e3   : > { %v5912_v6 = vsub.f32 1.0, %v5911_v60 }
 0x4e4   : > { %v9095_v58 = vpop.permute.xlu0 %9094 }
 0x4e5   : > { %v9097_v11 = vunpack.i.h.bf16 %v9095_v58  ;;  %v9096_v9 = vunpack.i.l.bf16 %v9095_v58  ;;  %v5913_v35 = vmul.f32 %v9172_v16, %v5912_v6  ;;  %v8936_v6 = vld [vmem:[%s14755_s8 + $0xcc] sm:$0xf] }
 0x4e7   : > { %v5779_v45 = vsel %vm4448_vm1, %v12558_v18, %v9096_v9  ;;  %v5780_v48 = vsel %vm4448_vm1, %v12568_v5, %v9097_v11  ;;  %v9103_v18 = vld [vmem:[%s14752_s5] ss:$0 sm:$0xff]  ;;  %v5914_v4 = vadd.f32 %v9172_v16, %v5913_v35  ;;  %v8713_v35 = vld [vmem:[%s14755_s8 + $0xd8] sm:$0xf0] }
 0x4e8   : > { %v5785_v12 = vpack.c.bf16 %v5780_v48, %v5779_v45  ;;  %v883_v5 = vld [vmem:[%s12680_s26] sm:$0xff]  ;;  %s8896_s26 = sshll.u32 %s9393_s19, 4  ;;  %s8247_s19 = scalar_lea.sflag [#allocation6], %s9704_s30 }
 0x4e9   : > { %v12725_v53 = vsel %vm5915_vm10, %v9172_v16, %v5914_v4  ;;  %v8938_v16 = vld [vmem:[%s14755_s8 + $0xd4] sm:$0xf0]  ;;  %v8687_v4 = vld [vmem:[%s14755_s8 + $0xa0] sm:$0xf]  ;;  %s14652_s12 = sadd.s32 %s8896_s26, %s12665_s24 }
 0x4ea   : > { %5868 = vmatmul.bf16.gmra.mxu2 %v5784_v29 }
 0x4fa   : > { %5873 = vmatmul.bf16.gmra.mxu2 %v5785_v12 }
 0x533   : > { %v9100_v19 = vpop.permute.xlu1 %9099 }
 0x534   : > { %v9102_v14 = vunpack.i.h.bf16 %v9100_v19  ;;  %v9101_v7 = vunpack.i.l.bf16 %v9100_v19 }
 0x536   : > { %v5781_v36 = vsel %vm4448_vm1, %v5702_v31, %v9101_v7  ;;  %v5782_v51 = vsel %vm4448_vm1, %v5740_v1, %v9102_v14 }
 0x537   : > { %v5786_v28 = vpack.c.bf16 %v5782_v51, %v5781_v36 }
 0x539   : > { %5878 = vmatmul.bf16.gmra.mxu2 %v5786_v28 }
 0x55d   : > { %v5864_v56 = vpop.f32.mrf.mxu2 }
 0x55e   : > { %v5865_v37 = vadd.f32 %v9103_v18, %v5864_v56 }
 0x560   : > { %v12686_v57 = vadd.f32 %v5865_v37, %v883_v5  ;;  %8221 = vst [vmem:[%s12690_s23] sm:$0xff] %v5865_v37 }
 0x562   : > { %15049 = vst [vmem:[#allocation17_spill] sm:$0xff] %v12686_v57  ;;  %5894 = vadd.xlane.f32.xlu2 %v12686_v57 }
 0x565   : > { %v5866_v39 = vpop.f32.mrf.mxu2 }
 0x566   : > { %v5867_v13 = vadd.f32 %v9103_v18, %v5866_v39  ;;  %v8941_v39 = vld [vmem:[%s14755_s8 + $0xec] sm:$0xf0] }
 0x568   : > { %v12695_v63 = vadd.f32 %v5867_v13, %v884_v47  ;;  %8222 = vst [vmem:[%s12690_s23 + $0x8] sm:$0xff] %v5867_v13  ;;  %v8719_v47 = vld [vmem:[%s14755_s8 + $0xe0] sm:$0xf]  ;;  %v8939_v13 = vld [vmem:[%s14755_s8 + $0xe4] sm:$0xf] }
 0x56a   : > { %15050 = vst [vmem:[#allocation31_spill] sm:$0xff] %v12695_v63  ;;  %5896 = vadd.xlane.f32.xlu0 %v12695_v63 }
 0x56d   : > { %v5869_v38 = vpop.f32.mrf.mxu2 }
 0x56e   : > { %v5870_v34 = vadd.f32 %v9103_v18, %v5869_v38  ;;  %v8721_v38 = vld [vmem:[%s14755_s8 + $0xf0] sm:$0xf0] }
 0x570   : > { %v12700_v23 = vadd.f32 %v5870_v34, %v885_v27  ;;  %8223 = vst [vmem:[%s12690_s23 + $0x10] sm:$0xff] %v5870_v34  ;;  %v8720_v27 = vor.u32 %v8941_v39, %v8719_v47  ;;  %v8727_v34 = vld [vmem:[%s14755_s8 + $0xe8] sm:$0xf] }
 0x572   : > { %15051 = vst [vmem:[#allocation23_spill] sm:$0xff] %v12700_v23  ;;  %5898 = vadd.xlane.f32.xlu1 %v12700_v23  ;;  %6289 = vmatpush.bf16.msra.mxu3 %v8720_v27 }
 0x575   : > { %v5871_v15 = vpop.f32.mrf.mxu2 }
 0x576   : > { %v5872_v3 = vadd.f32 %v9103_v18, %v5871_v15  ;;  %v8724_v15 = vor.u32 %v8939_v13, %v8721_v38  ;;  %v8928_v38 = vld [vmem:[%s14755_s8 + $0x8c] sm:$0xf] }
 0x578   : > { %v12705_v62 = vadd.f32 %v5872_v3, %v886_v10  ;;  %8224 = vst [vmem:[%s12690_s23 + $0x18] sm:$0xff] %v5872_v3  ;;  %v8942_v10 = vld [vmem:[%s14755_s8 + $0xf4] sm:$0xf0]  ;;  %6318 = vmatpush.bf16.msrb.mxu0 %v8724_v15 }
 0x579   : > { %v8728_v3 = vor.u32 %v8942_v10, %v8727_v34  ;;  %v8681_v34 = vld [vmem:[%s14755_s8 + $0x98] sm:$0xf0]  ;;  %v8655_v10 = vld [vmem:[%s14755_s8 + $0x60] sm:$0xf] }
 0x57a   : > { %15052 = vst [vmem:[#allocation40_spill] sm:$0xff] %v12705_v62  ;;  %5900 = vadd.xlane.f32.xlu2 %v12705_v62  ;;  %v8684_v15 = vor.u32 %v8928_v38, %v8681_v34  ;;  %v8631_v38 = vld [vmem:[%s14755_s8 + $0x28] sm:$0xf]  ;;  %v8918_v34 = vld [vmem:[%s14755_s8 + $0x34] sm:$0xf0] }
 0x57b   : > { %6347 = vmatpush.bf16.msrb.mxu1 %v8728_v3  ;;  %v8925_v3 = vld [vmem:[%s14755_s8 + $0x6c] sm:$0xf0] }
 0x57d   : > { %v5874_v26 = vpop.f32.mrf.mxu2 }
 0x57e   : > { %v5875_v33 = vadd.f32 %v9103_v18, %v5874_v26  ;;  %v8729_v26 = vld [vmem:[%s14755_s8 + $0xf8] sm:$0xf0] }
 0x580   : > { %v12710_v24 = vadd.f32 %v5875_v33, %v887_v55  ;;  %8225 = vst [vmem:[%s12690_s23 + $0x20] sm:$0xff] %v5875_v33  ;;  %v8940_v55 = vld [vmem:[%s14755_s8 + $0xec] sm:$0xf] }
 0x581   : > { %v8732_v33 = vor.u32 %v8940_v55, %v8729_v26  ;;  %v8923_v55 = vld [vmem:[%s14755_s8 + $0x64] sm:$0xf]  ;;  %v8657_v26 = vld [vmem:[%s14755_s8 + $0x70] sm:$0xf0] }
 0x582   : > { %15053 = vst [vmem:[#allocation21_spill] sm:$0xff] %v12710_v24  ;;  %5902 = vadd.xlane.f32.xlu0 %v12710_v24 }
 0x583   : > { %6376 = vmatpush.bf16.msra.mxu2 %v8732_v33 }
 0x585   : > { %v5876_v41 = vpop.f32.mrf.mxu2 }
 0x586   : > { %v5877_v49 = vadd.f32 %v9103_v18, %v5876_v41  ;;  %v8937_v41 = vld [vmem:[%s14755_s8 + $0xcc] sm:$0xf0] }
 0x588   : > { %v12715_v25 = vadd.f32 %v5877_v49, %v888_v40  ;;  %8226 = vst [vmem:[%s12690_s23 + $0x28] sm:$0xff] %v5877_v49  ;;  %v8703_v40 = vld [vmem:[%s14755_s8 + $0xc0] sm:$0xf]  ;;  %v8935_v49 = vld [vmem:[%s14755_s8 + $0xc4] sm:$0xf] }
 0x58a   : > { %15054 = vst [vmem:[#allocation41_spill] sm:$0xff] %v12715_v25  ;;  %5904 = vadd.xlane.f32.xlu1 %v12715_v25 }
 0x5bc   : > { %v5879_v8 = vpop.f32.mrf.mxu2 }
 0x5bd   : > { %v5880_v21 = vadd.f32 %v9103_v18, %v5879_v8  ;;  %v8705_v8 = vld [vmem:[%s14755_s8 + $0xd0] sm:$0xf0] }
 0x5bf   : > { %v12720_v30 = vadd.f32 %v5880_v21, %v889_v0  ;;  %8227 = vst [vmem:[%s12690_s23 + $0x30] sm:$0xff] %v5880_v21  ;;  %v8704_v0 = vor.u32 %v8937_v41, %v8703_v40  ;;  %v8711_v21 = vld [vmem:[%s14755_s8 + $0xc8] sm:$0xf] }
 0x5c1   : > { %15055 = vst [vmem:[#allocation34_spill] sm:$0xff] %v12720_v30  ;;  %5906 = vadd.xlane.f32.xlu1 %v12720_v30  ;;  %6290 = vmatpush.bf16.msra.mxu3 %v8704_v0  ;;  %v8663_v0 = vld [vmem:[%s14755_s8 + $0x68] sm:$0xf] }
 0x5c4   : > { %v5881_v61 = vpop.f32.mrf.mxu2 }
 0x5c5   : > { %v5882_v2 = vadd.f32 %v9103_v18, %v5881_v61  ;;  %v8708_v61 = vor.u32 %v8935_v49, %v8705_v8  ;;  %v8656_v49 = vor.u32 %v8925_v3, %v8655_v10  ;;  %v8926_v8 = vld [vmem:[%s14755_s8 + $0x74] sm:$0xf0]  ;;  %v8916_v10 = vld [vmem:[%s14755_s8 + $0x2c] sm:$0xf]  ;;  %v8633_v3 = vld [vmem:[%s14755_s8 + $0x38] sm:$0xf0] }
 0x5c7   : > { %8228 = vst [vmem:[%s12690_s23 + $0x38] sm:$0xff] %v5882_v2  ;;  %v12738_v42 = vadd.f32 %v5882_v2, %v890_v20  ;;  %v8712_v2 = vor.u32 %v8938_v16, %v8711_v21  ;;  %6319 = vmatpush.bf16.msrb.mxu0 %v8708_v61  ;;  %v8664_v16 = vor.u32 %v8926_v8, %v8663_v0  ;;  %v8665_v61 = vld [vmem:[%s14755_s8 + $0x78] sm:$0xf0]  ;;  %v8911_v0 = vld [vmem:[%s14755_s8 + $0x4] sm:$0xf] }
 0x5c9   : > { %15056 = vst [vmem:[#allocation30_spill] sm:$0xff] %v12738_v42  ;;  %6348 = vmatpush.bf16.msrb.mxu1 %v8712_v2 }
 0x5d5   : > { %v5895_v52 = vpop.xlane.xlu2 %5894 }
 0x5d6   : > { %v5917_v32 = vmul.f32 %v12725_v53, %v5895_v52  ;;  %v8716_v52 = vor.u32 %v8936_v6, %v8713_v35 }
 0x5d8   : > { %v12729_v22 = vsub.f32 %v12686_v57, %v5917_v32  ;;  %v8933_v32 = vld [vmem:[%s14755_s8 + $0xac] sm:$0xf0]  ;;  %6377 = vmatpush.bf16.msra.mxu2 %v8716_v52 }
 0x5d9   : > { %v8688_v20 = vor.u32 %v8933_v32, %v8687_v4  ;;  %v8639_v4 = vld [vmem:[%s14755_s8 + $0x40] sm:$0xf]  ;;  %v8921_v52 = vld [vmem:[%s14755_s8 + $0x4c] sm:$0xf0]  ;;  %v8919_v32 = vld [vmem:[%s14755_s8 + $0x44] sm:$0xf] }
 0x5da   : > { %v5933_v29 = vmul.f32 %v12729_v22, %v12729_v22 }
 0x5db   : > { %6291 = vmatpush.bf16.msra.mxu3 %v8688_v20  ;;  %v8640_v20 = vor.u32 %v8921_v52, %v8639_v4  ;;  %v8912_v4 = vld [vmem:[%s14755_s8 + $0xc] sm:$0xf]  ;;  %v8617_v52 = vld [vmem:[%s14755_s8 + $0x18] sm:$0xf0] }
 0x5dc   : > { %5941 = vadd.xlane.f32.xlu2 %v5933_v29  ;;  %v8931_v29 = vld [vmem:[%s14755_s8 + $0xa4] sm:$0xf] }
 0x5dd   : > { %v5897_v59 = vpop.xlane.xlu0 %5896 }
 0x5de   : > { %v5918_v54 = vmul.f32 %v12725_v53, %v5897_v59  ;;  %v8689_v59 = vld [vmem:[%s14755_s8 + $0xb0] sm:$0xf0] }
 0x5e0   : > { %v12736_v50 = vsub.f32 %v12695_v63, %v5918_v54 }
 0x5e2   : > { %v5934_v43 = vmul.f32 %v12736_v50, %v12736_v50 }
 0x5e4   : > { %5943 = vadd.xlane.f32.xlu0 %v5934_v43  ;;  %5908 = vadd.xlane.f32.xlu2 %v12738_v42  ;;  %v8692_v43 = vor.u32 %v8931_v29, %v8689_v59 }
 0x5e5   : > { %v5899_v58 = vpop.xlane.xlu1 %5898 }
 0x5e6   : > { %v5919_v44 = vmul.f32 %v12725_v53, %v5899_v58  ;;  %v8695_v58 = vld [vmem:[%s14755_s8 + $0xa8] sm:$0xf]  ;;  %6320 = vmatpush.bf16.msrb.mxu0 %v8692_v43  ;;  %v8641_v43 = vld [vmem:[%s14755_s8 + $0x50] sm:$0xf0] }
 0x5e8   : > { %v12745_v11 = vsub.f32 %v12700_v23, %v5919_v44  ;;  %v8934_v44 = vld [vmem:[%s14755_s8 + $0xb4] sm:$0xf0] }
 0x5ea   : > { %v5935_v9 = vmul.f32 %v12745_v11, %v12745_v11 }
 0x5ec   : > { %5945 = vadd.xlane.f32.xlu0 %v5935_v9  ;;  %v8696_v9 = vor.u32 %v8934_v44, %v8695_v58  ;;  %v8647_v58 = vld [vmem:[%s14755_s8 + $0x48] sm:$0xf] }
 0x5ed   : > { %v5901_v31 = vpop.xlane.xlu2 %5900 }
 0x5ee   : > { %v5920_v45 = vmul.f32 %v12725_v53, %v5901_v31  ;;  %v8932_v31 = vld [vmem:[%s14755_s8 + $0xac] sm:$0xf]  ;;  %6349 = vmatpush.bf16.msrb.mxu1 %v8696_v9  ;;  %v8644_v9 = vor.u32 %v8919_v32, %v8641_v43 }
 0x5f0   : > { %v12751_v48 = vsub.f32 %v12705_v62, %v5920_v45  ;;  %v8697_v45 = vld [vmem:[%s14755_s8 + $0xb8] sm:$0xf0] }
 0x5f2   : > { %v5936_v12 = vmul.f32 %v12751_v48, %v12751_v48 }
 0x5f4   : > { %5947 = vadd.xlane.f32.xlu1 %v5936_v12  ;;  %v8700_v12 = vor.u32 %v8932_v31, %v8697_v45  ;;  %v8922_v31 = vld [vmem:[%s14755_s8 + $0x54] sm:$0xf0]  ;;  %v8920_v45 = vld [vmem:[%s14755_s8 + $0x4c] sm:$0xf] }
 0x5f5   : > { %v5903_v17 = vpop.xlane.xlu0 %5902 }
 0x5f6   : > { %v5921_v1 = vmul.f32 %v12725_v53, %v5903_v17  ;;  %v8671_v17 = vld [vmem:[%s14755_s8 + $0x80] sm:$0xf]  ;;  %6378 = vmatpush.bf16.msra.mxu2 %v8700_v12  ;;  %v8649_v12 = vld [vmem:[%s14755_s8 + $0x58] sm:$0xf0] }
 0x5f8   : > { %v12757_v19 = vsub.f32 %v12710_v24, %v5921_v1  ;;  %v8929_v1 = vld [vmem:[%s14755_s8 + $0x8c] sm:$0xf0] }
 0x5fa   : > { %v5937_v14 = vmul.f32 %v12757_v19, %v12757_v19  ;;  %6379 = vmatpush.bf16.msra.mxu2 %v8684_v15  ;;  %v8632_v15 = vor.u32 %v8918_v34, %v8631_v38 }
 0x5fc   : > { %5949 = vadd.xlane.f32.xlu2 %v5937_v14  ;;  %v8927_v14 = vld [vmem:[%s14755_s8 + $0x84] sm:$0xf] }
 0x5fd   : > { %v5905_v7 = vpop.xlane.xlu1 %5904 }
 0x5fe   : > { %v5922_v36 = vmul.f32 %v12725_v53, %v5905_v7 }
 0x600   : > { %v12763_v51 = vsub.f32 %v12715_v25, %v5922_v36 }
 0x602   : > { %v5938_v28 = vmul.f32 %v12763_v51, %v12763_v51 }
 0x604   : > { %5951 = vadd.xlane.f32.xlu0 %v5938_v28  ;;  %v8672_v28 = vor.u32 %v8929_v1, %v8671_v17  ;;  %v8648_v1 = vor.u32 %v8922_v31, %v8647_v58 }
 0x606   : > { %6292 = vmatpush.bf16.msra.mxu3 %v8672_v28 }
 0x60a   : > { %6293 = vmatpush.bf16.msra.mxu3 %v8656_v49  ;;  %v8636_v49 = vor.u32 %v8916_v10, %v8633_v3 }
 0x60e   : > { %6294 = vmatpush.bf16.msra.mxu3 %v8640_v20 }
 0x634   : > { %v5907_v18 = vpop.xlane.xlu1 %5906 }
 0x635   : > { %v5923_v5 = vmul.f32 %v12725_v53, %v5907_v18  ;;  %v8673_v18 = vld [vmem:[%s14755_s8 + $0x90] sm:$0xf0] }
 0x636   : > { %v8676_v13 = vor.u32 %v8927_v14, %v8673_v18  ;;  %v8652_v14 = vor.u32 %v8920_v45, %v8649_v12 }
 0x637   : > { %v12769_v56 = vsub.f32 %v12720_v30, %v5923_v5  ;;  %v8679_v5 = vld [vmem:[%s14755_s8 + $0x88] sm:$0xf] }
 0x638   : > { %6321 = vmatpush.bf16.msrb.mxu0 %v8676_v13 }
 0x639   : > { %v5939_v37 = vmul.f32 %v12769_v56, %v12769_v56 }
 0x63b   : > { %5953 = vadd.xlane.f32.xlu1 %v5939_v37  ;;  %v8930_v37 = vld [vmem:[%s14755_s8 + $0x94] sm:$0xf0] }
 0x63c   : > { %v8680_v27 = vor.u32 %v8930_v37, %v8679_v5  ;;  %v8915_v37 = vld [vmem:[%s14755_s8 + $0x24] sm:$0xf] }
 0x63e   : > { %6350 = vmatpush.bf16.msrb.mxu1 %v8680_v27 }
 0x642   : > { %6351 = vmatpush.bf16.msrb.mxu1 %v8664_v16 }
 0x646   : > { %6352 = vmatpush.bf16.msrb.mxu1 %v8648_v1  ;;  %v13015_v1 = vld [vmem:[%s15059_s25] ss:$0 sm:$0xff]  ;;  %s15161_s25 = sld [smem:[#allocation50_spill]] }
 0x64a   : > { %6353 = vmatpush.bf16.msrb.mxu1 %v8632_v15 }
 0x64f   : > { %v5942_v46 = vpop.xlane.xlu2 %5941 }
 0x650   : > { %v5957_v60 = vmul.f32 %v5942_v46, %v12725_v53  ;;  %v8660_v46 = vor.u32 %v8923_v55, %v8657_v26 }
 0x652   : > { %v12834_v54 = vadd.f32 1e-05, %v5957_v60  ;;  %v8924_v60 = vld [vmem:[%s14755_s8 + $0x6c] sm:$0xf]  ;;  %6322 = vmatpush.bf16.msrb.mxu0 %v8660_v46  ;;  %v8913_v46 = vld [vmem:[%s14755_s8 + $0xc] sm:$0xf0] }
 0x653   : > { %v8668_v6 = vor.u32 %v8924_v60, %v8665_v61  ;;  %v8609_v61 = vld [vmem:[%s14755_s8 + $0x10] sm:$0xf0] }
 0x654   : > { %9173 = vrsqrt.f32 %v12834_v54  ;;  %vm5979_vm12 = vweird.f32 %v12834_v54 }
 0x655   : > { %6380 = vmatpush.bf16.msra.mxu2 %v8668_v6 }
 0x656   : > { %6323 = vmatpush.bf16.msrb.mxu0 %v8644_v9 }
 0x657   : > { %v5944_v7 = vpop.xlane.xlu0 %5943  ;;  %v5909_v36 = vpop.xlane.xlu2 %5908 }
 0x658   : > { %v5958_v47 = vmul.f32 %v5944_v7, %v12725_v53  ;;  %v5924_v39 = vmul.f32 %v12725_v53, %v5909_v36  ;;  %v8623_v7 = vld [vmem:[%s14755_s8 + $0x20] sm:$0xf]  ;;  %v8917_v36 = vld [vmem:[%s14755_s8 + $0x2c] sm:$0xf0] }
 0x659   : > { %v8624_v5 = vor.u32 %v8917_v36, %v8623_v7  ;;  %6381 = vmatpush.bf16.msra.mxu2 %v8652_v14 }
 0x65a   : > { %v12887_v33 = vpop.eup %9173  ;;  %v12889_v40 = vadd.f32 1e-05, %v5958_v47  ;;  %v12892_v41 = vsub.f32 %v12738_v42, %v5924_v39  ;;  %v8625_v47 = vld [vmem:[%s14755_s8 + $0x30] sm:$0xf0] }
 0x65b   : > { %v5974_v21 = vmul.f32 %v12887_v33, %v12834_v54  ;;  %vm5980_vm11 = vweird.f32 %v12887_v33  ;;  %v8628_v27 = vor.u32 %v8915_v37, %v8625_v47  ;;  %6295 = vmatpush.bf16.msra.mxu3 %v8624_v5  ;;  %v8607_v54 = vld [vmem:[%s14755_s8] sm:$0xf] }
 0x65c   : > { %9175 = vrsqrt.f32 %v12889_v40  ;;  %v5940_v2 = vmul.f32 %v12892_v41, %v12892_v41  ;;  %vm12970_vm13 = vmor %vm5979_vm12, %vm5980_vm11  ;;  %v8608_v60 = vor.u32 %v8913_v46, %v8607_v54  ;;  %vm5989_vm15 = vweird.f32 %v12889_v40 }
 0x65d   : > { %v5975_v35 = vmul.f32 %v12887_v33, %v5974_v21  ;;  %6324 = vmatpush.bf16.msrb.mxu0 %v8628_v27  ;;  %6382 = vmatpush.bf16.msra.mxu2 %v8636_v49 }
 0x65e   : > { %5955 = vadd.xlane.f32.xlu2 %v5940_v2  ;;  %v8615_v2 = vld [vmem:[%s14755_s8 + $0x8] sm:$0xf] }
 0x65f   : > { %v5976_v29 = vmul.f32 0.5, %v5975_v35  ;;  %v5946_v59 = vpop.xlane.xlu0 %5945  ;;  %v8612_v35 = vor.u32 %v8911_v0, %v8609_v61  ;;  %6296 = vmatpush.bf16.msra.mxu3 %v8608_v60 }
 0x660   : > { %v5959_v44 = vmul.f32 %v5946_v59, %v12725_v53  ;;  %v8620_v59 = vor.u32 %v8912_v4, %v8617_v52 }
 0x661   : > { %v5977_v17 = vsub.f32 1.5, %v5976_v29  ;;  %6325 = vmatpush.bf16.msrb.mxu0 %v8612_v35 }
 0x662   : > { %v9176_v28 = vpop.eup %9175  ;;  %v12944_v18 = vadd.f32 1e-05, %v5959_v44  ;;  %v13006_v44 = vld [vmem:[%s14753_s6] ss:$0 sm:$0xff]  ;;  %6383 = vmatpush.bf16.msra.mxu2 %v8620_v59 }
 0x663   : > { %v5978_v39 = vmul.f32 %v12887_v33, %v5977_v17  ;;  %v5984_v13 = vmul.f32 %v9176_v28, %v12889_v40  ;;  %vm5990_vm14 = vweird.f32 %v9176_v28 }
 0x664   : > { %9177 = vrsqrt.f32 %v12944_v18  ;;  %vm5991_vm0 = vmor %vm5989_vm15, %vm5990_vm14  ;;  %vm5999_vm2 = vweird.f32 %v12944_v18 }
 0x665   : > { %v5985_v26 = vmul.f32 %v9176_v28, %v5984_v13  ;;  %v5982_v8 = vsel %vm12970_vm13, %v12887_v33, %v5978_v39  ;;  %v8914_v33 = vld [vmem:[%s14755_s8 + $0x14] sm:$0xf0] }
 0x666   : > { %v8616_v29 = vor.u32 %v8914_v33, %v8615_v2  ;;  %v6053_v43 = vmul.f32 %v5982_v8, %v12729_v22 }
 0x667   : > { %v5986_v21 = vmul.f32 0.5, %v5985_v26  ;;  %v5948_v16 = vpop.xlane.xlu1 %5947 }
 0x668   : > { %v5960_v6 = vmul.f32 %v5948_v16, %v12725_v53  ;;  %6354 = vmatpush.bf16.msrb.mxu1 %v8616_v29  ;;  %v6064_v17 = vmul.f32 %v13006_v44, %v6053_v43 }
 0x669   : > { %v5987_v32 = vsub.f32 1.5, %v5986_v21 }
 0x66a   : > { %v9178_v20 = vpop.eup %9177  ;;  %v5968_v58 = vadd.f32 1e-05, %v5960_v6 }
 0x66b   : > { %v5988_v9 = vmul.f32 %v9176_v28, %v5987_v32  ;;  %v5994_v31 = vmul.f32 %v9178_v20, %v12944_v18  ;;  %vm6000_vm1 = vweird.f32 %v9178_v20 }
 0x66c   : > { %9179 = vrsqrt.f32 %v5968_v58  ;;  %vm6001_vm3 = vmor %vm5999_vm2, %vm6000_vm1  ;;  %vm6009_vm5 = vweird.f32 %v5968_v58 }
 0x66d   : > { %v5992_v45 = vsel %vm5991_vm0, %v9176_v28, %v5988_v9  ;;  %v5995_v12 = vmul.f32 %v9178_v20, %v5994_v31  ;;  %v6075_v28 = vadd.f32 %v13015_v1, %v6064_v17 }
 0x66e   : > { %v6054_v22 = vmul.f32 %v5992_v45, %v12736_v50 }
 0x66f   : > { %v5996_v14 = vmul.f32 0.5, %v5995_v12  ;;  %v5950_v7 = vpop.xlane.xlu2 %5949 }
 0x670   : > { %v5961_v40 = vmul.f32 %v5950_v7, %v12725_v53  ;;  %v6065_v36 = vmul.f32 %v13006_v44, %v6054_v22 }
 0x671   : > { %v5997_v5 = vsub.f32 1.5, %v5996_v14 }
 0x672   : > { %v9180_v37 = vpop.eup %9179  ;;  %v5969_v47 = vadd.f32 1e-05, %v5961_v40  ;;  %v6076_v50 = vadd.f32 %v13015_v1, %v6065_v36 }
 0x673   : > { %v5998_v39 = vmul.f32 %v9178_v20, %v5997_v5  ;;  %v6004_v13 = vmul.f32 %v9180_v37, %v5968_v58  ;;  %vm6010_vm4 = vweird.f32 %v9180_v37 }
 0x674   : > { %9181 = vrsqrt.f32 %v5969_v47  ;;  %v6083_v27 = vpack.c.bf16 %v6076_v50, %v6075_v28  ;;  %vm6011_vm6 = vmor %vm6009_vm5, %vm6010_vm4  ;;  %vm6019_vm8 = vweird.f32 %v5969_v47 }
 0x675   : > { %v6005_v38 = vmul.f32 %v9180_v37, %v6004_v13  ;;  %v6002_v34 = vsel %vm6001_vm3, %v9178_v20, %v5998_v39 }
 0x676   : > { %6297 = vmatmul.bf16.vlgmr.msra.gmra.mxu3 %v6083_v27  ;;  %6326 = vmatmul.bf16.vlgmr.msrb.gmra.mxu0 %v6083_v27  ;;  %v6055_v49 = vmul.f32 %v6002_v34, %v12745_v11 }
 0x677   : > { %v6006_v10 = vmul.f32 0.5, %v6005_v38  ;;  %6355 = vmatmul.bf16.vlgmr.msrb.gmra.mxu1 %v6083_v27  ;;  %6384 = vmatmul.bf16.vlgmr.msra.gmra.mxu2 %v6083_v27  ;;  %v5952_v15 = vpop.xlane.xlu0 %5951 }
 0x678   : > { %v5962_v3 = vmul.f32 %v5952_v15, %v12725_v53  ;;  %v6066_v16 = vmul.f32 %v13006_v44, %v6055_v49 }
 0x679   : > { %v6007_v55 = vsub.f32 1.5, %v6006_v10 }
 0x67a   : > { %v9182_v26 = vpop.eup %9181  ;;  %v5970_v54 = vadd.f32 1e-05, %v5962_v3  ;;  %v6077_v35 = vadd.f32 %v13015_v1, %v6066_v16 }
 0x67b   : > { %v6008_v46 = vmul.f32 %v9180_v37, %v6007_v55  ;;  %v6014_v18 = vmul.f32 %v9182_v26, %v5969_v47  ;;  %vm6020_vm7 = vweird.f32 %v9182_v26 }
 0x67c   : > { %9183 = vrsqrt.f32 %v5970_v54  ;;  %vm6021_vm9 = vmor %vm6019_vm8, %vm6020_vm7  ;;  %vm6029_vm11 = vweird.f32 %v5970_v54 }
 0x67d   : > { %v6012_v0 = vsel %vm6011_vm6, %v9180_v37, %v6008_v46  ;;  %v6015_v8 = vmul.f32 %v9182_v26, %v6014_v18 }
 0x67e   : > { %v6056_v21 = vmul.f32 %v6012_v0, %v12751_v48  ;;  %v6119_v0 = vld [vmem:[%s15060_s27] sm:$0xf]  ;;  %s15171_s27 = sld [smem:[#allocation52_spill]] }
 0x67f   : > { %v6016_v60 = vmul.f32 0.5, %v6015_v8 }
 0x680   : > { %v6067_v61 = vmul.f32 %v13006_v44, %v6056_v21 }
 0x681   : > { %v6017_v2 = vsub.f32 1.5, %v6016_v60 }
 0x682   : > { %v9184_v6 = vpop.eup %9183  ;;  %v6078_v11 = vadd.f32 %v13015_v1, %v6067_v61 }
 0x683   : > { %v6018_v33 = vmul.f32 %v9182_v26, %v6017_v2  ;;  %v6024_v4 = vmul.f32 %v9184_v6, %v5970_v54  ;;  %vm6030_vm10 = vweird.f32 %v9184_v6 }
 0x684   : > { %v6084_v52 = vpack.c.bf16 %v6078_v11, %v6077_v35  ;;  %vm6031_vm12 = vmor %vm6029_vm11, %vm6030_vm10  ;;  %s9283_s2 = scalar_lea.hbm %s15171_s27, 256 }
 0x685   : > { %v6025_v32 = vmul.f32 %v9184_v6, %v6024_v4  ;;  %v6022_v48 = vsel %vm6021_vm9, %v9182_v26, %v6018_v33  ;;  %v13062_v4 = vperm.slane %v6119_v0, 2 }
 0x686   : > { %6302 = vmatmul.bf16.gmra.mxu3 %v6084_v52  ;;  %6331 = vmatmul.bf16.gmra.mxu0 %v6084_v52  ;;  %v6057_v20 = vmul.f32 %v6022_v48, %v12757_v19 }
 0x687   : > { %v6026_v29 = vmul.f32 0.5, %v6025_v32  ;;  %6360 = vmatmul.bf16.gmra.mxu1 %v6084_v52  ;;  %6389 = vmatmul.bf16.gmra.mxu2 %v6084_v52 }
 0x688   : > { %v6068_v31 = vmul.f32 %v13006_v44, %v6057_v20 }
 0x689   : > { %v6027_v59 = vsub.f32 1.5, %v6026_v29 }
 0x68a   : > { %v6079_v12 = vadd.f32 %v13015_v1, %v6068_v31 }
 0x68b   : > { %v6028_v43 = vmul.f32 %v9184_v6, %v6027_v59 }
 0x68d   : > { %v6032_v58 = vsel %vm6031_vm12, %v9184_v6, %v6028_v43 }
 0x68e   : > { %v6058_v9 = vmul.f32 %v6032_v58, %v12763_v51 }
 0x690   : > { %v6069_v45 = vmul.f32 %v13006_v44, %v6058_v9 }
 0x692   : > { %v6080_v22 = vadd.f32 %v13015_v1, %v6069_v45 }
 0x694   : > { %v6085_v17 = vpack.c.bf16 %v6080_v22, %v6079_v12  ;;  %v13079_v12 = vperm.slane %v6119_v0, 0  ;;  %v13081_v22 = vperm.slane %v6119_v0, 3 }
 0x696   : > { %6307 = vmatmul.bf16.gmra.mxu3 %v6085_v17  ;;  %6336 = vmatmul.bf16.gmra.mxu0 %v6085_v17  ;;  %15062 = vst [vmem:[#allocation32_spill] sm:$0xff] %v13081_v22 }
 0x697   : > { %6365 = vmatmul.bf16.gmra.mxu1 %v6085_v17  ;;  %6394 = vmatmul.bf16.gmra.mxu2 %v6085_v17 }
 0x6ae   : > { %v5954_v19 = vpop.xlane.xlu1 %5953 }
 0x6af   : > { %v5963_v14 = vmul.f32 %v5954_v19, %v12725_v53 }
 0x6b1   : > { %v5971_v7 = vadd.f32 1e-05, %v5963_v14 }
 0x6b3   : > { %9185 = vrsqrt.f32 %v5971_v7  ;;  %vm6039_vm14 = vweird.f32 %v5971_v7 }
 0x6b9   : > { %v9186_v40 = vpop.eup %9185 }
 0x6ba   : > { %v6034_v51 = vmul.f32 %v9186_v40, %v5971_v7  ;;  %vm6040_vm13 = vweird.f32 %v9186_v40 }
 0x6bb   : > { %vm6041_vm15 = vmor %vm6039_vm14, %vm6040_vm13 }
 0x6bc   : > { %v6035_v36 = vmul.f32 %v9186_v40, %v6034_v51 }
 0x6be   : > { %v6036_v28 = vmul.f32 0.5, %v6035_v36 }
 0x6c0   : > { %v6037_v50 = vsub.f32 1.5, %v6036_v28 }
 0x6c2   : > { %v6038_v13 = vmul.f32 %v9186_v40, %v6037_v50 }
 0x6c4   : > { %v6042_v34 = vsel %vm6041_vm15, %v9186_v40, %v6038_v13 }
 0x6c5   : > { %v6059_v3 = vmul.f32 %v6042_v34, %v12769_v56  ;;  %v13046_v56 = vperm.slane %v6119_v0, 1 }
 0x6c7   : > { %v6070_v49 = vmul.f32 %v13006_v44, %v6059_v3  ;;  %15061 = vst [vmem:[#allocation19_spill] sm:$0xff] %v13046_v56 }
 0x6c9   : > { %v6081_v46 = vadd.f32 %v13015_v1, %v6070_v49 }
 0x6d1   : > { %v5956_v5 = vpop.xlane.xlu2 %5955 }
 0x6d2   : > { %v5964_v37 = vmul.f32 %v5956_v5, %v12725_v53 }
 0x6d4   : > { %v5972_v47 = vadd.f32 1e-05, %v5964_v37 }
 0x6d6   : > { %9187 = vrsqrt.f32 %v5972_v47  ;;  %vm6049_vm1 = vweird.f32 %v5972_v47 }
 0x6dc   : > { %v9188_v39 = vpop.eup %9187 }
 0x6dd   : > { %v6044_v27 = vmul.f32 %v9188_v39, %v5972_v47  ;;  %vm6050_vm0 = vweird.f32 %v9188_v39 }
 0x6de   : > { %vm6051_vm2 = vmor %vm6049_vm1, %vm6050_vm0 }
 0x6df   : > { %v6045_v38 = vmul.f32 %v9188_v39, %v6044_v27 }
 0x6e1   : > { %v6046_v10 = vmul.f32 0.5, %v6045_v38 }
 0x6e3   : > { %v6047_v15 = vsub.f32 1.5, %v6046_v10 }
 0x6e5   : > { %v6048_v55 = vmul.f32 %v9188_v39, %v6047_v15 }
 0x6e7   : > { %v6052_v53 = vsel %vm6051_vm2, %v9188_v39, %v6048_v55 }
 0x6e8   : > { %v6060_v26 = vmul.f32 %v6052_v53, %v12892_v41 }
 0x6ea   : > { %v6071_v54 = vmul.f32 %v13006_v44, %v6060_v26 }
 0x6ec   : > { %v6082_v18 = vadd.f32 %v13015_v1, %v6071_v54 }
 0x6ee   : > { %v6086_v8 = vpack.c.bf16 %v6082_v18, %v6081_v46 }
 0x6f0   : > { %6312 = vmatmul.bf16.gmra.mxu3 %v6086_v8  ;;  %6341 = vmatmul.bf16.gmra.mxu0 %v6086_v8 }
 0x6f1   : > { %6370 = vmatmul.bf16.gmra.mxu1 %v6086_v8  ;;  %6399 = vmatmul.bf16.gmra.mxu2 %v6086_v8 }
 0x6f3   : > { %v6327_v41 = vpop.f32.mrf.mxu0 }
 0x6f4   : > { %v13049_v21 = vadd.f32 %v6327_v41, %v13046_v56  ;;  %v6356_v52 = vpop.f32.mrf.mxu1 }
 0x6f5   : > { %v13066_v48 = vadd.f32 %v6356_v52, %v13062_v4 }
 0x6f6   : > { %v13052_v44 = vmul.f32 0.70710677, %v13049_v21 }
 0x6f7   : > { %v13069_v20 = vmul.f32 0.70710677, %v13066_v48 }
 0x6f8   : > { %v6509_v1 = vmul.f32 %v13052_v44, %v13052_v44 }
 0x6f9   : > { %v6549_v58 = vmul.f32 %v13069_v20, %v13069_v20  ;;  %v6298_v17 = vpop.f32.mrf.mxu3 }
 0x6fa   : > { %v13056_v16 = vmin.f32 %v6509_v1, 16.0  ;;  %v6385_v19 = vpop.f32.mrf.mxu2  ;;  %v13085_v7 = vadd.f32 %v6298_v17, %v13079_v12 }
 0x6fb   : > { %v13077_v45 = vmin.f32 %v6549_v58, 16.0  ;;  %v13090_v36 = vadd.f32 %v6385_v19, %v13081_v22  ;;  %v6329_v38 = vpop.f32.mrf.mxu0 }
 0x6fc   : > { %v6522_v60 = vmul.f32 3.8918573e-05, %v13056_v16  ;;  %v6511_v11 = vmul.f32 2.1237322e-06, %v13056_v16  ;;  %v13093_v37 = vmul.f32 0.70710677, %v13085_v7  ;;  %v13112_v53 = vadd.f32 %v6329_v38, %v13046_v56 }
 0x6fd   : > { %v6562_v14 = vmul.f32 3.8918573e-05, %v13077_v45  ;;  %v6551_v51 = vmul.f32 2.1237322e-06, %v13077_v45  ;;  %v13096_v47 = vmul.f32 0.70710677, %v13090_v36 }
 0x6fe   : > { %v6523_v61 = vadd.f32 0.001143296, %v6522_v60  ;;  %v6512_v29 = vadd.f32 0.00028619796, %v6511_v11  ;;  %v6469_v13 = vmul.f32 %v13093_v37, %v13093_v37 }
 0x6ff   : > { %v6563_v5 = vadd.f32 0.001143296, %v6562_v14  ;;  %v6552_v39 = vadd.f32 0.00028619796, %v6551_v51  ;;  %v6589_v27 = vmul.f32 %v13096_v47, %v13096_v47 }
 0x700   : > { %v6524_v2 = vmul.f32 %v6523_v61, %v13056_v16  ;;  %v6513_v9 = vmul.f32 %v6512_v29, %v13056_v16  ;;  %v13106_v15 = vmin.f32 %v6469_v13, 16.0  ;;  %v13122_v61 = vmul.f32 0.70710677, %v13112_v53  ;;  %v6358_v29 = vpop.f32.mrf.mxu1 }
 0x701   : > { %v6564_v28 = vmul.f32 %v6563_v5, %v13077_v45  ;;  %v13108_v3 = vmin.f32 %v6589_v27, 16.0  ;;  %v6553_v49 = vmul.f32 %v6552_v39, %v13077_v45  ;;  %v13134_v51 = vadd.f32 %v6358_v29, %v13062_v4 }
 0x702   : > { %v6525_v6 = vadd.f32 0.014752088, %v6524_v2  ;;  %v6514_v40 = vadd.f32 0.0036580483, %v6513_v9  ;;  %v6482_v54 = vmul.f32 3.8918573e-05, %v13106_v15  ;;  %v6669_v17 = vmul.f32 %v13122_v61, %v13122_v61 }
 0x703   : > { %v6565_v34 = vadd.f32 0.014752088, %v6564_v28  ;;  %v6602_v0 = vmul.f32 3.8918573e-05, %v13108_v3  ;;  %v6471_v8 = vmul.f32 2.1237322e-06, %v13106_v15 }
 0x704   : > { %v6526_v35 = vmul.f32 %v6525_v6, %v13056_v16  ;;  %v6515_v50 = vmul.f32 %v6514_v40, %v13056_v16  ;;  %v6483_v41 = vadd.f32 0.001143296, %v6482_v54  ;;  %v6554_v6 = vadd.f32 0.0036580483, %v6553_v49 }
 0x705   : > { %v6566_v55 = vmul.f32 %v6565_v34, %v13077_v45  ;;  %v6603_v60 = vadd.f32 0.001143296, %v6602_v0  ;;  %v6591_v52 = vmul.f32 2.1237322e-06, %v13108_v3  ;;  %v13141_v38 = vmin.f32 %v6669_v17, 16.0 }
 0x706   : > { %v6527_v33 = vadd.f32 0.112945676, %v6526_v35  ;;  %v6516_v26 = vadd.f32 0.05243302, %v6515_v50  ;;  %v6484_v35 = vmul.f32 %v6483_v41, %v13106_v15  ;;  %v6555_v14 = vmul.f32 %v6554_v6, %v13077_v45 }
 0x707   : > { %v6567_v18 = vadd.f32 0.112945676, %v6566_v55  ;;  %v6592_v28 = vadd.f32 0.00028619796, %v6591_v52  ;;  %v13146_v49 = vmul.f32 0.70710677, %v13134_v51 }
 0x708   : > { %v6528_v32 = vmul.f32 %v6527_v33, %v13056_v16  ;;  %v6517_v2 = vmul.f32 %v6516_v26, %v13056_v16  ;;  %v6556_v55 = vadd.f32 0.05243302, %v6555_v14 }
 0x709   : > { %v6568_v1 = vmul.f32 %v6567_v18, %v13077_v45 }
 0x70a   : > { %v6529_v59 = vadd.f32 0.4994258, %v6528_v32  ;;  %v6604_v32 = vmul.f32 %v6603_v60, %v13108_v3  ;;  %v6518_v19 = vadd.f32 0.18741608, %v6517_v2  ;;  %v6682_v60 = vmul.f32 3.8918573e-05, %v13141_v38 }
 0x70b   : > { %v6569_v33 = vadd.f32 0.4994258, %v6568_v1 }
 0x70c   : > { %v6530_v43 = vmul.f32 %v6529_v59, %v13056_v16  ;;  %v6472_v59 = vadd.f32 0.00028619796, %v6471_v8  ;;  %v6605_v9 = vadd.f32 0.014752088, %v6604_v32  ;;  %v6519_v34 = vmul.f32 %v6518_v19, %v13056_v16 }
 0x70d   : > { %v6570_v58 = vmul.f32 %v6569_v33, %v13077_v45  ;;  %v6709_v33 = vmul.f32 %v13146_v49, %v13146_v49  ;;  %v6683_v29 = vadd.f32 0.001143296, %v6682_v60  ;;  %v13196_v60 = vmul.f32 0.5, %v13066_v48 }
 0x70e   : > { %v13075_v31 = vadd.f32 1.0, %v6530_v43  ;;  %v6485_v43 = vadd.f32 0.014752088, %v6484_v35  ;;  %v6606_v50 = vmul.f32 %v6605_v9, %v13108_v3  ;;  %v6473_v13 = vmul.f32 %v6472_v59, %v13106_v15  ;;  %v6300_v9 = vpop.f32.mrf.mxu3 }
 0x70f   : > { %v13138_v39 = vadd.f32 1.0, %v6570_v58  ;;  %v6520_v2 = vadd.f32 1.1283791, %v6519_v34  ;;  %v6557_v35 = vmul.f32 %v6556_v55, %v13077_v45  ;;  %v6671_v58 = vmul.f32 2.1237322e-06, %v13141_v38 }
 0x710   : > { %9189 = vrcp.f32 %v13075_v31  ;;  %v6486_v40 = vmul.f32 %v6485_v43, %v13106_v15  ;;  %v6607_v18 = vadd.f32 0.112945676, %v6606_v50  ;;  %v6543_v0 = vand.u32 2147483648, %v13075_v31 }
 0x711   : > { %9191 = vrcp.f32 %v13138_v39  ;;  %v6474_v8 = vadd.f32 0.0036580483, %v6473_v13  ;;  %vm6537_vm4 = vweird.f32 %v13075_v31  ;;  %v6541_v16 = vand.u32 2147483647, %v13075_v31 }
 0x712   : > { %v6487_v27 = vadd.f32 0.112945676, %v6486_v40  ;;  %v6608_v1 = vmul.f32 %v6607_v18, %v13108_v3  ;;  %v6544_v59 = vor.u32 1.1754944e-38, %v6543_v0  ;;  %v6684_v19 = vmul.f32 %v6683_v29, %v13141_v38 }
 0x713   : > { %v6475_v43 = vmul.f32 %v6474_v8, %v13106_v15  ;;  %vm6542_vm6 = vcmp.eq.f32.partialorder %v6541_v16, 8.507059e+37  ;;  %v13178_v13 = vmin.f32 %v6709_v33, 16.0  ;;  %v6672_v55 = vadd.f32 0.00028619796, %v6671_v58 }
 0x714   : > { %v6488_v26 = vmul.f32 %v6487_v27, %v13106_v15  ;;  %v6609_v32 = vadd.f32 0.4994258, %v6608_v1  ;;  %v13181_v27 = vadd.f32 %v6300_v9, %v13079_v12  ;;  %v6406_v18 = vmul.f32 0.5, %v13049_v21 }
 0x715   : > { %v6476_v34 = vadd.f32 0.05243302, %v6475_v43  ;;  %v6722_v16 = vmul.f32 3.8918573e-05, %v13178_v13  ;;  %v13208_v48 = vmul.f32 0.5, %v13112_v53  ;;  %v13215_v43 = vmul.f32 0.5, %v13134_v51 }
 0x716   : > { %v13104_v10 = vpop.eup %9189  ;;  %v6489_v41 = vadd.f32 0.4994258, %v6488_v26  ;;  %v6685_v26 = vadd.f32 0.014752088, %v6684_v19  ;;  %v13193_v1 = vmul.f32 0.70710677, %v13181_v27  ;;  %vm6577_vm7 = vweird.f32 %v13138_v39 }
 0x717   : > { %v6533_v46 = vmul.f32 %v13104_v10, %v13075_v31  ;;  %vm6538_vm3 = vweird.f32 %v13104_v10  ;;  %v13173_v14 = vpop.eup %9191  ;;  %v6477_v21 = vmul.f32 %v6476_v34, %v13106_v15  ;;  %v6581_v58 = vand.u32 2147483647, %v13138_v39 }
 0x718   : > { %vm13157_vm5 = vmor %vm6537_vm4, %vm6538_vm3  ;;  %v6583_v51 = vand.u32 2147483648, %v13138_v39  ;;  %vm6578_vm9 = vweird.f32 %v13173_v14 }
 0x719   : > { %v6534_v11 = vsub.f32 1.0, %v6533_v46  ;;  %v6593_v46 = vmul.f32 %v6592_v28, %v13108_v3  ;;  %v6521_v28 = vmul.f32 %v6520_v2, %v13052_v44  ;;  %v13199_v2 = vmul.f32 0.5, %v13085_v7  ;;  %vm13259_vm10 = vmor %vm6577_vm7, %vm6578_vm9 }
 0x71a   : > { %v6478_v9 = vadd.f32 0.18741608, %v6477_v21  ;;  %vm13235_vm8 = vcmp.eq.f32.partialorder %v6581_v58, 8.507059e+37 }
 0x71b   : > { %v6535_v5 = vmul.f32 %v13104_v10, %v6534_v11  ;;  %v6490_v11 = vmul.f32 %v6489_v41, %v13106_v15  ;;  %v6594_v52 = vadd.f32 0.0036580483, %v6593_v46  ;;  %v6573_v46 = vmul.f32 %v13173_v14, %v13138_v39 }
 0x71c   : > { %v6686_v41 = vmul.f32 %v6685_v26, %v13141_v38 }
 0x71d   : > { %v6536_v54 = vadd.f32 %v13104_v10, %v6535_v5  ;;  %v13170_v17 = vadd.f32 1.0, %v6490_v11  ;;  %v6558_v5 = vadd.f32 0.18741608, %v6557_v35  ;;  %v6595_v50 = vmul.f32 %v6594_v52, %v13108_v3 }
 0x71e   : > { %v6574_v35 = vsub.f32 1.0, %v6573_v46  ;;  %v13204_v11 = vmul.f32 0.5, %v13090_v36  ;;  %v6687_v33 = vadd.f32 0.112945676, %v6686_v41  ;;  %v6629_v36 = vmul.f32 %v13193_v1, %v13193_v1 }
 0x71f   : > { %v6540_v31 = vsel %vm13157_vm5, %v13104_v10, %v6536_v54  ;;  %v6610_v10 = vmul.f32 %v6609_v32, %v13108_v3  ;;  %9193 = vrcp.f32 %v13170_v17  ;;  %v6559_v44 = vmul.f32 %v6558_v5, %v13077_v45 }
 0x720   : > { %v6545_v40 = vsel %vm6542_vm6, %v6544_v59, %v6540_v31  ;;  %v6596_v8 = vadd.f32 0.05243302, %v6595_v50  ;;  %v6673_v45 = vmul.f32 %v6672_v55, %v13141_v38  ;;  %v6387_v31 = vpop.f32.mrf.mxu2  ;;  %v6723_v32 = vadd.f32 0.001143296, %v6722_v16 }
 0x721   : > { %v6546_v54 = vmul.f32 %v6545_v40, %v6521_v28  ;;  %v13188_v0 = vadd.f32 1.0, %v6610_v10  ;;  %v6560_v52 = vadd.f32 1.1283791, %v6559_v44  ;;  %v6688_v59 = vmul.f32 %v6687_v33, %v13141_v38 }
 0x722   : > { %v6597_v29 = vmul.f32 %v6596_v8, %v13108_v3  ;;  %v6674_v19 = vadd.f32 0.0036580483, %v6673_v45  ;;  %v13221_v53 = vadd.f32 %v6387_v31, %v13081_v22  ;;  %v6575_v5 = vmul.f32 %v13173_v14, %v6574_v35 }
 0x723   : > { %v8734_v6 = vclamps-f32 %v6546_v54, 1.0  ;;  %9195 = vrcp.f32 %v13188_v0  ;;  %v6689_v10 = vadd.f32 0.4994258, %v6688_v59  ;;  %v6724_v28 = vmul.f32 %v6723_v32, %v13178_v13 }
 0x724   : > { %v6561_v50 = vmul.f32 %v6560_v52, %v13069_v20  ;;  %v13229_v55 = vmin.f32 %v6629_v36, 16.0  ;;  %v6598_v26 = vadd.f32 0.18741608, %v6597_v29  ;;  %v6479_v20 = vmul.f32 %v6478_v9, %v13106_v15 }
 0x725   : > { %v13210_v7 = vpop.eup %9193  ;;  %v7750_v40 = vadd.f32 1.0, %v8734_v6  ;;  %v6690_v54 = vmul.f32 %v6689_v10, %v13141_v38  ;;  %v6725_v46 = vadd.f32 0.014752088, %v6724_v28  ;;  %v6675_v41 = vmul.f32 %v6674_v19, %v13141_v38 }
 0x726   : > { %v6493_v34 = vmul.f32 %v13210_v7, %v13170_v17  ;;  %v6642_v16 = vmul.f32 3.8918573e-05, %v13229_v55  ;;  %v6576_v21 = vadd.f32 %v13173_v14, %v6575_v5  ;;  %v6711_v45 = vmul.f32 2.1237322e-06, %v13178_v13 }
 0x727   : > { %v6726_v6 = vmul.f32 %v6725_v46, %v13178_v13  ;;  %v6584_v35 = vor.u32 1.1754944e-38, %v6583_v51  ;;  %v13246_v31 = vadd.f32 1.0, %v6690_v54  ;;  %v6631_v52 = vmul.f32 2.1237322e-06, %v13229_v55 }
 0x728   : > { %v6494_v33 = vsub.f32 1.0, %v6493_v34  ;;  %v6599_v15 = vmul.f32 %v6598_v26, %v13108_v3  ;;  %v13253_v29 = vmul.f32 0.5, %v13181_v27  ;;  %v6643_v59 = vadd.f32 0.001143296, %v6642_v16 }
 0x729   : > { %v13233_v44 = vpop.eup %9195  ;;  %v13255_v36 = vmul.f32 %v7750_v40, %v6406_v18  ;;  %v6480_v9 = vadd.f32 1.1283791, %v6479_v20  ;;  %v6676_v19 = vadd.f32 0.05243302, %v6675_v41  ;;  %v6727_v5 = vadd.f32 0.112945676, %v6726_v6 }
 0x72a   : > { %v6613_v32 = vmul.f32 %v13233_v44, %v13188_v0  ;;  %v6580_v3 = vsel %vm13259_vm10, %v13173_v14, %v6576_v21  ;;  %v6501_v10 = vand.u32 2147483647, %v13170_v17  ;;  %v6503_v27 = vand.u32 2147483648, %v13170_v17 }
 0x72b   : > { %v6712_v28 = vadd.f32 0.00028619796, %v6711_v45  ;;  %v6495_v18 = vmul.f32 %v13210_v7, %v6494_v33  ;;  %9197 = vrcp.f32 %v13246_v31  ;;  %v6728_v39 = vmul.f32 %v6727_v5, %v13178_v13 }
 0x72c   : > { %v6632_v40 = vadd.f32 0.00028619796, %v6631_v52  ;;  %v13271_v51 = vadd.f32 1.1283791, %v6599_v15  ;;  %v6614_v34 = vsub.f32 1.0, %v6613_v32  ;;  %v6644_v26 = vmul.f32 %v6643_v59, %v13229_v55  ;;  %v6332_v15 = vpop.f32.mrf.mxu0 }
 0x72d   : > { %v13275_v54 = vmul.f32 0.70710677, %v13221_v53  ;;  %v6481_v14 = vmul.f32 %v6480_v9, %v13093_v37  ;;  %vm6497_vm11 = vweird.f32 %v13170_v17  ;;  %v6677_v46 = vmul.f32 %v6676_v19, %v13141_v38 }
 0x72e   : > { %v6729_v20 = vadd.f32 0.4994258, %v6728_v39  ;;  %v6585_v41 = vsel %vm13235_vm8, %v6584_v35, %v6580_v3  ;;  %vm13282_vm12 = vcmp.eq.f32.partialorder %v6501_v10, 8.507059e+37  ;;  %v6713_v21 = vmul.f32 %v6712_v28, %v13178_v13 }
 0x72f   : > { %v6645_v45 = vadd.f32 0.014752088, %v6644_v26  ;;  %v6749_v6 = vmul.f32 %v13275_v54, %v13275_v54  ;;  %v6496_v37 = vadd.f32 %v13210_v7, %v6495_v18  ;;  %vm6498_vm13 = vweird.f32 %v13210_v7 }
 0x730   : > { %v6504_v33 = vor.u32 1.1754944e-38, %v6503_v27  ;;  %v6633_v52 = vmul.f32 %v6632_v40, %v13229_v55  ;;  %v6615_v8 = vmul.f32 %v13233_v44, %v6614_v34  ;;  %v6730_v35 = vmul.f32 %v6729_v20, %v13178_v13  ;;  %vm13303_vm15 = vmor %vm6497_vm11, %vm6498_vm13 }
 0x731   : > { %v6646_v32 = vmul.f32 %v6645_v45, %v13229_v55  ;;  %v13295_v59 = vmin.f32 %v6749_v6, 16.0  ;;  %v13297_v58 = vpop.eup %9197  ;;  %v6586_v9 = vmul.f32 %v6585_v41, %v6561_v50  ;;  %vm6617_vm14 = vweird.f32 %v13188_v0 }
 0x732   : > { %v6621_v19 = vand.u32 2147483647, %v13188_v0  ;;  %v6678_v5 = vadd.f32 0.18741608, %v6677_v46  ;;  %v6714_v10 = vadd.f32 0.0036580483, %v6713_v21  ;;  %v13310_v18 = vadd.f32 %v6332_v15, %v13046_v56  ;;  %v6361_v46 = vpop.f32.mrf.mxu1 }
 0x733   : > { %v13307_v27 = vadd.f32 1.0, %v6730_v35  ;;  %v6647_v28 = vadd.f32 0.112945676, %v6646_v32  ;;  %v6500_v50 = vsel %vm13303_vm15, %v13210_v7, %v6496_v37  ;;  %vm6618_vm0 = vweird.f32 %v13233_v44 }
 0x734   : > { %v6634_v39 = vadd.f32 0.0036580483, %v6633_v52  ;;  %v6762_v17 = vmul.f32 3.8918573e-05, %v13295_v59  ;;  %v6616_v40 = vadd.f32 %v13233_v44, %v6615_v8  ;;  %v6693_v34 = vmul.f32 %v13297_v58, %v13246_v31  ;;  %vm13339_vm2 = vmor %vm6617_vm14, %vm6618_vm0 }
 0x735   : > { %9199 = vrcp.f32 %v13307_v27  ;;  %v6751_v26 = vmul.f32 2.1237322e-06, %v13295_v59  ;;  %v8735_v20 = vclamps-f32 %v6586_v9, 1.0  ;;  %v6623_v41 = vand.u32 2147483648, %v13188_v0 }
 0x736   : > { %v6679_v7 = vmul.f32 %v6678_v5, %v13141_v38  ;;  %v6648_v21 = vmul.f32 %v6647_v28, %v13229_v55  ;;  %vm13325_vm1 = vcmp.eq.f32.partialorder %v6621_v19, 8.507059e+37  ;;  %v6715_v6 = vmul.f32 %v6714_v10, %v13178_v13 }
 0x737   : > { %v6763_v37 = vadd.f32 0.001143296, %v6762_v17  ;;  %v13331_v52 = vmul.f32 0.70710677, %v13310_v18  ;;  %v6505_v15 = vsel %vm13282_vm12, %v6504_v33, %v6500_v50  ;;  %v6635_v8 = vmul.f32 %v6634_v39, %v13229_v55 }
 0x738   : > { %v6649_v35 = vadd.f32 0.4994258, %v6648_v21  ;;  %v13345_v32 = vadd.f32 %v6361_v46, %v13062_v4  ;;  %v6620_v9 = vsel %vm13339_vm2, %v13233_v44, %v6616_v40  ;;  %v6694_v16 = vsub.f32 1.0, %v6693_v34 }
 0x739   : > { %v6752_v33 = vadd.f32 0.00028619796, %v6751_v26  ;;  %v6764_v19 = vmul.f32 %v6763_v37, %v13295_v59  ;;  %v7751_v5 = vadd.f32 1.0, %v8735_v20  ;;  %v6624_v0 = vor.u32 1.1754944e-38, %v6623_v41  ;;  %v6303_v20 = vpop.f32.mrf.mxu3 }
 0x73a   : > { %v6680_v3 = vadd.f32 1.1283791, %v6679_v7  ;;  %v6650_v10 = vmul.f32 %v6649_v35, %v13229_v55  ;;  %v6506_v50 = vmul.f32 %v6505_v15, %v6481_v14  ;;  %v6716_v39 = vadd.f32 0.05243302, %v6715_v6 }
 0x73b   : > { %v13352_v28 = vpop.eup %9199  ;;  %v6765_v17 = vadd.f32 0.014752088, %v6764_v19  ;;  %v6829_v46 = vmul.f32 %v13331_v52, %v13331_v52  ;;  %v6601_v44 = vmul.f32 %v13271_v51, %v13096_v47  ;;  %v6625_v40 = vsel %vm13325_vm1, %v6624_v0, %v6620_v9 }
 0x73c   : > { %v6636_v34 = vadd.f32 0.05243302, %v6635_v8  ;;  %v13361_v26 = vmul.f32 0.70710677, %v13345_v32  ;;  %v6695_v41 = vmul.f32 %v13297_v58, %v6694_v16  ;;  %v13364_v7 = vadd.f32 1.0, %v6650_v10  ;;  %v8966_v10 = vld [vmem:[%s15077_s28 + $0xb8] sm:$0xff] }
 0x73d   : > { %v6753_v14 = vmul.f32 %v6752_v33, %v13295_v59  ;;  %v6766_v21 = vmul.f32 %v6765_v17, %v13295_v59  ;;  %v13369_v6 = vmul.f32 %v7751_v5, %v13196_v60  ;;  %v6681_v47 = vmul.f32 %v6680_v3, %v13122_v61  ;;  %v8958_v3 = vld [vmem:[%s15077_s28 + $0x78] sm:$0xff]  ;;  %8147 = vmatpush.bf16.msra.mxu1 %v8966_v10 }
 0x73e   : > { %v6733_v51 = vmul.f32 %v13352_v28, %v13307_v27  ;;  %v13375_v45 = vmul.f32 0.5, %v13221_v53  ;;  %v8733_v37 = vclamps-f32 %v6506_v50, 1.0  ;;  %v6717_v15 = vmul.f32 %v6716_v39, %v13178_v13  ;;  %8118 = vmatpush.bf16.msra.mxu0 %v8958_v3 }
 0x73f   : > { %v13378_v38 = vmin.f32 %v6829_v46, 16.0  ;;  %v13381_v8 = vadd.f32 %v6303_v20, %v13079_v12  ;;  %v6626_v35 = vmul.f32 %v6625_v40, %v6601_v44  ;;  %9201 = vrcp.f32 %v13364_v7  ;;  %v6390_v46 = vpop.f32.mrf.mxu2 }
 0x740   : > { %v6767_v60 = vadd.f32 0.112945676, %v6766_v21  ;;  %v6869_v61 = vmul.f32 %v13361_v26, %v13361_v26  ;;  %v6696_v9 = vadd.f32 %v13297_v58, %v6695_v41  ;;  %vm6698_vm3 = vweird.f32 %v13297_v58 }
 0x741   : > { %v6637_v53 = vmul.f32 %v6636_v34, %v13229_v55  ;;  %v6754_v16 = vadd.f32 0.0036580483, %v6753_v14  ;;  %v6701_v33 = vand.u32 2147483647, %v13246_v31  ;;  %v6703_v19 = vand.u32 2147483648, %v13246_v31 }
 0x742   : > { %v6734_v5 = vsub.f32 1.0, %v6733_v51  ;;  %v6768_v0 = vmul.f32 %v6767_v60, %v13295_v59  ;;  %vm6697_vm4 = vweird.f32 %v13246_v31  ;;  %v6718_v50 = vadd.f32 0.18741608, %v6717_v15 }
 0x743   : > { %v6831_v39 = vmul.f32 2.1237322e-06, %v13378_v38  ;;  %v13401_v17 = vmul.f32 0.70710677, %v13381_v8  ;;  %v7749_v44 = vadd.f32 1.0, %v8733_v37  ;;  %v8736_v40 = vclamps-f32 %v6626_v35, 1.0  ;;  %vm13405_vm5 = vmor %vm6697_vm4, %vm6698_vm3 }
 0x744   : > { %v6769_v20 = vadd.f32 0.4994258, %v6768_v0  ;;  %v13409_v41 = vmin.f32 %v6869_v61, 16.0  ;;  %v6700_v31 = vsel %vm13405_vm5, %v13297_v58, %v6696_v9  ;;  %v6638_v14 = vadd.f32 0.18741608, %v6637_v53  ;;  %v8957_v61 = vld [vmem:[%s15077_s28 + $0x70] sm:$0xff] }
 0x745   : > { %v6755_v21 = vmul.f32 %v6754_v16, %v13295_v59  ;;  %v6789_v51 = vmul.f32 %v13401_v17, %v13401_v17  ;;  %v13417_v37 = vpop.eup %9201  ;;  %vm6702_vm6 = vcmp.eq.f32.partialorder %v6701_v33, 8.507059e+37  ;;  %v6704_v15 = vor.u32 1.1754944e-38, %v6703_v19  ;;  %v8965_v58 = vld [vmem:[%s15077_s28 + $0xb0] sm:$0xff]  ;;  %8119 = vmatpush.bf16.msra.mxu0 %v8957_v61 }
 0x746   : > { %v6735_v35 = vmul.f32 %v13352_v28, %v6734_v5  ;;  %v13421_v60 = vadd.f32 %v6390_v46, %v13081_v22  ;;  %v6719_v9 = vmul.f32 %v6718_v50, %v13178_v13  ;;  %v6770_v53 = vmul.f32 %v6769_v20, %v13295_v59  ;;  %8148 = vmatpush.bf16.msra.mxu1 %v8965_v58 }
 0x747   : > { %v6832_v16 = vadd.f32 0.00028619796, %v6831_v39  ;;  %v13431_v33 = vmin.f32 %v6789_v51, 16.0  ;;  %v13434_v19 = vmul.f32 %v7749_v44, %v13199_v2  ;;  %v7752_v5 = vadd.f32 1.0, %v8736_v40 }
 0x748   : > { %v6705_v0 = vsel %vm6702_vm6, %v6704_v15, %v6700_v31  ;;  %v6871_v3 = vmul.f32 2.1237322e-06, %v13409_v41  ;;  %v6639_v10 = vmul.f32 %v6638_v14, %v13229_v55  ;;  %v6653_v46 = vmul.f32 %v13417_v37, %v13364_v7  ;;  %v6334_v31 = vpop.f32.mrf.mxu0  ;;  %v8950_v14 = vld [vmem:[%s15077_s28 + $0x38] sm:$0xff] }
 0x749   : > { %v6756_v13 = vadd.f32 0.05243302, %v6755_v21  ;;  %v13440_v50 = vadd.f32 1.0, %v6770_v53  ;;  %v6736_v39 = vadd.f32 %v13352_v28, %v6735_v35  ;;  %vm6738_vm7 = vweird.f32 %v13352_v28  ;;  %v8974_v21 = vld [vmem:[%s15077_s28 + $0xf8] sm:$0xff]  ;;  %8089 = vmatpush.bf16.msrb.mxu3 %v8950_v14 }
 0x74a   : > { %v6791_v2 = vmul.f32 2.1237322e-06, %v13431_v33  ;;  %v13446_v44 = vmul.f32 0.70710677, %v13421_v60  ;;  %v6706_v40 = vmul.f32 %v6705_v0, %v6681_v47  ;;  %v6720_v34 = vadd.f32 1.1283791, %v6719_v9  ;;  %8176 = vmatpush.bf16.msrb.mxu2 %v8974_v21 }
 0x74b   : > { %v6743_v20 = vand.u32 2147483648, %v13307_v27  ;;  %v6833_v55 = vmul.f32 %v6832_v16, %v13378_v38  ;;  %vm6737_vm8 = vweird.f32 %v13307_v27  ;;  %v6741_v51 = vand.u32 2147483647, %v13307_v27 }
 0x74c   : > { %9203 = vrcp.f32 %v13440_v50  ;;  %v6872_v47 = vadd.f32 0.00028619796, %v6871_v3  ;;  %v13460_v15 = vmul.f32 %v7752_v5, %v13204_v11  ;;  %vm13464_vm9 = vmor %vm6737_vm8, %vm6738_vm7  ;;  %v6654_v61 = vsub.f32 1.0, %v6653_v46  ;;  %v6363_v5 = vpop.f32.mrf.mxu1 }
 0x74d   : > { %v6757_v58 = vmul.f32 %v6756_v13, %v13295_v59  ;;  %v6909_v9 = vmul.f32 %v13446_v44, %v13446_v44  ;;  %v6740_v27 = vsel %vm13464_vm9, %v13352_v28, %v6736_v39  ;;  %v6640_v11 = vadd.f32 1.1283791, %v6639_v10 }
 0x74e   : > { %v6792_v53 = vadd.f32 0.00028619796, %v6791_v2  ;;  %v13475_v16 = vadd.f32 %v6334_v31, %v13046_v56  ;;  %v8738_v0 = vclamps-f32 %v6706_v40, 1.0  ;;  %v6744_v3 = vor.u32 1.1754944e-38, %v6743_v20 }
 0x74f   : > { %v6834_v46 = vadd.f32 0.0036580483, %v6833_v55  ;;  %v13477_v42 = vmin.f32 %v6909_v9, 16.0  ;;  %v6721_v13 = vmul.f32 %v6720_v34, %v13146_v49  ;;  %vm6742_vm10 = vcmp.eq.f32.partialorder %v6741_v51, 8.507059e+37  ;;  %v6305_v55 = vpop.f32.mrf.mxu3 }
 0x750   : > { %v13481_v14 = vmul.f32 0.5, %v13310_v18  ;;  %v6873_v21 = vmul.f32 %v6872_v47, %v13409_v41  ;;  %v6745_v28 = vsel %vm6742_vm10, %v6744_v3, %v6740_v27  ;;  %v6655_v10 = vmul.f32 %v13417_v37, %v6654_v61 }
 0x751   : > { %15082 = vst [vmem:[#allocation36_spill] sm:$0xff] %v13477_v42  ;;  %v6758_v39 = vadd.f32 0.18741608, %v6757_v58  ;;  %v13486_v2 = vadd.f32 %v6363_v5, %v13062_v4  ;;  %v13491_v20 = vmul.f32 %v6640_v11, %v13193_v1  ;;  %v13494_v49 = vmul.f32 0.5, %v13345_v32 }
 0x752   : > { %15083 = vst [vmem:[#allocation28_spill] sm:$0xff] %v13481_v14  ;;  %v13488_v40 = vpop.eup %9203  ;;  %v6793_v18 = vmul.f32 %v6792_v53, %v13431_v33  ;;  %v13498_v34 = vmul.f32 0.70710677, %v13475_v16  ;;  %v7754_v31 = vadd.f32 1.0, %v8738_v0  ;;  %v6661_v51 = vand.u32 2147483647, %v13364_v7 }
 0x753   : > { %15084 = vst [vmem:[#allocation22_spill] sm:$0xff] %v13494_v49  ;;  %v6835_v47 = vmul.f32 %v6834_v46, %v13378_v38  ;;  %v6911_v35 = vmul.f32 2.1237322e-06, %v13477_v42  ;;  %v6746_v61 = vmul.f32 %v6745_v28, %v6721_v13  ;;  %vm6658_vm11 = vweird.f32 %v13417_v37 }
 0x754   : > { %v6874_v1 = vadd.f32 0.0036580483, %v6873_v21  ;;  %v13505_v32 = vmul.f32 0.70710677, %v13486_v2  ;;  %v6656_v58 = vadd.f32 %v13417_v37, %v6655_v10  ;;  %v6759_v9 = vmul.f32 %v6758_v39, %v13295_v59  ;;  %v6392_v21 = vpop.f32.mrf.mxu2  ;;  %v8949_v10 = vld [vmem:[%s15077_s28 + $0x30] sm:$0xff] }
 0x755   : > { %v6773_v27 = vmul.f32 %v13488_v40, %v13440_v50  ;;  %v13512_v11 = vadd.f32 %v6305_v55, %v13079_v12  ;;  %v6663_v53 = vand.u32 2147483648, %v13364_v7  ;;  %v13516_v5 = vmul.f32 0.5, %v13381_v8  ;;  %8090 = vmatpush.bf16.msrb.mxu3 %v8949_v10  ;;  %v6366_v10 = vpop.f32.mrf.mxu1 }
 0x756   : > { %v6794_v0 = vadd.f32 0.0036580483, %v6793_v18  ;;  %v6989_v3 = vmul.f32 %v13498_v34, %v13498_v34  ;;  %v13521_v46 = vmul.f32 %v7754_v31, %v13208_v48  ;;  %vm6657_vm12 = vweird.f32 %v13364_v7  ;;  %v8956_v7 = vld [vmem:[%s15077_s28 + $0x68] sm:$0xff] }
 0x757   : > { %15085 = vst [vmem:[#allocation29_spill] sm:$0xff] %v13516_v5  ;;  %v6836_v59 = vadd.f32 0.05243302, %v6835_v47  ;;  %v6912_v13 = vadd.f32 0.00028619796, %v6911_v35  ;;  %v8739_v28 = vclamps-f32 %v6746_v61, 1.0  ;;  %vm13526_vm13 = vmor %vm6657_vm12, %vm6658_vm11  ;;  %v6875_v39 = vmul.f32 %v6874_v1, %v13409_v41  ;;  %8120 = vmatpush.bf16.msra.mxu0 %v8956_v7 }
 0x758   : > { %vm13530_vm14 = vcmp.eq.f32.partialorder %v6661_v51, 8.507059e+37  ;;  %v7029_v48 = vmul.f32 %v13505_v32, %v13505_v32  ;;  %v8964_v18 = vld [vmem:[%s15077_s28 + $0xa8] sm:$0xff]  ;;  %v6660_v55 = vsel %vm13526_vm13, %v13417_v37, %v6656_v58  ;;  %v6760_v31 = vadd.f32 1.1283791, %v6759_v9  ;;  %v8973_v37 = vld [vmem:[%s15077_s28 + $0xf0] sm:$0xff]  ;;  %v8955_v58 = vld [vmem:[%s15077_s28 + $0x60] sm:$0xff] }
 0x759   : > { %v6774_v51 = vsub.f32 1.0, %v6773_v27  ;;  %v13547_v47 = vmul.f32 0.70710677, %v13512_v11  ;;  %v6664_v35 = vor.u32 1.1754944e-38, %v6663_v53  ;;  %v6795_v61 = vmul.f32 %v6794_v0, %v13431_v33  ;;  %8149 = vmatpush.bf16.msra.mxu1 %v8964_v18  ;;  %v6337_v0 = vpop.f32.mrf.mxu0  ;;  %8177 = vmatpush.bf16.msrb.mxu2 %v8973_v37 }
 0x75a   : > { %v13550_v1 = vmin.f32 %v6989_v3, 16.0  ;;  %v13553_v30 = vadd.f32 %v6392_v21, %v13081_v22  ;;  %v6837_v9 = vmul.f32 %v6836_v59, %v13378_v38  ;;  %v13565_v27 = vmul.f32 0.5, %v13421_v60  ;;  %v8963_v60 = vld [vmem:[%s15077_s28 + $0xa0] sm:$0xff] }
 0x75b   : > { %v6913_v53 = vmul.f32 %v6912_v13, %v13477_v42  ;;  %v7755_v3 = vadd.f32 1.0, %v8739_v28  ;;  %v6665_v21 = vsel %vm13530_vm14, %v6664_v35, %v6660_v55  ;;  %v6876_v7 = vadd.f32 0.05243302, %v6875_v39  ;;  %8121 = vmatpush.bf16.msra.mxu0 %v8955_v58 }
 0x75c   : > { %15090 = vst [vmem:[#allocation25_spill] sm:$0xff] %v13565_v27  ;;  %v13570_v18 = vmin.f32 %v7029_v48, 16.0  ;;  %v13579_v59 = vmul.f32 %v6760_v31, %v13275_v54  ;;  %v6775_v13 = vmul.f32 %v13488_v40, %v6774_v51  ;;  %v6949_v28 = vmul.f32 %v13547_v47, %v13547_v47 }
 0x75d   : > { %v13585_v8 = vmul.f32 0.70710677, %v13553_v30  ;;  %vm6777_vm15 = vweird.f32 %v13440_v50  ;;  %v6796_v39 = vadd.f32 0.05243302, %v6795_v61  ;;  %v6991_v48 = vmul.f32 2.1237322e-06, %v13550_v1  ;;  %8150 = vmatpush.bf16.msra.mxu1 %v8963_v60 }
 0x75e   : > { %v13590_v55 = vadd.f32 %v6337_v0, %v13046_v56  ;;  %v6666_v54 = vmul.f32 %v6665_v21, %v13491_v20  ;;  %v6781_v31 = vand.u32 2147483647, %v13440_v50  ;;  %v6914_v51 = vadd.f32 0.0036580483, %v6913_v53 }
 0x75f   : > { %v7069_v35 = vmul.f32 %v13585_v8, %v13585_v8  ;;  %vm6778_vm0 = vweird.f32 %v13488_v40  ;;  %v6783_v61 = vand.u32 2147483648, %v13440_v50  ;;  %v6877_v37 = vmul.f32 %v6876_v7, %v13409_v41 }
 0x760   : > { %v7031_v0 = vmul.f32 2.1237322e-06, %v13570_v18  ;;  %v6776_v58 = vadd.f32 %v13488_v40, %v6775_v13  ;;  %v13601_v60 = vmin.f32 %v6949_v28, 16.0  ;;  %v13606_v53 = vmul.f32 0.70710677, %v13590_v55  ;;  %vm13622_vm1 = vmor %vm6777_vm15, %vm6778_vm0 }
 0x761   : > { %v13603_v20 = vmin.f32 %v7069_v35, 16.0  ;;  %v13609_v21 = vmul.f32 %v7755_v3, %v13215_v43  ;;  %v6797_v25 = vmul.f32 %v6796_v39, %v13431_v33  ;;  %v6992_v24 = vadd.f32 0.00028619796, %v6991_v48  ;;  %v6308_v35 = vpop.f32.mrf.mxu3 }
 0x762   : > { %v13613_v62 = vadd.f32 %v6366_v10, %v13062_v4  ;;  %v8737_v7 = vclamps-f32 %v6666_v54, 1.0  ;;  %v6838_v23 = vadd.f32 0.18741608, %v6837_v9  ;;  %v6915_v13 = vmul.f32 %v6914_v51, %v13477_v42 }
 0x763   : > { %v7149_v28 = vmul.f32 %v13606_v53, %v13606_v53  ;;  %vm13626_vm2 = vcmp.eq.f32.partialorder %v6781_v31, 8.507059e+37  ;;  %v6784_v39 = vor.u32 1.1754944e-38, %v6783_v61  ;;  %v6878_v9 = vadd.f32 0.18741608, %v6877_v37  ;;  %v6395_v37 = vpop.f32.mrf.mxu2 }
 0x764   : > { %15091 = vst [vmem:[#allocation18_spill] sm:$0xff] %v13613_v62  ;;  %v7032_v48 = vadd.f32 0.00028619796, %v7031_v0  ;;  %v6780_v54 = vsel %vm13622_vm1, %v13488_v40, %v6776_v58  ;;  %v6951_v51 = vmul.f32 2.1237322e-06, %v13601_v60  ;;  %v6993_v57 = vmul.f32 %v6992_v24, %v13550_v1  ;;  %v8972_v24 = vld [vmem:[%s15077_s28 + $0xe8] sm:$0xff] }
 0x765   : > { %v7071_v10 = vmul.f32 2.1237322e-06, %v13603_v20  ;;  %v13635_v50 = vmin.f32 %v7149_v28, 16.0  ;;  %v6798_v63 = vadd.f32 0.18741608, %v6797_v25  ;;  %v13642_v61 = vadd.f32 %v6308_v35, %v13079_v12  ;;  %v8948_v25 = vld [vmem:[%s15077_s28 + $0x28] sm:$0xff]  ;;  %8178 = vmatpush.bf16.msrb.mxu2 %v8972_v24 }
 0x766   : > { %v13639_v31 = vmul.f32 0.70710677, %v13613_v62  ;;  %v7753_v0 = vadd.f32 1.0, %v8737_v7  ;;  %v6839_v43 = vmul.f32 %v6838_v23, %v13378_v38  ;;  %v6916_v40 = vadd.f32 0.05243302, %v6915_v13  ;;  %8091 = vmatpush.bf16.msrb.mxu3 %v8948_v25 }
 0x767   : > { %v13646_v58 = vmul.f32 0.5, %v13475_v16  ;;  %v6785_v28 = vsel %vm13626_vm2, %v6784_v39, %v6780_v54  ;;  %v7033_v35 = vmul.f32 %v7032_v48, %v13570_v18  ;;  %v7151_v7 = vmul.f32 2.1237322e-06, %v13635_v50 }
 0x768   : > { %15096 = vst [vmem:[#allocation16_spill] sm:$0xff] %v13639_v31  ;;  %v7189_v23 = vmul.f32 %v13639_v31, %v13639_v31  ;;  %v6879_v16 = vmul.f32 %v6878_v9, %v13409_v41  ;;  %v6952_v13 = vadd.f32 0.00028619796, %v6951_v51  ;;  %v7072_v62 = vadd.f32 0.00028619796, %v7071_v10  ;;  %v8954_v9 = vld [vmem:[%s15077_s28 + $0x58] sm:$0xff] }
 0x769   : > { %15097 = vst [vmem:[#allocation35_spill] sm:$0xff] %v13646_v58  ;;  %v13662_v27 = vadd.f32 %v6395_v37, %v13081_v22  ;;  %v6799_v39 = vmul.f32 %v6798_v63, %v13431_v33  ;;  %v6994_v48 = vadd.f32 0.0036580483, %v6993_v57  ;;  %v13668_v54 = vmul.f32 0.70710677, %v13642_v61  ;;  %v8962_v51 = vld [vmem:[%s15077_s28 + $0x98] sm:$0xff]  ;;  %8122 = vmatpush.bf16.msra.mxu0 %v8954_v9  ;;  %v6339_v9 = vpop.f32.mrf.mxu0 }
 0x76a   : > { %v6786_v10 = vmul.f32 %v6785_v28, %v13579_v59  ;;  %v6840_v37 = vadd.f32 1.1283791, %v6839_v43  ;;  %v6917_v25 = vmul.f32 %v6916_v40, %v13477_v42  ;;  %v13679_v24 = vmul.f32 0.5, %v13486_v2  ;;  %v8947_v57 = vld [vmem:[%s15077_s28 + $0x20] sm:$0xff]  ;;  %8151 = vmatpush.bf16.msra.mxu1 %v8962_v51 }
 0x76b   : > { %v8971_v63 = vld [vmem:[%s15077_s28 + $0xe0] sm:$0xff]  ;;  %v7034_v3 = vadd.f32 0.0036580483, %v7033_v35  ;;  %v7152_v31 = vadd.f32 0.00028619796, %v7151_v7  ;;  %v13687_v5 = vmin.f32 %v7189_v23, 16.0  ;;  %v7109_v59 = vmul.f32 %v13668_v54, %v13668_v54  ;;  %8092 = vmatpush.bf16.msrb.mxu3 %v8947_v57 }
 0x76c   : > { %15098 = vst [vmem:[#allocation33_spill] sm:$0xff] %v13679_v24  ;;  %v6880_v43 = vadd.f32 1.1283791, %v6879_v16  ;;  %v6953_v2 = vmul.f32 %v6952_v13, %v13601_v60  ;;  %v7073_v40 = vmul.f32 %v7072_v62, %v13603_v20  ;;  %v13694_v28 = vmul.f32 0.70710677, %v13662_v27  ;;  %8179 = vmatpush.bf16.msrb.mxu2 %v8971_v63  ;;  %v8953_v16 = vld [vmem:[%s15077_s28 + $0x50] sm:$0xff] }
 0x76d   : > { %v13697_v35 = vmul.f32 %v7753_v0, %v13253_v29  ;;  %v13699_v7 = vadd.f32 1.1283791, %v6799_v39  ;;  %v6995_v23 = vmul.f32 %v6994_v48, %v13550_v1  ;;  %v13702_v24 = vmin.f32 %v7109_v59, 16.0  ;;  %v8961_v62 = vld [vmem:[%s15077_s28 + $0x90] sm:$0xff]  ;;  %v8946_v39 = vld [vmem:[%s15077_s28 + $0x18] sm:$0xff]  ;;  %8123 = vmatpush.bf16.msra.mxu0 %v8953_v16 }
 0x76e   : > { %v8740_v13 = vclamps-f32 %v6786_v10, 1.0  ;;  %v6918_v51 = vadd.f32 0.18741608, %v6917_v25  ;;  %v13711_v29 = vmul.f32 0.5, %v13512_v11  ;;  %v7229_v0 = vmul.f32 %v13694_v28, %v13694_v28  ;;  %v8970_v48 = vld [vmem:[%s15077_s28 + $0xd8] sm:$0xff]  ;;  %8152 = vmatpush.bf16.msra.mxu1 %v8961_v62 }
 0x76f   : > { %v7035_v57 = vmul.f32 %v7034_v3, %v13570_v18  ;;  %v7153_v63 = vmul.f32 %v7152_v31, %v13635_v50  ;;  %v7191_v10 = vmul.f32 2.1237322e-06, %v13687_v5  ;;  %v7122_v11 = vmul.f32 3.8918573e-05, %v13702_v24  ;;  %8093 = vmatpush.bf16.msrb.mxu3 %v8946_v39 }
 0x770   : > { %15099 = vst [vmem:[#allocation24_spill] sm:$0xff] %v13711_v29  ;;  %v6954_v25 = vadd.f32 0.0036580483, %v6953_v2  ;;  %v7074_v59 = vadd.f32 0.0036580483, %v7073_v40  ;;  %v13725_v29 = vmin.f32 %v7229_v0, 16.0  ;;  %v13728_v49 = vadd.f32 %v6339_v9, %v13046_v56  ;;  %8180 = vmatpush.bf16.msrb.mxu2 %v8970_v48 }
 0x771   : > { %v13731_v58 = vmul.f32 %v6840_v37, %v13331_v52  ;;  %v6996_v3 = vadd.f32 0.05243302, %v6995_v23  ;;  %v7111_v31 = vmul.f32 2.1237322e-06, %v13702_v24  ;;  %v7123_v14 = vadd.f32 0.001143296, %v7122_v11 }
 0x772   : > { %v7756_v62 = vadd.f32 1.0, %v8740_v13  ;;  %v13737_v2 = vmul.f32 0.5, %v13553_v30  ;;  %v7242_v40 = vmul.f32 3.8918573e-05, %v13725_v29  ;;  %v8952_v9 = vld [vmem:[%s15077_s28 + $0x48] sm:$0xff]  ;;  %v6919_v37 = vmul.f32 %v6918_v51, %v13477_v42  ;;  %v8945_v30 = vld [vmem:[%s15077_s28 + $0x10] sm:$0xff]  ;;  %v6368_v42 = vpop.f32.mrf.mxu1 }
 0x773   : > { %v8960_v52 = vld [vmem:[%s15077_s28 + $0x88] sm:$0xff]  ;;  %v7154_v23 = vadd.f32 0.0036580483, %v7153_v63  ;;  %v7192_v0 = vadd.f32 0.00028619796, %v7191_v10  ;;  %v7124_v39 = vmul.f32 %v7123_v14, %v13702_v24  ;;  %v8969_v13 = vld [vmem:[%s15077_s28 + $0xd0] sm:$0xff]  ;;  %v6955_v11 = vmul.f32 %v6954_v25, %v13601_v60  ;;  %8124 = vmatpush.bf16.msra.mxu0 %v8952_v9  ;;  %8094 = vmatpush.bf16.msrb.mxu3 %v8945_v30 }
 0x774   : > { %15100 = vst [vmem:[#allocation27_spill] sm:$0xff] %v13737_v2  ;;  %v7036_v48 = vadd.f32 0.05243302, %v7035_v57  ;;  %v7075_v16 = vmul.f32 %v7074_v59, %v13603_v20  ;;  %v13757_v56 = vmul.f32 0.70710677, %v13728_v49  ;;  %8153 = vmatpush.bf16.msra.mxu1 %v8960_v52  ;;  %v6997_v14 = vmul.f32 %v6996_v3, %v13550_v1  ;;  %8181 = vmatpush.bf16.msrb.mxu2 %v8969_v13  ;;  %v8951_v3 = vld [vmem:[%s15077_s28 + $0x40] sm:$0xff]  ;;  %v6310_v13 = vpop.f32.mrf.mxu3 }
 0x775   : > { %v7112_v51 = vadd.f32 0.00028619796, %v7111_v31  ;;  %v7125_v63 = vadd.f32 0.014752088, %v7124_v39  ;;  %v7231_v10 = vmul.f32 2.1237322e-06, %v13725_v29  ;;  %v7788_v2 = vmul.f32 %v7756_v62, %v13375_v45 }
 0x776   : > { %v13763_v57 = vmul.f32 %v6880_v43, %v13361_v26  ;;  %v13766_v25 = vmul.f32 0.5, %v13590_v55  ;;  %v7243_v59 = vadd.f32 0.001143296, %v7242_v40  ;;  %v8959_v31 = vld [vmem:[%s15077_s28 + $0x80] sm:$0xff]  ;;  %v8944_v45 = vld [vmem:[%s15077_s28 + $0x8] sm:$0xff]  ;;  %v7155_v26 = vmul.f32 %v7154_v23, %v13635_v50 }
 0x777   : > { %v13777_v62 = vadd.f32 1.1283791, %v6919_v37  ;;  %v7193_v55 = vmul.f32 %v7192_v0, %v13687_v5  ;;  %v7126_v43 = vmul.f32 %v7125_v63, %v13702_v24  ;;  %v8968_v40 = vld [vmem:[%s15077_s28 + $0xc8] sm:$0xff]  ;;  %v6956_v9 = vadd.f32 0.05243302, %v6955_v11  ;;  %8125 = vmatpush.bf16.msra.mxu0 %v8951_v3  ;;  %8095 = vmatpush.bf16.msrb.mxu3 %v8944_v45  ;;  %v8943_v3 = vld [vmem:[%s15077_s28] sm:$0xff] }
 0x778   : > { %15101 = vst [vmem:[#allocation26_spill] sm:$0xff] %v13766_v25  ;;  %v7076_v52 = vadd.f32 0.05243302, %v7075_v16  ;;  %v7244_v39 = vmul.f32 %v7243_v59, %v13725_v29  ;;  %v7309_v30 = vmul.f32 %v13757_v56, %v13757_v56  ;;  %8154 = vmatpush.bf16.msra.mxu1 %v8959_v31  ;;  %v6998_v37 = vadd.f32 0.18741608, %v6997_v14  ;;  %8182 = vmatpush.bf16.msrb.mxu2 %v8968_v40  ;;  %v8967_v14 = vld [vmem:[%s15077_s28 + $0xc0] sm:$0xff] }
 0x779   : > { %v7113_v23 = vmul.f32 %v7112_v51, %v13702_v24  ;;  %v7127_v0 = vadd.f32 0.112945676, %v7126_v43  ;;  %v13790_v63 = vadd.f32 %v6368_v42, %v13062_v4  ;;  %v7816_v11 = vpack.c.bf16 %v7788_v2, %v13460_v15 }
 0x77a   : > { %v7037_v16 = vmul.f32 %v7036_v48, %v13570_v18  ;;  %v7232_v59 = vadd.f32 0.00028619796, %v7231_v10  ;;  %v7245_v25 = vadd.f32 0.014752088, %v7244_v39  ;;  %v7156_v51 = vadd.f32 0.05243302, %v7155_v26 }
 0x77b   : > { %15102 = vst [vmem:[#allocation42_spill] sm:$0xff] %v13790_v63  ;;  %v7194_v31 = vadd.f32 0.0036580483, %v7193_v55  ;;  %v7128_v42 = vmul.f32 %v7127_v0, %v13702_v24  ;;  %v13802_v45 = vadd.f32 %v6310_v13, %v13079_v12  ;;  %v15103_v15 = vpack.c.bf16 %v13521_v46, %v13255_v36  ;;  %8096 = vmatpush.bf16.msrb.mxu3 %v8943_v3 }
 0x77c   : > { %v6957_v2 = vmul.f32 %v6956_v9, %v13601_v60  ;;  %v7077_v48 = vmul.f32 %v7076_v52, %v13603_v20  ;;  %v7246_v10 = vmul.f32 %v7245_v25, %v13725_v29  ;;  %v13810_v43 = vmin.f32 %v7309_v30, 16.0  ;;  %8183 = vmatpush.bf16.msrb.mxu2 %v8967_v14  ;;  %v6397_v30 = vpop.f32.mrf.mxu2 }
 0x77d   : > { %8126 = vmatmul.bf16.vlgmr.msra.gmra.mxu0 %v15103_v15  ;;  %v15104_v26 = vpack.c.bf16 %v13609_v21, %v13369_v6  ;;  %v13817_v55 = vmul.f32 %v13699_v7, %v13401_v17  ;;  %v7114_v40 = vadd.f32 0.0036580483, %v7113_v23  ;;  %v7129_v39 = vadd.f32 0.4994258, %v7128_v42 }
 0x77e   : > { %v13820_v36 = vmul.f32 0.70710677, %v13790_v63  ;;  %v6999_v46 = vmul.f32 %v6998_v37, %v13550_v1  ;;  %v7038_v25 = vadd.f32 0.18741608, %v7037_v16  ;;  %v7233_v9 = vmul.f32 %v7232_v59, %v13725_v29 }
 0x77f   : > { %8155 = vmatmul.bf16.vlgmr.msra.gmra.mxu1 %v15104_v26  ;;  %v7247_v52 = vadd.f32 0.112945676, %v7246_v10  ;;  %v7157_v6 = vmul.f32 %v7156_v51, %v13635_v50  ;;  %v7195_v21 = vmul.f32 %v7194_v31, %v13687_v5  ;;  %v7130_v17 = vmul.f32 %v7129_v39, %v13702_v24  ;;  %8184 = vmatmul.bf16.vlgmr.msrb.gmra.mxu2 %v7816_v11 }
 0x780   : > { %15105 = vst [vmem:[#allocation38_spill] sm:$0xff] %v13820_v36  ;;  %v13828_v7 = vmul.f32 0.70710677, %v13802_v45  ;;  %v6958_v13 = vadd.f32 0.18741608, %v6957_v2  ;;  %v15106_v16 = vpack.c.bf16 %v13697_v35, %v13434_v19  ;;  %v7115_v59 = vmul.f32 %v7114_v40, %v13702_v24 }
 0x781   : > { %v7078_v23 = vadd.f32 0.18741608, %v7077_v48  ;;  %v7248_v0 = vmul.f32 %v7247_v52, %v13725_v29  ;;  %v7311_v37 = vmul.f32 2.1237322e-06, %v13810_v43  ;;  %v7349_v3 = vmul.f32 %v13820_v36, %v13820_v36 }
 0x782   : > { %8097 = vmatmul.bf16.vlgmr.msrb.gmra.mxu3 %v15106_v16  ;;  %v7269_v14 = vmul.f32 %v13828_v7, %v13828_v7  ;;  %v13841_v51 = vadd.f32 %v6397_v30, %v13081_v22  ;;  %v13844_v31 = vmul.f32 0.5, %v13642_v61  ;;  %v13846_v42 = vadd.f32 1.0, %v7130_v17 }
 0x783   : > { %v7234_v15 = vadd.f32 0.0036580483, %v7233_v9  ;;  %v7249_v19 = vadd.f32 0.4994258, %v7248_v0  ;;  %v13850_v35 = vmul.f32 %v13777_v62, %v13446_v44  ;;  %v7000_v11 = vadd.f32 1.1283791, %v6999_v46 }
 0x784   : > { %v7158_v2 = vadd.f32 0.18741608, %v7157_v6  ;;  %v7196_v48 = vadd.f32 0.05243302, %v7195_v21  ;;  %v7039_v10 = vmul.f32 %v7038_v25, %v13570_v18  ;;  %v13854_v26 = vmul.f32 0.5, %v13662_v27 }
 0x785   : > { %v7250_v40 = vmul.f32 %v7249_v19, %v13725_v29  ;;  %v7312_v61 = vadd.f32 0.00028619796, %v7311_v37  ;;  %v7116_v39 = vadd.f32 0.05243302, %v7115_v59  ;;  %v13857_v52 = vmin.f32 %v7349_v3, 16.0 }
 0x786   : > { %15107 = vst [vmem:[#allocation37_spill] sm:$0xff] %v13854_v26  ;;  %v13859_v9 = vmin.f32 %v7269_v14, 16.0  ;;  %v13862_v30 = vmul.f32 0.70710677, %v13841_v51  ;;  %v6959_v44 = vmul.f32 %v6958_v13, %v13601_v60  ;;  %v7079_v62 = vmul.f32 %v7078_v23, %v13603_v20 }
 0x787   : > { %9205 = vrcp.f32 %v13846_v42  ;;  %v7235_v27 = vmul.f32 %v7234_v15, %v13725_v29  ;;  %v7159_v46 = vmul.f32 %v7158_v2, %v13635_v50  ;;  %v7197_v25 = vmul.f32 %v7196_v48, %v13687_v5 }
 0x788   : > { %v7271_v6 = vmul.f32 2.1237322e-06, %v13859_v9  ;;  %v7282_v21 = vmul.f32 3.8918573e-05, %v13859_v9  ;;  %v7040_v17 = vadd.f32 1.1283791, %v7039_v10  ;;  %v7313_v37 = vmul.f32 %v7312_v61, %v13810_v43 }
 0x789   : > { %v13872_v0 = vadd.f32 1.0, %v7250_v40  ;;  %v7389_v13 = vmul.f32 %v13862_v30, %v13862_v30  ;;  %v7117_v23 = vmul.f32 %v7116_v39, %v13702_v24  ;;  %v7351_v16 = vmul.f32 2.1237322e-06, %v13857_v52 }
 0x78a   : > { %v7272_v59 = vadd.f32 0.00028619796, %v7271_v6  ;;  %v7283_v3 = vadd.f32 0.001143296, %v7282_v21  ;;  %v13880_v14 = vmul.f32 %v7000_v11, %v13498_v34  ;;  %v6960_v15 = vadd.f32 1.1283791, %v6959_v44 }
 0x78b   : > { %v7080_v19 = vadd.f32 1.1283791, %v7079_v62  ;;  %v7236_v2 = vadd.f32 0.05243302, %v7235_v27  ;;  %v7160_v48 = vadd.f32 1.1283791, %v7159_v46  ;;  %9207 = vrcp.f32 %v13872_v0 }
 0x78c   : > { %v7198_v10 = vadd.f32 0.18741608, %v7197_v25  ;;  %v7273_v40 = vmul.f32 %v7272_v59, %v13859_v9  ;;  %v7284_v61 = vmul.f32 %v7283_v3, %v13859_v9  ;;  %v7314_v39 = vadd.f32 0.0036580483, %v7313_v37 }
 0x78d   : > { %v13884_v22 = vpop.eup %9205  ;;  %v13887_v63 = vmin.f32 %v7389_v13, 16.0  ;;  %v6842_v6 = vmul.f32 3.8918573e-05, %v13378_v38  ;;  %v13891_v34 = vmul.f32 %v7040_v17, %v13505_v32  ;;  %v7118_v11 = vadd.f32 0.18741608, %v7117_v23 }
 0x78e   : > { %v7352_v44 = vadd.f32 0.00028619796, %v7351_v16  ;;  %v7285_v62 = vadd.f32 0.014752088, %v7284_v61  ;;  %v7237_v27 = vmul.f32 %v7236_v2, %v13725_v29  ;;  %v13897_v59 = vmul.f32 %v6960_v15, %v13547_v47 }
 0x78f   : > { %v7391_v46 = vmul.f32 2.1237322e-06, %v13887_v63  ;;  %v7402_v25 = vmul.f32 3.8918573e-05, %v13887_v63  ;;  %v6843_v21 = vadd.f32 0.001143296, %v6842_v6  ;;  %v7133_v37 = vmul.f32 %v13884_v22, %v13846_v42 }
 0x790   : > { %v13902_v13 = vmul.f32 0.5, %v13728_v49  ;;  %v7274_v32 = vadd.f32 0.0036580483, %v7273_v40  ;;  %v13905_v17 = vmul.f32 %v7080_v19, %v13585_v8  ;;  %v7199_v23 = vmul.f32 %v7198_v10, %v13687_v5 }
 0x791   : > { %v7315_v16 = vmul.f32 %v7314_v39, %v13810_v43  ;;  %v7286_v3 = vmul.f32 %v7285_v62, %v13859_v9  ;;  %v13911_v2 = vmul.f32 %v7160_v48, %v13606_v53  ;;  %v7392_v47 = vadd.f32 0.00028619796, %v7391_v46  ;;  %v13914_v6 = vpop.eup %9207 }
 0x792   : > { %15108 = vst [vmem:[#allocation39_spill] sm:$0xff] %v13902_v13  ;;  %v7403_v15 = vadd.f32 0.001143296, %v7402_v25  ;;  %v6844_v61 = vmul.f32 %v6843_v21, %v13378_v38  ;;  %v7119_v49 = vmul.f32 %v7118_v11, %v13702_v24  ;;  %v7238_v40 = vadd.f32 0.18741608, %v7237_v27 }
 0x793   : > { %v7353_v8 = vmul.f32 %v7352_v44, %v13857_v52  ;;  %v7287_v19 = vadd.f32 0.112945676, %v7286_v3  ;;  %v7134_v10 = vsub.f32 1.0, %v7133_v37  ;;  %v7275_v39 = vmul.f32 %v7274_v32, %v13859_v9 }
 0x794   : > { %v7404_v62 = vmul.f32 %v7403_v15, %v13887_v63  ;;  %v7002_v53 = vmul.f32 3.8918573e-05, %v13550_v1  ;;  %v13921_v48 = vadd.f32 1.1283791, %v7199_v23  ;;  %v7316_v46 = vadd.f32 0.05243302, %v7315_v16 }
 0x795   : > { %v13924_v25 = vmul.f32 0.5, %v13802_v45  ;;  %v7288_v21 = vmul.f32 %v7287_v19, %v13859_v9  ;;  %v7253_v24 = vmul.f32 %v13914_v6, %v13872_v0  ;;  %v7393_v11 = vmul.f32 %v7392_v47, %v13887_v63 }
 0x796   : > { %v7405_v44 = vadd.f32 0.014752088, %v7404_v62  ;;  %v6845_v27 = vadd.f32 0.014752088, %v6844_v61  ;;  %v7120_v37 = vadd.f32 1.1283791, %v7119_v49  ;;  %v7239_v32 = vmul.f32 %v7238_v40, %v13725_v29 }
 0x797   : > { %v7354_v3 = vadd.f32 0.0036580483, %v7353_v8  ;;  %v7289_v15 = vadd.f32 0.4994258, %v7288_v21  ;;  %v7135_v23 = vmul.f32 %v13884_v22, %v7134_v10  ;;  %v7276_v16 = vadd.f32 0.05243302, %v7275_v39 }
 0x798   : > { %v6846_v45 = vmul.f32 %v6845_v27, %v13378_v38  ;;  %v7003_v36 = vadd.f32 0.001143296, %v7002_v53  ;;  %v7141_v19 = vand.u32 2147483647, %v13846_v42  ;;  %v7143_v13 = vand.u32 2147483648, %v13846_v42 }
 0x799   : > { %v7290_v26 = vmul.f32 %v7289_v15, %v13859_v9  ;;  %v7406_v47 = vmul.f32 %v7405_v44, %v13887_v63  ;;  %v7254_v61 = vsub.f32 1.0, %v7253_v24  ;;  %v7317_v49 = vmul.f32 %v7316_v46, %v13810_v43 }
 0x79a   : > { %v7394_v29 = vadd.f32 0.0036580483, %v7393_v11  ;;  %v6847_v40 = vadd.f32 0.112945676, %v6846_v45  ;;  %vm7137_vm3 = vweird.f32 %v13846_v42  ;;  %v7355_v8 = vmul.f32 %v7354_v3, %v13857_v52 }
 0x79b   : > { %v13940_v10 = vadd.f32 1.0, %v7290_v26  ;;  %v7004_v39 = vmul.f32 %v7003_v36, %v13550_v1  ;;  %v7136_v62 = vadd.f32 %v13884_v22, %v7135_v23  ;;  %vm7138_vm4 = vweird.f32 %v13884_v22 }
 0x79c   : > { %v7277_v53 = vmul.f32 %v7276_v16, %v13859_v9  ;;  %v6848_v21 = vmul.f32 %v6847_v40, %v13378_v38  ;;  %vm13947_vm5 = vcmp.eq.f32.partialorder %v7141_v19, 8.507059e+37  ;;  %v7144_v24 = vor.u32 1.1754944e-38, %v7143_v13  ;;  %vm13957_vm6 = vmor %vm7137_vm3, %vm7138_vm4 }
 0x79d   : > { %v7240_v11 = vadd.f32 1.1283791, %v7239_v32  ;;  %v7407_v44 = vadd.f32 0.112945676, %v7406_v47  ;;  %v7255_v26 = vmul.f32 %v13914_v6, %v7254_v61  ;;  %v7318_v27 = vadd.f32 0.18741608, %v7317_v49 }
 0x79e   : > { %9209 = vrcp.f32 %v13940_v10  ;;  %v7395_v36 = vmul.f32 %v7394_v29, %v13887_v63  ;;  %v7121_v3 = vmul.f32 %v7120_v37, %v13668_v54  ;;  %v7261_v23 = vand.u32 2147483647, %v13872_v0 }
 0x79f   : > { %v6849_v13 = vadd.f32 0.4994258, %v6848_v21  ;;  %v7005_v32 = vadd.f32 0.014752088, %v7004_v39  ;;  %v7140_v16 = vsel %vm13957_vm6, %v13884_v22, %v7136_v62  ;;  %v7263_v45 = vand.u32 2147483648, %v13872_v0 }
 0x7a0   : > { %v7356_v19 = vadd.f32 0.05243302, %v7355_v8  ;;  %v7278_v47 = vadd.f32 0.18741608, %v7277_v53  ;;  %v7408_v54 = vmul.f32 %v7407_v44, %v13887_v63  ;;  %v6882_v61 = vmul.f32 3.8918573e-05, %v13409_v41 }
 0x7a1   : > { %v6850_v42 = vmul.f32 %v6849_v13, %v13378_v38  ;;  %v7006_v37 = vmul.f32 %v7005_v32, %v13550_v1  ;;  %v7256_v49 = vadd.f32 %v13914_v6, %v7255_v26  ;;  %vm7258_vm7 = vweird.f32 %v13914_v6 }
 0x7a2   : > { %v7319_v29 = vmul.f32 %v7318_v27, %v13810_v43  ;;  %v7396_v40 = vadd.f32 0.05243302, %v7395_v36  ;;  %v7145_v22 = vsel %vm13947_vm5, %v7144_v24, %v7140_v16  ;;  %v6883_v62 = vadd.f32 0.001143296, %v6882_v61 }
 0x7a3   : > { %v13975_v8 = vadd.f32 1.0, %v6850_v42  ;;  %v7007_v39 = vadd.f32 0.112945676, %v7006_v37  ;;  %vm7257_vm8 = vweird.f32 %v13872_v0  ;;  %v7357_v38 = vmul.f32 %v7356_v19, %v13857_v52 }
 0x7a4   : > { %v13977_v53 = vpop.eup %9209  ;;  %v7279_v21 = vmul.f32 %v7278_v47, %v13859_v9  ;;  %v7042_v44 = vmul.f32 3.8918573e-05, %v13570_v18  ;;  %vm13983_vm9 = vmor %vm7257_vm8, %vm7258_vm7  ;;  %vm13987_vm10 = vcmp.eq.f32.partialorder %v7261_v23, 8.507059e+37  ;;  %v7264_v24 = vor.u32 1.1754944e-38, %v7263_v45 }
 0x7a5   : > { %v7409_v27 = vadd.f32 0.4994258, %v7408_v54  ;;  %9211 = vrcp.f32 %v13975_v8  ;;  %v13992_v36 = vmul.f32 %v7145_v22, %v7121_v3  ;;  %v7260_v9 = vsel %vm13983_vm9, %v13914_v6, %v7256_v49 }
 0x7a6   : > { %v13997_v0 = vadd.f32 1.1283791, %v7319_v29  ;;  %v6802_v15 = vmul.f32 3.8918573e-05, %v13431_v33  ;;  %v7293_v23 = vmul.f32 %v13977_v53, %v13940_v10  ;;  %v7397_v13 = vmul.f32 %v7396_v40, %v13887_v63 }
 0x7a7   : > { %v7008_v32 = vmul.f32 %v7007_v39, %v13550_v1  ;;  %v6884_v16 = vmul.f32 %v6883_v62, %v13409_v41  ;;  %v14006_v3 = vmul.f32 %v7240_v11, %v13694_v28  ;;  %v14008_v45 = vadd.f32 0.18741608, %v7357_v38 }
 0x7a8   : > { %v7280_v19 = vadd.f32 1.1283791, %v7279_v21  ;;  %v7043_v6 = vadd.f32 0.001143296, %v7042_v44  ;;  %v7303_v47 = vand.u32 2147483648, %v13940_v10  ;;  %v7410_v54 = vmul.f32 %v7409_v27, %v13887_v63 }
 0x7a9   : > { %v7009_v42 = vadd.f32 0.4994258, %v7008_v32  ;;  %v6885_v37 = vadd.f32 0.014752088, %v6884_v16  ;;  %v14015_v49 = vsel %vm13987_vm10, %v7264_v24, %v7260_v9  ;;  %v6803_v28 = vadd.f32 0.001143296, %v6802_v15 }
 0x7aa   : > { %v7044_v29 = vmul.f32 %v7043_v6, %v13570_v18  ;;  %v7294_v40 = vsub.f32 1.0, %v7293_v23  ;;  %v7398_v22 = vadd.f32 0.18741608, %v7397_v13  ;;  %v14021_v38 = vmul.f32 %v7280_v19, %v13828_v7 }
 0x7ab   : > { %v9212_v11 = vpop.eup %9211  ;;  %v7010_v39 = vmul.f32 %v7009_v42, %v13550_v1  ;;  %v6886_v62 = vmul.f32 %v6885_v37, %v13409_v41  ;;  %v7301_v21 = vand.u32 2147483647, %v13940_v10  ;;  %vm7297_vm11 = vweird.f32 %v13940_v10 }
 0x7ac   : > { %v6853_v44 = vmul.f32 %v9212_v11, %v13975_v8  ;;  %v7045_v26 = vadd.f32 0.014752088, %v7044_v29  ;;  %v7304_v46 = vor.u32 1.1754944e-38, %v7303_v47  ;;  %v14026_v24 = vadd.f32 1.0, %v7410_v54 }
 0x7ad   : > { %v14028_v27 = vadd.f32 1.0, %v7010_v39  ;;  %v6887_v9 = vadd.f32 0.112945676, %v6886_v62  ;;  %v6863_v1 = vand.u32 2147483648, %v13975_v8  ;;  %v6804_v7 = vmul.f32 %v6803_v28, %v13431_v33 }
 0x7ae   : > { %v6854_v15 = vsub.f32 1.0, %v6853_v44  ;;  %v7046_v23 = vmul.f32 %v7045_v26, %v13570_v18  ;;  %v7295_v13 = vmul.f32 %v13977_v53, %v7294_v40  ;;  %v7399_v32 = vmul.f32 %v7398_v22, %v13887_v63 }
 0x7af   : > { %9213 = vrcp.f32 %v14028_v27  ;;  %v6962_v16 = vmul.f32 3.8918573e-05, %v13601_v60  ;;  %vm6858_vm12 = vweird.f32 %v9212_v11  ;;  %v6861_v6 = vand.u32 2147483647, %v13975_v8 }
 0x7b0   : > { %v6855_v19 = vmul.f32 %v9212_v11, %v6854_v15  ;;  %v6888_v47 = vmul.f32 %v6887_v9, %v13409_v41  ;;  %vm7298_vm13 = vweird.f32 %v13977_v53  ;;  %9215 = vrcp.f32 %v14026_v24 }
 0x7b1   : > { %v7047_v54 = vadd.f32 0.112945676, %v7046_v23  ;;  %v6805_v42 = vadd.f32 0.014752088, %v6804_v7  ;;  %vm14041_vm14 = vcmp.eq.f32.partialorder %v7301_v21, 8.507059e+37  ;;  %vm6857_vm15 = vweird.f32 %v13975_v8  ;;  %vm14057_vm2 = vmor %vm7297_vm11, %vm7298_vm13 }
 0x7b2   : > { %v6856_v63 = vadd.f32 %v9212_v11, %v6855_v19  ;;  %v6864_v29 = vor.u32 1.1754944e-38, %v6863_v1  ;;  %v6889_v28 = vadd.f32 0.4994258, %v6888_v47  ;;  %v7296_v40 = vadd.f32 %v13977_v53, %v7295_v13  ;;  %vm6859_vm0 = vmor %vm6857_vm15, %vm6858_vm12 }
 0x7b3   : > { %v7048_v22 = vmul.f32 %v7047_v54, %v13570_v18  ;;  %v6806_v39 = vmul.f32 %v6805_v42, %v13431_v33  ;;  %v6963_v62 = vadd.f32 0.001143296, %v6962_v16  ;;  %v14049_v44 = vadd.f32 1.1283791, %v7399_v32 }
 0x7b4   : > { %v6860_v26 = vsel %vm6859_vm0, %v9212_v11, %v6856_v63  ;;  %vm6862_vm1 = vcmp.eq.f32.partialorder %v6861_v6, 8.507059e+37  ;;  %v6890_v21 = vmul.f32 %v6889_v28, %v13409_v41  ;;  %v7423_v13 = vand.u32 2147483648, %v14026_v24  ;;  %v15121_v28 = vld [vmem:[#allocation36_spill] sm:$0xff] }
 0x7b5   : > { %v9214_v9 = vpop.eup %9213  ;;  %v6865_v8 = vsel %vm6862_vm1, %v6864_v29, %v6860_v26  ;;  %v7049_v1 = vadd.f32 0.4994258, %v7048_v22  ;;  %v6807_v23 = vadd.f32 0.112945676, %v6806_v39  ;;  %v7300_v19 = vsel %vm14057_vm2, %v13977_v53, %v7296_v40 }
 0x7b6   : > { %v6866_v11 = vmul.f32 %v6865_v8, %v13731_v58  ;;  %v7013_v41 = vmul.f32 %v9214_v9, %v14028_v27  ;;  %v14064_v32 = vadd.f32 1.0, %v6890_v21  ;;  %v14066_v16 = vpop.eup %9215  ;;  %v6964_v47 = vmul.f32 %v6963_v62, %v13601_v60 }
 0x7b7   : > { %v7050_v10 = vmul.f32 %v7049_v1, %v13570_v18  ;;  %v6808_v6 = vmul.f32 %v6807_v23, %v13431_v33  ;;  %v7021_v42 = vand.u32 2147483647, %v14028_v27  ;;  %v7023_v58 = vand.u32 2147483648, %v14028_v27 }
 0x7b8   : > { %v7014_v54 = vsub.f32 1.0, %v7013_v41  ;;  %9217 = vrcp.f32 %v14064_v32  ;;  %v8742_v63 = vclamps-f32 %v6866_v11, 1.0  ;;  %vm7018_vm3 = vweird.f32 %v9214_v9 }
 0x7b9   : > { %v14077_v29 = vadd.f32 1.0, %v7050_v10  ;;  %v6922_v22 = vmul.f32 3.8918573e-05, %v15121_v28  ;;  %v6903_v18 = vand.u32 2147483648, %v14064_v32  ;;  %v6809_v40 = vadd.f32 0.4994258, %v6808_v6 }
 0x7ba   : > { %v7015_v53 = vmul.f32 %v9214_v9, %v7014_v54  ;;  %v6965_v39 = vadd.f32 0.014752088, %v6964_v47  ;;  %v14083_v62 = vsel %vm14041_vm14, %v7304_v46, %v7300_v19  ;;  %v14087_v26 = vmul.f32 %v14066_v16, %v14026_v24 }
 0x7bb   : > { %v6901_v21 = vand.u32 2147483647, %v14064_v32  ;;  %9219 = vrcp.f32 %v14077_v29  ;;  %vm7017_vm4 = vweird.f32 %v14028_v27  ;;  %vm7022_vm5 = vcmp.eq.f32.partialorder %v7021_v42, 8.507059e+37 }
 0x7bc   : > { %v7016_v8 = vadd.f32 %v9214_v9, %v7015_v53  ;;  %v7024_v1 = vor.u32 1.1754944e-38, %v7023_v58  ;;  %vm7019_vm6 = vmor %vm7017_vm4, %vm7018_vm3  ;;  %v7758_v23 = vadd.f32 1.0, %v8742_v63  ;;  %v6810_v37 = vmul.f32 %v6809_v40, %v13431_v33  ;;  %v15124_v53 = vld [vmem:[#allocation28_spill] sm:$0xff] }
 0x7bd   : > { %v6966_v46 = vmul.f32 %v6965_v39, %v13601_v60  ;;  %v6923_v7 = vadd.f32 0.001143296, %v6922_v22  ;;  %vm6897_vm7 = vweird.f32 %v14064_v32  ;;  %v6904_v19 = vor.u32 1.1754944e-38, %v6903_v18 }
 0x7be   : > { %v9218_v11 = vpop.eup %9217  ;;  %v7020_v41 = vsel %vm7019_vm6, %v9214_v9, %v7016_v8  ;;  %v7082_v10 = vmul.f32 3.8918573e-05, %v13603_v20  ;;  %vm14098_vm8 = vcmp.eq.f32.partialorder %v6901_v21, 8.507059e+37  ;;  %v7061_v54 = vand.u32 2147483647, %v14077_v29 }
 0x7bf   : > { %v7025_v6 = vsel %vm7022_vm5, %v7024_v1, %v7020_v41  ;;  %v6893_v27 = vmul.f32 %v9218_v11, %v14064_v32  ;;  %v7162_v33 = vmul.f32 3.8918573e-05, %v13635_v50  ;;  %v14105_v58 = vadd.f32 1.0, %v6810_v37 }
 0x7c0   : > { %v7026_v42 = vmul.f32 %v7025_v6, %v13880_v14  ;;  %v6967_v9 = vadd.f32 0.112945676, %v6966_v46  ;;  %v6924_v63 = vmul.f32 %v6923_v7, %v15121_v28  ;;  %v7790_v18 = vmul.f32 %v7758_v23, %v15124_v53  ;;  %v15127_v53 = vld [vmem:[#allocation35_spill] sm:$0xff] }
 0x7c1   : > { %v9220_v22 = vpop.eup %9219  ;;  %v6894_v40 = vsub.f32 1.0, %v6893_v27  ;;  %v7063_v39 = vand.u32 2147483648, %v14077_v29  ;;  %v7083_v21 = vadd.f32 0.001143296, %v7082_v10  ;;  %vm7057_vm9 = vweird.f32 %v14077_v29 }
 0x7c2   : > { %v8746_v8 = vclamps-f32 %v7026_v42, 1.0  ;;  %v7053_v1 = vmul.f32 %v9220_v22, %v14077_v29  ;;  %9221 = vrcp.f32 %v14105_v58  ;;  %vm6898_vm10 = vweird.f32 %v9218_v11 }
 0x7c3   : > { %v6895_v14 = vmul.f32 %v9218_v11, %v6894_v40  ;;  %vm14113_vm11 = vcmp.eq.f32.partialorder %v7061_v54, 8.507059e+37  ;;  %v7163_v46 = vadd.f32 0.001143296, %v7162_v33  ;;  %v6968_v41 = vmul.f32 %v6967_v9, %v13601_v60  ;;  %vm6899_vm13 = vmor %vm6897_vm7, %vm6898_vm10 }
 0x7c4   : > { %v7762_v7 = vadd.f32 1.0, %v8746_v8  ;;  %v7054_v23 = vsub.f32 1.0, %v7053_v1  ;;  %v6925_v6 = vadd.f32 0.014752088, %v6924_v63  ;;  %vm7058_vm12 = vweird.f32 %v9220_v22 }
 0x7c5   : > { %v6896_v10 = vadd.f32 %v9218_v11, %v6895_v14  ;;  %v7064_v27 = vor.u32 1.1754944e-38, %v7063_v39  ;;  %v7084_v42 = vmul.f32 %v7083_v21, %v13603_v20  ;;  %v6969_v40 = vadd.f32 0.4994258, %v6968_v41  ;;  %vm7059_vm14 = vmor %vm7057_vm9, %vm7058_vm12 }
 0x7c6   : > { %v7794_v61 = vmul.f32 %v7762_v7, %v15127_v53  ;;  %v7055_v54 = vmul.f32 %v9220_v22, %v7054_v23  ;;  %v6926_v15 = vmul.f32 %v6925_v6, %v15121_v28  ;;  %v6821_v8 = vand.u32 2147483647, %v14105_v58 }
 0x7c7   : > { %v6900_v33 = vsel %vm6899_vm13, %v9218_v11, %v6896_v10  ;;  %v7085_v1 = vadd.f32 0.014752088, %v7084_v42  ;;  %v7164_v9 = vmul.f32 %v7163_v46, %v13635_v50  ;;  %v6970_v7 = vmul.f32 %v6969_v40, %v13601_v60 }
 0x7c8   : > { %v9222_v63 = vpop.eup %9221  ;;  %v7818_v14 = vpack.c.bf16 %v7794_v61, %v7790_v18  ;;  %v6905_v39 = vsel %vm14098_vm8, %v6904_v19, %v6900_v33  ;;  %v7056_v21 = vadd.f32 %v9220_v22, %v7055_v54  ;;  %v6823_v23 = vand.u32 2147483648, %v14105_v58 }
 0x7c9   : > { %v6906_v32 = vmul.f32 %v6905_v39, %v13763_v57  ;;  %v6813_v11 = vmul.f32 %v9222_v63, %v14105_v58  ;;  %v6927_v41 = vadd.f32 0.112945676, %v6926_v15  ;;  %v14134_v61 = vadd.f32 1.0, %v6970_v7 }
 0x7ca   : > { %8131 = vmatmul.bf16.gmra.mxu0 %v7818_v14  ;;  %v7060_v46 = vsel %vm7059_vm14, %v9220_v22, %v7056_v21  ;;  %v7086_v19 = vmul.f32 %v7085_v1, %v13603_v20  ;;  %v7165_v47 = vadd.f32 0.014752088, %v7164_v9  ;;  %v7414_v6 = vsub.f32 1.0, %v14087_v26  ;;  %v15128_v1 = vld [vmem:[#allocation22_spill] sm:$0xff] }
 0x7cb   : > { %v8743_v18 = vclamps-f32 %v6906_v32, 1.0  ;;  %v7065_v60 = vsel %vm14113_vm11, %v7064_v27, %v7060_v46  ;;  %v6814_v57 = vsub.f32 1.0, %v6813_v11  ;;  %v6928_v29 = vmul.f32 %v6927_v41, %v15121_v28  ;;  %v15129_v41 = vld [vmem:[#allocation33_spill] sm:$0xff] }
 0x7cc   : > { %v7066_v10 = vmul.f32 %v7065_v60, %v13891_v34  ;;  %9223 = vrcp.f32 %v14134_v61  ;;  %v7322_v15 = vmul.f32 3.8918573e-05, %v13810_v43  ;;  %vm6818_vm15 = vweird.f32 %v9222_v63 }
 0x7cd   : > { %v7759_v22 = vadd.f32 1.0, %v8743_v18  ;;  %v6815_v42 = vmul.f32 %v9222_v63, %v6814_v57  ;;  %v6929_v53 = vadd.f32 0.4994258, %v6928_v29  ;;  %vm6817_vm0 = vweird.f32 %v14105_v58 }
 0x7ce   : > { %v8747_v54 = vclamps-f32 %v7066_v10, 1.0  ;;  %v7087_v37 = vadd.f32 0.112945676, %v7086_v19  ;;  %v7166_v27 = vmul.f32 %v7165_v47, %v13635_v50  ;;  %vm6822_vm1 = vcmp.eq.f32.partialorder %v6821_v8, 8.507059e+37  ;;  %vm6819_vm2 = vmor %vm6817_vm0, %vm6818_vm15 }
 0x7cf   : > { %v6816_v40 = vadd.f32 %v9222_v63, %v6815_v42  ;;  %v6824_v33 = vor.u32 1.1754944e-38, %v6823_v23  ;;  %v6930_v26 = vmul.f32 %v6929_v53, %v15121_v28  ;;  %v7791_v9 = vmul.f32 %v7759_v22, %v15128_v1 }
 0x7d0   : > { %v7763_v34 = vadd.f32 1.0, %v8747_v54  ;;  %v7088_v14 = vmul.f32 %v7087_v37, %v13603_v20  ;;  %v7167_v39 = vadd.f32 0.112945676, %v7166_v27  ;;  %v7323_v32 = vadd.f32 0.001143296, %v7322_v15 }
 0x7d1   : > { %v6820_v21 = vsel %vm6819_vm2, %v9222_v63, %v6816_v40  ;;  %v14149_v7 = vadd.f32 1.0, %v6930_v26  ;;  %v7202_v58 = vmul.f32 3.8918573e-05, %v13687_v5  ;;  %vm7417_vm3 = vweird.f32 %v14026_v24 }
 0x7d2   : > { %v9224_v11 = vpop.eup %9223  ;;  %v7795_v46 = vmul.f32 %v7763_v34, %v15129_v41  ;;  %v6825_v8 = vsel %vm6822_vm1, %v6824_v33, %v6820_v21  ;;  %v7089_v23 = vadd.f32 0.4994258, %v7088_v14  ;;  %v7168_v28 = vmul.f32 %v7167_v39, %v13635_v50 }
 0x7d3   : > { %vm7418_vm4 = vweird.f32 %v14066_v16  ;;  %v14158_v19 = vor.u32 1.1754944e-38, %v7423_v13  ;;  %v6973_v63 = vmul.f32 %v9224_v11, %v14134_v61  ;;  %9225 = vrcp.f32 %v14149_v7 }
 0x7d4   : > { %v14164_v47 = vmul.f32 %v14083_v62, %v14021_v38  ;;  %v7415_v18 = vmul.f32 %v14066_v16, %v7414_v6  ;;  %v7819_v60 = vpack.c.bf16 %v7795_v46, %v7791_v9  ;;  %v6826_v57 = vmul.f32 %v6825_v8, %v13817_v55  ;;  %vm14191_vm9 = vmor %vm7417_vm3, %vm7418_vm4 }
 0x7d5   : > { %v6974_v29 = vsub.f32 1.0, %v6973_v63  ;;  %v6981_v10 = vand.u32 2147483647, %v14134_v61  ;;  %v7090_v15 = vmul.f32 %v7089_v23, %v13603_v20  ;;  %v7169_v13 = vadd.f32 0.4994258, %v7168_v28 }
 0x7d6   : > { %8160 = vmatmul.bf16.gmra.mxu1 %v7819_v60  ;;  %v6983_v22 = vand.u32 2147483648, %v14134_v61  ;;  %v7324_v42 = vmul.f32 %v7323_v32, %v13810_v43  ;;  %v7203_v53 = vadd.f32 0.001143296, %v7202_v58  ;;  %v7362_v38 = vmul.f32 3.8918573e-05, %v13857_v52 }
 0x7d7   : > { %v6975_v62 = vmul.f32 %v9224_v11, %v6974_v29  ;;  %vm6978_vm5 = vweird.f32 %v9224_v11  ;;  %v14173_v6 = vadd.f32 1.0, %v7090_v15  ;;  %v7170_v55 = vmul.f32 %v7169_v13, %v13635_v50 }
 0x7d8   : > { %v14177_v54 = vadd.f32 %v14066_v16, %v7415_v18  ;;  %v8741_v37 = vclamps-f32 %v6826_v57, 1.0  ;;  %v7325_v20 = vadd.f32 0.014752088, %v7324_v42  ;;  %v7204_v27 = vmul.f32 %v7203_v53, %v13687_v5 }
 0x7d9   : > { %v9226_v40 = vpop.eup %9225  ;;  %v6976_v33 = vadd.f32 %v9224_v11, %v6975_v62  ;;  %vm6977_vm6 = vweird.f32 %v14134_v61  ;;  %vm6982_vm7 = vcmp.eq.f32.partialorder %v6981_v10, 8.507059e+37  ;;  %9227 = vrcp.f32 %v14173_v6  ;;  %v15137_v10 = vld [vmem:[#allocation29_spill] sm:$0xff] }
 0x7da   : > { %vm6979_vm8 = vmor %vm6977_vm6, %vm6978_vm5  ;;  %v6984_v26 = vor.u32 1.1754944e-38, %v6983_v22  ;;  %v6933_v34 = vmul.f32 %v9226_v40, %v14149_v7  ;;  %v6941_v50 = vand.u32 2147483647, %v14149_v7  ;;  %v7363_v1 = vadd.f32 0.001143296, %v7362_v38 }
 0x7db   : > { %v6980_v9 = vsel %vm6979_vm8, %v9224_v11, %v6976_v33  ;;  %v14184_v14 = vadd.f32 1.0, %v7170_v55  ;;  %v7326_v39 = vmul.f32 %v7325_v20, %v13810_v43  ;;  %v7205_v21 = vadd.f32 0.014752088, %v7204_v27  ;;  %v15138_v27 = vld [vmem:[#allocation24_spill] sm:$0xff] }
 0x7dc   : > { %v6985_v32 = vsel %vm6982_vm7, %v6984_v26, %v6980_v9  ;;  %v7757_v58 = vadd.f32 1.0, %v8741_v37  ;;  %v6934_v41 = vsub.f32 1.0, %v6933_v34  ;;  %v6943_v46 = vand.u32 2147483648, %v14149_v7 }
 0x7dd   : > { %v8753_v11 = vclamps-f32 %v14164_v47, 1.0  ;;  %v7420_v8 = vsel %vm14191_vm9, %v14066_v16, %v14177_v54  ;;  %v6986_v23 = vmul.f32 %v6985_v32, %v13897_v59  ;;  %9229 = vrcp.f32 %v14184_v14 }
 0x7de   : > { %v6935_v28 = vmul.f32 %v9226_v40, %v6934_v41  ;;  %vm6938_vm10 = vweird.f32 %v9226_v40  ;;  %v7327_v63 = vadd.f32 0.112945676, %v7326_v39  ;;  %v7206_v18 = vmul.f32 %v7205_v21, %v13687_v5 }
 0x7df   : > { %v9228_v60 = vpop.eup %9227  ;;  %v8745_v57 = vclamps-f32 %v6986_v23, 1.0  ;;  %vm6937_vm11 = vweird.f32 %v14149_v7  ;;  %vm14205_vm12 = vcmp.eq.f32.partialorder %v6941_v50, 8.507059e+37  ;;  %v7364_v29 = vmul.f32 %v7363_v1, %v13857_v52 }
 0x7e0   : > { %v15134_v16 = vand.u32 2147483647, %v14026_v24  ;;  %v7789_v15 = vmul.f32 %v7757_v58, %v15137_v10  ;;  %v6936_v13 = vadd.f32 %v9226_v40, %v6935_v28  ;;  %v6944_v22 = vor.u32 1.1754944e-38, %v6943_v46  ;;  %vm6939_vm14 = vmor %vm6937_vm11, %vm6938_vm10 }
 0x7e1   : > { %v7093_v42 = vmul.f32 %v9228_v60, %v14173_v6  ;;  %v7761_v53 = vadd.f32 1.0, %v8745_v57  ;;  %v7328_v7 = vmul.f32 %v7327_v63, %v13810_v43  ;;  %v7207_v38 = vadd.f32 0.112945676, %v7206_v18 }
 0x7e2   : > { %vm14212_vm13 = vcmp.eq.f32.partialorder %v15134_v16, 8.507059e+37  ;;  %v7365_v62 = vadd.f32 0.014752088, %v7364_v29  ;;  %v6940_v55 = vsel %vm6939_vm14, %v9226_v40, %v6936_v13  ;;  %v7101_v24 = vand.u32 2147483647, %v14173_v6 }
 0x7e3   : > { %v7094_v54 = vsub.f32 1.0, %v7093_v42  ;;  %v7103_v37 = vand.u32 2147483648, %v14173_v6  ;;  %v9230_v20 = vpop.eup %9229  ;;  %v7793_v33 = vmul.f32 %v7761_v53, %v15138_v27  ;;  %v6945_v26 = vsel %vm14205_vm12, %v6944_v22, %v6940_v55  ;;  %v15142_v42 = vld [vmem:[#allocation16_spill] sm:$0xff] }
 0x7e4   : > { %v7329_v34 = vadd.f32 0.4994258, %v7328_v7  ;;  %v7208_v50 = vmul.f32 %v7207_v38, %v13687_v5  ;;  %v6946_v1 = vmul.f32 %v6945_v26, %v13850_v35  ;;  %vm7098_vm15 = vweird.f32 %v9228_v60 }
 0x7e5   : > { %v7095_v9 = vmul.f32 %v9228_v60, %v7094_v54  ;;  %v7173_v40 = vmul.f32 %v9230_v20, %v14184_v14  ;;  %v7817_v39 = vpack.c.bf16 %v7793_v33, %v7789_v15  ;;  %v7366_v32 = vmul.f32 %v7365_v62, %v13857_v52  ;;  %v6342_v33 = vpop.f32.mrf.mxu0 }
 0x7e6   : > { %v7330_v21 = vmul.f32 %v7329_v34, %v13810_v43  ;;  %v7209_v61 = vadd.f32 0.4994258, %v7208_v50  ;;  %vm7097_vm0 = vweird.f32 %v14173_v6  ;;  %vm7102_vm1 = vcmp.eq.f32.partialorder %v7101_v24, 8.507059e+37  ;;  %v15143_v24 = vld [vmem:[#allocation25_spill] sm:$0xff] }
 0x7e7   : > { %v7096_v58 = vadd.f32 %v9228_v60, %v7095_v9  ;;  %v7174_v41 = vsub.f32 1.0, %v7173_v40  ;;  %8102 = vmatmul.bf16.gmra.mxu3 %v7817_v39  ;;  %vm7099_vm2 = vmor %vm7097_vm0, %vm7098_vm15  ;;  %v7104_v46 = vor.u32 1.1754944e-38, %v7103_v37  ;;  %v7367_v28 = vadd.f32 0.112945676, %v7366_v32  ;;  %v6313_v9 = vpop.f32.mrf.mxu3 }
 0x7e8   : > { %v14230_v23 = vadd.f32 1.0, %v7330_v21  ;;  %v7210_v35 = vmul.f32 %v7209_v61, %v13687_v5  ;;  %v8744_v63 = vclamps-f32 %v6946_v1, 1.0  ;;  %vm7178_vm3 = vweird.f32 %v9230_v20 }
 0x7e9   : > { %v7100_v18 = vsel %vm7099_vm2, %v9228_v60, %v7096_v58  ;;  %v7175_v57 = vmul.f32 %v9230_v20, %v7174_v41  ;;  %v7425_v43 = vsel %vm14212_vm13, %v14158_v19, %v7420_v8  ;;  %v7183_v6 = vand.u32 2147483648, %v14184_v14 }
 0x7ea   : > { %v7105_v47 = vsel %vm7102_vm1, %v7104_v46, %v7100_v18  ;;  %9231 = vrcp.f32 %v14230_v23  ;;  %vm7177_vm4 = vweird.f32 %v14184_v14  ;;  %v7181_v5 = vand.u32 2147483647, %v14184_v14 }
 0x7eb   : > { %v7106_v29 = vmul.f32 %v7105_v47, %v13905_v17  ;;  %v7176_v16 = vadd.f32 %v9230_v20, %v7175_v57  ;;  %v7769_v10 = vadd.f32 1.0, %v8753_v11  ;;  %v7401_v60 = vmul.f32 %v14049_v44, %v13862_v30  ;;  %vm14243_vm5 = vmor %vm7177_vm4, %vm7178_vm3 }
 0x7ec   : > { %v14247_v19 = vadd.f32 1.0, %v7210_v35  ;;  %v7368_v8 = vmul.f32 %v7367_v28, %v13857_v52  ;;  %v7266_v17 = vmul.f32 %v14015_v49, %v14006_v3  ;;  %v7760_v13 = vadd.f32 1.0, %v8744_v63 }
 0x7ed   : > { %v8748_v59 = vclamps-f32 %v7106_v29, 1.0  ;;  %v7180_v14 = vsel %vm14243_vm5, %v9230_v20, %v7176_v16  ;;  %v15141_v11 = vclamps-f32 %v13992_v36, 1.0  ;;  %v7426_v30 = vmul.f32 %v7425_v43, %v7401_v60  ;;  %v15144_v20 = vld [vmem:[#allocation27_spill] sm:$0xff]  ;;  %v15146_v16 = vld [vmem:[#allocation37_spill] sm:$0xff] }
 0x7ee   : > { %v7184_v44 = vor.u32 1.1754944e-38, %v7183_v6  ;;  %9233 = vrcp.f32 %v14247_v19  ;;  %v14259_v53 = vmul.f32 %v13921_v48, %v15142_v42  ;;  %vm7182_vm6 = vcmp.eq.f32.partialorder %v7181_v5, 8.507059e+37 }
 0x7ef   : > { %v7765_v22 = vadd.f32 1.0, %v15141_v11  ;;  %v7764_v7 = vadd.f32 1.0, %v8748_v59  ;;  %v7369_v38 = vadd.f32 0.4994258, %v7368_v8  ;;  %v7321_v49 = vmul.f32 %v13997_v0, %v13757_v56 }
 0x7f0   : > { %v9232_v3 = vpop.eup %9231  ;;  %v7801_v62 = vmul.f32 %v7769_v10, %v13924_v25  ;;  %v6428_v36 = vmul.f32 0.5, %v13841_v51  ;;  %v7185_v55 = vsel %vm7182_vm6, %v7184_v44, %v7180_v14  ;;  %v8752_v54 = vclamps-f32 %v7266_v17, 1.0 }
 0x7f1   : > { %v7792_v37 = vmul.f32 %v7760_v13, %v15143_v24  ;;  %v7796_v27 = vmul.f32 %v7764_v7, %v15144_v20  ;;  %v7333_v48 = vmul.f32 %v9232_v3, %v14230_v23  ;;  %v7797_v26 = vmul.f32 %v7765_v22, %v13844_v31  ;;  %v15145_v31 = vld [vmem:[#allocation19_spill] sm:$0xff] }
 0x7f2   : > { %v7359_v34 = vmul.f32 %v14008_v45, %v13857_v52  ;;  %v8756_v50 = vclamps-f32 %v7426_v30, 1.0  ;;  %v7370_v56 = vmul.f32 %v7369_v38, %v13857_v52  ;;  %v7186_v51 = vmul.f32 %v7185_v55, %v13911_v2  ;;  %v6371_v2 = vpop.f32.mrf.mxu1 }
 0x7f3   : > { %v7820_v25 = vpack.c.bf16 %v7796_v27, %v7792_v37  ;;  %v7334_v0 = vsub.f32 1.0, %v7333_v48  ;;  %v7341_v1 = vand.u32 2147483647, %v14230_v23  ;;  %v7343_v39 = vand.u32 2147483648, %v14230_v23  ;;  %v15148_v48 = vld [vmem:[#allocation39_spill] sm:$0xff] }
 0x7f4   : > { %v9234_v40 = vpop.eup %9233  ;;  %v14275_v21 = vadd.f32 1.0, %v7370_v56  ;;  %v7821_v61 = vpack.c.bf16 %v7801_v62, %v7797_v26  ;;  %v14278_v32 = vadd.f32 %v6342_v33, %v15145_v31  ;;  %v7768_v45 = vadd.f32 1.0, %v8752_v54 }
 0x7f5   : > { %8189 = vmatmul.bf16.gmra.mxu2 %v7820_v25  ;;  %v7335_v58 = vmul.f32 %v9232_v3, %v7334_v0  ;;  %vm7338_vm7 = vweird.f32 %v9232_v3  ;;  %v7213_v52 = vmul.f32 %v9234_v40, %v14247_v19  ;;  %v7772_v41 = vadd.f32 1.0, %v8756_v50  ;;  %v15149_v0 = vld [vmem:[#allocation38_spill] sm:$0xff] }
 0x7f6   : > { %vm7337_vm8 = vweird.f32 %v14230_v23  ;;  %9235 = vrcp.f32 %v14275_v21  ;;  %v14284_v46 = vadd.f32 %v6313_v9, %v13079_v12  ;;  %v8750_v35 = vclamps-f32 %v7186_v51, 1.0 }
 0x7f7   : > { %v7336_v28 = vadd.f32 %v9232_v3, %v7335_v58  ;;  %vm7342_vm9 = vcmp.eq.f32.partialorder %v7341_v1, 8.507059e+37  ;;  %v7214_v63 = vsub.f32 1.0, %v7213_v52  ;;  %vm7339_vm10 = vmor %vm7337_vm8, %vm7338_vm7  ;;  %v7344_v18 = vor.u32 1.1754944e-38, %v7343_v39  ;;  %8107 = vmatmul.bf16.gmra.mxu3 %v7821_v61 }
 0x7f8   : > { %v7223_v57 = vand.u32 2147483648, %v14247_v19  ;;  %v14288_v43 = vmul.f32 0.70710677, %v14278_v32  ;;  %v14291_v47 = vadd.f32 %v6371_v2, %v13062_v4  ;;  %vm7218_vm11 = vweird.f32 %v9234_v40 }
 0x7f9   : > { %v7340_v23 = vsel %vm7339_vm10, %v9232_v3, %v7336_v28  ;;  %v7215_v6 = vmul.f32 %v9234_v40, %v7214_v63  ;;  %v7221_v29 = vand.u32 2147483647, %v14247_v19  ;;  %v7800_v5 = vmul.f32 %v7768_v45, %v15146_v16 }
 0x7fa   : > { %v7804_v10 = vmul.f32 %v7772_v41, %v6428_v36  ;;  %v7345_v60 = vsel %vm7342_vm9, %v7344_v18, %v7340_v23  ;;  %v14296_v15 = vmul.f32 0.70710677, %v14284_v46  ;;  %v7766_v17 = vadd.f32 1.0, %v8750_v35  ;;  %v15147_v36 = vld [vmem:[#allocation26_spill] sm:$0xff] }
 0x7fb   : > { %v7346_v8 = vmul.f32 %v7345_v60, %v7321_v49  ;;  %v7216_v59 = vadd.f32 %v9234_v40, %v7215_v6  ;;  %vm7217_vm12 = vweird.f32 %v14247_v19  ;;  %v7224_v14 = vor.u32 1.1754944e-38, %v7223_v57  ;;  %v15150_v57 = vld [vmem:[#allocation18_spill] sm:$0xff] }
 0x7fc   : > { %v9236_v13 = vpop.eup %9235  ;;  %vm7219_vm13 = vmor %vm7217_vm12, %vm7218_vm11  ;;  %v7469_v11 = vmul.f32 %v14288_v43, %v14288_v43  ;;  %v14302_v22 = vmul.f32 0.70710677, %v14291_v47  ;;  %v7429_v30 = vmul.f32 %v14296_v15, %v14296_v15  ;;  %vm7222_vm14 = vcmp.eq.f32.partialorder %v7221_v29, 8.507059e+37  ;;  %v15151_v6 = vld [vmem:[#allocation42_spill] sm:$0xff] }
 0x7fd   : > { %v8754_v44 = vclamps-f32 %v7346_v8, 1.0  ;;  %v7220_v42 = vsel %vm7219_vm13, %v9234_v40, %v7216_v59  ;;  %v7373_v7 = vmul.f32 %v9236_v13, %v14275_v21  ;;  %v7360_v38 = vadd.f32 1.1283791, %v7359_v34 }
 0x7fe   : > { %v7225_v3 = vsel %vm7222_vm14, %v7224_v14, %v7220_v42  ;;  %v7824_v19 = vpack.c.bf16 %v7804_v10, %v7800_v5  ;;  %v14307_v49 = vmin.f32 %v7429_v30, 16.0  ;;  %v7798_v55 = vmul.f32 %v7766_v17, %v15147_v36  ;;  %v6400_v17 = vpop.f32.mrf.mxu2 }
 0x7ff   : > { %v7770_v62 = vadd.f32 1.0, %v8754_v44  ;;  %v7374_v54 = vsub.f32 1.0, %v7373_v7  ;;  %v7381_v24 = vand.u32 2147483647, %v14275_v21  ;;  %vm7378_vm15 = vweird.f32 %v9236_v13 }
 0x800   : > { %v7383_v37 = vand.u32 2147483648, %v14275_v21  ;;  %v14312_v20 = vmin.f32 %v7469_v11, 16.0  ;;  %v7509_v27 = vmul.f32 %v14302_v22, %v14302_v22  ;;  %v7226_v26 = vmul.f32 %v7225_v3, %v14259_v53  ;;  %v15152_v11 = vld [vmem:[#allocation32_spill] sm:$0xff] }
 0x801   : > { %v7802_v33 = vmul.f32 %v7770_v62, %v15148_v48  ;;  %v7375_v34 = vmul.f32 %v9236_v13, %v7374_v54  ;;  %v7442_v50 = vmul.f32 3.8918573e-05, %v14307_v49  ;;  %vm7377_vm0 = vweird.f32 %v14275_v21  ;;  %v6344_v48 = vpop.f32.mrf.mxu0 }
 0x802   : > { %v7361_v1 = vmul.f32 %v7360_v38, %v15149_v0  ;;  %vm7379_vm1 = vmor %vm7377_vm0, %vm7378_vm15  ;;  %v7384_v9 = vor.u32 1.1754944e-38, %v7383_v37  ;;  %v7471_v40 = vmul.f32 2.1237322e-06, %v14312_v20  ;;  %v14322_v39 = vmin.f32 %v7509_v27, 16.0 }
 0x803   : > { %v7822_v56 = vpack.c.bf16 %v7802_v33, %v7798_v55  ;;  %v7376_v25 = vadd.f32 %v9236_v13, %v7375_v34  ;;  %v7443_v51 = vadd.f32 0.001143296, %v7442_v50  ;;  %v8751_v61 = vclamps-f32 %v7226_v26, 1.0  ;;  %v6373_v33 = vpop.f32.mrf.mxu1 }
 0x804   : > { %vm7382_vm2 = vcmp.eq.f32.partialorder %v7381_v24, 8.507059e+37  ;;  %v7472_v21 = vadd.f32 0.00028619796, %v7471_v40  ;;  %v7511_v41 = vmul.f32 2.1237322e-06, %v14322_v39  ;;  %v6423_v23 = vmul.f32 0.5, %v15150_v57 }
 0x805   : > { %8136 = vmatmul.bf16.gmra.mxu0 %v7822_v56  ;;  %v7380_v45 = vsel %vm7379_vm1, %v9236_v13, %v7376_v25  ;;  %8194 = vmatmul.bf16.gmra.mxu2 %v7824_v19  ;;  %v7444_v53 = vmul.f32 %v7443_v51, %v14307_v49  ;;  %v7431_v35 = vmul.f32 2.1237322e-06, %v14307_v49  ;;  %v7767_v63 = vadd.f32 1.0, %v8751_v61 }
 0x806   : > { %v7385_v58 = vsel %vm7382_vm2, %v7384_v9, %v7380_v45  ;;  %v6427_v29 = vmul.f32 0.5, %v15151_v6  ;;  %v7473_v10 = vmul.f32 %v7472_v21, %v14312_v20  ;;  %v7512_v60 = vadd.f32 0.00028619796, %v7511_v41 }
 0x807   : > { %v7386_v52 = vmul.f32 %v7385_v58, %v7361_v1  ;;  %v7445_v2 = vadd.f32 0.014752088, %v7444_v53  ;;  %v7432_v8 = vadd.f32 0.00028619796, %v7431_v35  ;;  %v7799_v59 = vmul.f32 %v7767_v63, %v6423_v23 }
 0x808   : > { %v14333_v30 = vadd.f32 %v6400_v17, %v15152_v11  ;;  %v7513_v38 = vmul.f32 %v7512_v60, %v14322_v39  ;;  %v7474_v19 = vadd.f32 0.0036580483, %v7473_v10  ;;  %v14352_v50 = vadd.f32 %v6344_v48, %v15145_v31 }
 0x809   : > { %v8755_v28 = vclamps-f32 %v7386_v52, 1.0  ;;  %v7446_v18 = vmul.f32 %v7445_v2, %v14307_v49  ;;  %v7433_v3 = vmul.f32 %v7432_v8, %v14307_v49  ;;  %v14355_v56 = vadd.f32 %v6373_v33, %v13062_v4  ;;  %v6315_v52 = vpop.f32.mrf.mxu3  ;;  %v6402_v2 = vpop.f32.mrf.mxu2 }
 0x80a   : > { %v14336_v7 = vmul.f32 0.70710677, %v14333_v30  ;;  %v7514_v24 = vadd.f32 0.0036580483, %v7513_v38  ;;  %v7475_v27 = vmul.f32 %v7474_v19, %v14312_v20  ;;  %v7482_v25 = vmul.f32 3.8918573e-05, %v14312_v20 }
 0x80b   : > { %v7771_v16 = vadd.f32 1.0, %v8755_v28  ;;  %v7447_v5 = vadd.f32 0.112945676, %v7446_v18  ;;  %v7434_v37 = vadd.f32 0.0036580483, %v7433_v3  ;;  %v14376_v57 = vadd.f32 %v6315_v52, %v13079_v12 }
 0x80c   : > { %v7549_v36 = vmul.f32 %v14336_v7, %v14336_v7  ;;  %v7515_v51 = vmul.f32 %v7514_v24, %v14322_v39  ;;  %v14361_v40 = vmul.f32 0.70710677, %v14352_v50  ;;  %v7483_v61 = vadd.f32 0.001143296, %v7482_v25 }
 0x80d   : > { %v7803_v13 = vmul.f32 %v7771_v16, %v6427_v29  ;;  %v7448_v14 = vmul.f32 %v7447_v5, %v14307_v49  ;;  %v7435_v0 = vmul.f32 %v7434_v37, %v14307_v49  ;;  %v7476_v45 = vadd.f32 0.05243302, %v7475_v27 }
 0x80e   : > { %v14345_v54 = vmin.f32 %v7549_v36, 16.0  ;;  %v14365_v31 = vmul.f32 0.70710677, %v14355_v56  ;;  %v7629_v58 = vmul.f32 %v14361_v40, %v14361_v40  ;;  %v7484_v21 = vmul.f32 %v7483_v61, %v14312_v20 }
 0x80f   : > { %v7823_v44 = vpack.c.bf16 %v7803_v13, %v7799_v59  ;;  %v7449_v42 = vadd.f32 0.4994258, %v7448_v14  ;;  %v7516_v41 = vadd.f32 0.05243302, %v7515_v51  ;;  %v7436_v35 = vadd.f32 0.05243302, %v7435_v0 }
 0x810   : > { %v7551_v26 = vmul.f32 2.1237322e-06, %v14345_v54  ;;  %v7562_v34 = vmul.f32 3.8918573e-05, %v14345_v54  ;;  %v14373_v18 = vmin.f32 %v7629_v58, 16.0  ;;  %v14379_v23 = vadd.f32 %v6402_v2, %v15152_v11 }
 0x811   : > { %8165 = vmatmul.bf16.gmra.mxu1 %v7823_v44  ;;  %v7450_v62 = vmul.f32 %v7449_v42, %v14307_v49  ;;  %v7477_v6 = vmul.f32 %v7476_v45, %v14312_v20  ;;  %v7669_v16 = vmul.f32 %v14365_v31, %v14365_v31  ;;  %v7485_v60 = vadd.f32 0.014752088, %v7484_v21 }
 0x812   : > { %v7563_v1 = vadd.f32 0.001143296, %v7562_v34  ;;  %v7552_v9 = vadd.f32 0.00028619796, %v7551_v26  ;;  %v7631_v10 = vmul.f32 2.1237322e-06, %v14373_v18  ;;  %v7517_v17 = vmul.f32 %v7516_v41, %v14322_v39 }
 0x813   : > { %v14343_v55 = vadd.f32 1.0, %v7450_v62  ;;  %v14389_v12 = vmul.f32 0.70710677, %v14376_v57  ;;  %v7437_v59 = vmul.f32 %v7436_v35, %v14307_v49  ;;  %v14394_v14 = vmul.f32 0.70710677, %v14379_v23 }
 0x814   : > { %v7564_v53 = vmul.f32 %v7563_v1, %v14345_v54  ;;  %v7553_v63 = vmul.f32 %v7552_v9, %v14345_v54  ;;  %v7478_v11 = vadd.f32 0.18741608, %v7477_v6  ;;  %v14397_v42 = vmin.f32 %v7669_v16, 16.0 }
 0x815   : > { %9237 = vrcp.f32 %v14343_v55  ;;  %v7589_v38 = vmul.f32 %v14389_v12, %v14389_v12  ;;  %v7632_v19 = vadd.f32 0.00028619796, %v7631_v10  ;;  %v7709_v62 = vmul.f32 %v14394_v14, %v14394_v14 }
 0x816   : > { %v7565_v28 = vadd.f32 0.014752088, %v7564_v53  ;;  %v7554_v13 = vadd.f32 0.0036580483, %v7553_v63  ;;  %v7486_v36 = vmul.f32 %v7485_v60, %v14312_v20  ;;  %v7518_v27 = vadd.f32 0.18741608, %v7517_v17 }
 0x817   : > { %v14404_v37 = vmin.f32 %v7589_v38, 16.0  ;;  %v7438_v48 = vadd.f32 0.18741608, %v7437_v59  ;;  %v14407_v26 = vmin.f32 %v7709_v62, 16.0  ;;  %v7479_v34 = vmul.f32 %v7478_v11, %v14312_v20 }
 0x818   : > { %v7566_v29 = vmul.f32 %v7565_v28, %v14345_v54  ;;  %v7555_v33 = vmul.f32 %v7554_v13, %v14345_v54  ;;  %v7671_v51 = vmul.f32 2.1237322e-06, %v14397_v42  ;;  %v7633_v9 = vmul.f32 %v7632_v19, %v14373_v18 }
 0x819   : > { %v7591_v0 = vmul.f32 2.1237322e-06, %v14404_v37  ;;  %v7602_v61 = vmul.f32 3.8918573e-05, %v14404_v37  ;;  %v7487_v45 = vadd.f32 0.112945676, %v7486_v36  ;;  %v7439_v21 = vmul.f32 %v7438_v48, %v14307_v49 }
 0x81a   : > { %v7567_v8 = vadd.f32 0.112945676, %v7566_v29  ;;  %v7711_v52 = vmul.f32 2.1237322e-06, %v14407_v26  ;;  %v14420_v2 = vmul.f32 0.5, %v14284_v46  ;;  %v14424_v63 = vmul.f32 %v7518_v27, %v14322_v39 }
 0x81b   : > { %v14367_v4 = vpop.eup %9237  ;;  %v7592_v58 = vadd.f32 0.00028619796, %v7591_v0  ;;  %v7556_v41 = vadd.f32 0.05243302, %v7555_v33  ;;  %v7603_v35 = vadd.f32 0.001143296, %v7602_v61  ;;  %vm7457_vm4 = vweird.f32 %v14343_v55 }
 0x81c   : > { %v7453_v5 = vmul.f32 %v14367_v4, %v14343_v55  ;;  %v7568_v44 = vmul.f32 %v7567_v8, %v14345_v54  ;;  %v7480_v28 = vadd.f32 1.1283791, %v7479_v34  ;;  %vm7458_vm3 = vweird.f32 %v14367_v4 }
 0x81d   : > { %v7672_v6 = vadd.f32 0.00028619796, %v7671_v51  ;;  %v7634_v16 = vadd.f32 0.0036580483, %v7633_v9  ;;  %v7463_v46 = vand.u32 2147483648, %v14343_v55  ;;  %v7593_v49 = vmul.f32 %v7592_v58, %v14404_v37  ;;  %vm14436_vm5 = vmor %vm7457_vm4, %vm7458_vm3 }
 0x81e   : > { %v7454_v3 = vsub.f32 1.0, %v7453_v5  ;;  %v7569_v24 = vadd.f32 0.4994258, %v7568_v44  ;;  %v7488_v5 = vmul.f32 %v7487_v45, %v14312_v20  ;;  %v7604_v10 = vmul.f32 %v7603_v35, %v14404_v37 }
 0x81f   : > { %v7712_v60 = vadd.f32 0.00028619796, %v7711_v52  ;;  %v7440_v8 = vadd.f32 1.1283791, %v7439_v21  ;;  %v7461_v17 = vand.u32 2147483647, %v14343_v55  ;;  %v7557_v59 = vmul.f32 %v7556_v41, %v14345_v54 }
 0x820   : > { %v7570_v25 = vmul.f32 %v7569_v24, %v14345_v54  ;;  %v7455_v1 = vmul.f32 %v14367_v4, %v7454_v3  ;;  %v7673_v11 = vmul.f32 %v7672_v6, %v14397_v42  ;;  %v7594_v44 = vadd.f32 0.0036580483, %v7593_v49 }
 0x821   : > { %v7605_v38 = vadd.f32 0.014752088, %v7604_v10  ;;  %v7722_v3 = vmul.f32 3.8918573e-05, %v14407_v26  ;;  %v7635_v62 = vmul.f32 %v7634_v16, %v14373_v18  ;;  %v7713_v55 = vmul.f32 %v7712_v60, %v14407_v26 }
 0x822   : > { %v14416_v53 = vadd.f32 1.0, %v7570_v25  ;;  %v7456_v29 = vadd.f32 %v14367_v4, %v7455_v1  ;;  %v7489_v36 = vadd.f32 0.4994258, %v7488_v5  ;;  %v7464_v24 = vor.u32 1.1754944e-38, %v7463_v46 }
 0x823   : > { %v7595_v27 = vmul.f32 %v7594_v44, %v14404_v37  ;;  %v7606_v48 = vmul.f32 %v7605_v38, %v14404_v37  ;;  %v7723_v33 = vadd.f32 0.001143296, %v7722_v3  ;;  %v7441_v25 = vmul.f32 %v7440_v8, %v14296_v15 }
 0x824   : > { %9239 = vrcp.f32 %v14416_v53  ;;  %v7460_v19 = vsel %vm14436_vm5, %v14367_v4, %v7456_v29  ;;  %vm7462_vm6 = vcmp.eq.f32.partialorder %v7461_v17, 8.507059e+37  ;;  %v7558_v51 = vadd.f32 0.18741608, %v7557_v59 }
 0x825   : > { %v7642_v0 = vmul.f32 3.8918573e-05, %v14373_v18  ;;  %v7465_v4 = vsel %vm7462_vm6, %v7464_v24, %v7460_v19  ;;  %v7674_v1 = vadd.f32 0.0036580483, %v7673_v11  ;;  %v7607_v9 = vadd.f32 0.112945676, %v7606_v48 }
 0x826   : > { %v7724_v61 = vmul.f32 %v7723_v33, %v14407_v26  ;;  %v7636_v45 = vadd.f32 0.05243302, %v7635_v62  ;;  %v7714_v58 = vadd.f32 0.0036580483, %v7713_v55  ;;  %v7490_v52 = vmul.f32 %v7489_v36, %v14312_v20 }
 0x827   : > { %v7522_v21 = vmul.f32 3.8918573e-05, %v14322_v39  ;;  %v7596_v35 = vadd.f32 0.05243302, %v7595_v27  ;;  %v7608_v15 = vmul.f32 %v7607_v9, %v14404_v37  ;;  %v7466_v29 = vmul.f32 %v7465_v4, %v7441_v25 }
 0x828   : > { %v7725_v6 = vadd.f32 0.014752088, %v7724_v61  ;;  %v7559_v16 = vmul.f32 %v7558_v51, %v14345_v54  ;;  %v14460_v5 = vadd.f32 1.0, %v7490_v52  ;;  %v7643_v46 = vadd.f32 0.001143296, %v7642_v0 }
 0x829   : > { %v14463_v49 = vmul.f32 0.5, %v14333_v30  ;;  %v7675_v20 = vmul.f32 %v7674_v1, %v14397_v42  ;;  %v7609_v10 = vadd.f32 0.4994258, %v7608_v15  ;;  %v7637_v8 = vmul.f32 %v7636_v45, %v14373_v18 }
 0x82a   : > { %v14449_v34 = vpop.eup %9239  ;;  %v7726_v60 = vmul.f32 %v7725_v6, %v14407_v26  ;;  %v7715_v17 = vmul.f32 %v7714_v58, %v14407_v26  ;;  %9241 = vrcp.f32 %v14460_v5  ;;  %v7523_v59 = vadd.f32 0.001143296, %v7522_v21 }
 0x82b   : > { %v7573_v41 = vmul.f32 %v14449_v34, %v14416_v53  ;;  %v7597_v54 = vmul.f32 %v7596_v35, %v14404_v37  ;;  %v7610_v11 = vmul.f32 %v7609_v10, %v14404_v37  ;;  %v14473_v30 = vmul.f32 %v7480_v28, %v14288_v43 }
 0x82c   : > { %v7727_v44 = vadd.f32 0.112945676, %v7726_v60  ;;  %v8757_v38 = vclamps-f32 %v7466_v29, 1.0  ;;  %v7560_v3 = vadd.f32 1.1283791, %v7559_v16  ;;  %v7644_v19 = vmul.f32 %v7643_v46, %v14373_v18 }
 0x82d   : > { %v7574_v13 = vsub.f32 1.0, %v7573_v41  ;;  %v7676_v62 = vadd.f32 0.05243302, %v7675_v20  ;;  %v14477_v55 = vmul.f32 0.5, %v14376_v57  ;;  %v14479_v36 = vadd.f32 1.0, %v7610_v11 }
 0x82e   : > { %v14482_v24 = vmul.f32 0.5, %v14379_v23  ;;  %v7638_v27 = vadd.f32 0.18741608, %v7637_v8  ;;  %v7716_v48 = vadd.f32 0.05243302, %v7715_v17  ;;  %v7728_v33 = vmul.f32 %v7727_v44, %v14407_v26 }
 0x82f   : > { %v7645_v25 = vadd.f32 0.014752088, %v7644_v19  ;;  %v7575_v43 = vmul.f32 %v14449_v34, %v7574_v13  ;;  %v7598_v28 = vadd.f32 0.18741608, %v7597_v54  ;;  %9243 = vrcp.f32 %v14479_v36 }
 0x830   : > { %v7524_v51 = vmul.f32 %v7523_v59, %v14322_v39  ;;  %v14488_v0 = vpop.eup %9241  ;;  %v14490_v57 = vadd.f32 1.0, %v8757_v38  ;;  %v7561_v4 = vmul.f32 %v7560_v3, %v14336_v7  ;;  %v7581_v23 = vand.u32 2147483647, %v14416_v53 }
 0x831   : > { %v7729_v1 = vadd.f32 0.4994258, %v7728_v33  ;;  %vm7577_vm7 = vweird.f32 %v14416_v53  ;;  %v7583_v9 = vand.u32 2147483648, %v14416_v53  ;;  %v7493_v61 = vmul.f32 %v14488_v0, %v14460_v5 }
 0x832   : > { %v7646_v45 = vmul.f32 %v7645_v25, %v14373_v18  ;;  %vm7578_vm8 = vweird.f32 %v14449_v34  ;;  %v7639_v58 = vmul.f32 %v7638_v27, %v14373_v18  ;;  %v7717_v52 = vmul.f32 %v7716_v48, %v14407_v26 }
 0x833   : > { %v7730_v7 = vmul.f32 %v7729_v1, %v14407_v26  ;;  %v7576_v21 = vadd.f32 %v14449_v34, %v7575_v43  ;;  %v7599_v41 = vmul.f32 %v7598_v28, %v14404_v37  ;;  %v7525_v15 = vadd.f32 0.014752088, %v7524_v51  ;;  %vm14521_vm10 = vmor %vm7577_vm7, %vm7578_vm8 }
 0x834   : > { %v7647_v35 = vadd.f32 0.112945676, %v7646_v45  ;;  %vm14505_vm9 = vcmp.eq.f32.partialorder %v7581_v23, 8.507059e+37  ;;  %v14510_v29 = vmul.f32 %v7676_v62, %v14397_v42  ;;  %v7682_v46 = vmul.f32 3.8918573e-05, %v14397_v42 }
 0x835   : > { %v14512_v16 = vadd.f32 1.0, %v7730_v7  ;;  %v9244_v20 = vpop.eup %9243  ;;  %v7584_v10 = vor.u32 1.1754944e-38, %v7583_v9  ;;  %v7494_v60 = vsub.f32 1.0, %v7493_v61  ;;  %v7526_v37 = vmul.f32 %v7525_v15, %v14322_v39 }
 0x836   : > { %v7648_v8 = vmul.f32 %v7647_v35, %v14373_v18  ;;  %v14525_v59 = vadd.f32 1.1283791, %v7639_v58  ;;  %v7613_v13 = vmul.f32 %v9244_v20, %v14479_v36  ;;  %v7501_v54 = vand.u32 2147483647, %v14460_v5 }
 0x837   : > { %9245 = vrcp.f32 %v14512_v16  ;;  %v7580_v11 = vsel %vm14521_vm10, %v14449_v34, %v7576_v21  ;;  %v7600_v44 = vadd.f32 1.1283791, %v7599_v41  ;;  %v7718_v38 = vadd.f32 0.18741608, %v7717_v52 }
 0x838   : > { %vm7497_vm11 = vweird.f32 %v14460_v5  ;;  %v7649_v53 = vadd.f32 0.4994258, %v7648_v8  ;;  %v7614_v3 = vsub.f32 1.0, %v7613_v13  ;;  %v7503_v19 = vand.u32 2147483648, %v14460_v5 }
 0x839   : > { %v7527_v62 = vadd.f32 0.112945676, %v7526_v37  ;;  %v7683_v27 = vadd.f32 0.001143296, %v7682_v46  ;;  %v7621_v48 = vand.u32 2147483647, %v14479_v36  ;;  %v7495_v25 = vmul.f32 %v14488_v0, %v7494_v60 }
 0x83a   : > { %v7623_v33 = vand.u32 2147483648, %v14479_v36  ;;  %v7650_v43 = vmul.f32 %v7649_v53, %v14373_v18  ;;  %v7615_v28 = vmul.f32 %v9244_v20, %v7614_v3  ;;  %vm7618_vm12 = vweird.f32 %v9244_v20 }
 0x83b   : > { %v7528_v34 = vmul.f32 %v7527_v62, %v14322_v39  ;;  %v7684_v51 = vmul.f32 %v7683_v27, %v14397_v42  ;;  %v7585_v23 = vsel %vm14505_vm9, %v7584_v10, %v7580_v11  ;;  %vm7617_vm13 = vweird.f32 %v14479_v36 }
 0x83c   : > { %v7719_v1 = vmul.f32 %v7718_v38, %v14407_v26  ;;  %v14545_v9 = vadd.f32 1.0, %v7650_v43  ;;  %v7616_v45 = vadd.f32 %v9244_v20, %v7615_v28  ;;  %vm7498_vm14 = vweird.f32 %v14488_v0  ;;  %vm7619_vm15 = vmor %vm7617_vm13, %vm7618_vm12 }
 0x83d   : > { %v9246_v61 = vpop.eup %9245  ;;  %v7529_v18 = vadd.f32 0.4994258, %v7528_v34  ;;  %v7685_v58 = vadd.f32 0.014752088, %v7684_v51  ;;  %v7624_v52 = vor.u32 1.1754944e-38, %v7623_v33  ;;  %v7496_v21 = vadd.f32 %v14488_v0, %v7495_v25  ;;  %vm14559_vm1 = vmor %vm7497_vm11, %vm7498_vm14 }
 0x83e   : > { %v7733_v7 = vmul.f32 %v9246_v61, %v14512_v16  ;;  %9247 = vrcp.f32 %v14545_v9  ;;  %v7586_v41 = vmul.f32 %v7585_v23, %v7561_v4  ;;  %v7601_v36 = vmul.f32 %v7600_v44, %v14389_v12 }
 0x83f   : > { %v7620_v26 = vsel %vm7619_vm15, %v9244_v20, %v7616_v45  ;;  %vm7622_vm0 = vcmp.eq.f32.partialorder %v7621_v48, 8.507059e+37  ;;  %v7720_v15 = vadd.f32 1.1283791, %v7719_v1  ;;  %v7530_v46 = vmul.f32 %v7529_v18, %v14322_v39  ;;  %v8098_v18 = vpop.f32.mrf.mxu3 }
 0x840   : > { %v7625_v35 = vsel %vm7622_vm0, %v7624_v52, %v7620_v26  ;;  %v7734_v6 = vsub.f32 1.0, %v7733_v7  ;;  %v7741_v60 = vand.u32 2147483647, %v14512_v16  ;;  %v7743_v8 = vand.u32 2147483648, %v14512_v16  ;;  %v8127_v7 = vpop.f32.mrf.mxu0 }
 0x841   : > { %v7626_v10 = vmul.f32 %v7625_v35, %v7601_v36  ;;  %v7686_v12 = vmul.f32 %v7685_v58, %v14397_v42  ;;  %vm7738_vm2 = vweird.f32 %v9246_v61  ;;  %v7500_v39 = vsel %vm14559_vm1, %v14488_v0, %v7496_v21 }
 0x842   : > { %v7735_v20 = vmul.f32 %v9246_v61, %v7734_v6  ;;  %v14567_v37 = vadd.f32 1.0, %v7530_v46  ;;  %vm7502_vm3 = vcmp.eq.f32.partialorder %v7501_v54, 8.507059e+37  ;;  %v7504_v13 = vor.u32 1.1754944e-38, %v7503_v19 }
 0x843   : > { %v8761_v17 = vclamps-f32 %v7626_v10, 1.0  ;;  %v7687_v11 = vadd.f32 0.112945676, %v7686_v12  ;;  %v8760_v5 = vclamps-f32 %v7586_v41, 1.0  ;;  %vm7737_vm4 = vweird.f32 %v14512_v16  ;;  %v8185_v12 = vpop.f32.mrf.mxu2 }
 0x844   : > { %v9248_v44 = vpop.eup %9247  ;;  %v7736_v38 = vadd.f32 %v9246_v61, %v7735_v20  ;;  %9249 = vrcp.f32 %v14567_v37  ;;  %vm7739_vm5 = vmor %vm7737_vm4, %vm7738_vm2  ;;  %v7744_v3 = vor.u32 1.1754944e-38, %v7743_v8  ;;  %v7505_v62 = vsel %vm7502_vm3, %v7504_v13, %v7500_v39 }
 0x845   : > { %v7777_v53 = vadd.f32 1.0, %v8761_v17  ;;  %v7653_v27 = vmul.f32 %v9248_v44, %v14545_v9  ;;  %v7721_v0 = vmul.f32 %v7720_v15, %v14394_v14  ;;  %vm7742_vm6 = vcmp.eq.f32.partialorder %v7741_v60, 8.507059e+37  ;;  %v8156_v15 = vpop.f32.mrf.mxu1 }
 0x846   : > { %v7740_v48 = vsel %vm7739_vm5, %v9246_v61, %v7736_v38  ;;  %v7688_v54 = vmul.f32 %v7687_v11, %v14397_v42  ;;  %v7805_v19 = vmul.f32 %v14490_v57, %v14420_v2  ;;  %v7506_v28 = vmul.f32 %v7505_v62, %v14473_v30  ;;  %v14583_v61 = vld [vmem:[%s15161_s25] ss:$0 sm:$0xff]  ;;  %s8897_s25 = sshll.u32 %s14652_s12, 3 }
 0x847   : > { %v7809_v33 = vmul.f32 %v7777_v53, %v14477_v55  ;;  %v7745_v16 = vsel %vm7742_vm6, %v7744_v3, %v7740_v48  ;;  %v7654_v25 = vsub.f32 1.0, %v7653_v27  ;;  %v7663_v34 = vand.u32 2147483648, %v14545_v9  ;;  %v8100_v53 = vpop.f32.mrf.mxu3  ;;  %v15166_v48 = vld [vmem:[#allocation17_spill] sm:$0xff]  ;;  %s8269_s14 = scalar_lea.hbm %s15171_s27, %s8897_s25 }
 0x848   : > { %v7746_v43 = vmul.f32 %v7745_v16, %v7721_v0  ;;  %v7689_v51 = vadd.f32 0.4994258, %v7688_v54  ;;  %vm7658_vm7 = vweird.f32 %v9248_v44  ;;  %v7661_v14 = vand.u32 2147483647, %v14545_v9  ;;  %v8129_v16 = vpop.f32.mrf.mxu0  ;;  %s8272_s9 = sshll.u32 %s8269_s14, 4  ;;  %s8273_s9 = int_to_ptr.hbm [resolvable:$true] %s8272_s9 }
 0x849   : > { %v7655_v23 = vmul.f32 %v9248_v44, %v7654_v25  ;;  %v7825_v1 = vpack.c.bf16 %v7809_v33, %v7805_v19  ;;  %v7776_v55 = vadd.f32 1.0, %v8760_v5  ;;  %v7641_v57 = vmul.f32 %v14525_v59, %v14361_v40  ;;  %s9277_s24 = sshra.s32 %s8273_s9, 4  ;;  %s9278_s24 = int_to_ptr.hbm [resolvable:$true] %s9277_s24 }
 0x84a   : > { %v14585_v2 = vpop.eup %9249  ;;  %v8764_v30 = vclamps-f32 %v7746_v43, 1.0  ;;  %v7690_v45 = vmul.f32 %v7689_v51, %v14397_v42  ;;  %vm7657_vm8 = vweird.f32 %v14545_v9  ;;  %v8099_v21 = vadd.f32 %v14583_v61, %v8098_v18  ;;  %s9279_s23 = scalar_lea.hbm %s9278_s24, 64  ;;  %p9284_p10 = scmp.lt.s32.totalorder %s9278_s24, %s15171_s27 }
 0x84b   : > { %v7656_v58 = vadd.f32 %v9248_v44, %v7655_v23  ;;  %v7533_v52 = vmul.f32 %v14585_v2, %v14567_v37  ;;  %8112 = vmatmul.bf16.gmra.mxu3 %v7825_v1  ;;  %v8758_v36 = vclamps-f32 %v7506_v28, 1.0  ;;  %vm7659_vm9 = vmor %vm7657_vm8, %vm7658_vm7  ;;  %v7664_v26 = vor.u32 1.1754944e-38, %v7663_v34  ;;  %p9280_p6 = scmp.ne.s32.totalorder %s9278_s24, %s9279_s23  ;;  %p9285_p11 = scmp.lt.s32.totalorder %s9283_s2, %s9279_s23 }
 0x84c   : > { %v7780_v41 = vadd.f32 1.0, %v8764_v30  ;;  %v14595_v40 = vadd.f32 1.0, %v7690_v45  ;;  %vm7662_vm10 = vcmp.eq.f32.partialorder %v7661_v14, 8.507059e+37  ;;  %v8128_v6 = vadd.f32 %v8127_v7, %v8099_v21  ;;  %v8187_v30 = vpop.f32.mrf.mxu2 }
 0x84d   : > { %v7660_v59 = vsel %vm7659_vm9, %v9248_v44, %v7656_v58  ;;  %v7534_v35 = vsub.f32 1.0, %v7533_v52  ;;  %v7808_v9 = vmul.f32 %v7776_v55, %v14463_v49  ;;  %v7678_v60 = vadd.f32 0.18741608, %v14510_v29  ;;  %v8158_v51 = vpop.f32.mrf.mxu1  ;;  %v15168_v58 = vld [vmem:[#allocation31_spill] sm:$0xff]  ;;  %p9281_p7 = pnand %p9280_p6, %p9564_p8  ;;  %p9286_p12 = por %p9285_p11, %p9284_p10 }
 0x84e   : > { %v7812_v46 = vmul.f32 %v7780_v41, %v14482_v24  ;;  %v7665_v10 = vsel %vm7662_vm10, %v7664_v26, %v7660_v59  ;;  %9251 = vrcp.f32 %v14595_v40  ;;  %vm7538_vm11 = vweird.f32 %v14585_v2 }
 0x84f   : > { %v7666_v8 = vmul.f32 %v7665_v10, %v7641_v57  ;;  %v7535_v4 = vmul.f32 %v14585_v2, %v7534_v35  ;;  %v7774_v20 = vadd.f32 1.0, %v8758_v36  ;;  %v7543_v39 = vand.u32 2147483648, %v14567_v37  ;;  %p9282_p9 = pneg %p9281_p7 }
 0x850   : > { %v7828_v17 = vpack.c.bf16 %v7812_v46, %v7808_v9  ;;  %v8157_v13 = vadd.f32 %v8156_v15, %v8128_v6  ;;  %vm7537_vm12 = vweird.f32 %v14567_v37  ;;  %v7541_v11 = vand.u32 2147483647, %v14567_v37  ;;  %v8132_v9 = vpop.f32.mrf.mxu0 }
 0x851   : > { %v8762_v49 = vclamps-f32 %v7666_v8, 1.0  ;;  %v7536_v24 = vadd.f32 %v14585_v2, %v7535_v4  ;;  %v6430_v29 = vmul.f32 0.5, %v14278_v32  ;;  %v7520_v44 = vadd.f32 1.1283791, %v14424_v63  ;;  %vm14609_vm13 = vmor %vm7537_vm12, %vm7538_vm11  ;;  %p9287_p0 = pnand %p9286_p12, %p9282_p9 }
 0x852   : > { %8199 = vmatmul.bf16.gmra.mxu2 %v7828_v17  ;;  %v8186_v38 = vadd.f32 %v8185_v12, %v8157_v13  ;;  %v6434_v37 = vmul.f32 0.5, %v14352_v50  ;;  %v8101_v63 = vadd.f32 %v14583_v61, %v8100_v53  ;;  %v7679_v27 = vmul.f32 %v7678_v60, %v14397_v42 }
 0x853   : > { %v7778_v3 = vadd.f32 1.0, %v8762_v49  ;;  %v7540_v32 = vsel %vm14609_vm13, %v14585_v2, %v7536_v24  ;;  %v7544_v0 = vor.u32 1.1754944e-38, %v7543_v39  ;;  %v7806_v50 = vmul.f32 %v7774_v20, %v6430_v29  ;;  %v15169_v24 = vld [vmem:[#allocation23_spill] sm:$0xff] }
 0x854   : > { %v9252_v62 = vpop.eup %9251  ;;  %v8205_v54 = vadd.f32 %v8186_v38, %v15166_v48  ;;  %8229 = vst [vmem:[%s14629_s0] sm:$0xff] %v8186_v38  ;;  %vm7542_vm14 = vcmp.eq.f32.partialorder %v7541_v11, 8.507059e+37  ;;  %v8130_v43 = vadd.f32 %v8129_v16, %v8101_v63  ;;  %v7521_v28 = vmul.f32 %v7520_v44, %v14302_v22 }
 0x855   : > { %v7810_v19 = vmul.f32 %v7778_v3, %v6434_v37  ;;  %v7693_v33 = vmul.f32 %v9252_v62, %v14595_v40  ;;  %v7545_v25 = vsel %vm7542_vm14, %v7544_v0, %v7540_v32  ;;  %v7680_v23 = vadd.f32 1.1283791, %v7679_v27  ;;  %v8161_v4 = vpop.f32.mrf.mxu1  ;;  %v15170_v37 = vld [vmem:[#allocation40_spill] sm:$0xff] }
 0x856   : > { %8213 = vst [vmem:[%s14618_s13] sm:$0xff] %v8205_v54  ;;  %v7703_v14 = vand.u32 2147483648, %v14595_v40  ;;  %v8159_v1 = vadd.f32 %v8158_v51, %v8130_v43  ;;  %v7546_v2 = vmul.f32 %v7545_v25, %v7521_v28  ;;  %vm7698_vm15 = vweird.f32 %v9252_v62 }
 0x857   : > { %v7826_v42 = vpack.c.bf16 %v7810_v19, %v7806_v50  ;;  %v7694_v34 = vsub.f32 1.0, %v7693_v33  ;;  %v7701_v57 = vand.u32 2147483647, %v14595_v40  ;;  %vm7697_vm0 = vweird.f32 %v14595_v40 }
 0x858   : > { %v8188_v45 = vadd.f32 %v8187_v30, %v8159_v1  ;;  %vm7699_vm1 = vmor %vm7697_vm0, %vm7698_vm15  ;;  %v7704_v22 = vor.u32 1.1754944e-38, %v7703_v14  ;;  %v7681_v7 = vmul.f32 %v7680_v23, %v14365_v31  ;;  %v8759_v21 = vclamps-f32 %v7546_v2, 1.0  ;;  %v8134_v13 = vpop.f32.mrf.mxu0 }
 0x859   : > { %8141 = vmatmul.bf16.gmra.mxu0 %v7826_v42  ;;  %v7695_v55 = vmul.f32 %v9252_v62, %v7694_v34  ;;  %vm7702_vm2 = vcmp.eq.f32.partialorder %v7701_v57, 8.507059e+37  ;;  %v6431_v40 = vmul.f32 0.5, %v14291_v47  ;;  %v6435_v46 = vmul.f32 0.5, %v14355_v56 }
 0x85a   : > { %v8206_v52 = vadd.f32 %v8188_v45, %v15168_v58  ;;  %8230 = vst [vmem:[%s14629_s0 + $0x8] sm:$0xff] %v8188_v45  ;;  %v7775_v15 = vadd.f32 1.0, %v8759_v21 }
 0x85b   : > { %v7696_v18 = vadd.f32 %v9252_v62, %v7695_v55 }
 0x85c   : > { %8214 = vst [vmem:[%s14618_s13 + $0x8] sm:$0xff] %v8206_v52  ;;  %v7807_v60 = vmul.f32 %v7775_v15, %v6431_v40 }
 0x85d   : > { %v7700_v41 = vsel %vm7699_vm1, %v9252_v62, %v7696_v18  ;;  %v8163_v29 = vpop.f32.mrf.mxu1 }
 0x85e   : > { %v7705_v36 = vsel %vm7702_vm2, %v7704_v22, %v7700_v41 }
 0x85f   : > { %v7706_v26 = vmul.f32 %v7705_v36, %v7681_v7 }
 0x861   : > { %v8763_v35 = vclamps-f32 %v7706_v26, 1.0 }
 0x863   : > { %v7779_v10 = vadd.f32 1.0, %v8763_v35 }
 0x865   : > { %v7811_v31 = vmul.f32 %v7779_v10, %v6435_v46 }
 0x867   : > { %v7827_v12 = vpack.c.bf16 %v7811_v31, %v7807_v60 }
 0x869   : > { %8170 = vmatmul.bf16.gmra.mxu1 %v7827_v12 }
 0x86a   : > { %v8103_v59 = vpop.f32.mrf.mxu3 }
 0x86b   : > { %v8104_v6 = vadd.f32 %v14583_v61, %v8103_v59 }
 0x86d   : > { %v8133_v8 = vadd.f32 %v8132_v9, %v8104_v6 }
 0x86f   : > { %v8162_v39 = vadd.f32 %v8161_v4, %v8133_v8 }
 0x872   : > { %v8105_v20 = vpop.f32.mrf.mxu3 }
 0x873   : > { %v8106_v17 = vadd.f32 %v14583_v61, %v8105_v20 }
 0x875   : > { %v8135_v49 = vadd.f32 %v8134_v13, %v8106_v17 }
 0x877   : > { %v8164_v44 = vadd.f32 %v8163_v29, %v8135_v49 }
 0x878   : > { %v8190_v47 = vpop.f32.mrf.mxu2 }
 0x879   : > { %v8191_v56 = vadd.f32 %v8190_v47, %v8162_v39 }
 0x87a   : > { %v8108_v53 = vpop.f32.mrf.mxu3 }
 0x87b   : > { %v8207_v11 = vadd.f32 %v8191_v56, %v15169_v24  ;;  %8231 = vst [vmem:[%s14629_s0 + $0x10] sm:$0xff] %v8191_v56  ;;  %v8109_v32 = vadd.f32 %v14583_v61, %v8108_v53 }
 0x87d   : > { %8215 = vst [vmem:[%s14618_s13 + $0x10] sm:$0xff] %v8207_v11 }
 0x880   : > { %v8192_v5 = vpop.f32.mrf.mxu2 }
 0x881   : > { %v8193_v38 = vadd.f32 %v8192_v5, %v8164_v44 }
 0x883   : > { %v8208_v3 = vadd.f32 %v8193_v38, %v15170_v37  ;;  %8232 = vst [vmem:[%s14629_s0 + $0x18] sm:$0xff] %v8193_v38 }
 0x885   : > { %8216 = vst [vmem:[%s14618_s13 + $0x18] sm:$0xff] %v8208_v3 }
 0x886   : > { %9290 = shalt.err (!%p9287_p0)
}
 0x887   : > { %s9411_s7 = smov 128   ;;  %s9412_s14 = smov 8   ;;  %v8137_v63 = vpop.f32.mrf.mxu0  ;;  %v8110_v27 = vpop.f32.mrf.mxu3  ;;  %v15172_v16 = vld [vmem:[#allocation21_spill] sm:$0xff]  ;;  %v15174_v21 = vld [vmem:[#allocation34_spill] sm:$0xff] }
 0x888   : > { %8985 = dma.vmem_to_hbm [thread:$0]  (%p9564_p8), %s8271_s18, 1024, %s8273_s9, %s8247_s19, %s9411_s7, %s9411_s7, %s9412_s14   ;;  %v8138_v62 = vadd.f32 %v8137_v63, %v8109_v32  ;;  %v8195_v48 = vpop.f32.mrf.mxu2  ;;  %v8111_v50 = vadd.f32 %v14583_v61, %v8110_v27  ;;  %v15173_v23 = vld [vmem:[#allocation41_spill] sm:$0xff]  ;;  %v15176_v15 = vld [vmem:[#allocation30_spill] sm:$0xff] }
 0x889   : > { %s15175_s3 = sld [smem:[#allocation53_spill]]  ;;  %s8289_s9 = sshll.u32 %s14629_s0, 4  ;;  %s8290_s9 = int_to_ptr.vmem [resolvable:$true] %s8289_s9 }
 0x88a   : > { %s8252_s24 = scalar_lea.sflag [#allocation8], %s9704_s30 }
 0x88e   : > { %v8166_v0 = vpop.f32.mrf.mxu1 }
 0x88f   : > { %v8167_v54 = vadd.f32 %v8166_v0, %v8138_v62  ;;  %v8139_v33 = vpop.f32.mrf.mxu0  ;;  %s8288_s18 = scalar_lea.hbm %s15175_s3, %s8897_s25  ;;  %s9311_s10 = scalar_lea.hbm %s15175_s3, 256 }
 0x890   : > { %v8140_v43 = vadd.f32 %v8139_v33, %v8111_v50  ;;  %v8197_v34 = vpop.f32.mrf.mxu2  ;;  %s8291_s19 = sshll.u32 %s8288_s18, 4  ;;  %s8292_s19 = int_to_ptr.hbm [resolvable:$true] %s8291_s19 }
 0x891   : > { %v8196_v19 = vadd.f32 %v8195_v48, %v8167_v54  ;;  %s9305_s23 = sshra.s32 %s8292_s19, 4  ;;  %s9306_s23 = int_to_ptr.hbm [resolvable:$true] %s9305_s23 }
 0x892   : > { %s9307_s12 = scalar_lea.hbm %s9306_s23, 64  ;;  %p9312_p4 = scmp.lt.s32.totalorder %s9306_s23, %s15175_s3 }
 0x893   : > { %v8209_v25 = vadd.f32 %v8196_v19, %v15172_v16  ;;  %8233 = vst [vmem:[%s14629_s0 + $0x20] sm:$0xff] %v8196_v19  ;;  %p9308_p1 = scmp.ne.s32.totalorder %s9306_s23, %s9307_s12  ;;  %p9313_p5 = scmp.lt.s32.totalorder %s9311_s10, %s9307_s12 }
 0x895   : > { %8217 = vst [vmem:[%s14618_s13 + $0x20] sm:$0xff] %v8209_v25  ;;  %p9309_p2 = pnand %p9308_p1, %p9564_p8  ;;  %p9314_p6 = por %p9313_p5, %p9312_p4 }
 0x896   : > { %v8168_v28 = vpop.f32.mrf.mxu1 }
 0x897   : > { %v8169_v42 = vadd.f32 %v8168_v28, %v8140_v43  ;;  %p9310_p3 = pneg %p9309_p2 }
 0x899   : > { %v8198_v51 = vadd.f32 %v8197_v34, %v8169_v42  ;;  %p9315_p7 = pnand %p9314_p6, %p9310_p3 }
 0x89b   : > { %v8210_v14 = vadd.f32 %v8198_v51, %v15173_v23  ;;  %8234 = vst [vmem:[%s14629_s0 + $0x28] sm:$0xff] %v8198_v51 }
 0x89d   : > { %8218 = vst [vmem:[%s14618_s13 + $0x28] sm:$0xff] %v8210_v14 }
 0x8ce   : > { %v8113_v1 = vpop.f32.mrf.mxu3 }
 0x8cf   : > { %v8114_v2 = vadd.f32 %v14583_v61, %v8113_v1 }
 0x8d5   : > { %v8200_v18 = vpop.f32.mrf.mxu2 }
 0x8d6   : > { %v8142_v55 = vpop.f32.mrf.mxu0  ;;  %v8115_v30 = vpop.f32.mrf.mxu3 }
 0x8d7   : > { %v8143_v57 = vadd.f32 %v8142_v55, %v8114_v2  ;;  %v8116_v58 = vadd.f32 %v14583_v61, %v8115_v30 }
 0x8dd   : > { %v8202_v61 = vpop.f32.mrf.mxu2 }
 0x8de   : > { %v8144_v7 = vpop.f32.mrf.mxu0 }
 0x8df   : > { %v8145_v36 = vadd.f32 %v8144_v7, %v8116_v58 }
 0x8e6   : > { %v8171_v45 = vpop.f32.mrf.mxu1 }
 0x8e7   : > { %v8172_v22 = vadd.f32 %v8171_v45, %v8143_v57 }
 0x8e9   : > { %v8201_v52 = vadd.f32 %v8200_v18, %v8172_v22 }
 0x8eb   : > { %v8211_v41 = vadd.f32 %v8201_v52, %v15174_v21  ;;  %8235 = vst [vmem:[%s14629_s0 + $0x30] sm:$0xff] %v8201_v52 }
 0x8ed   : > { %8219 = vst [vmem:[%s14618_s13 + $0x30] sm:$0xff] %v8211_v41 }
 0x8ee   : > { %v8173_v26 = vpop.f32.mrf.mxu1 }
 0x8ef   : > { %v8174_v59 = vadd.f32 %v8173_v26, %v8145_v36 }
 0x8f1   : > { %v8203_v35 = vadd.f32 %v8202_v61, %v8174_v59 }
 0x8f3   : > { %v8212_v6 = vadd.f32 %v8203_v35, %v15176_v15  ;;  %8236 = vst [vmem:[%s14629_s0 + $0x38] sm:$0xff] %v8203_v35 }
 0x8f4   : > { %9318 = shalt.err (!%p9315_p7)
}
 0x8f5   : > { %8986 = dma.vmem_to_hbm [thread:$0]  (%p9564_p8), %s8290_s9, 1024, %s8292_s19, %s8252_s24, %s9411_s7, %s9411_s7, %s9412_s14  }
 0x8f6   : > { %8220 = vst [vmem:[%s14618_s13 + $0x38] sm:$0xff] %v8212_v6 }
 0x8f7 PF: > { %p8996_p9 = scmp.ge.s32.totalorder %s9405_s22, 2  ;;  %s8318_s0 = sand.u32 1, %s9369_s29  }
 0x8f8   : > { %s8319_s18 = scalar_lea.sflag [#allocation6], %s8318_s0 }
 0x8f9   : > { %p8990_p10 = pnand %p8996_p9, %p9578_p13 }
 0x8fb   : > { %p8991_p11 = pneg %p8990_p10 }
 0x8fd   : > { %9360 = dma.done.wait (%p8991_p11), %s8319_s18, 1024  }
 0x8fe   : > { %9362 = vsyncadd (%p8991_p11), %s8319_s18, 4294966272  ;;  %s8329_s23 = scalar_lea.sflag [#allocation8], %s8318_s0 }
 0x8ff   : > { %9364 = dma.done.wait (%p8991_p11), %s8329_s23, 1024  }
 0x900   : > { %9366 = vsyncadd (%p8991_p11), %s8329_s23, 4294966272  ;;  %s31_s22 = sadd.s32 1, %s9405_s22   ;;  %s15178_s11 = sld [smem:[#allocation13_spill]] }
 0x901   : > { %p28_p12 = scmp.ge.s32.totalorder %s31_s22, 6   ;;  %s15179_s13 = sld [smem:[#allocation14_spill]] }
 0x902   : > { %s15180_s7 = sld [smem:[#allocation11_spill]]  ;;  %s15182_s29 = smov %s9381_s16 }
 0x903   : > { %s15181_s14 = sld [smem:[#allocation12_spill]]  ;;  %s15183_s30 = smov %s9377_s15 }
 0x904   : > { %s15185_s16 = smov %s9385_s17  ;;  %s15187_s18 = smov %s9397_s20 }
 0x905   : > { %s15188_s19 = smov %s9401_s21  ;;  %30 = sbr.rel (!%p28_p12) target bundleno = 20 (0x14), region = 279 }
 0x906   : > { %s15184_s15 = smov %s15178_s11 }
 0x907   : > { %s15186_s17 = smov %s15179_s13 }
 0x908   : > { %s15189_s20 = smov %s15180_s7 }
 0x909   : > { %s15190_s21 = smov %s15181_s14 }
 0x90a   :  { %8335 = vsyncpa [#allocation6], 1 }
 0x90b   :  { %8337 = vsyncpa [#allocation6 + $0x1], 1 }
 0x90c   :  { %8338 = vsyncpa [#allocation8], 1 }
 0x90d   :  { %8340 = vsyncpa [#allocation8 + $0x1], 1 }

</bundles_post_ra>
